<compile_context>
chip_gen: v5e
topology: v5e:2x2
jax: 0.10.0
libtpu: 0.0.40
codegen_flags: <defaults>
</compile_context>

<pallas_src>
import jax
import jax.numpy as jnp
from jax.experimental import pallas as pl
from jax.experimental.pallas import tpu as pltpu

BN_EPS = 1e-5


def _round128(n):
    return ((n + 127) // 128) * 128


def _make_kernel(hd, hd2, emb, head_pad, offs):
    o1, o2, o3, o4 = offs

    def da_net_kernel(alphas_ref,                  # SMEM (scalar prefetch): [a1, a2]
                      x_ref,
                      w1_ref, w2_ref, wc_ref, wh_ref,   # bf16 weights (BN folded into w1)
                      bias_ref,                          # f32, all biases concatenated
                      out_ref):
        a1 = alphas_ref[0]
        a2 = alphas_ref[1]

        b1 = bias_ref[:, o1:o1 + hd]
        b2 = bias_ref[:, o2:o2 + hd2]
        bc = bias_ref[:, o3:o3 + emb]
        bh = bias_ref[:, o4:o4 + head_pad]

        x = x_ref[...].astype(jnp.bfloat16)

        # --- model1 (BatchNorm folded into w1/b1) ---
        h = jnp.dot(x, w1_ref[...], preferred_element_type=jnp.float32) + b1
        h = jnp.where(h >= 0.0, h, a1 * h)          # PReLU (single shared parameter)
        # TODO(synk): Dropout(0.5) training-mode RNG masking omitted (eval-mode identity).
        h = jnp.dot(h.astype(jnp.bfloat16), w2_ref[...],
                    preferred_element_type=jnp.float32) + b2
        h = jnp.where(h >= 0.0, h, a2 * h)

        # --- classlayer + L2 normalize over dim=1 (rsqrt -> EUP slot) ---
        out = jnp.dot(h.astype(jnp.bfloat16), wc_ref[...],
                      preferred_element_type=jnp.float32) + bc
        sumsq = jnp.sum(out * out, axis=1, keepdims=True)
        feature = out * jax.lax.rsqrt(sumsq + 1e-32)

        # --- fused heads: single lane-dense (tb, 128) store ---
        out_ref[...] = (jnp.dot(feature.astype(jnp.bfloat16), wh_ref[...],
                                preferred_element_type=jnp.float32) + bh)

    return da_net_kernel


def _tensorcores_per_chip():
    """Best-effort TC-per-chip query; default 2 (keep grid>=2) if unknown."""
    try:
        info = pltpu.get_tpu_info()
        for name in ("num_cores_per_chip", "tensorcores_per_chip", "num_tensorcores"):
            v = getattr(info, name, None)
            if isinstance(v, int) and v > 0:
                return v
    except Exception:
        pass
    return 2


def _pick_tb(batch, min_grid):
    """Biggest batch tile (<=512 rows) keeping at least `min_grid` grid steps."""
    for cand in (512, 256, 128, 64, 32, 16, 8):
        if batch % cand == 0 and batch // cand >= min_grid:
            return cand
    return batch


def da_net_forward(x, params, *, tb=None):
    (w1, b1, bn_g, bn_b, bn_m, bn_v, a1,
     w2, b2, a2, wc, bc, wd, bd, wp, bp) = params

    B, indim = x.shape
    hd = w1.shape[1]
    hd2 = w2.shape[1]
    emb = wc.shape[1]
    num_dc = wd.shape[1]
    num_p = wp.shape[1]
    n_head = num_dc + num_p
    head_pad = _round128(n_head)                      # lane-dense output width

    # Fold eval-mode BatchNorm into the first Linear (exact affine fold).
    scale = bn_g * jax.lax.rsqrt(bn_v + BN_EPS)        # (1, hd)
    w1f = w1 * scale
    b1f = (b1 - bn_m) * scale + bn_b

    # Fuse + lane-pad the two heads into a single [emb, head_pad] weight.
    wh = jnp.zeros((emb, head_pad), jnp.float32)
    wh = wh.at[:, :num_dc].set(wd).at[:, num_dc:n_head].set(wp)
    bh = jnp.zeros((1, head_pad), jnp.float32)
    bh = bh.at[:, :num_dc].set(bd).at[:, num_dc:n_head].set(bp)

    # bf16 weights: half the HBM bytes / VMEM footprint, native MXU bf16 path.
    w1_bf = w1f.astype(jnp.bfloat16)
    w2_bf = w2.astype(jnp.bfloat16)
    wc_bf = wc.astype(jnp.bfloat16)
    wh_bf = wh.astype(jnp.bfloat16)

    # Concatenate all biases (kept f32) into one lane-aligned replicated buffer.
    o1 = 0
    o2 = o1 + _round128(hd)
    o3 = o2 + _round128(hd2)
    o4 = o3 + _round128(emb)
    total_b = o4 + head_pad
    bias_all = jnp.zeros((1, total_b), jnp.float32)
    bias_all = (bias_all.at[:, o1:o1 + hd].set(b1f)
                        .at[:, o2:o2 + hd2].set(b2)
                        .at[:, o3:o3 + emb].set(bc)
                        .at[:, o4:o4 + head_pad].set(bh))

    # PReLU scalars -> SMEM via scalar prefetch.
    alphas = jnp.concatenate([a1.reshape(-1), a2.reshape(-1)]).astype(jnp.float32)

    # Generation-aware batch tile: only require grid>=2 when megacore exists.
    min_grid = 2 if _tensorcores_per_chip() >= 2 else 1
    tb = _pick_tb(B, min_grid) if tb is None else tb
    assert B % tb == 0, "batch must be divisible by the batch tile"
    grid = (B // tb,)

    def rep(shape):
        # Replicated (constant-index) block: fetched once and reused; single-buffered
        # so it doesn't pay for a useless second pipeline buffer.
        return pl.BlockSpec(shape, lambda i, alphas: (0, 0),
                            pipeline_mode=pl.Buffered(1))

    in_specs = [
        pl.BlockSpec((tb, indim), lambda i, alphas: (i, 0)),    # x (pipelined)
        rep((indim, hd)),                                        # w1 (BN folded, bf16)
        rep((hd, hd2)),                                          # w2 (bf16)
        rep((hd2, emb)),                                         # wc (bf16)
        rep((emb, head_pad)),                                    # fused heads (bf16)
        rep((1, total_b)),                                       # all biases (f32)
    ]
    out_specs = pl.BlockSpec((tb, head_pad), lambda i, alphas: (i, 0))
    out_shape = jax.ShapeDtypeStruct((B, head_pad), jnp.float32)

    w_elems = indim * hd + hd * hd2 + hd2 * emb + emb * head_pad
    flops = 2 * B * w_elems
    bytes_accessed = (4 * B * indim + 2 * w_elems + 4 * total_b + 4 * B * head_pad)
    cost = pl.CostEstimate(flops=flops, transcendentals=B,
                           bytes_accessed=bytes_accessed)

    # Explicit scoped-VMEM budget (~2x estimated footprint) so growth in tb/hd/indim
    # doesn't hit the 16 MiB default cliff on v5e; capped well under v7x's 64 MiB.
    vmem_est = (2 * w_elems + 4 * total_b
                + 2 * 4 * tb * indim                              # double-buffered x tile
                + 2 * 4 * tb * head_pad                           # double-buffered out tile
                + 4 * tb * (indim + hd + hd2 + emb + head_pad))   # live intermediates
    vmem_limit = int(min(max(2 * vmem_est, 4 * 1024 * 1024), 48 * 1024 * 1024))

    kernel = _make_kernel(hd, hd2, emb, head_pad, (o1, o2, o3, o4))

    out_full = pl.pallas_call(
        kernel,
        out_shape=out_shape,
        grid_spec=pltpu.PrefetchScalarGridSpec(
            num_scalar_prefetch=1,
            grid=grid,
            in_specs=in_specs,
            out_specs=out_specs,
        ),
        compiler_params=pltpu.CompilerParams(
            dimension_semantics=("parallel",),
            vmem_limit_bytes=vmem_limit),
        cost_estimate=cost,
    )(alphas, x, w1_bf, w2_bf, wc_bf, wh_bf, bias_all)

    out_d = out_full[:, :num_dc]
    out_p = out_full[:, num_dc:n_head]
    return out_d, out_p


def da_net_reference(x, params):
    """Pure-JAX f32 reference of the original (un-folded) forward pass."""
    (w1, b1, bn_g, bn_b, bn_m, bn_v, a1,
     w2, b2, a2, wc, bc, wd, bd, wp, bp) = params
    h = x @ w1 + b1
    h = (h - bn_m) / jnp.sqrt(bn_v + BN_EPS) * bn_g + bn_b
    h = jnp.where(h >= 0.0, h, a1 * h)
    h = h @ w2 + b2
    h = jnp.where(h >= 0.0, h, a2 * h)
    out = h @ wc + bc
    norm = jnp.linalg.norm(out, axis=1, keepdims=True)
    feature = out / (norm + 1e-16)
    return feature @ wd + bd, feature @ wp + bp


def make_params(key, indim, hd, emb, num_dc, num_p):
    hd2 = hd // 2
    keys = jax.random.split(key, 8)

    def linear(k, fan_in, fan_out):
        k1, k2 = jax.random.split(k)
        bound = 1.0 / jnp.sqrt(float(fan_in))
        w = jax.random.uniform(k1, (fan_in, fan_out), jnp.float32, -bound, bound)
        b = jax.random.uniform(k2, (1, fan_out), jnp.float32, -bound, bound)
        return w, b

    w1, b1 = linear(keys[0], indim, hd)
    w2, b2 = linear(keys[1], hd, hd2)
    wc, bc = linear(keys[2], hd2, emb)
    wd, bd = linear(keys[3], emb, num_dc)
    wp, bp = linear(keys[4], emb, num_p)

    bn_g = jnp.ones((1, hd), jnp.float32)
    bn_b = jnp.zeros((1, hd), jnp.float32)
    bn_m = 0.1 * jax.random.normal(keys[5], (1, hd), jnp.float32)
    bn_v = jax.random.uniform(keys[6], (1, hd), jnp.float32, 0.5, 1.5)

    a1 = jnp.full((1, 1), 0.25, jnp.float32)   # PReLU default init
    a2 = jnp.full((1, 1), 0.25, jnp.float32)

    return (w1, b1, bn_g, bn_b, bn_m, bn_v, a1,
            w2, b2, a2, wc, bc, wd, bd, wp, bp)


if __name__ == "__main__":
    # Module-consistent dims (indim=2048, hd=512, embed=128, heads 2/31),
    # small batch; tb picked so the grid has >=2 steps on megacore chips.
    B, INDIM, HD, EMB = 256, 2048, 512, 128
    NUM_DC, NUM_P = 2, 31

    key = jax.random.PRNGKey(0)
    k_param, k_x = jax.random.split(key)
    params = make_params(k_param, INDIM, HD, EMB, NUM_DC, NUM_P)
    x = jax.random.normal(k_x, (B, INDIM), jnp.float32)

    out_d, out_p = da_net_forward(x, params)
    jax.block_until_ready((out_d, out_p))

    ref_d, ref_p = da_net_reference(x, params)
    assert out_d.shape == (B, NUM_DC) and out_p.shape == (B, NUM_P)
    # bf16 weights/activations (f32 accumulation) -> looser tolerance than pure f32.
    assert jnp.allclose(out_d, ref_d, atol=2e-2, rtol=2e-2)
    assert jnp.allclose(out_p, ref_p, atol=2e-2, rtol=2e-2)

    print("KERNEL_OK")
</pallas_src>

<mosaic_0001>
module attributes {stable_mosaic.version = 11 : i64} {
  func.func @da_net_kernel(%arg0: i32, %arg1: memref<2xf32, #tpu.memory_space<smem>>, %arg2: memref<128x2048xf32, #tpu.memory_space<vmem>>, %arg3: memref<2048x512xbf16, #tpu.memory_space<vmem>>, %arg4: memref<512x256xbf16, #tpu.memory_space<vmem>>, %arg5: memref<256x128xbf16, #tpu.memory_space<vmem>>, %arg6: memref<128x128xbf16, #tpu.memory_space<vmem>>, %arg7: memref<1x1024xf32, #tpu.memory_space<vmem>>, %arg8: memref<128x128xf32, #tpu.memory_space<vmem>>) attributes {dimension_semantics = [#tpu.dimension_semantics<parallel>], iteration_bounds = array<i64: 2>, scalar_prefetch = 1 : i64, scratch_operands = 0 : i64, tpu.core_type = #tpu.core_type<tc>, window_params = [{transform_indices = @transform_0, window_bounds = array<i64: 128, 2048>}, {pipeline_mode = #tpu.pipeline_mode<synchronous>, transform_indices = @transform_1, window_bounds = array<i64: 2048, 512>}, {pipeline_mode = #tpu.pipeline_mode<synchronous>, transform_indices = @transform_2, window_bounds = array<i64: 512, 256>}, {pipeline_mode = #tpu.pipeline_mode<synchronous>, transform_indices = @transform_3, window_bounds = array<i64: 256, 128>}, {pipeline_mode = #tpu.pipeline_mode<synchronous>, transform_indices = @transform_4, window_bounds = array<i64: 128, 128>}, {pipeline_mode = #tpu.pipeline_mode<synchronous>, transform_indices = @transform_5, window_bounds = array<i64: 1, 1024>}, {transform_indices = @transform_6, window_bounds = array<i64: 128, 128>}]} {
    %c0 = arith.constant 0 : index
    %0 = memref.load %arg1[%c0] : memref<2xf32, #tpu.memory_space<smem>>
    %c1 = arith.constant 1 : index
    %1 = memref.load %arg1[%c1] : memref<2xf32, #tpu.memory_space<smem>>
    %c0_0 = arith.constant 0 : index
    %c0_1 = arith.constant 0 : index
    %2 = vector.load %arg7[%c0_0, %c0_1] : memref<1x1024xf32, #tpu.memory_space<vmem>>, vector<1x512xf32>
    %c0_2 = arith.constant 0 : index
    %c512 = arith.constant 512 : index
    %3 = vector.load %arg7[%c0_2, %c512] : memref<1x1024xf32, #tpu.memory_space<vmem>>, vector<1x256xf32>
    %c0_3 = arith.constant 0 : index
    %c768 = arith.constant 768 : index
    %4 = vector.load %arg7[%c0_3, %c768] : memref<1x1024xf32, #tpu.memory_space<vmem>>, vector<1x128xf32>
    %c0_4 = arith.constant 0 : index
    %c896 = arith.constant 896 : index
    %5 = vector.load %arg7[%c0_4, %c896] : memref<1x1024xf32, #tpu.memory_space<vmem>>, vector<1x128xf32>
    %c0_5 = arith.constant 0 : index
    %c0_6 = arith.constant 0 : index
    %6 = vector.load %arg2[%c0_5, %c0_6] : memref<128x2048xf32, #tpu.memory_space<vmem>>, vector<128x2048xf32>
    %7 = arith.truncf %6 : vector<128x2048xf32> to vector<128x2048xbf16>
    %c0_7 = arith.constant 0 : index
    %c0_8 = arith.constant 0 : index
    %8 = vector.load %arg3[%c0_7, %c0_8] : memref<2048x512xbf16, #tpu.memory_space<vmem>>, vector<2048x512xbf16>
    %cst = arith.constant dense<0.000000e+00> : vector<128x512xf32>
    %9 = tpu.matmul %7, %8, %cst {dimension_numbers = #tpu.dot_dimension_numbers<[1], [0], [0], [1], [0, 0, 1, 1], [], []>} : vector<128x2048xbf16>, vector<2048x512xbf16>, vector<128x512xf32> -> vector<128x512xf32>
    %10 = vector.broadcast %2 : vector<1x512xf32> to vector<128x512xf32>
    %11 = arith.addf %9, %10 : vector<128x512xf32>
    %cst_9 = arith.constant 0.000000e+00 : f32
    %12 = vector.broadcast %cst_9 : f32 to vector<128x512xf32>
    %13 = arith.cmpf oge, %11, %12 : vector<128x512xf32>
    %14 = vector.broadcast %0 : f32 to vector<128x512xf32>
    %15 = arith.mulf %14, %11 : vector<128x512xf32>
    %16 = arith.select %13, %11, %15 : vector<128x512xi1>, vector<128x512xf32>
    %17 = arith.truncf %16 : vector<128x512xf32> to vector<128x512xbf16>
    %c0_10 = arith.constant 0 : index
    %c0_11 = arith.constant 0 : index
    %18 = vector.load %arg4[%c0_10, %c0_11] : memref<512x256xbf16, #tpu.memory_space<vmem>>, vector<512x256xbf16>
    %cst_12 = arith.constant dense<0.000000e+00> : vector<128x256xf32>
    %19 = tpu.matmul %17, %18, %cst_12 {dimension_numbers = #tpu.dot_dimension_numbers<[1], [0], [0], [1], [0, 0, 1, 1], [], []>} : vector<128x512xbf16>, vector<512x256xbf16>, vector<128x256xf32> -> vector<128x256xf32>
    %20 = vector.broadcast %3 : vector<1x256xf32> to vector<128x256xf32>
    %21 = arith.addf %19, %20 : vector<128x256xf32>
    %cst_13 = arith.constant 0.000000e+00 : f32
    %22 = vector.broadcast %cst_13 : f32 to vector<128x256xf32>
    %23 = arith.cmpf oge, %21, %22 : vector<128x256xf32>
    %24 = vector.broadcast %1 : f32 to vector<128x256xf32>
    %25 = arith.mulf %24, %21 : vector<128x256xf32>
    %26 = arith.select %23, %21, %25 : vector<128x256xi1>, vector<128x256xf32>
    %27 = arith.truncf %26 : vector<128x256xf32> to vector<128x256xbf16>
    %c0_14 = arith.constant 0 : index
    %c0_15 = arith.constant 0 : index
    %28 = vector.load %arg5[%c0_14, %c0_15] : memref<256x128xbf16, #tpu.memory_space<vmem>>, vector<256x128xbf16>
    %cst_16 = arith.constant dense<0.000000e+00> : vector<128x128xf32>
    %29 = tpu.matmul %27, %28, %cst_16 {dimension_numbers = #tpu.dot_dimension_numbers<[1], [0], [0], [1], [0, 0, 1, 1], [], []>} : vector<128x256xbf16>, vector<256x128xbf16>, vector<128x128xf32> -> vector<128x128xf32>
    %30 = vector.broadcast %4 : vector<1x128xf32> to vector<128x128xf32>
    %31 = arith.addf %29, %30 : vector<128x128xf32>
    %32 = arith.mulf %31, %31 : vector<128x128xf32>
    %cst_17 = arith.constant dense<0.000000e+00> : vector<128xf32>
    %33 = vector.multi_reduction <add>, %32, %cst_17 [1] : vector<128x128xf32> to vector<128xf32>
    %34 = vector.shape_cast %33 : vector<128xf32> to vector<128x1xf32>
    %cst_18 = arith.constant 1.000000e-32 : f32
    %35 = vector.broadcast %cst_18 : f32 to vector<128x1xf32>
    %36 = arith.addf %34, %35 : vector<128x1xf32>
    %37 = math.rsqrt %36 : vector<128x1xf32>
    %38 = vector.broadcast %37 : vector<128x1xf32> to vector<128x128xf32>
    %39 = arith.mulf %31, %38 : vector<128x128xf32>
    %40 = arith.truncf %39 : vector<128x128xf32> to vector<128x128xbf16>
    %c0_19 = arith.constant 0 : index
    %c0_20 = arith.constant 0 : index
    %41 = vector.load %arg6[%c0_19, %c0_20] : memref<128x128xbf16, #tpu.memory_space<vmem>>, vector<128x128xbf16>
    %cst_21 = arith.constant dense<0.000000e+00> : vector<128x128xf32>
    %42 = tpu.matmul %40, %41, %cst_21 {dimension_numbers = #tpu.dot_dimension_numbers<[1], [0], [0], [1], [0, 0, 1, 1], [], []>} : vector<128x128xbf16>, vector<128x128xbf16>, vector<128x128xf32> -> vector<128x128xf32>
    %43 = vector.broadcast %5 : vector<1x128xf32> to vector<128x128xf32>
    %44 = arith.addf %42, %43 : vector<128x128xf32>
    %c0_22 = arith.constant 0 : index
    %c0_23 = arith.constant 0 : index
    %45 = vector.load %arg8[%c0_22, %c0_23] : memref<128x128xf32, #tpu.memory_space<vmem>>, vector<128x128xf32>
    tpu.vector_store %arg8[%c0_22, %c0_23], %44 {strides = array<i32>} : memref<128x128xf32, #tpu.memory_space<vmem>>, vector<128x128xf32>,
    return
  }
  func.func @transform_0(%arg0: i32, %arg1: memref<2xf32, #tpu.memory_space<smem>>) -> (i32, i32) {
    %c0_i32 = arith.constant 0 : i32
    %c0_i32_0 = arith.constant 0 : i32
    return %arg0, %c0_i32 : i32, i32
  }
  func.func @transform_1(%arg0: i32, %arg1: memref<2xf32, #tpu.memory_space<smem>>) -> (i32, i32) {
    %c0_i32 = arith.constant 0 : i32
    %c0_i32_0 = arith.constant 0 : i32
    %c0_i32_1 = arith.constant 0 : i32
    return %c0_i32, %c0_i32_0 : i32, i32
  }
  func.func @transform_2(%arg0: i32, %arg1: memref<2xf32, #tpu.memory_space<smem>>) -> (i32, i32) {
    %c0_i32 = arith.constant 0 : i32
    %c0_i32_0 = arith.constant 0 : i32
    %c0_i32_1 = arith.constant 0 : i32
    return %c0_i32, %c0_i32_0 : i32, i32
  }
  func.func @transform_3(%arg0: i32, %arg1: memref<2xf32, #tpu.memory_space<smem>>) -> (i32, i32) {
    %c0_i32 = arith.constant 0 : i32
    %c0_i32_0 = arith.constant 0 : i32
    %c0_i32_1 = arith.constant 0 : i32
    return %c0_i32, %c0_i32_0 : i32, i32
  }
  func.func @transform_4(%arg0: i32, %arg1: memref<2xf32, #tpu.memory_space<smem>>) -> (i32, i32) {
    %c0_i32 = arith.constant 0 : i32
    %c0_i32_0 = arith.constant 0 : i32
    %c0_i32_1 = arith.constant 0 : i32
    return %c0_i32, %c0_i32_0 : i32, i32
  }
  func.func @transform_5(%arg0: i32, %arg1: memref<2xf32, #tpu.memory_space<smem>>) -> (i32, i32) {
    %c0_i32 = arith.constant 0 : i32
    %c0_i32_0 = arith.constant 0 : i32
    %c0_i32_1 = arith.constant 0 : i32
    return %c0_i32, %c0_i32_0 : i32, i32
  }
  func.func @transform_6(%arg0: i32, %arg1: memref<2xf32, #tpu.memory_space<smem>>) -> (i32, i32) {
    %c0_i32 = arith.constant 0 : i32
    %c0_i32_0 = arith.constant 0 : i32
    return %arg0, %c0_i32 : i32, i32
  }
}

</mosaic_0001>

<bundles_post_ra>
// kernel: tpu_custom_call.1
= control target key start
LH: loop header
LB: loop body
LE: loop exit
PB: predicated region body
PF: predicated region fallthrough
CT: control target
= control target key end

     0   :  { %s12308_s27 = smov [#allocation3]   ;;  %s14993_s0 = inlined_call_operand.hbm [shape: f32[2], index: 0, kind: input, shape index: {}]   ;;  %s14994_s1 = inlined_call_operand.hbm [shape: f32[256,2048], index: 1, kind: input, shape index: {}]   ;;  %s14995_s2 = inlined_call_operand.hbm [shape: bf16[2048,512], index: 2, kind: input, shape index: {}]   ;;  %s14996_s3 = inlined_call_operand.hbm [shape: bf16[512,256], index: 3, kind: input, shape index: {}]   ;;  %s14997_s4 = inlined_call_operand.hbm [shape: bf16[256,128], index: 4, kind: input, shape index: {}]   ;;  %s14998_s5 = inlined_call_operand.hbm [shape: bf16[128,128], index: 5, kind: input, shape index: {}]   ;;  %s14999_s6 = inlined_call_operand.hbm [shape: f32[1,1024], index: 6, kind: input, shape index: {}]   ;;  %s15000_s7 = inlined_call_operand.hbm [shape: f32[256,128], index: 7, kind: output, shape index: {}]  }
   0x1   :  { %15235 = sst [smem:[#allocation145_spill]] %s14995_s2  ;;  %s13_s26 = sshll.u32 %s14993_s0, 4  ;;  %s14_s26 = int_to_ptr.hbm [resolvable:$true] %s13_s26 }
   0x2   :  { %16 = dma.hbm_to_smem %s14_s26, 16, %s12308_s27, [#allocation2] }
   0x3   :  { %12270 = dma.done.wait [#allocation2], 16 }
   0x4   :  { %12271 = vsyncadd [#allocation2], 4294967280 }
   0x5   :  { %19 = sfence }
   0x6   :  { %20 = vsyncpa [#allocation5], 0 }
   0x7   :  { %22 = vsyncpa [#allocation5 + $0x1], 0 }
   0x8   :  { %23 = vsyncpa [#allocation8], 0 }
   0x9   :  { %24 = vsyncpa [#allocation11], 0 }
   0xa   :  { %25 = vsyncpa [#allocation14], 0 }
   0xb   :  { %26 = vsyncpa [#allocation6], 0 }
   0xc   :  { %28 = vsyncpa [#allocation6 + $0x1], 0  ;;  %s12366_s28 = smov 0   ;;  %s12368_s29 = smov 0  }
   0xd   :  { %s12370_s30 = smov 0   ;;  %s12372_s0 = smov 0  }
   0xe LB: > { %s15236_s2 = sld [smem:[#allocation145_spill]]  ;;  %s12390_s11 = sadd.s32 4294967295, %s12306_s0   ;;  %s12306_s0 = sphi %s12372_s0, %s15701_s0   ;;  %s12302_s30 = sphi %s12370_s30, %s15700_s30   ;;  %s12298_s29 = sphi %s12368_s29, %s15699_s29   ;;  %s12294_s28 = sphi %s12366_s28, %s15698_s28  }
   0xf   : > { %p8838_p0 = scmp.ge.s32.totalorder %s12306_s0, 1  ;;  %p55_p1 = scmp.eq.s32.totalorder %s12390_s11, 0 }
  0x10   : > { %p196_p2 = scmp.lt.s32.totalorder %s12306_s0, 3  ;;  %s12309_s13 = smov [#allocation7]  }
  0x11   : > { %s209_s14 = sshll.u32 %s12309_s13, 4  ;;  %s235_s17 = sshll.u32 %s14997_s4, 4  ;;  %s210_s14 = int_to_ptr.vmem [resolvable:$true] %s209_s14  ;;  %s236_s17 = int_to_ptr.hbm [resolvable:$true] %s235_s17 }
  0x12   : > { %p12395_p3 = pnand %p8838_p0, %p196_p2  ;;  %s12310_s19 = smov [#allocation10]  }
  0x13   : > { %s237_s20 = sshll.u32 %s12310_s19, 4  ;;  %s12311_s21 = smov 256   ;;  %s238_s20 = int_to_ptr.vmem [resolvable:$true] %s237_s20 }
  0x14   : > { %s207_s10 = sshll.u32 %s15236_s2, 4  ;;  %p11914_p4 = pneg %p12395_p3  ;;  %s208_s10 = int_to_ptr.hbm [resolvable:$true] %s207_s10 }
  0x15   : > { %s12312_s22 = smov 16   ;;  %s12313_s23 = smov 64  }
  0x16   : > { %p12407_p6 = pnand %p11914_p4, %p55_p1  ;;  %s12314_s24 = smov 4  }
  0x17   : > { %s221_s27 = sshll.u32 %s14996_s3, 4  ;;  %s12315_s8 = smov [#allocation9]   ;;  %s222_s27 = int_to_ptr.hbm [resolvable:$true] %s221_s27 }
  0x18   : > { %11917 = dma.hbm_to_vmem [thread:$0]  (!%p12407_p6), %s208_s10, 65536, %s210_s14, [#allocation8], %s12311_s21, %s12311_s21, %s12312_s22  }
  0x19   : > { %11923 = dma.hbm_to_vmem [thread:$0]  (!%p12407_p6), %s236_s17, 2048, %s238_s20, [#allocation11], %s12313_s23, %s12313_s23, %s12314_s24  }
  0x1a   : > { %s223_s9 = sshll.u32 %s12315_s8, 4  ;;  %s249_s10 = sshll.u32 %s14998_s5, 4  ;;  %s224_s9 = int_to_ptr.vmem [resolvable:$true] %s223_s9  ;;  %s250_s10 = int_to_ptr.hbm [resolvable:$true] %s249_s10 }
  0x1b   : > { %s15001_s14 = smov 128   ;;  %s12317_s16 = smov 8  }
  0x1c   : > { %11920 = dma.hbm_to_vmem [thread:$0]  (!%p12407_p6), %s222_s27, 8192, %s224_s9, [#allocation8], %s15001_s14, %s15001_s14, %s12317_s16  }
  0x1d   : > { %s12318_s17 = smov [#allocation12]   ;;  %s264_s22 = sshll.u32 %s14999_s6, 4  ;;  %s265_s22 = int_to_ptr.hbm [resolvable:$true] %s264_s22 }
  0x1e   : > { %s251_s19 = sshll.u32 %s12318_s17, 4  ;;  %s12319_s25 = smov [#allocation13]   ;;  %s252_s19 = int_to_ptr.vmem [resolvable:$true] %s251_s19 }
  0x1f   : > { %11926 = dma.hbm_to_vmem [thread:$0]  (!%p12407_p6), %s250_s10, 1024, %s252_s19, [#allocation11], %s12313_s23, %s12313_s23, %s12314_s24  }
  0x20   : > { %s266_s26 = sshll.u32 %s12319_s25, 4  ;;  %s8837_s27 = sadd.s32 4294967294, %s12306_s0   ;;  %s267_s26 = int_to_ptr.vmem [resolvable:$true] %s266_s26 }
  0x21   : > { %11929 = dma.hbm_to_vmem [thread:$0]  (!%p12407_p6), %s265_s22, 128, %s267_s26, [#allocation14]  }
  0x22   : > { %s12434_s8 = sadd.s32 1, %s12306_s0   ;;  %s41_s9 = sadd.s32 1, %s12302_s30 }
  0x23   : > { %s38_s13 = ssub.s32 %s12306_s0, %s12434_s8  ;;  %p48_p7 = scmp.ne.s32.totalorder %s12302_s30, %s12298_s29 }
  0x24   : > { %p39_p8 = scmp.eq.s32.totalorder %s38_s13, 0  ;;  %p49_p9 = scmp.eq.s32.totalorder %s12306_s0, 0 }
  0x25   : > { %p54_p10 = scmp.ne.s32.totalorder %s12298_s29, %s12294_s28  ;;  %p183_p11 = scmp.eq.s32.totalorder %s12390_s11, 1 }
  0x26   : > { %s12446_s23 = scalar_select %p39_p8, %s12302_s30, %s41_s9  }
  0x27   : > { %p12448_p12 = por %p49_p9, %p48_p7  ;;  %p12454_p13 = por %p55_p1, %p54_p10 }
  0x28   : > { %p12458_p0 = por %p183_p11, %p48_p7  ;;  %p189_p2 = scmp.eq.s32.totalorder %s8837_s27, 1 }
  0x29   : > { %p11943_p4 = scmp.lt.s32.totalorder %s12306_s0, 2  ;;  %s277_s10 = sand.u32 1, %s12302_s30  }
  0x2a   : > { %p12464_p6 = por %p189_p2, %p54_p10  ;;  %s8845_s17 = sshll.u32 %s277_s10, 11 }
  0x2b   : > { %s11264_s19 = sshll.u32 %s12306_s0, 11  ;;  %s281_s26 = scalar_lea.vmem [#allocation4], %s8845_s17 }
  0x2c   : > { %s287_s22 = scalar_lea.hbm %s14994_s1, %s11264_s19  ;;  %s290_s9 = sshll.u32 %s281_s26, 4  ;;  %s291_s9 = int_to_ptr.vmem [resolvable:$true] %s290_s9 }
  0x2d   : > { %s288_s25 = sshll.u32 %s287_s22, 4  ;;  %p12474_p7 = pnand %p11943_p4, %p12448_p12  ;;  %s289_s25 = int_to_ptr.hbm [resolvable:$true] %s288_s25 }
  0x2e   : > { %s278_s13 = scalar_lea.sflag [#allocation5], %s277_s10  ;;  %s12196_s14 = sshra.s32 %s289_s25, 4  ;;  %s12197_s14 = int_to_ptr.hbm [resolvable:$true] %s12196_s14 }
  0x2f   : > { %s12198_s2 = scalar_lea.hbm %s12197_s14, 2048  ;;  %p12200_p9 = pneg %p12474_p7 }
  0x30   : > { %p12199_p8 = scmp.ne.s32.totalorder %s12197_s14, %s12198_s2  ;;  %s12203_s20 = scalar_lea.hbm %s14994_s1, 4096 }
  0x31   : > { %p12204_p12 = scmp.lt.s32.totalorder %s12197_s14, %s14994_s1  ;;  %p12205_p2 = scmp.lt.s32.totalorder %s12203_s20, %s12198_s2 }
  0x32   : > { %p12201_p10 = pnand %p12200_p9, %p12199_p8 }
  0x33   : > { %p12206_p4 = por %p12205_p2, %p12204_p12 }
  0x34   : > { %p12202_p11 = pneg %p12201_p10 }
  0x36   : > { %p12207_p5 = pnand %p12206_p4, %p12202_p11 }
  0x38   : > { %12210 = shalt.err (!%p12207_p5)
}
  0x39   : > { %s12320_s10 = smov 2048   ;;  %s15244_s22 = smov 128  }
  0x3a   : > { %11933 = dma.hbm_to_vmem [thread:$0]  (!%p12474_p7), %s289_s25, 32768, %s291_s9, %s278_s13, %s12320_s10, %s12320_s10, %s15244_s22  }
  0x3b   : > { %302 = sbr.rel (%p12395_p3) target bundleno = 3082 (0xc0a), region = 44 }
  0x40   : > { %s12492_s26 = sand.u32 1, %s12298_s29  }
  0x41   : > { %s8850_s19 = sshll.u32 %s12492_s26, 11  ;;  %s305_s14 = scalar_lea.sflag [#allocation5], %s12492_s26 }
  0x42   : > { %s12496_s2 = scalar_lea.vmem [#allocation4], %s8850_s19 }
  0x43   : > { %12273 = dma.done.wait (%p12454_p13), %s305_s14, 32768  }
  0x44   : > { %12275 = vsyncadd (%p12454_p13), %s305_s14, 4294934528 }
  0x45   : > { %12277 = dma.done.wait (%p55_p1), [#allocation8], 73728  }
  0x46   : > { %12279 = vsyncadd (%p55_p1), [#allocation8], 4294893568 }
  0x47   : > { %12281 = dma.done.wait (%p55_p1), [#allocation11], 3072  }
  0x48   : > { %12283 = vsyncadd (%p55_p1), [#allocation11], 4294964224 }
  0x49   : > { %12285 = dma.done.wait (%p55_p1), [#allocation14], 128  }
  0x4a   : > { %12287 = vsyncadd (%p55_p1), [#allocation14], 4294967168  ;;  %v8972_v0 = vld [vmem:[#allocation7 + $0xe0] sm:$0xf]  ;;  %v11295_v1 = vld [vmem:[#allocation7 + $0xec] sm:$0xf0] }
  0x4b   : > { %v9100_v2 = vld [vmem:[#allocation7 + $0x1e0] sm:$0xf]  ;;  %v8973_v3 = vor.u32 %v11295_v1, %v8972_v0  ;;  %v11327_v4 = vld [vmem:[#allocation7 + $0x1ec] sm:$0xf0]  ;;  %s365_s12 = sld [smem:[#allocation3]]  ;;  %s8856_s25 = sshll.u32 %s12492_s26, 7 }
  0x4c   : > { %v9228_v5 = vld [vmem:[#allocation7 + $0x2e0] sm:$0xf]  ;;  %v11359_v6 = vld [vmem:[#allocation7 + $0x2ec] sm:$0xf0]  ;;  %v12514_v7 = vor.u32 %v11327_v4, %v9100_v2  ;;  %s8857_s18 = sld [smem:[#allocation3 + $0x1]]  ;;  %s14941_s9 = scalar_lea.vmem [#allocation15], %s8856_s25 }
  0x4d   : > { %v12516_v8 = vor.u32 %v11359_v6, %v9228_v5  ;;  %v8956_v9 = vld [vmem:[#allocation7 + $0xc0] sm:$0xf]  ;;  %v11291_v10 = vld [vmem:[#allocation7 + $0xcc] sm:$0xf0]  ;;  %3836 = vmatpush.bf16.msra.mxu0 %v8973_v3  ;;  %11866 = vmatpush.bf16.msra.mxu3 %v8973_v3  ;;  %s11865_s27 = sshll.u32 %s12390_s11, 7  ;;  %s8713_s21 = sshll.u32 %s14941_s9, 4  ;;  %s8714_s21 = int_to_ptr.vmem [resolvable:$true] %s8713_s21 }
  0x4e   : > { %v9084_v11 = vld [vmem:[#allocation7 + $0x1c0] sm:$0xf]  ;;  %v8957_v12 = vor.u32 %v11291_v10, %v8956_v9  ;;  %v11323_v13 = vld [vmem:[#allocation7 + $0x1cc] sm:$0xf0]  ;;  %11874 = vmatpush.bf16.msra.mxu1 %v12514_v7  ;;  %s8712_s20 = scalar_lea.hbm %s15000_s7, %s11865_s27  ;;  %s8701_s10 = scalar_lea.sflag [#allocation6], %s12492_s26 }
  0x4f   : > { %v9212_v14 = vld [vmem:[#allocation7 + $0x2c0] sm:$0xf]  ;;  %v11355_v15 = vld [vmem:[#allocation7 + $0x2cc] sm:$0xf0]  ;;  %11882 = vmatpush.bf16.msra.mxu2 %v12516_v8  ;;  %v12520_v16 = vor.u32 %v11323_v13, %v9084_v11  ;;  %s8715_s24 = sshll.u32 %s8712_s20, 4  ;;  %s8716_s24 = int_to_ptr.hbm [resolvable:$true] %s8715_s24 }
  0x50   : > { %v12522_v17 = vor.u32 %v11355_v15, %v9212_v14  ;;  %v8940_v18 = vld [vmem:[#allocation7 + $0xa0] sm:$0xf]  ;;  %v11287_v19 = vld [vmem:[#allocation7 + $0xac] sm:$0xf0]  ;;  %v436_v14 = vld [vmem:[%s12496_s2 + $0x208] sm:$0xff]  ;;  %s12240_s22 = sshra.s32 %s8716_s24, 4  ;;  %s12241_s22 = int_to_ptr.hbm [resolvable:$true] %s12240_s22 }
  0x51   : > { %v9068_v20 = vld [vmem:[#allocation7 + $0x1a0] sm:$0xf]  ;;  %v11319_v21 = vld [vmem:[#allocation7 + $0x1ac] sm:$0xf0]  ;;  %3837 = vmatpush.bf16.msra.mxu0 %v8957_v12  ;;  %11867 = vmatpush.bf16.msra.mxu3 %v8957_v12  ;;  %v8941_v24 = vor.u32 %v11287_v19, %v8940_v18  ;;  %v452_v19 = vld [vmem:[%s12496_s2 + $0x288] sm:$0xff]  ;;  %s12242_s19 = scalar_lea.hbm %s12241_s22, 128  ;;  %p12247_p13 = scmp.lt.s32.totalorder %s12241_s22, %s15000_s7 }
  0x52   : > { %v9196_v22 = vld [vmem:[#allocation7 + $0x2a0] sm:$0xf]  ;;  %v11351_v23 = vld [vmem:[#allocation7 + $0x2ac] sm:$0xf0]  ;;  %11875 = vmatpush.bf16.msra.mxu1 %v12520_v16  ;;  %v12526_v25 = vor.u32 %v11319_v21, %v9068_v20  ;;  %p12243_p1 = scmp.ne.s32.totalorder %s12241_s22, %s12242_s19 }
  0x53   : > { %11883 = vmatpush.bf16.msra.mxu2 %v12522_v17  ;;  %v12528_v26 = vor.u32 %v11351_v23, %v9196_v22  ;;  %v8924_v27 = vld [vmem:[#allocation7 + $0x80] sm:$0xf]  ;;  %v11283_v28 = vld [vmem:[#allocation7 + $0x8c] sm:$0xf0] }
  0x54   : > { %v9052_v29 = vld [vmem:[#allocation7 + $0x180] sm:$0xf]  ;;  %v11315_v30 = vld [vmem:[#allocation7 + $0x18c] sm:$0xf0]  ;;  %v8925_v33 = vor.u32 %v11283_v28, %v8924_v27  ;;  %p12244_p3 = pnand %p12243_p1, %p12458_p0 }
  0x55   : > { %v9180_v31 = vld [vmem:[#allocation7 + $0x280] sm:$0xf]  ;;  %v11347_v32 = vld [vmem:[#allocation7 + $0x28c] sm:$0xf0]  ;;  %3838 = vmatpush.bf16.msra.mxu0 %v8941_v24  ;;  %11868 = vmatpush.bf16.msra.mxu3 %v8941_v24  ;;  %v12532_v34 = vor.u32 %v11315_v30, %v9052_v29  ;;  %v12572_v29 = vpack.c.bf16 %v452_v19, %v436_v14 }
  0x56   : > { %11876 = vmatpush.bf16.msra.mxu1 %v12526_v25  ;;  %v12534_v35 = vor.u32 %v11347_v32, %v9180_v31  ;;  %v8908_v36 = vld [vmem:[#allocation7 + $0x60] sm:$0xf]  ;;  %v11279_v37 = vld [vmem:[#allocation7 + $0x6c] sm:$0xf0]  ;;  %p12245_p5 = pneg %p12244_p3 }
  0x57   : > { %11884 = vmatpush.bf16.msra.mxu2 %v12528_v26  ;;  %v9036_v38 = vld [vmem:[#allocation7 + $0x160] sm:$0xf]  ;;  %v11311_v39 = vld [vmem:[#allocation7 + $0x16c] sm:$0xf0]  ;;  %v8909_v42 = vor.u32 %v11279_v37, %v8908_v36 }
  0x58   : > { %v9164_v40 = vld [vmem:[#allocation7 + $0x260] sm:$0xf]  ;;  %v11343_v41 = vld [vmem:[#allocation7 + $0x26c] sm:$0xf0]  ;;  %v12538_v43 = vor.u32 %v11311_v39, %v9036_v38 }
  0x59   : > { %3839 = vmatpush.bf16.msra.mxu0 %v8925_v33  ;;  %11869 = vmatpush.bf16.msra.mxu3 %v8925_v33  ;;  %v12540_v44 = vor.u32 %v11343_v41, %v9164_v40  ;;  %v8892_v45 = vld [vmem:[#allocation7 + $0x40] sm:$0xf]  ;;  %v11275_v46 = vld [vmem:[#allocation7 + $0x4c] sm:$0xf0] }
  0x5a   : > { %11877 = vmatpush.bf16.msra.mxu1 %v12532_v34  ;;  %v9020_v47 = vld [vmem:[#allocation7 + $0x140] sm:$0xf]  ;;  %v11307_v48 = vld [vmem:[#allocation7 + $0x14c] sm:$0xf0]  ;;  %v8893_v51 = vor.u32 %v11275_v46, %v8892_v45  ;;  %v468_v45 = vld [vmem:[%s12496_s2 + $0x308] sm:$0xff] }
  0x5b   : > { %11885 = vmatpush.bf16.msra.mxu2 %v12534_v35  ;;  %v9148_v49 = vld [vmem:[#allocation7 + $0x240] sm:$0xf]  ;;  %v11339_v50 = vld [vmem:[#allocation7 + $0x24c] sm:$0xf0]  ;;  %v12544_v52 = vor.u32 %v11307_v48, %v9020_v47  ;;  %v484_v46 = vld [vmem:[%s12496_s2 + $0x388] sm:$0xff] }
  0x5c   : > { %v12546_v53 = vor.u32 %v11339_v50, %v9148_v49  ;;  %v8876_v54 = vld [vmem:[#allocation7 + $0x20] sm:$0xf]  ;;  %v11271_v55 = vld [vmem:[#allocation7 + $0x2c] sm:$0xf0]  ;;  %v12598_v50 = vpack.c.bf16 %v484_v46, %v468_v45 }
  0x5d   : > { %3840 = vmatpush.bf16.msra.mxu0 %v8909_v42  ;;  %11870 = vmatpush.bf16.msra.mxu3 %v8909_v42  ;;  %v9004_v56 = vld [vmem:[#allocation7 + $0x120] sm:$0xf]  ;;  %v11303_v57 = vld [vmem:[#allocation7 + $0x12c] sm:$0xf0]  ;;  %v8877_v60 = vor.u32 %v11271_v55, %v8876_v54 }
  0x5e   : > { %11878 = vmatpush.bf16.msra.mxu1 %v12538_v43  ;;  %v9132_v58 = vld [vmem:[#allocation7 + $0x220] sm:$0xf]  ;;  %v11335_v59 = vld [vmem:[#allocation7 + $0x22c] sm:$0xf0]  ;;  %v12550_v62 = vor.u32 %v11303_v57, %v9004_v56  ;;  %15246 = vst [vmem:[#allocation23_spill] sm:$0xff] %v12598_v50 }
  0x5f   : > { %11886 = vmatpush.bf16.msra.mxu2 %v12540_v44  ;;  %v8860_v61 = vld [vmem:[#allocation7] sm:$0xf]  ;;  %v12552_v63 = vor.u32 %v11335_v59, %v9132_v58  ;;  %v11267_v0 = vld [vmem:[#allocation7 + $0xc] sm:$0xf0]  ;;  %v372_v59 = vld [vmem:[%s12496_s2 + $0x8] sm:$0xff] }
  0x60   : > { %v8988_v1 = vld [vmem:[#allocation7 + $0x100] sm:$0xf]  ;;  %v11299_v2 = vld [vmem:[#allocation7 + $0x10c] sm:$0xf0]  ;;  %v8861_v11 = vor.u32 %v11267_v0, %v8860_v61  ;;  %v500_v61 = vld [vmem:[%s12496_s2 + $0x408] sm:$0xff] }
  0x61   : > { %3841 = vmatpush.bf16.msra.mxu0 %v8893_v51  ;;  %11871 = vmatpush.bf16.msra.mxu3 %v8893_v51  ;;  %v9116_v3 = vld [vmem:[#allocation7 + $0x200] sm:$0xf]  ;;  %v11331_v4 = vld [vmem:[#allocation7 + $0x20c] sm:$0xf0]  ;;  %v12561_v15 = vor.u32 %v11299_v2, %v8988_v1  ;;  %v516_v0 = vld [vmem:[%s12496_s2 + $0x488] sm:$0xff] }
  0x62   : > { %11879 = vmatpush.bf16.msra.mxu1 %v12544_v52  ;;  %v371_v5 = vld [vmem:[%s12496_s2] sm:$0xff]  ;;  %v11391_v10 = vld [vmem:[#allocation7 + $0x3ec] sm:$0xf0]  ;;  %v12563_v18 = vor.u32 %v11331_v4, %v9116_v3  ;;  %v12623_v4 = vpack.c.bf16 %v516_v0, %v500_v61 }
  0x63   : > { %11887 = vmatpush.bf16.msra.mxu2 %v12546_v53  ;;  %v387_v6 = vld [vmem:[%s12496_s2 + $0x80] sm:$0xff]  ;;  %v437_v20 = vld [vmem:[%s12496_s2 + $0x210] sm:$0xff] }
  0x64   : > { %v9356_v9 = vld [vmem:[#allocation7 + $0x3e0] sm:$0xf]  ;;  %v453_v21 = vld [vmem:[%s12496_s2 + $0x290] sm:$0xff]  ;;  %v12568_v23 = vpack.c.bf16 %v387_v6, %v371_v5  ;;  %15249 = vst [vmem:[#allocation26_spill] sm:$0xff] %v12623_v4 }
  0x65   : > { %3842 = vmatpush.bf16.msra.mxu0 %v8877_v60  ;;  %11872 = vmatpush.bf16.msra.mxu3 %v8877_v60  ;;  %v435_v12 = vld [vmem:[%s12496_s2 + $0x200] sm:$0xff]  ;;  %v9357_v22 = vor.u32 %v11391_v10, %v9356_v9  ;;  %v11387_v28 = vld [vmem:[#allocation7 + $0x3cc] sm:$0xf0]  ;;  %v12574_v30 = vpack.c.bf16 %v453_v21, %v437_v20  ;;  %v388_v60 = vld [vmem:[%s12496_s2 + $0x88] sm:$0xff] }
  0x66   : > { %v451_v13 = vld [vmem:[%s12496_s2 + $0x280] sm:$0xff]  ;;  %11880 = vmatpush.bf16.msra.mxu1 %v12550_v62  ;;  %v11383_v33 = vld [vmem:[#allocation7 + $0x3ac] sm:$0xf0] }
  0x67   : > { %11888 = vmatpush.bf16.msra.mxu2 %v12552_v63  ;;  %v12570_v24 = vpack.c.bf16 %v451_v13, %v435_v12  ;;  %v9340_v27 = vld [vmem:[#allocation7 + $0x3c0] sm:$0xf]  ;;  %v11379_v37 = vld [vmem:[#allocation7 + $0x38c] sm:$0xf0] }
  0x68   : > { %v9341_v31 = vor.u32 %v11387_v28, %v9340_v27  ;;  %v9324_v32 = vld [vmem:[#allocation7 + $0x3a0] sm:$0xf]  ;;  %v469_v47 = vld [vmem:[%s12496_s2 + $0x310] sm:$0xff] }
  0x69   : > { %3843 = vmatpush.bf16.msra.mxu0 %v8861_v11  ;;  %11873 = vmatpush.bf16.msra.mxu3 %v8861_v11  ;;  %v9308_v36 = vld [vmem:[#allocation7 + $0x380] sm:$0xf]  ;;  %v485_v48 = vld [vmem:[%s12496_s2 + $0x390] sm:$0xff] }
  0x6a   : > { %11881 = vmatpush.bf16.msra.mxu1 %v12561_v15  ;;  %v9309_v38 = vor.u32 %v11379_v37, %v9308_v36  ;;  %v403_v39 = vld [vmem:[%s12496_s2 + $0x100] sm:$0xff]  ;;  %v11375_v51 = vld [vmem:[#allocation7 + $0x36c] sm:$0xf0] }
  0x6b   : > { %11889 = vmatpush.bf16.msra.mxu2 %v12563_v18  ;;  %v419_v40 = vld [vmem:[%s12496_s2 + $0x180] sm:$0xff]  ;;  %v11371_v55 = vld [vmem:[#allocation7 + $0x34c] sm:$0xf0] }
  0x6c   : > { %3844 = vmatmul.bf16.vlgmr.msra.gmra.mxu0 %v12568_v23  ;;  %3854 = vmatmul.bf16.vlgmr.msra.gmra.mxu3 %v12570_v24  ;;  %v467_v41 = vld [vmem:[%s12496_s2 + $0x300] sm:$0xff]  ;;  %v501_v1 = vld [vmem:[%s12496_s2 + $0x410] sm:$0xff] }
  0x6d   : > { %3983 = vmatpush.bf16.msrb.mxu3 %v9357_v22  ;;  %3885 = vmatpush.bf16.msrb.mxu0 %v12514_v7  ;;  %v9325_v7 = vor.u32 %v11383_v33, %v9324_v32  ;;  %v483_v42 = vld [vmem:[%s12496_s2 + $0x380] sm:$0xff]  ;;  %v517_v2 = vld [vmem:[%s12496_s2 + $0x490] sm:$0xff] }
  0x6e   : > { %3903 = vmatmul.bf16.vlgmr.msra.gmra.mxu1 %v12572_v29  ;;  %3952 = vmatmul.bf16.vlgmr.msra.gmra.mxu2 %v12574_v30  ;;  %v12596_v49 = vpack.c.bf16 %v483_v42, %v467_v41  ;;  %v499_v57 = vld [vmem:[%s12496_s2 + $0x400] sm:$0xff]  ;;  %v11455_v6 = vld [vmem:[#allocation7 + $0x5ec] sm:$0xf0]  ;;  %v548_v41 = vld [vmem:[%s12496_s2 + $0x588] sm:$0xff] }
  0x6f   : > { %v515_v58 = vld [vmem:[%s12496_s2 + $0x480] sm:$0xff]  ;;  %v11487_v10 = vld [vmem:[#allocation7 + $0x6ec] sm:$0xf0] }
  0x70   : > { %15245 = vst [vmem:[#allocation22_spill] sm:$0xff] %v12596_v49  ;;  %v12618_v3 = vpack.c.bf16 %v515_v58, %v499_v57  ;;  %v9612_v5 = vld [vmem:[#allocation7 + $0x5e0] sm:$0xf]  ;;  %v11451_v13 = vld [vmem:[#allocation7 + $0x5cc] sm:$0xf0] }
  0x71   : > { %3886 = vmatpush.bf16.msrb.mxu0 %v12520_v16  ;;  %3984 = vmatpush.bf16.msrb.mxu3 %v9341_v31  ;;  %v12594_v16 = vpack.c.bf16 %v419_v40, %v403_v39  ;;  %v9740_v9 = vld [vmem:[#allocation7 + $0x6e0] sm:$0xf]  ;;  %v9613_v11 = vor.u32 %v11455_v6, %v9612_v5  ;;  %v11367_v22 = vld [vmem:[#allocation7 + $0x32c] sm:$0xf0]  ;;  %v420_v39 = vld [vmem:[%s12496_s2 + $0x188] sm:$0xff] }
  0x72   : > { %15248 = vst [vmem:[#allocation25_spill] sm:$0xff] %v12618_v3  ;;  %v9596_v12 = vld [vmem:[#allocation7 + $0x5c0] sm:$0xf]  ;;  %v11479_v32 = vld [vmem:[#allocation7 + $0x6ac] sm:$0xf0]  ;;  %v532_v40 = vld [vmem:[%s12496_s2 + $0x508] sm:$0xff] }
  0x73   : > { %v9724_v14 = vld [vmem:[#allocation7 + $0x6c0] sm:$0xf]  ;;  %4081 = vmatpush.bf16.msrb.mxu1 %v9613_v11  ;;  %v9597_v19 = vor.u32 %v11451_v13, %v9596_v12  ;;  %v533_v42 = vld [vmem:[%s12496_s2 + $0x510] sm:$0xff] }
  0x74   : > { %v9260_v21 = vld [vmem:[#allocation7 + $0x320] sm:$0xf]  ;;  %v549_v45 = vld [vmem:[%s12496_s2 + $0x590] sm:$0xff] }
  0x75   : > { %3887 = vmatpush.bf16.msrb.mxu0 %v12526_v25  ;;  %3985 = vmatpush.bf16.msrb.mxu3 %v9325_v7  ;;  %v12600_v25 = vpack.c.bf16 %v485_v48, %v469_v47  ;;  %v9261_v27 = vor.u32 %v11367_v22, %v9260_v21  ;;  %v9580_v28 = vld [vmem:[#allocation7 + $0x5a0] sm:$0xf]  ;;  %v11439_v57 = vld [vmem:[#allocation7 + $0x56c] sm:$0xf0] }
  0x76   : > { %v9708_v31 = vld [vmem:[#allocation7 + $0x6a0] sm:$0xf]  ;;  %v11363_v61 = vld [vmem:[#allocation7 + $0x30c] sm:$0xf0] }
  0x77   : > { %15247 = vst [vmem:[#allocation24_spill] sm:$0xff] %v12600_v25  ;;  %v531_v33 = vld [vmem:[%s12496_s2 + $0x500] sm:$0xff]  ;;  %4082 = vmatpush.bf16.msrb.mxu1 %v9597_v19  ;;  %v9709_v37 = vor.u32 %v11479_v32, %v9708_v31  ;;  %v11435_v6 = vld [vmem:[#allocation7 + $0x54c] sm:$0xf0]  ;;  %v580_v31 = vld [vmem:[%s12496_s2 + $0x688] sm:$0xff] }
  0x78   : > { %v547_v7 = vld [vmem:[%s12496_s2 + $0x580] sm:$0xff]  ;;  %v11467_v11 = vld [vmem:[#allocation7 + $0x64c] sm:$0xf0] }
  0x79   : > { %3888 = vmatpush.bf16.msrb.mxu0 %v12532_v34  ;;  %3986 = vmatpush.bf16.msrb.mxu3 %v9309_v38  ;;  %v9292_v34 = vld [vmem:[#allocation7 + $0x360] sm:$0xf]  ;;  %v404_v38 = vld [vmem:[%s12496_s2 + $0x108] sm:$0xff]  ;;  %v12642_v47 = vpack.c.bf16 %v547_v7, %v531_v33  ;;  %v11419_v21 = vld [vmem:[#allocation7 + $0x4cc] sm:$0xf0] }
  0x7a   : > { %v9293_v54 = vor.u32 %v11375_v51, %v9292_v34  ;;  %v9564_v46 = vld [vmem:[#allocation7 + $0x580] sm:$0xf]  ;;  %v12644_v48 = vpack.c.bf16 %v420_v39, %v404_v38  ;;  %v11475_v51 = vld [vmem:[#allocation7 + $0x68c] sm:$0xf0] }
  0x7b   : > { %15251 = vst [vmem:[#allocation28_spill] sm:$0xff] %v12642_v47  ;;  %v9692_v34 = vld [vmem:[#allocation7 + $0x680] sm:$0xf]  ;;  %v565_v32 = vld [vmem:[%s12496_s2 + $0x610] sm:$0xff] }
  0x7c   : > { %3849 = vmatmul.bf16.gmra.mxu0 %v12594_v16  ;;  %3859 = vmatmul.bf16.gmra.mxu3 %v12596_v49  ;;  %v9676_v58 = vld [vmem:[#allocation7 + $0x660] sm:$0xf]  ;;  %v581_v33 = vld [vmem:[%s12496_s2 + $0x690] sm:$0xff] }
  0x7d   : > { %3889 = vmatpush.bf16.msrb.mxu0 %v12538_v43  ;;  %3987 = vmatpush.bf16.msrb.mxu3 %v9293_v54  ;;  %v9276_v43 = vld [vmem:[#allocation7 + $0x340] sm:$0xf]  ;;  %v12646_v54 = vpack.c.bf16 %v548_v41, %v532_v40  ;;  %v11427_v40 = vld [vmem:[#allocation7 + $0x50c] sm:$0xf0] }
  0x7e   : > { %3908 = vmatmul.bf16.gmra.mxu1 %v12598_v50  ;;  %3957 = vmatmul.bf16.gmra.mxu2 %v12600_v25  ;;  %v9277_v56 = vor.u32 %v11371_v55, %v9276_v43  ;;  %v12648_v43 = vpack.c.bf16 %v549_v45, %v533_v42  ;;  %v9693_v55 = vor.u32 %v11475_v51, %v9692_v34  ;;  %v9484_v0 = vld [vmem:[#allocation7 + $0x4e0] sm:$0xf]  ;;  %v11415_v45 = vld [vmem:[#allocation7 + $0x4ac] sm:$0xf0] }
  0x7f   : > { %15252 = vst [vmem:[#allocation29_spill] sm:$0xff] %v12646_v54  ;;  %v9532_v5 = vld [vmem:[#allocation7 + $0x540] sm:$0xf]  ;;  %v12672_v34 = vpack.c.bf16 %v581_v33, %v565_v32  ;;  %v11515_v32 = vld [vmem:[#allocation7 + $0x7cc] sm:$0xf0] }
  0x80   : > { %15253 = vst [vmem:[#allocation30_spill] sm:$0xff] %v12648_v43  ;;  %v579_v12 = vld [vmem:[%s12496_s2 + $0x680] sm:$0xff] }
  0x81   : > { %3890 = vmatpush.bf16.msrb.mxu0 %v12544_v52  ;;  %3988 = vmatpush.bf16.msrb.mxu3 %v9277_v56  ;;  %v12620_v52 = vpack.c.bf16 %v388_v60, %v372_v59  ;;  %v9548_v56 = vld [vmem:[#allocation7 + $0x560] sm:$0xf]  ;;  %v11471_v59 = vld [vmem:[#allocation7 + $0x66c] sm:$0xf0]  ;;  %15256 = vst [vmem:[#allocation33_spill] sm:$0xff] %v12672_v34 }
  0x82   : > { %v9549_v60 = vor.u32 %v11439_v57, %v9548_v56  ;;  %v9516_v19 = vld [vmem:[#allocation7 + $0x520] sm:$0xf]  ;;  %v11411_v57 = vld [vmem:[#allocation7 + $0x48c] sm:$0xf0] }
  0x83   : > { %v9644_v22 = vld [vmem:[#allocation7 + $0x620] sm:$0xf] }
  0x84   : > { %v9500_v39 = vld [vmem:[#allocation7 + $0x500] sm:$0xf] }
  0x85   : > { %3891 = vmatpush.bf16.msrb.mxu0 %v12550_v62  ;;  %v12625_v62 = vpack.c.bf16 %v517_v2, %v501_v1  ;;  %3989 = vmatpush.bf16.msrb.mxu3 %v9261_v27  ;;  %v9677_v1 = vor.u32 %v11471_v59, %v9676_v58  ;;  %v11463_v27 = vld [vmem:[#allocation7 + $0x62c] sm:$0xf0]  ;;  %v9501_v51 = vor.u32 %v11427_v40, %v9500_v39  ;;  %v9436_v56 = vld [vmem:[#allocation7 + $0x480] sm:$0xf]  ;;  %v376_v40 = vld [vmem:[%s12496_s2 + $0x28] sm:$0xff] }
  0x86   : > { %v9645_v38 = vor.u32 %v11463_v27, %v9644_v22  ;;  %v9868_v58 = vld [vmem:[#allocation7 + $0x7e0] sm:$0xf]  ;;  %v11519_v59 = vld [vmem:[#allocation7 + $0x7ec] sm:$0xf0] }
  0x87   : > { %15250 = vst [vmem:[#allocation27_spill] sm:$0xff] %v12625_v62  ;;  %v391_v39 = vld [vmem:[%s12496_s2 + $0xa0] sm:$0xff] }
  0x89   : > { %3892 = vmatpush.bf16.msrb.mxu0 %v12561_v15  ;;  %v11483_v15 = vld [vmem:[#allocation7 + $0x6cc] sm:$0xf0] }
  0x8a   : > { %v9725_v20 = vor.u32 %v11483_v15, %v9724_v14  ;;  %v9468_v14 = vld [vmem:[#allocation7 + $0x4c0] sm:$0xf] }
  0x8c   : > { %3864 = vmatmul.bf16.gmra.mxu3 %v12618_v3  ;;  %3893 = vmatmul.bf16.vlgmr.msrb.gmra.mxu0 %v12620_v52 }
  0x8d   : > { %3934 = vmatpush.bf16.msra.mxu0 %v12516_v8  ;;  %v9741_v8 = vor.u32 %v11487_v10, %v9740_v9  ;;  %v11423_v9 = vld [vmem:[#allocation7 + $0x4ec] sm:$0xf0]  ;;  %v9660_v10 = vld [vmem:[#allocation7 + $0x640] sm:$0xf] }
  0x8e   : > { %3913 = vmatmul.bf16.gmra.mxu1 %v12623_v4  ;;  %3962 = vmatmul.bf16.gmra.mxu2 %v12625_v62  ;;  %v9485_v13 = vor.u32 %v11423_v9, %v9484_v0  ;;  %v9661_v15 = vor.u32 %v11467_v11, %v9660_v10  ;;  %v11407_v0 = vld [vmem:[#allocation7 + $0x46c] sm:$0xf0]  ;;  %v596_v10 = vld [vmem:[%s12496_s2 + $0x708] sm:$0xff] }
  0x8f   : > { %4130 = vmatpush.bf16.msrb.mxu2 %v9741_v8  ;;  %v563_v8 = vld [vmem:[%s12496_s2 + $0x600] sm:$0xff]  ;;  %v11403_v9 = vld [vmem:[#allocation7 + $0x44c] sm:$0xf0] }
  0x90   : > { %v12666_v41 = vpack.c.bf16 %v579_v12, %v563_v8  ;;  %v405_v11 = vld [vmem:[%s12496_s2 + $0x110] sm:$0xff]  ;;  %v612_v8 = vld [vmem:[%s12496_s2 + $0x788] sm:$0xff] }
  0x91   : > { %3935 = vmatpush.bf16.msra.mxu0 %v12522_v17  ;;  %v11447_v17 = vld [vmem:[#allocation7 + $0x5ac] sm:$0xf0]  ;;  %v12690_v22 = vpack.c.bf16 %v612_v8, %v596_v10  ;;  %v9820_v8 = vld [vmem:[#allocation7 + $0x780] sm:$0xf] }
  0x92   : > { %v9581_v36 = vor.u32 %v11447_v17, %v9580_v28  ;;  %v564_v28 = vld [vmem:[%s12496_s2 + $0x608] sm:$0xff]  ;;  %v373_v17 = vld [vmem:[%s12496_s2 + $0x10] sm:$0xff]  ;;  %15254 = vst [vmem:[#allocation31_spill] sm:$0xff] %v12666_v41 }
  0x93   : > { %4131 = vmatpush.bf16.msrb.mxu2 %v9725_v20  ;;  %v11431_v20 = vld [vmem:[#allocation7 + $0x52c] sm:$0xf0]  ;;  %15258 = vst [vmem:[#allocation35_spill] sm:$0xff] %v12690_v22 }
  0x94   : > { %4083 = vmatpush.bf16.msrb.mxu1 %v9581_v36  ;;  %v9517_v7 = vor.u32 %v11431_v20, %v9516_v19  ;;  %v9469_v36 = vor.u32 %v11419_v21, %v9468_v14  ;;  %v597_v12 = vld [vmem:[%s12496_s2 + $0x710] sm:$0xff]  ;;  %v9388_v20 = vld [vmem:[#allocation7 + $0x420] sm:$0xf] }
  0x95   : > { %3936 = vmatpush.bf16.msra.mxu0 %v12528_v26  ;;  %v11443_v26 = vld [vmem:[#allocation7 + $0x58c] sm:$0xf0] }
  0x96   : > { %v11399_v21 = vld [vmem:[#allocation7 + $0x42c] sm:$0xf0] }
  0x97   : > { %4132 = vmatpush.bf16.msrb.mxu2 %v9709_v37  ;;  %v9452_v37 = vld [vmem:[#allocation7 + $0x4a0] sm:$0xf] }
  0x99   : > { %3937 = vmatpush.bf16.msra.mxu0 %v12534_v35  ;;  %v9565_v35 = vor.u32 %v11443_v26, %v9564_v46  ;;  %v9628_v46 = vld [vmem:[#allocation7 + $0x600] sm:$0xf]  ;;  %v11459_v26 = vld [vmem:[#allocation7 + $0x60c] sm:$0xf0] }
  0x9b   : > { %4084 = vmatpush.bf16.msrb.mxu1 %v9565_v35  ;;  %4133 = vmatpush.bf16.msrb.mxu2 %v9693_v55  ;;  %v9453_v35 = vor.u32 %v11415_v45, %v9452_v37  ;;  %v9629_v55 = vor.u32 %v11459_v26, %v9628_v46  ;;  %v390_v37 = vld [vmem:[%s12496_s2 + $0x98] sm:$0xff]  ;;  %v392_v45 = vld [vmem:[%s12496_s2 + $0xa8] sm:$0xff]  ;;  %v377_v46 = vld [vmem:[%s12496_s2 + $0x30] sm:$0xff] }
  0x9c   : > { %3869 = vmatmul.bf16.gmra.mxu3 %v12642_v47  ;;  %3898 = vmatmul.bf16.gmra.mxu0 %v12644_v48  ;;  %v393_v26 = vld [vmem:[%s12496_s2 + $0xb0] sm:$0xff] }
  0x9d   : > { %3938 = vmatpush.bf16.msra.mxu0 %v12540_v44  ;;  %v9244_v44 = vld [vmem:[#allocation7 + $0x300] sm:$0xf]  ;;  %v11715_v47 = vld [vmem:[#allocation7 + $0xe0c] sm:$0xf0] }
  0x9e   : > { %3918 = vmatmul.bf16.gmra.mxu1 %v12646_v54  ;;  %3967 = vmatmul.bf16.gmra.mxu2 %v12648_v43  ;;  %v9245_v2 = vor.u32 %v11363_v61, %v9244_v44  ;;  %v9437_v44 = vor.u32 %v11411_v57, %v9436_v56  ;;  %v9420_v61 = vld [vmem:[#allocation7 + $0x460] sm:$0xf]  ;;  %v12712_v56 = vpack.c.bf16 %v393_v26, %v377_v46  ;;  %v11503_v26 = vld [vmem:[#allocation7 + $0x76c] sm:$0xf0] }
  0x9f   : > { %4085 = vmatpush.bf16.msrb.mxu1 %v9549_v60  ;;  %4134 = vmatpush.bf16.msrb.mxu2 %v9677_v1  ;;  %v9869_v60 = vor.u32 %v11519_v59, %v9868_v58  ;;  %v595_v1 = vld [vmem:[%s12496_s2 + $0x700] sm:$0xff]  ;;  %v11511_v58 = vld [vmem:[#allocation7 + $0x7ac] sm:$0xf0] }
  0xa0   : > { %3990 = vmatpush.bf16.msrb.mxu3 %v9245_v2  ;;  %v9421_v2 = vor.u32 %v11407_v0, %v9420_v61  ;;  %15263 = vst [vmem:[#allocation40_spill] sm:$0xff] %v12712_v56  ;;  %v9836_v57 = vld [vmem:[#allocation7 + $0x7a0] sm:$0xf] }
  0xa1   : > { %3939 = vmatpush.bf16.msra.mxu0 %v12546_v53  ;;  %v9533_v53 = vor.u32 %v11435_v6, %v9532_v5  ;;  %v611_v5 = vld [vmem:[%s12496_s2 + $0x780] sm:$0xff]  ;;  %v9837_v59 = vor.u32 %v11511_v58, %v9836_v57 }
  0xa2   : > { %v9404_v6 = vld [vmem:[#allocation7 + $0x440] sm:$0xf] }
  0xa3   : > { %4086 = vmatpush.bf16.msrb.mxu1 %v9533_v53  ;;  %4135 = vmatpush.bf16.msrb.mxu2 %v9661_v15  ;;  %v421_v53 = vld [vmem:[%s12496_s2 + $0x190] sm:$0xff]  ;;  %v9405_v14 = vor.u32 %v11403_v9, %v9404_v6  ;;  %v12686_v15 = vpack.c.bf16 %v611_v5, %v595_v1  ;;  %v407_v61 = vld [vmem:[%s12496_s2 + $0x120] sm:$0xff]  ;;  %v408_v1 = vld [vmem:[%s12496_s2 + $0x128] sm:$0xff] }
  0xa4   : > { %4179 = vmatpush.bf16.msra.mxu3 %v9869_v60  ;;  %v12688_v19 = vpack.c.bf16 %v421_v53, %v405_v11  ;;  %v406_v60 = vld [vmem:[%s12496_s2 + $0x118] sm:$0xff]  ;;  %v423_v0 = vld [vmem:[%s12496_s2 + $0x1a0] sm:$0xff]  ;;  %v409_v5 = vld [vmem:[%s12496_s2 + $0x130] sm:$0xff] }
  0xa5   : > { %3940 = vmatpush.bf16.msra.mxu0 %v12552_v63  ;;  %v389_v63 = vld [vmem:[%s12496_s2 + $0x90] sm:$0xff]  ;;  %15257 = vst [vmem:[#allocation34_spill] sm:$0xff] %v12686_v15  ;;  %v12728_v10 = vpack.c.bf16 %v423_v0, %v407_v61  ;;  %v9804_v46 = vld [vmem:[#allocation7 + $0x760] sm:$0xf] }
  0xa6   : > { %v12668_v42 = vpack.c.bf16 %v389_v63, %v373_v17  ;;  %v9372_v17 = vld [vmem:[#allocation7 + $0x400] sm:$0xf]  ;;  %v11395_v63 = vld [vmem:[#allocation7 + $0x40c] sm:$0xf0]  ;;  %v9805_v57 = vor.u32 %v11503_v26, %v9804_v46 }
  0xa7   : > { %4087 = vmatpush.bf16.msrb.mxu1 %v9517_v7  ;;  %4136 = vmatpush.bf16.msrb.mxu2 %v9645_v38  ;;  %v9373_v7 = vor.u32 %v11395_v63, %v9372_v17  ;;  %v375_v38 = vld [vmem:[%s12496_s2 + $0x20] sm:$0xff]  ;;  %v425_v6 = vld [vmem:[%s12496_s2 + $0x1b0] sm:$0xff]  ;;  %15265 = vst [vmem:[#allocation42_spill] sm:$0xff] %v12728_v10  ;;  %v440_v17 = vld [vmem:[%s12496_s2 + $0x228] sm:$0xff] }
  0xa8   : > { %v12732_v53 = vpack.c.bf16 %v425_v6, %v409_v5  ;;  %v456_v63 = vld [vmem:[%s12496_s2 + $0x2a8] sm:$0xff]  ;;  %v486_v5 = vld [vmem:[%s12496_s2 + $0x398] sm:$0xff]  ;;  %v471_v6 = vld [vmem:[%s12496_s2 + $0x320] sm:$0xff] }
  0xa9   : > { %3941 = vmatpush.bf16.msra.mxu0 %v12563_v18  ;;  %v12670_v18 = vpack.c.bf16 %v580_v31, %v564_v28  ;;  %v9389_v28 = vor.u32 %v11399_v21, %v9388_v20  ;;  %v9852_v31 = vld [vmem:[#allocation7 + $0x7c0] sm:$0xf]  ;;  %v454_v20 = vld [vmem:[%s12496_s2 + $0x298] sm:$0xff] }
  0xaa   : > { %v9853_v33 = vor.u32 %v11515_v32, %v9852_v31  ;;  %15267 = vst [vmem:[#allocation44_spill] sm:$0xff] %v12732_v53  ;;  %v439_v21 = vld [vmem:[%s12496_s2 + $0x220] sm:$0xff]  ;;  %v441_v31 = vld [vmem:[%s12496_s2 + $0x230] sm:$0xff] }
  0xab   : > { %15255 = vst [vmem:[#allocation32_spill] sm:$0xff] %v12670_v18  ;;  %4088 = vmatpush.bf16.msrb.mxu1 %v9501_v51  ;;  %4137 = vmatpush.bf16.msrb.mxu2 %v9629_v55  ;;  %v12710_v55 = vpack.c.bf16 %v392_v45, %v376_v40  ;;  %v457_v32 = vld [vmem:[%s12496_s2 + $0x2b0] sm:$0xff]  ;;  %v10652_v54 = vld [vmem:[#allocation7 + $0xe00] sm:$0xf] }
  0xac   : > { %3874 = vmatmul.bf16.gmra.mxu3 %v12666_v41  ;;  %3942 = vmatmul.bf16.vlgmr.msra.gmra.mxu0 %v12668_v42 }
  0xad   : > { %4032 = vmatpush.bf16.msrb.mxu0 %v9485_v13  ;;  %v613_v13 = vld [vmem:[%s12496_s2 + $0x790] sm:$0xff]  ;;  %4180 = vmatpush.bf16.msra.mxu3 %v9853_v33  ;;  %15262 = vst [vmem:[#allocation39_spill] sm:$0xff] %v12710_v55 }
  0xae   : > { %3923 = vmatmul.bf16.gmra.mxu1 %v12670_v18  ;;  %3972 = vmatmul.bf16.gmra.mxu2 %v12672_v34  ;;  %v12692_v27 = vpack.c.bf16 %v613_v13, %v597_v12  ;;  %v11507_v12 = vld [vmem:[#allocation7 + $0x78c] sm:$0xf0] }
  0xaf   : > { %v9821_v13 = vor.u32 %v11507_v12, %v9820_v8  ;;  %v487_v8 = vld [vmem:[%s12496_s2 + $0x3a0] sm:$0xff]  ;;  %v472_v12 = vld [vmem:[%s12496_s2 + $0x328] sm:$0xff]  ;;  %v11587_v34 = vld [vmem:[#allocation7 + $0xa0c] sm:$0xf0] }
  0xb0   : > { %15259 = vst [vmem:[#allocation36_spill] sm:$0xff] %v12692_v27 }
  0xb1   : > { %4033 = vmatpush.bf16.msrb.mxu0 %v9469_v36  ;;  %v374_v36 = vld [vmem:[%s12496_s2 + $0x18] sm:$0xff]  ;;  %4181 = vmatpush.bf16.msra.mxu3 %v9837_v59 }
  0xb2   : > { %v12706_v51 = vpack.c.bf16 %v390_v37, %v374_v36  ;;  %v367_v36 = vld [vmem:[#allocation13] sm:$0xf] }
  0xb3   : > { %v12754_v45 = vperm.slane %v367_v36, 0 }
  0xb4   : > { %15260 = vst [vmem:[#allocation37_spill] sm:$0xff] %v12706_v51 }
  0xb5   : > { %4034 = vmatpush.bf16.msrb.mxu0 %v9453_v35  ;;  %v12708_v35 = vpack.c.bf16 %v391_v39, %v375_v38  ;;  %4182 = vmatpush.bf16.msra.mxu3 %v9821_v13  ;;  %v12750_v38 = vpack.c.bf16 %v456_v63, %v440_v17  ;;  %v12752_v39 = vpack.c.bf16 %v457_v32, %v441_v31  ;;  %v488_v13 = vld [vmem:[%s12496_s2 + $0x3a8] sm:$0xff] }
  0xb6   : > { %v12776_v31 = vpack.c.bf16 %v487_v8, %v471_v6  ;;  %v12780_v36 = vpack.c.bf16 %v488_v13, %v472_v12  ;;  %v502_v13 = vld [vmem:[%s12496_s2 + $0x418] sm:$0xff] }
  0xb7   : > { %15261 = vst [vmem:[#allocation38_spill] sm:$0xff] %v12708_v35 }
  0xb8   : > { %15270 = vst [vmem:[#allocation47_spill] sm:$0xff] %v12750_v38 }
  0xb9   : > { %4035 = vmatpush.bf16.msrb.mxu0 %v9437_v44  ;;  %v422_v44 = vld [vmem:[%s12496_s2 + $0x198] sm:$0xff]  ;;  %15271 = vst [vmem:[#allocation48_spill] sm:$0xff] %v12752_v39  ;;  %4183 = vmatpush.bf16.msra.mxu3 %v9805_v57 }
  0xba   : > { %v12726_v9 = vpack.c.bf16 %v422_v44, %v406_v60  ;;  %15273 = vst [vmem:[#allocation50_spill] sm:$0xff] %v12776_v31 }
  0xbb   : > { %15274 = vst [vmem:[#allocation51_spill] sm:$0xff] %v12780_v36 }
  0xbc   : > { %3879 = vmatmul.bf16.gmra.mxu3 %v12686_v15  ;;  %3947 = vmatmul.bf16.gmra.mxu0 %v12688_v19  ;;  %15264 = vst [vmem:[#allocation41_spill] sm:$0xff] %v12726_v9  ;;  %v10140_v15 = vld [vmem:[#allocation7 + $0xa00] sm:$0xf] }
  0xbd   : > { %4036 = vmatpush.bf16.msrb.mxu0 %v9421_v2  ;;  %v424_v2 = vld [vmem:[%s12496_s2 + $0x1a8] sm:$0xff] }
  0xbe   : > { %3928 = vmatmul.bf16.gmra.mxu1 %v12690_v22  ;;  %3977 = vmatmul.bf16.gmra.mxu2 %v12692_v27  ;;  %v12730_v11 = vpack.c.bf16 %v424_v2, %v408_v1  ;;  %v470_v2 = vld [vmem:[%s12496_s2 + $0x318] sm:$0xff]  ;;  %v11555_v22 = vld [vmem:[#allocation7 + $0x90c] sm:$0xf0] }
  0xbf   : > { %v12774_v63 = vpack.c.bf16 %v486_v5, %v470_v2 }
  0xc0   : > { %15266 = vst [vmem:[#allocation43_spill] sm:$0xff] %v12730_v11 }
  0xc1   : > { %4037 = vmatpush.bf16.msrb.mxu0 %v9405_v14  ;;  %v438_v14 = vld [vmem:[%s12496_s2 + $0x218] sm:$0xff]  ;;  %15272 = vst [vmem:[#allocation49_spill] sm:$0xff] %v12774_v63 }
  0xc2   : > { %v12746_v33 = vpack.c.bf16 %v454_v20, %v438_v14  ;;  %v473_v14 = vld [vmem:[%s12496_s2 + $0x330] sm:$0xff] }
  0xc3   : > { %v489_v20 = vld [vmem:[%s12496_s2 + $0x3b0] sm:$0xff] }
  0xc4   : > { %15268 = vst [vmem:[#allocation45_spill] sm:$0xff] %v12746_v33 }
  0xc5   : > { %4038 = vmatpush.bf16.msrb.mxu0 %v9389_v28  ;;  %v455_v28 = vld [vmem:[%s12496_s2 + $0x2a0] sm:$0xff] }
  0xc9   : > { %4039 = vmatpush.bf16.msrb.mxu0 %v9373_v7  ;;  %v12748_v7 = vpack.c.bf16 %v455_v28, %v439_v21 }
  0xcb   : > { %15269 = vst [vmem:[#allocation46_spill] sm:$0xff] %v12748_v7 }
  0xcc   : > { %3991 = vmatmul.bf16.vlgmr.msrb.gmra.mxu3 %v12706_v51  ;;  %4040 = vmatmul.bf16.vlgmr.msrb.gmra.mxu0 %v12708_v35 }
  0xce   : > { %4089 = vmatmul.bf16.vlgmr.msrb.gmra.mxu1 %v12710_v55  ;;  %4138 = vmatmul.bf16.vlgmr.msrb.gmra.mxu2 %v12712_v56 }
  0xdc   : > { %3996 = vmatmul.bf16.gmra.mxu3 %v12726_v9  ;;  %4045 = vmatmul.bf16.gmra.mxu0 %v12728_v10 }
  0xde   : > { %4094 = vmatmul.bf16.gmra.mxu1 %v12730_v11  ;;  %4143 = vmatmul.bf16.gmra.mxu2 %v12732_v53  ;;  %v553_v53 = vld [vmem:[%s12496_s2 + $0x5b0] sm:$0xff] }
  0xe9   : > { %v3845_v37 = vpop.f32.mrf.mxu0 }
  0xeb   : > { %v3904_v40 = vpop.f32.mrf.mxu1 }
  0xec   : > { %4001 = vmatmul.bf16.gmra.mxu3 %v12746_v33  ;;  %4050 = vmatmul.bf16.gmra.mxu0 %v12748_v7  ;;  %v550_v7 = vld [vmem:[%s12496_s2 + $0x598] sm:$0xff]  ;;  %v537_v33 = vld [vmem:[%s12496_s2 + $0x530] sm:$0xff] }
  0xee   : > { %4099 = vmatmul.bf16.gmra.mxu1 %v12750_v38  ;;  %4148 = vmatmul.bf16.gmra.mxu2 %v12752_v39  ;;  %v11611_v38 = vld [vmem:[#allocation7 + $0xacc] sm:$0xf0] }
  0xef   : > { %v3855_v58 = vpop.f32.mrf.mxu3 }
  0xf0   : > { %v3856_v59 = vadd.f32 %v3855_v58, %v12754_v45  ;;  %v9788_v58 = vld [vmem:[#allocation7 + $0x740] sm:$0xf] }
  0xf1   : > { %v3953_v60 = vpop.f32.mrf.mxu2  ;;  %v12761_v44 = vpop.f32.mrf.mxu0 }
  0xf2   : > { %v3905_v61 = vadd.f32 %v3904_v40, %v3856_v59  ;;  %v12782_v40 = vpack.c.bf16 %v489_v20, %v473_v14  ;;  %v11499_v59 = vld [vmem:[#allocation7 + $0x74c] sm:$0xf0]  ;;  %v518_v14 = vld [vmem:[%s12496_s2 + $0x498] sm:$0xff]  ;;  %v503_v20 = vld [vmem:[%s12496_s2 + $0x420] sm:$0xff] }
  0xf3   : > { %v3906_v0 = vpop.f32.mrf.mxu1 }
  0xf4   : > { %v12763_v1 = vadd.f32 %v3953_v60, %v3905_v61  ;;  %15275 = vst [vmem:[#allocation52_spill] sm:$0xff] %v12782_v40  ;;  %v9789_v60 = vor.u32 %v11499_v59, %v9788_v58  ;;  %v505_v58 = vld [vmem:[%s12496_s2 + $0x430] sm:$0xff] }
  0xf5   : > { %v521_v59 = vld [vmem:[%s12496_s2 + $0x4b0] sm:$0xff] }
  0xf6   : > { %4184 = vmatpush.bf16.msra.mxu3 %v9789_v60 }
  0xf7   : > { %v3857_v21 = vpop.f32.mrf.mxu3 }
  0xf8   : > { %v3858_v28 = vadd.f32 %v3857_v21, %v12754_v45  ;;  %v519_v21 = vld [vmem:[%s12496_s2 + $0x4a0] sm:$0xff] }
  0xf9   : > { %v3955_v17 = vpop.f32.mrf.mxu2  ;;  %v12778_v32 = vpop.f32.mrf.mxu0 }
  0xfa   : > { %v3907_v46 = vadd.f32 %v3906_v0, %v3858_v28  ;;  %v504_v28 = vld [vmem:[%s12496_s2 + $0x428] sm:$0xff] }
  0xfb   : > { %v3909_v26 = vpop.f32.mrf.mxu1 }
  0xfc   : > { %v12784_v57 = vadd.f32 %v3955_v17, %v3907_v46  ;;  %4006 = vmatmul.bf16.gmra.mxu3 %v12774_v63  ;;  %4055 = vmatmul.bf16.gmra.mxu0 %v12776_v31  ;;  %v3846_v17 = vadd.f32 %v3845_v37, %v12754_v45  ;;  %v520_v46 = vld [vmem:[%s12496_s2 + $0x4a8] sm:$0xff] }
  0xfe   : > { %4104 = vmatmul.bf16.gmra.mxu1 %v12780_v36  ;;  %4153 = vmatmul.bf16.gmra.mxu2 %v12782_v40  ;;  %v12805_v36 = vpack.c.bf16 %v518_v14, %v502_v13  ;;  %v9772_v13 = vld [vmem:[#allocation7 + $0x720] sm:$0xf]  ;;  %v11495_v14 = vld [vmem:[#allocation7 + $0x72c] sm:$0xf0] }
  0xff   : > { %v3860_v61 = vpop.f32.mrf.mxu3 }
 0x100   : > { %v3861_v0 = vadd.f32 %v3860_v61, %v12754_v45  ;;  %15276 = vst [vmem:[#allocation53_spill] sm:$0xff] %v12805_v36 }
 0x101   : > { %v3958_v2 = vpop.f32.mrf.mxu2  ;;  %v12791_v5 = vpop.f32.mrf.mxu0 }
 0x102   : > { %v3910_v6 = vadd.f32 %v3909_v26, %v3861_v0  ;;  %v12807_v26 = vpack.c.bf16 %v519_v21, %v503_v20  ;;  %v11551_v20 = vld [vmem:[#allocation7 + $0x8ec] sm:$0xf0]  ;;  %v9773_v21 = vor.u32 %v11495_v14, %v9772_v13 }
 0x103   : > { %v3911_v8 = vpop.f32.mrf.mxu1  ;;  %v11579_v13 = vld [vmem:[#allocation7 + $0x9cc] sm:$0xf0] }
 0x104   : > { %v12793_v12 = vadd.f32 %v3958_v2, %v3910_v6  ;;  %15277 = vst [vmem:[#allocation54_spill] sm:$0xff] %v12807_v26  ;;  %v12809_v2 = vpack.c.bf16 %v520_v46, %v504_v28  ;;  %v12811_v6 = vpack.c.bf16 %v521_v59, %v505_v58  ;;  %v10252_v46 = vld [vmem:[#allocation7 + $0xae0] sm:$0xf]  ;;  %4185 = vmatpush.bf16.msra.mxu3 %v9773_v21 }
 0x106   : > { %15278 = vst [vmem:[#allocation55_spill] sm:$0xff] %v12809_v2 }
 0x107   : > { %v3862_v40 = vpop.f32.mrf.mxu3  ;;  %15279 = vst [vmem:[#allocation56_spill] sm:$0xff] %v12811_v6 }
 0x108   : > { %v3863_v61 = vadd.f32 %v3862_v40, %v12754_v45  ;;  %v9996_v40 = vld [vmem:[#allocation7 + $0x8e0] sm:$0xf] }
 0x109   : > { %v3960_v60 = vpop.f32.mrf.mxu2  ;;  %v3894_v0 = vpop.f32.mrf.mxu0  ;;  %v9997_v28 = vor.u32 %v11551_v20, %v9996_v40  ;;  %v10236_v40 = vld [vmem:[#allocation7 + $0xac0] sm:$0xf] }
 0x10a   : > { %v3912_v31 = vadd.f32 %v3911_v8, %v3863_v61  ;;  %v12813_v63 = vadd.f32 %v3894_v0, %v3846_v17  ;;  %v3848_v8 = vadd.f32 %v12761_v44, %v12754_v45  ;;  %v10124_v17 = vld [vmem:[#allocation7 + $0x9e0] sm:$0xf]  ;;  %v11615_v61 = vld [vmem:[#allocation7 + $0xaec] sm:$0xf0]  ;;  %v10237_v21 = vor.u32 %v11611_v38, %v10236_v40  ;;  %v552_v40 = vld [vmem:[%s12496_s2 + $0x5a8] sm:$0xff] }
 0x10b   : > { %v3914_v37 = vpop.f32.mrf.mxu1  ;;  %v11547_v0 = vld [vmem:[#allocation7 + $0x8cc] sm:$0xf0]  ;;  %4228 = vmatpush.bf16.msra.mxu0 %v9997_v28  ;;  %v10108_v44 = vld [vmem:[#allocation7 + $0x9c0] sm:$0xf]  ;;  %v534_v28 = vld [vmem:[%s12496_s2 + $0x518] sm:$0xff] }
 0x10c   : > { %v12815_v39 = vadd.f32 %v3960_v60, %v3912_v31  ;;  %4011 = vmatmul.bf16.gmra.mxu3 %v12805_v36  ;;  %4060 = vmatmul.bf16.gmra.mxu0 %v12807_v26  ;;  %v11583_v31 = vld [vmem:[#allocation7 + $0x9ec] sm:$0xf0]  ;;  %v9980_v60 = vld [vmem:[#allocation7 + $0x8c0] sm:$0xf]  ;;  %v10109_v20 = vor.u32 %v11579_v13, %v10108_v44  ;;  %v12839_v9 = vpack.c.bf16 %v550_v7, %v534_v28 }
 0x10d   : > { %v10125_v59 = vor.u32 %v11583_v31, %v10124_v17  ;;  %v9981_v36 = vor.u32 %v11547_v0, %v9980_v60  ;;  %v10092_v60 = vld [vmem:[#allocation7 + $0x9a0] sm:$0xf]  ;;  %v11607_v0 = vld [vmem:[#allocation7 + $0xaac] sm:$0xf0] }
 0x10e   : > { %4109 = vmatmul.bf16.gmra.mxu1 %v12809_v2  ;;  %4158 = vmatmul.bf16.gmra.mxu2 %v12811_v6  ;;  %v10253_v6 = vor.u32 %v11615_v61, %v10252_v46  ;;  %v9964_v46 = vld [vmem:[#allocation7 + $0x8a0] sm:$0xf]  ;;  %v11543_v61 = vld [vmem:[#allocation7 + $0x8ac] sm:$0xf0]  ;;  %15280 = vst [vmem:[#allocation57_spill] sm:$0xff] %v12839_v9 }
 0x10f   : > { %v3865_v58 = vpop.f32.mrf.mxu3  ;;  %4277 = vmatpush.bf16.msra.mxu1 %v10125_v59  ;;  %4229 = vmatpush.bf16.msra.mxu0 %v9981_v36  ;;  %v535_v44 = vld [vmem:[%s12496_s2 + $0x520] sm:$0xff]  ;;  %v11539_v36 = vld [vmem:[#allocation7 + $0x88c] sm:$0xf0] }
 0x110   : > { %v3866_v2 = vadd.f32 %v3865_v58, %v12754_v45  ;;  %4326 = vmatpush.bf16.msra.mxu2 %v10253_v6  ;;  %v551_v13 = vld [vmem:[%s12496_s2 + $0x5a0] sm:$0xff]  ;;  %v3851_v6 = vadd.f32 %v12778_v32, %v12754_v45  ;;  %v11603_v32 = vld [vmem:[#allocation7 + $0xa8c] sm:$0xf0] }
 0x111   : > { %v3963_v26 = vpop.f32.mrf.mxu2  ;;  %v3896_v14 = vpop.f32.mrf.mxu0  ;;  %v12841_v56 = vpack.c.bf16 %v551_v13, %v535_v44 }
 0x112   : > { %v3915_v17 = vadd.f32 %v3914_v37, %v3866_v2  ;;  %v12824_v31 = vadd.f32 %v3896_v14, %v3848_v8  ;;  %v9965_v2 = vor.u32 %v11543_v61, %v9964_v46  ;;  %v11575_v37 = vld [vmem:[#allocation7 + $0x9ac] sm:$0xf0]  ;;  %v10220_v8 = vld [vmem:[#allocation7 + $0xaa0] sm:$0xf]  ;;  %v536_v14 = vld [vmem:[%s12496_s2 + $0x528] sm:$0xff] }
 0x113   : > { %v3916_v58 = vpop.f32.mrf.mxu1  ;;  %4278 = vmatpush.bf16.msra.mxu1 %v10109_v20  ;;  %v10093_v38 = vor.u32 %v11575_v37, %v10092_v60  ;;  %v10221_v11 = vor.u32 %v11607_v0, %v10220_v8  ;;  %v10076_v46 = vld [vmem:[#allocation7 + $0x980] sm:$0xf]  ;;  %15281 = vst [vmem:[#allocation58_spill] sm:$0xff] %v12841_v56  ;;  %v11571_v20 = vld [vmem:[#allocation7 + $0x98c] sm:$0xf0]  ;;  %v12843_v55 = vpack.c.bf16 %v552_v40, %v536_v14 }
 0x114   : > { %v12828_v59 = vadd.f32 %v3963_v26, %v3915_v17  ;;  %4327 = vmatpush.bf16.msra.mxu2 %v10237_v21  ;;  %v9948_v17 = vld [vmem:[#allocation7 + $0x880] sm:$0xf]  ;;  %4230 = vmatpush.bf16.msra.mxu0 %v9965_v2  ;;  %v12845_v21 = vpack.c.bf16 %v553_v53, %v537_v33  ;;  %v10077_v7 = vor.u32 %v11571_v20, %v10076_v46  ;;  %v11491_v33 = vld [vmem:[#allocation7 + $0x70c] sm:$0xf0] }
 0x115   : > { %v10204_v60 = vld [vmem:[#allocation7 + $0xa80] sm:$0xf]  ;;  %15282 = vst [vmem:[#allocation59_spill] sm:$0xff] %v12843_v55 }
 0x116   : > { %15283 = vst [vmem:[#allocation60_spill] sm:$0xff] %v12845_v21  ;;  %v10205_v28 = vor.u32 %v11603_v32, %v10204_v60  ;;  %v9932_v2 = vld [vmem:[#allocation7 + $0x860] sm:$0xf] }
 0x117   : > { %v3867_v26 = vpop.f32.mrf.mxu3  ;;  %4279 = vmatpush.bf16.msra.mxu1 %v10093_v38  ;;  %v9756_v53 = vld [vmem:[#allocation7 + $0x700] sm:$0xf]  ;;  %v11567_v38 = vld [vmem:[#allocation7 + $0x96c] sm:$0xf0] }
 0x118   : > { %v3868_v61 = vadd.f32 %v3867_v26, %v12754_v45  ;;  %4328 = vmatpush.bf16.msra.mxu2 %v10221_v11  ;;  %v9949_v26 = vor.u32 %v11539_v36, %v9948_v17  ;;  %v3853_v11 = vadd.f32 %v12791_v5, %v12754_v45  ;;  %v9757_v13 = vor.u32 %v11491_v33, %v9756_v53  ;;  %v10060_v14 = vld [vmem:[#allocation7 + $0x960] sm:$0xf]  ;;  %v11599_v36 = vld [vmem:[#allocation7 + $0xa6c] sm:$0xf0] }
 0x119   : > { %v3965_v10 = vpop.f32.mrf.mxu2  ;;  %v3899_v37 = vpop.f32.mrf.mxu0  ;;  %v10061_v17 = vor.u32 %v11567_v38, %v10060_v14  ;;  %v9916_v46 = vld [vmem:[#allocation7 + $0x840] sm:$0xf]  ;;  %v582_v14 = vld [vmem:[%s12496_s2 + $0x698] sm:$0xff] }
 0x11a   : > { %v3917_v8 = vadd.f32 %v3916_v58, %v3868_v61  ;;  %v12847_v0 = vadd.f32 %v3899_v37, %v3851_v6  ;;  %v11535_v58 = vld [vmem:[#allocation7 + $0x86c] sm:$0xf0]  ;;  %4231 = vmatpush.bf16.msra.mxu0 %v9949_v26  ;;  %v10188_v6 = vld [vmem:[#allocation7 + $0xa60] sm:$0xf]  ;;  %4186 = vmatpush.bf16.msra.mxu3 %v9757_v13  ;;  %v566_v13 = vld [vmem:[%s12496_s2 + $0x618] sm:$0xff] }
 0x11b   : > { %v3919_v35 = vpop.f32.mrf.mxu1  ;;  %4280 = vmatpush.bf16.msra.mxu1 %v10077_v7  ;;  %v11531_v61 = vld [vmem:[#allocation7 + $0x84c] sm:$0xf0]  ;;  %v10189_v5 = vor.u32 %v11599_v36, %v10188_v6  ;;  %v10044_v32 = vld [vmem:[#allocation7 + $0x940] sm:$0xf]  ;;  %v12871_v51 = vpack.c.bf16 %v582_v14, %v566_v13  ;;  %v10141_v14 = vor.u32 %v11587_v34, %v10140_v15 }
 0x11c   : > { %v12849_v44 = vadd.f32 %v3965_v10, %v3917_v8  ;;  %4016 = vmatmul.bf16.gmra.mxu3 %v12839_v9  ;;  %4065 = vmatmul.bf16.gmra.mxu0 %v12841_v56  ;;  %v9933_v10 = vor.u32 %v11535_v58, %v9932_v2  ;;  %v11563_v37 = vld [vmem:[#allocation7 + $0x94c] sm:$0xf0]  ;;  %v10172_v8 = vld [vmem:[#allocation7 + $0xa40] sm:$0xf]  ;;  %v9917_v7 = vor.u32 %v11531_v61, %v9916_v46 }
 0x11d   : > { %4329 = vmatpush.bf16.msra.mxu2 %v10205_v28  ;;  %v11595_v2 = vld [vmem:[#allocation7 + $0xa4c] sm:$0xf0]  ;;  %v10045_v58 = vor.u32 %v11563_v37, %v10044_v32  ;;  %v9900_v6 = vld [vmem:[#allocation7 + $0x820] sm:$0xf]  ;;  %15284 = vst [vmem:[#allocation61_spill] sm:$0xff] %v12871_v51 }
 0x11e   : > { %4114 = vmatmul.bf16.gmra.mxu1 %v12843_v55  ;;  %4163 = vmatmul.bf16.gmra.mxu2 %v12845_v21  ;;  %v10173_v38 = vor.u32 %v11595_v2, %v10172_v8  ;;  %v10028_v36 = vld [vmem:[#allocation7 + $0x920] sm:$0xf]  ;;  %v11591_v61 = vld [vmem:[#allocation7 + $0xa2c] sm:$0xf0] }
 0x11f   : > { %v3870_v40 = vpop.f32.mrf.mxu3  ;;  %4232 = vmatpush.bf16.msra.mxu0 %v9933_v10  ;;  %4281 = vmatpush.bf16.msra.mxu1 %v10061_v17  ;;  %v10156_v46 = vld [vmem:[#allocation7 + $0xa20] sm:$0xf]  ;;  %v584_v17 = vld [vmem:[%s12496_s2 + $0x6a8] sm:$0xff]  ;;  %v569_v21 = vld [vmem:[%s12496_s2 + $0x630] sm:$0xff] }
 0x120   : > { %v3871_v20 = vadd.f32 %v3870_v40, %v12754_v45  ;;  %v11527_v40 = vld [vmem:[#allocation7 + $0x82c] sm:$0xf0]  ;;  %v583_v10 = vld [vmem:[%s12496_s2 + $0x6a0] sm:$0xff]  ;;  %v10157_v8 = vor.u32 %v11591_v61, %v10156_v46 }
 0x121   : > { %v3968_v60 = vpop.f32.mrf.mxu2  ;;  %v3901_v26 = vpop.f32.mrf.mxu0  ;;  %4330 = vmatpush.bf16.msra.mxu2 %v10189_v5  ;;  %v585_v32 = vld [vmem:[%s12496_s2 + $0x6b0] sm:$0xff]  ;;  %v9901_v37 = vor.u32 %v11527_v40, %v9900_v6  ;;  %v9884_v2 = vld [vmem:[#allocation7 + $0x800] sm:$0xf] }
 0x122   : > { %v3920_v53 = vadd.f32 %v3919_v35, %v3871_v20  ;;  %v12858_v33 = vadd.f32 %v3901_v26, %v3853_v11  ;;  %v11559_v11 = vld [vmem:[#allocation7 + $0x92c] sm:$0xf0]  ;;  %v567_v20 = vld [vmem:[%s12496_s2 + $0x620] sm:$0xff]  ;;  %v568_v26 = vld [vmem:[%s12496_s2 + $0x628] sm:$0xff]  ;;  %v12877_v6 = vpack.c.bf16 %v585_v32, %v569_v21 }
 0x123   : > { %v3921_v28 = vpop.f32.mrf.mxu1  ;;  %4233 = vmatpush.bf16.msra.mxu0 %v9917_v7  ;;  %4282 = vmatpush.bf16.msra.mxu1 %v10045_v58  ;;  %v10029_v55 = vor.u32 %v11559_v11, %v10028_v36  ;;  %v11523_v56 = vld [vmem:[#allocation7 + $0x80c] sm:$0xf0]  ;;  %v12873_v27 = vpack.c.bf16 %v583_v10, %v567_v20  ;;  %v12875_v58 = vpack.c.bf16 %v584_v17, %v568_v26  ;;  %v598_v10 = vld [vmem:[%s12496_s2 + $0x718] sm:$0xff]  ;;  %v599_v17 = vld [vmem:[%s12496_s2 + $0x720] sm:$0xff] }
 0x124   : > { %v12862_v35 = vadd.f32 %v3968_v60, %v3920_v53  ;;  %v10012_v60 = vld [vmem:[#allocation7 + $0x900] sm:$0xf]  ;;  %15287 = vst [vmem:[#allocation64_spill] sm:$0xff] %v12877_v6  ;;  %v614_v26 = vld [vmem:[%s12496_s2 + $0x798] sm:$0xff] }
 0x125   : > { %4331 = vmatpush.bf16.msra.mxu2 %v10173_v38  ;;  %15285 = vst [vmem:[#allocation62_spill] sm:$0xff] %v12873_v27  ;;  %v9885_v38 = vor.u32 %v11523_v56, %v9884_v2  ;;  %v10013_v13 = vor.u32 %v11555_v22, %v10012_v60  ;;  %v10380_v56 = vld [vmem:[#allocation7 + $0xbe0] sm:$0xf]  ;;  %v617_v2 = vld [vmem:[%s12496_s2 + $0x7b0] sm:$0xff] }
 0x126   : > { %15286 = vst [vmem:[#allocation63_spill] sm:$0xff] %v12875_v58  ;;  %v615_v32 = vld [vmem:[%s12496_s2 + $0x7a0] sm:$0xff] }
 0x127   : > { %v3872_v5 = vpop.f32.mrf.mxu3  ;;  %4234 = vmatpush.bf16.msra.mxu0 %v9901_v37  ;;  %4283 = vmatpush.bf16.msra.mxu1 %v10029_v55  ;;  %v600_v37 = vld [vmem:[%s12496_s2 + $0x728] sm:$0xff] }
 0x128   : > { %v3873_v53 = vadd.f32 %v3872_v5, %v12754_v45  ;;  %v616_v5 = vld [vmem:[%s12496_s2 + $0x7a8] sm:$0xff] }
 0x129   : > { %v3970_v9 = vpop.f32.mrf.mxu2  ;;  %v3943_v7 = vpop.f32.mrf.mxu0  ;;  %4332 = vmatpush.bf16.msra.mxu2 %v10157_v8  ;;  %v601_v8 = vld [vmem:[%s12496_s2 + $0x730] sm:$0xff] }
 0x12a   : > { %v3922_v40 = vadd.f32 %v3921_v28, %v3873_v53  ;;  %v12880_v11 = vadd.f32 %v3943_v7, %v12813_v63  ;;  %v11647_v63 = vld [vmem:[#allocation7 + $0xbec] sm:$0xf0] }
 0x12b   : > { %v3924_v36 = vpop.f32.mrf.mxu1  ;;  %4235 = vmatpush.bf16.msra.mxu0 %v9885_v38  ;;  %4284 = vmatpush.bf16.msra.mxu1 %v10013_v13  ;;  %v10381_v34 = vor.u32 %v11647_v63, %v10380_v56  ;;  %v12903_v38 = vpack.c.bf16 %v614_v26, %v598_v10  ;;  %v12909_v13 = vpack.c.bf16 %v617_v2, %v601_v8  ;;  %v379_v8 = vld [vmem:[%s12496_s2 + $0x40] sm:$0xff] }
 0x12c   : > { %v12882_v46 = vadd.f32 %v3970_v9, %v3922_v40  ;;  %4021 = vmatmul.bf16.gmra.mxu3 %v12871_v51  ;;  %4070 = vmatmul.bf16.gmra.mxu0 %v12873_v27  ;;  %v12905_v40 = vpack.c.bf16 %v615_v32, %v599_v17  ;;  %v395_v2 = vld [vmem:[%s12496_s2 + $0xc0] sm:$0xff] }
 0x12d   : > { %4333 = vmatpush.bf16.msra.mxu2 %v10141_v14  ;;  %4375 = vmatpush.bf16.msrb.mxu3 %v10381_v34  ;;  %15288 = vst [vmem:[#allocation65_spill] sm:$0xff] %v12903_v38  ;;  %v10460_v51 = vld [vmem:[#allocation7 + $0xc80] sm:$0xf] }
 0x12e   : > { %4119 = vmatmul.bf16.gmra.mxu1 %v12875_v58  ;;  %4168 = vmatmul.bf16.gmra.mxu2 %v12877_v6  ;;  %15289 = vst [vmem:[#allocation66_spill] sm:$0xff] %v12905_v40  ;;  %v557_v6 = vld [vmem:[%s12496_s2 + $0x5d0] sm:$0xff] }
 0x12f   : > { %v3875_v15 = vpop.f32.mrf.mxu3  ;;  %15291 = vst [vmem:[#allocation68_spill] sm:$0xff] %v12909_v13 }
 0x130   : > { %v3876_v22 = vadd.f32 %v3875_v15, %v12754_v45  ;;  %v10364_v15 = vld [vmem:[#allocation7 + $0xbc0] sm:$0xf] }
 0x131   : > { %v3973_v55 = vpop.f32.mrf.mxu2  ;;  %v3945_v9 = vpop.f32.mrf.mxu0 }
 0x132   : > { %v3925_v21 = vadd.f32 %v3924_v36, %v3876_v22  ;;  %v12890_v61 = vadd.f32 %v3945_v9, %v12824_v31  ;;  %v12907_v36 = vpack.c.bf16 %v616_v5, %v600_v37  ;;  %v11643_v22 = vld [vmem:[#allocation7 + $0xbcc] sm:$0xf0]  ;;  %v378_v37 = vld [vmem:[%s12496_s2 + $0x38] sm:$0xff] }
 0x133   : > { %v3926_v28 = vpop.f32.mrf.mxu1  ;;  %v394_v5 = vld [vmem:[%s12496_s2 + $0xb8] sm:$0xff] }
 0x134   : > { %v12892_v20 = vadd.f32 %v3973_v55, %v3925_v21  ;;  %15290 = vst [vmem:[#allocation67_spill] sm:$0xff] %v12907_v36  ;;  %v10365_v55 = vor.u32 %v11643_v22, %v10364_v15 }
 0x136   : > { %4376 = vmatpush.bf16.msrb.mxu3 %v10365_v55 }
 0x137   : > { %v3877_v60 = vpop.f32.mrf.mxu3 }
 0x138   : > { %v3878_v53 = vadd.f32 %v3877_v60, %v12754_v45  ;;  %v380_v60 = vld [vmem:[%s12496_s2 + $0x48] sm:$0xff] }
 0x139   : > { %v3975_v7 = vpop.f32.mrf.mxu2  ;;  %v3948_v31 = vpop.f32.mrf.mxu0 }
 0x13a   : > { %v3927_v14 = vadd.f32 %v3926_v28, %v3878_v53  ;;  %v12912_v63 = vadd.f32 %v3948_v31, %v12847_v0  ;;  %v396_v53 = vld [vmem:[%s12496_s2 + $0xc8] sm:$0xff]  ;;  %v397_v31 = vld [vmem:[%s12496_s2 + $0xd0] sm:$0xff] }
 0x13b   : > { %v3929_v56 = vpop.f32.mrf.mxu1  ;;  %v12939_v55 = vpack.c.bf16 %v396_v53, %v380_v60 }
 0x13c   : > { %v12914_v34 = vadd.f32 %v3975_v7, %v3927_v14  ;;  %4026 = vmatmul.bf16.gmra.mxu3 %v12903_v38  ;;  %4075 = vmatmul.bf16.gmra.mxu0 %v12905_v40  ;;  %v381_v7 = vld [vmem:[%s12496_s2 + $0x50] sm:$0xff]  ;;  %v10748_v40 = vld [vmem:[#allocation7 + $0xec0] sm:$0xf] }
 0x13d   : > { %15294 = vst [vmem:[#allocation71_spill] sm:$0xff] %v12939_v55  ;;  %v541_v38 = vld [vmem:[%s12496_s2 + $0x550] sm:$0xff] }
 0x13e   : > { %4124 = vmatmul.bf16.gmra.mxu1 %v12907_v36  ;;  %4173 = vmatmul.bf16.gmra.mxu2 %v12909_v13  ;;  %v429_v13 = vld [vmem:[%s12496_s2 + $0x1d0] sm:$0xff] }
 0x13f   : > { %v3880_v0 = vpop.f32.mrf.mxu3 }
 0x140   : > { %v3881_v9 = vadd.f32 %v3880_v0, %v12754_v45  ;;  %v12935_v0 = vpack.c.bf16 %v394_v5, %v378_v37  ;;  %v11639_v37 = vld [vmem:[#allocation7 + $0xbac] sm:$0xf0] }
 0x141   : > { %v3978_v21 = vpop.f32.mrf.mxu2  ;;  %v3950_v28 = vpop.f32.mrf.mxu0 }
 0x142   : > { %v3930_v10 = vadd.f32 %v3929_v56, %v3881_v9  ;;  %v12922_v17 = vadd.f32 %v3950_v28, %v12858_v33  ;;  %15292 = vst [vmem:[#allocation69_spill] sm:$0xff] %v12935_v0  ;;  %v12937_v56 = vpack.c.bf16 %v395_v2, %v379_v8  ;;  %v12941_v9 = vpack.c.bf16 %v397_v31, %v381_v7 }
 0x143   : > { %v3931_v26 = vpop.f32.mrf.mxu1 }
 0x144   : > { %v12924_v32 = vadd.f32 %v3978_v21, %v3930_v10  ;;  %15293 = vst [vmem:[#allocation70_spill] sm:$0xff] %v12937_v56 }
 0x145   : > { %15295 = vst [vmem:[#allocation72_spill] sm:$0xff] %v12941_v9 }
 0x147   : > { %v3882_v14 = vpop.f32.mrf.mxu3 }
 0x148   : > { %v3883_v15 = vadd.f32 %v3882_v14, %v12754_v45  ;;  %v10348_v45 = vld [vmem:[#allocation7 + $0xba0] sm:$0xf]  ;;  %v410_v14 = vld [vmem:[%s12496_s2 + $0x138] sm:$0xff] }
 0x149   : > { %v3980_v22 = vpop.f32.mrf.mxu2  ;;  %v4041_v33 = vpop.f32.mrf.mxu0  ;;  %v10349_v5 = vor.u32 %v11639_v37, %v10348_v45 }
 0x14a   : > { %v3932_v21 = vadd.f32 %v3931_v26, %v3883_v15  ;;  %v426_v15 = vld [vmem:[%s12496_s2 + $0x1b8] sm:$0xff] }
 0x14b   : > { %v4090_v28 = vpop.f32.mrf.mxu1  ;;  %4377 = vmatpush.bf16.msrb.mxu3 %v10349_v5 }
 0x14c   : > { %v12943_v10 = vadd.f32 %v3980_v22, %v3932_v21  ;;  %4187 = vmatmul.bf16.vlgmr.msra.gmra.mxu3 %v12935_v0  ;;  %4236 = vmatmul.bf16.vlgmr.msra.gmra.mxu0 %v12937_v56  ;;  %v411_v22 = vld [vmem:[%s12496_s2 + $0x140] sm:$0xff]  ;;  %v428_v56 = vld [vmem:[%s12496_s2 + $0x1c8] sm:$0xff]  ;;  %v413_v0 = vld [vmem:[%s12496_s2 + $0x150] sm:$0xff] }
 0x14d   : > { %v427_v21 = vld [vmem:[%s12496_s2 + $0x1c0] sm:$0xff] }
 0x14e   : > { %4285 = vmatmul.bf16.vlgmr.msra.gmra.mxu1 %v12939_v55  ;;  %4334 = vmatmul.bf16.vlgmr.msra.gmra.mxu2 %v12941_v9  ;;  %v412_v9 = vld [vmem:[%s12496_s2 + $0x148] sm:$0xff]  ;;  %v12963_v5 = vpack.c.bf16 %v427_v21, %v411_v22  ;;  %v442_v21 = vld [vmem:[%s12496_s2 + $0x238] sm:$0xff] }
 0x14f   : > { %v3992_v26 = vpop.f32.mrf.mxu3 }
 0x150   : > { %v3993_v8 = vadd.f32 %v3992_v26, %v12880_v11  ;;  %v12961_v26 = vpack.c.bf16 %v426_v15, %v410_v14  ;;  %15297 = vst [vmem:[#allocation74_spill] sm:$0xff] %v12963_v5 }
 0x151   : > { %v4139_v2 = vpop.f32.mrf.mxu2  ;;  %v4043_v60 = vpop.f32.mrf.mxu0 }
 0x152   : > { %v4042_v53 = vadd.f32 %v4041_v33, %v3993_v8  ;;  %15296 = vst [vmem:[#allocation73_spill] sm:$0xff] %v12961_v26  ;;  %v12967_v8 = vpack.c.bf16 %v429_v13, %v413_v0  ;;  %v10332_v13 = vld [vmem:[#allocation7 + $0xb80] sm:$0xf]  ;;  %v11635_v0 = vld [vmem:[#allocation7 + $0xb8c] sm:$0xf0] }
 0x153   : > { %v4092_v7 = vpop.f32.mrf.mxu1 }
 0x154   : > { %v4091_v31 = vadd.f32 %v4090_v28, %v4042_v53  ;;  %v12965_v28 = vpack.c.bf16 %v428_v56, %v412_v9  ;;  %15299 = vst [vmem:[#allocation76_spill] sm:$0xff] %v12967_v8  ;;  %v10333_v9 = vor.u32 %v11635_v0, %v10332_v13 }
 0x156   : > { %v12955_v55 = vadd.f32 %v4139_v2, %v4091_v31  ;;  %15298 = vst [vmem:[#allocation75_spill] sm:$0xff] %v12965_v28  ;;  %4378 = vmatpush.bf16.msrb.mxu3 %v10333_v9 }
 0x157   : > { %v3994_v45 = vpop.f32.mrf.mxu3 }
 0x158   : > { %v3995_v37 = vadd.f32 %v3994_v45, %v12890_v61  ;;  %v458_v45 = vld [vmem:[%s12496_s2 + $0x2b8] sm:$0xff] }
 0x159   : > { %v4141_v11 = vpop.f32.mrf.mxu2  ;;  %v4046_v33 = vpop.f32.mrf.mxu0 }
 0x15a   : > { %v4044_v53 = vadd.f32 %v4043_v60, %v3995_v37  ;;  %v443_v37 = vld [vmem:[%s12496_s2 + $0x240] sm:$0xff] }
 0x15b   : > { %v4095_v36 = vpop.f32.mrf.mxu1 }
 0x15c   : > { %v4093_v2 = vadd.f32 %v4092_v7, %v4044_v53  ;;  %4192 = vmatmul.bf16.gmra.mxu3 %v12961_v26  ;;  %4241 = vmatmul.bf16.gmra.mxu0 %v12963_v5  ;;  %v444_v53 = vld [vmem:[%s12496_s2 + $0x248] sm:$0xff]  ;;  %v461_v5 = vld [vmem:[%s12496_s2 + $0x2d0] sm:$0xff] }
 0x15e   : > { %4290 = vmatmul.bf16.gmra.mxu1 %v12965_v28  ;;  %4339 = vmatmul.bf16.gmra.mxu2 %v12967_v8  ;;  %v12973_v61 = vadd.f32 %v4141_v11, %v4093_v2  ;;  %v459_v11 = vld [vmem:[%s12496_s2 + $0x2c0] sm:$0xff]  ;;  %v460_v8 = vld [vmem:[%s12496_s2 + $0x2c8] sm:$0xff]  ;;  %v445_v28 = vld [vmem:[%s12496_s2 + $0x250] sm:$0xff] }
 0x15f   : > { %v3997_v56 = vpop.f32.mrf.mxu3  ;;  %v12989_v9 = vpack.c.bf16 %v459_v11, %v443_v37 }
 0x160   : > { %v3998_v60 = vadd.f32 %v3997_v56, %v12912_v63  ;;  %v12987_v56 = vpack.c.bf16 %v458_v45, %v442_v21 }
 0x161   : > { %v4144_v7 = vpop.f32.mrf.mxu2  ;;  %v4048_v31 = vpop.f32.mrf.mxu0  ;;  %15301 = vst [vmem:[#allocation78_spill] sm:$0xff] %v12989_v9 }
 0x162   : > { %v4047_v14 = vadd.f32 %v4046_v33, %v3998_v60  ;;  %15300 = vst [vmem:[#allocation77_spill] sm:$0xff] %v12987_v56  ;;  %v12993_v60 = vpack.c.bf16 %v461_v5, %v445_v28  ;;  %v10316_v5 = vld [vmem:[#allocation7 + $0xb60] sm:$0xf]  ;;  %v11631_v28 = vld [vmem:[#allocation7 + $0xb6c] sm:$0xf0] }
 0x163   : > { %v4097_v15 = vpop.f32.mrf.mxu1 }
 0x164   : > { %v4096_v22 = vadd.f32 %v4095_v36, %v4047_v14  ;;  %v12991_v36 = vpack.c.bf16 %v460_v8, %v444_v53  ;;  %15303 = vst [vmem:[#allocation80_spill] sm:$0xff] %v12993_v60  ;;  %v474_v53 = vld [vmem:[%s12496_s2 + $0x338] sm:$0xff] }
 0x166   : > { %v12981_v2 = vadd.f32 %v4144_v7, %v4096_v22  ;;  %15302 = vst [vmem:[#allocation79_spill] sm:$0xff] %v12991_v36 }
 0x167   : > { %v3999_v13 = vpop.f32.mrf.mxu3 }
 0x168   : > { %v4000_v0 = vadd.f32 %v3999_v13, %v12922_v17  ;;  %v490_v13 = vld [vmem:[%s12496_s2 + $0x3b8] sm:$0xff] }
 0x169   : > { %v4146_v63 = vpop.f32.mrf.mxu2  ;;  %v4051_v33 = vpop.f32.mrf.mxu0 }
 0x16a   : > { %v4049_v14 = vadd.f32 %v4048_v31, %v4000_v0  ;;  %v10317_v31 = vor.u32 %v11631_v28, %v10316_v5  ;;  %v475_v0 = vld [vmem:[%s12496_s2 + $0x340] sm:$0xff] }
 0x16b   : > { %v4100_v26 = vpop.f32.mrf.mxu1 }
 0x16c   : > { %v4098_v7 = vadd.f32 %v4097_v15, %v4049_v14  ;;  %4197 = vmatmul.bf16.gmra.mxu3 %v12987_v56  ;;  %4246 = vmatmul.bf16.gmra.mxu0 %v12989_v9  ;;  %v476_v14 = vld [vmem:[%s12496_s2 + $0x348] sm:$0xff]  ;;  %v493_v9 = vld [vmem:[%s12496_s2 + $0x3d0] sm:$0xff] }
 0x16d   : > { %4379 = vmatpush.bf16.msrb.mxu3 %v10317_v31 }
 0x16e   : > { %4295 = vmatmul.bf16.gmra.mxu1 %v12991_v36  ;;  %4344 = vmatmul.bf16.gmra.mxu2 %v12993_v60  ;;  %v12999_v17 = vadd.f32 %v4146_v63, %v4098_v7  ;;  %v491_v63 = vld [vmem:[%s12496_s2 + $0x3c0] sm:$0xff]  ;;  %v492_v60 = vld [vmem:[%s12496_s2 + $0x3c8] sm:$0xff]  ;;  %v477_v36 = vld [vmem:[%s12496_s2 + $0x350] sm:$0xff] }
 0x16f   : > { %v4002_v8 = vpop.f32.mrf.mxu3  ;;  %v13015_v31 = vpack.c.bf16 %v491_v63, %v475_v0 }
 0x170   : > { %v4003_v15 = vadd.f32 %v4002_v8, %v12763_v1  ;;  %v13013_v8 = vpack.c.bf16 %v490_v13, %v474_v53 }
 0x171   : > { %v4149_v22 = vpop.f32.mrf.mxu2  ;;  %v4053_v21 = vpop.f32.mrf.mxu0  ;;  %15305 = vst [vmem:[#allocation82_spill] sm:$0xff] %v13015_v31 }
 0x172   : > { %v4052_v45 = vadd.f32 %v4051_v33, %v4003_v15  ;;  %15304 = vst [vmem:[#allocation81_spill] sm:$0xff] %v13013_v8  ;;  %v13019_v15 = vpack.c.bf16 %v493_v9, %v477_v36  ;;  %v10300_v9 = vld [vmem:[#allocation7 + $0xb40] sm:$0xf]  ;;  %v11627_v36 = vld [vmem:[#allocation7 + $0xb4c] sm:$0xf0] }
 0x173   : > { %v4102_v37 = vpop.f32.mrf.mxu1 }
 0x174   : > { %v4101_v11 = vadd.f32 %v4100_v26, %v4052_v45  ;;  %v13017_v26 = vpack.c.bf16 %v492_v60, %v476_v14  ;;  %15307 = vst [vmem:[#allocation84_spill] sm:$0xff] %v13019_v15  ;;  %v506_v14 = vld [vmem:[%s12496_s2 + $0x438] sm:$0xff] }
 0x176   : > { %v13007_v7 = vadd.f32 %v4149_v22, %v4101_v11  ;;  %15306 = vst [vmem:[#allocation83_spill] sm:$0xff] %v13017_v26 }
 0x177   : > { %v4004_v5 = vpop.f32.mrf.mxu3 }
 0x178   : > { %v4005_v28 = vadd.f32 %v4004_v5, %v12784_v57  ;;  %v522_v5 = vld [vmem:[%s12496_s2 + $0x4b8] sm:$0xff] }
 0x179   : > { %v4151_v1 = vpop.f32.mrf.mxu2  ;;  %v4056_v33 = vpop.f32.mrf.mxu0 }
 0x17a   : > { %v4054_v45 = vadd.f32 %v4053_v21, %v4005_v28  ;;  %v10301_v21 = vor.u32 %v11627_v36, %v10300_v9  ;;  %v507_v28 = vld [vmem:[%s12496_s2 + $0x440] sm:$0xff] }
 0x17b   : > { %v4105_v56 = vpop.f32.mrf.mxu1 }
 0x17c   : > { %v4103_v22 = vadd.f32 %v4102_v37, %v4054_v45  ;;  %4202 = vmatmul.bf16.gmra.mxu3 %v13013_v8  ;;  %4251 = vmatmul.bf16.gmra.mxu0 %v13015_v31  ;;  %v508_v45 = vld [vmem:[%s12496_s2 + $0x448] sm:$0xff]  ;;  %v525_v31 = vld [vmem:[%s12496_s2 + $0x4d0] sm:$0xff] }
 0x17d   : > { %4380 = vmatpush.bf16.msrb.mxu3 %v10301_v21 }
 0x17e   : > { %4300 = vmatmul.bf16.gmra.mxu1 %v13017_v26  ;;  %4349 = vmatmul.bf16.gmra.mxu2 %v13019_v15  ;;  %v13025_v57 = vadd.f32 %v4151_v1, %v4103_v22  ;;  %v523_v1 = vld [vmem:[%s12496_s2 + $0x4c0] sm:$0xff]  ;;  %v524_v15 = vld [vmem:[%s12496_s2 + $0x4c8] sm:$0xff]  ;;  %v509_v26 = vld [vmem:[%s12496_s2 + $0x450] sm:$0xff] }
 0x17f   : > { %v4007_v60 = vpop.f32.mrf.mxu3  ;;  %v13041_v21 = vpack.c.bf16 %v523_v1, %v507_v28  ;;  %v10764_v1 = vld [vmem:[#allocation7 + $0xee0] sm:$0xf] }
 0x180   : > { %v4008_v37 = vadd.f32 %v4007_v60, %v12793_v12  ;;  %v13039_v60 = vpack.c.bf16 %v522_v5, %v506_v14  ;;  %v10636_v14 = vld [vmem:[#allocation7 + $0xde0] sm:$0xf]  ;;  %v11711_v5 = vld [vmem:[#allocation7 + $0xdec] sm:$0xf0] }
 0x181   : > { %v4154_v11 = vpop.f32.mrf.mxu2  ;;  %v4058_v53 = vpop.f32.mrf.mxu0  ;;  %15309 = vst [vmem:[#allocation86_spill] sm:$0xff] %v13041_v21 }
 0x182   : > { %v4057_v13 = vadd.f32 %v4056_v33, %v4008_v37  ;;  %15308 = vst [vmem:[#allocation85_spill] sm:$0xff] %v13039_v60  ;;  %v13045_v37 = vpack.c.bf16 %v525_v31, %v509_v26  ;;  %v11623_v31 = vld [vmem:[#allocation7 + $0xb2c] sm:$0xf0] }
 0x183   : > { %v4107_v0 = vpop.f32.mrf.mxu1 }
 0x184   : > { %v4106_v63 = vadd.f32 %v4105_v56, %v4057_v13  ;;  %v13043_v56 = vpack.c.bf16 %v524_v15, %v508_v45  ;;  %15311 = vst [vmem:[#allocation88_spill] sm:$0xff] %v13045_v37  ;;  %v10284_v15 = vld [vmem:[#allocation7 + $0xb20] sm:$0xf] }
 0x185   : > { %v10285_v45 = vor.u32 %v11623_v31, %v10284_v15  ;;  %v538_v31 = vld [vmem:[%s12496_s2 + $0x538] sm:$0xff] }
 0x186   : > { %v13033_v22 = vadd.f32 %v4154_v11, %v4106_v63  ;;  %15310 = vst [vmem:[#allocation87_spill] sm:$0xff] %v13043_v56  ;;  %v10508_v63 = vld [vmem:[#allocation7 + $0xce0] sm:$0xf] }
 0x187   : > { %v4009_v9 = vpop.f32.mrf.mxu3  ;;  %4381 = vmatpush.bf16.msrb.mxu3 %v10285_v45  ;;  %v11703_v45 = vld [vmem:[#allocation7 + $0xdac] sm:$0xf0] }
 0x188   : > { %v4010_v36 = vadd.f32 %v4009_v9, %v12815_v39  ;;  %v11679_v39 = vld [vmem:[#allocation7 + $0xcec] sm:$0xf0] }
 0x189   : > { %v4156_v12 = vpop.f32.mrf.mxu2  ;;  %v4061_v33 = vpop.f32.mrf.mxu0  ;;  %v10509_v26 = vor.u32 %v11679_v39, %v10508_v63  ;;  %v11743_v9 = vld [vmem:[#allocation7 + $0xeec] sm:$0xf0] }
 0x18a   : > { %v4059_v13 = vadd.f32 %v4058_v53, %v4010_v36  ;;  %v10637_v53 = vor.u32 %v11711_v5, %v10636_v14  ;;  %v10492_v36 = vld [vmem:[#allocation7 + $0xcc0] sm:$0xf]  ;;  %v11739_v14 = vld [vmem:[#allocation7 + $0xecc] sm:$0xf0] }
 0x18b   : > { %v4110_v8 = vpop.f32.mrf.mxu1  ;;  %4424 = vmatpush.bf16.msrb.mxu0 %v10509_v26  ;;  %v554_v26 = vld [vmem:[%s12496_s2 + $0x5b8] sm:$0xff] }
 0x18c   : > { %v4108_v11 = vadd.f32 %v4107_v0, %v4059_v13  ;;  %4207 = vmatmul.bf16.gmra.mxu3 %v13039_v60  ;;  %4256 = vmatmul.bf16.gmra.mxu0 %v13041_v21  ;;  %v11675_v13 = vld [vmem:[#allocation7 + $0xccc] sm:$0xf0] }
 0x18d   : > { %4473 = vmatpush.bf16.msrb.mxu1 %v10637_v53  ;;  %v11707_v60 = vld [vmem:[#allocation7 + $0xdcc] sm:$0xf0]  ;;  %v10476_v53 = vld [vmem:[#allocation7 + $0xca0] sm:$0xf] }
 0x18e   : > { %4305 = vmatmul.bf16.gmra.mxu1 %v13043_v56  ;;  %4354 = vmatmul.bf16.gmra.mxu2 %v13045_v37  ;;  %v13051_v28 = vadd.f32 %v4156_v12, %v4108_v11  ;;  %v10765_v37 = vor.u32 %v11743_v9, %v10764_v1  ;;  %v10493_v12 = vor.u32 %v11675_v13, %v10492_v36  ;;  %v10620_v11 = vld [vmem:[#allocation7 + $0xdc0] sm:$0xf]  ;;  %v11671_v1 = vld [vmem:[#allocation7 + $0xcac] sm:$0xf0] }
 0x18f   : > { %v4012_v0 = vpop.f32.mrf.mxu3  ;;  %v10621_v39 = vor.u32 %v11707_v60, %v10620_v11  ;;  %v10477_v60 = vor.u32 %v11671_v1, %v10476_v53  ;;  %v539_v36 = vld [vmem:[%s12496_s2 + $0x540] sm:$0xff]  ;;  %v13065_v53 = vpack.c.bf16 %v554_v26, %v538_v31 }
 0x190   : > { %v4013_v21 = vadd.f32 %v4012_v0, %v12828_v59  ;;  %4522 = vmatpush.bf16.msrb.mxu2 %v10765_v37  ;;  %v10749_v59 = vor.u32 %v11739_v14, %v10748_v40  ;;  %v10604_v0 = vld [vmem:[#allocation7 + $0xda0] sm:$0xf]  ;;  %4425 = vmatpush.bf16.msrb.mxu0 %v10493_v12  ;;  %v540_v37 = vld [vmem:[%s12496_s2 + $0x548] sm:$0xff] }
 0x191   : > { %v4159_v56 = vpop.f32.mrf.mxu2  ;;  %v4063_v63 = vpop.f32.mrf.mxu0  ;;  %4474 = vmatpush.bf16.msrb.mxu1 %v10621_v39  ;;  %v555_v13 = vld [vmem:[%s12496_s2 + $0x5c0] sm:$0xff]  ;;  %v10605_v11 = vor.u32 %v11703_v45, %v10604_v0  ;;  %v556_v14 = vld [vmem:[%s12496_s2 + $0x5c8] sm:$0xff]  ;;  %15312 = vst [vmem:[#allocation89_spill] sm:$0xff] %v13065_v53 }
 0x192   : > { %v4062_v5 = vadd.f32 %v4061_v33, %v4013_v21  ;;  %v10732_v21 = vld [vmem:[#allocation7 + $0xea0] sm:$0xf]  ;;  %v11735_v33 = vld [vmem:[#allocation7 + $0xeac] sm:$0xf0]  ;;  %v13067_v1 = vpack.c.bf16 %v555_v13, %v539_v36  ;;  %v13069_v18 = vpack.c.bf16 %v556_v14, %v540_v37 }
 0x193   : > { %v4112_v15 = vpop.f32.mrf.mxu1  ;;  %v10733_v58 = vor.u32 %v11735_v33, %v10732_v21  ;;  %v10588_v12 = vld [vmem:[#allocation7 + $0xd80] sm:$0xf]  ;;  %v11727_v14 = vld [vmem:[#allocation7 + $0xe6c] sm:$0xf0] }
 0x194   : > { %v4111_v9 = vadd.f32 %v4110_v8, %v4062_v5  ;;  %4523 = vmatpush.bf16.msrb.mxu2 %v10749_v59  ;;  %v11667_v8 = vld [vmem:[#allocation7 + $0xc8c] sm:$0xf0]  ;;  %15313 = vst [vmem:[#allocation90_spill] sm:$0xff] %v13067_v1  ;;  %4426 = vmatpush.bf16.msrb.mxu0 %v10477_v60  ;;  %v10716_v0 = vld [vmem:[#allocation7 + $0xe80] sm:$0xf]  ;;  %v13071_v59 = vpack.c.bf16 %v557_v6, %v541_v38 }
 0x195   : > { %4475 = vmatpush.bf16.msrb.mxu1 %v10605_v11  ;;  %15314 = vst [vmem:[#allocation91_spill] sm:$0xff] %v13069_v18  ;;  %v10461_v41 = vor.u32 %v11667_v8, %v10460_v51  ;;  %v10444_v26 = vld [vmem:[#allocation7 + $0xc60] sm:$0xf]  ;;  %v11663_v60 = vld [vmem:[#allocation7 + $0xc6c] sm:$0xf0] }
 0x196   : > { %v13059_v40 = vadd.f32 %v4159_v56, %v4111_v9  ;;  %v11699_v56 = vld [vmem:[#allocation7 + $0xd8c] sm:$0xf0]  ;;  %15315 = vst [vmem:[#allocation92_spill] sm:$0xff] %v13071_v59  ;;  %v10572_v36 = vld [vmem:[#allocation7 + $0xd60] sm:$0xf] }
 0x197   : > { %v4014_v27 = vpop.f32.mrf.mxu3  ;;  %v11731_v9 = vld [vmem:[#allocation7 + $0xe8c] sm:$0xf0]  ;;  %v10268_v51 = vld [vmem:[#allocation7 + $0xb00] sm:$0xf] }
 0x198   : > { %v4015_v39 = vadd.f32 %v4014_v27, %v12849_v44  ;;  %4524 = vmatpush.bf16.msrb.mxu2 %v10733_v58  ;;  %v10589_v27 = vor.u32 %v11699_v56, %v10588_v12  ;;  %v10717_v44 = vor.u32 %v11731_v9, %v10716_v0  ;;  %v11695_v6 = vld [vmem:[#allocation7 + $0xd6c] sm:$0xf0]  ;;  %4427 = vmatpush.bf16.msrb.mxu0 %v10461_v41  ;;  %v10700_v13 = vld [vmem:[#allocation7 + $0xe60] sm:$0xf] }
 0x199   : > { %v4161_v5 = vpop.f32.mrf.mxu2  ;;  %v4066_v45 = vpop.f32.mrf.mxu0  ;;  %v11619_v58 = vld [vmem:[#allocation7 + $0xb0c] sm:$0xf0]  ;;  %v10428_v8 = vld [vmem:[#allocation7 + $0xc40] sm:$0xf] }
 0x19a   : > { %v4064_v21 = vadd.f32 %v4063_v63, %v4015_v39  ;;  %4476 = vmatpush.bf16.msrb.mxu1 %v10589_v27  ;;  %v10445_v63 = vor.u32 %v11663_v60, %v10444_v26  ;;  %v10269_v11 = vor.u32 %v11619_v58, %v10268_v51  ;;  %v11659_v12 = vld [vmem:[#allocation7 + $0xc4c] sm:$0xf0]  ;;  %v10556_v0 = vld [vmem:[#allocation7 + $0xd40] sm:$0xf] }
 0x19b   : > { %v4115_v33 = vpop.f32.mrf.mxu1  ;;  %v11691_v41 = vld [vmem:[#allocation7 + $0xd4c] sm:$0xf0]  ;;  %v10684_v9 = vld [vmem:[#allocation7 + $0xe40] sm:$0xf] }
 0x19c   : > { %v4113_v31 = vadd.f32 %v4112_v15, %v4064_v21  ;;  %4212 = vmatmul.bf16.gmra.mxu3 %v13065_v53  ;;  %4261 = vmatmul.bf16.gmra.mxu0 %v13067_v1  ;;  %v10573_v15 = vor.u32 %v11695_v6, %v10572_v36  ;;  %v11723_v27 = vld [vmem:[#allocation7 + $0xe4c] sm:$0xf0]  ;;  %v10557_v60 = vor.u32 %v11691_v41, %v10556_v0  ;;  %v586_v36 = vld [vmem:[%s12496_s2 + $0x6b8] sm:$0xff]  ;;  %v10412_v51 = vld [vmem:[#allocation7 + $0xc20] sm:$0xf] }
 0x19d   : > { %4525 = vmatpush.bf16.msrb.mxu2 %v10717_v44  ;;  %4382 = vmatpush.bf16.msrb.mxu3 %v10269_v11  ;;  %v10429_v44 = vor.u32 %v11659_v12, %v10428_v8  ;;  %v10685_v6 = vor.u32 %v11723_v27, %v10684_v9  ;;  %v11655_v58 = vld [vmem:[#allocation7 + $0xc2c] sm:$0xf0]  ;;  %v10668_v11 = vld [vmem:[#allocation7 + $0xe20] sm:$0xf]  ;;  %v588_v8 = vld [vmem:[%s12496_s2 + $0x6c8] sm:$0xff] }
 0x19e   : > { %4310 = vmatmul.bf16.gmra.mxu1 %v13069_v18  ;;  %4359 = vmatmul.bf16.gmra.mxu2 %v13071_v59  ;;  %v13077_v38 = vadd.f32 %v4161_v5, %v4113_v31  ;;  %v10701_v5 = vor.u32 %v11727_v14, %v10700_v13  ;;  %v10540_v13 = vld [vmem:[#allocation7 + $0xd20] sm:$0xf]  ;;  %v11719_v14 = vld [vmem:[#allocation7 + $0xe2c] sm:$0xf0]  ;;  %v10413_v41 = vor.u32 %v11655_v58, %v10412_v51 }
 0x19f   : > { %v4017_v37 = vpop.f32.mrf.mxu3  ;;  %4428 = vmatpush.bf16.msrb.mxu0 %v10445_v63  ;;  %4477 = vmatpush.bf16.msrb.mxu1 %v10573_v15  ;;  %v571_v63 = vld [vmem:[%s12496_s2 + $0x640] sm:$0xff]  ;;  %v572_v15 = vld [vmem:[%s12496_s2 + $0x648] sm:$0xff]  ;;  %v573_v12 = vld [vmem:[%s12496_s2 + $0x650] sm:$0xff]  ;;  %v10669_v27 = vor.u32 %v11719_v14, %v10668_v11 }
 0x1a0   : > { %v4018_v39 = vadd.f32 %v4017_v37, %v12862_v35  ;;  %v570_v35 = vld [vmem:[%s12496_s2 + $0x638] sm:$0xff]  ;;  %v589_v0 = vld [vmem:[%s12496_s2 + $0x6d0] sm:$0xff]  ;;  %v10396_v18 = vld [vmem:[#allocation7 + $0xc00] sm:$0xf] }
 0x1a1   : > { %v4164_v56 = vpop.f32.mrf.mxu2  ;;  %v4068_v21 = vpop.f32.mrf.mxu0  ;;  %4526 = vmatpush.bf16.msrb.mxu2 %v10701_v5  ;;  %v13091_v43 = vpack.c.bf16 %v586_v36, %v570_v35  ;;  %v13097_v51 = vpack.c.bf16 %v589_v0, %v573_v12  ;;  %v619_v12 = vld [vmem:[%s12496_s2 + $0x7c0] sm:$0xff]  ;;  %v604_v0 = vld [vmem:[%s12496_s2 + $0x748] sm:$0xff] }
 0x1a2   : > { %v4067_v31 = vadd.f32 %v4066_v45, %v4018_v39  ;;  %v11687_v45 = vld [vmem:[#allocation7 + $0xd2c] sm:$0xf0]  ;;  %v587_v39 = vld [vmem:[%s12496_s2 + $0x6c0] sm:$0xff] }
 0x1a3   : > { %v4117_v26 = vpop.f32.mrf.mxu1  ;;  %4429 = vmatpush.bf16.msrb.mxu0 %v10429_v44  ;;  %4478 = vmatpush.bf16.msrb.mxu1 %v10557_v60  ;;  %v10541_v5 = vor.u32 %v11687_v45, %v10540_v13  ;;  %15316 = vst [vmem:[#allocation93_spill] sm:$0xff] %v13091_v43  ;;  %v13095_v60 = vpack.c.bf16 %v588_v8, %v572_v15  ;;  %v618_v15 = vld [vmem:[%s12496_s2 + $0x7b8] sm:$0xff]  ;;  %v603_v8 = vld [vmem:[%s12496_s2 + $0x740] sm:$0xff] }
 0x1a4   : > { %v4116_v37 = vadd.f32 %v4115_v33, %v4067_v31  ;;  %v11651_v33 = vld [vmem:[#allocation7 + $0xc0c] sm:$0xf0]  ;;  %v10524_v31 = vld [vmem:[#allocation7 + $0xd00] sm:$0xf]  ;;  %15319 = vst [vmem:[#allocation96_spill] sm:$0xff] %v13097_v51 }
 0x1a5   : > { %4527 = vmatpush.bf16.msrb.mxu2 %v10685_v6  ;;  %15318 = vst [vmem:[#allocation95_spill] sm:$0xff] %v13095_v60  ;;  %v10397_v13 = vor.u32 %v11651_v33, %v10396_v18  ;;  %v10892_v18 = vld [vmem:[#allocation7 + $0xfe0] sm:$0xf] }
 0x1a6   : > { %v13085_v59 = vadd.f32 %v4164_v56, %v4116_v37  ;;  %v13093_v56 = vpack.c.bf16 %v587_v39, %v571_v63  ;;  %v11683_v37 = vld [vmem:[#allocation7 + $0xd0c] sm:$0xf0]  ;;  %v602_v39 = vld [vmem:[%s12496_s2 + $0x738] sm:$0xff] }
 0x1a7   : > { %v4019_v9 = vpop.f32.mrf.mxu3  ;;  %4430 = vmatpush.bf16.msrb.mxu0 %v10413_v41  ;;  %4479 = vmatpush.bf16.msrb.mxu1 %v10541_v5  ;;  %v10525_v45 = vor.u32 %v11683_v37, %v10524_v31  ;;  %v620_v5 = vld [vmem:[%s12496_s2 + $0x7c8] sm:$0xff]  ;;  %v13117_v37 = vpack.c.bf16 %v618_v15, %v602_v39  ;;  %v382_v39 = vld [vmem:[%s12496_s2 + $0x58] sm:$0xff] }
 0x1a8   : > { %v4020_v1 = vadd.f32 %v4019_v9, %v12882_v46  ;;  %15317 = vst [vmem:[#allocation94_spill] sm:$0xff] %v13093_v56  ;;  %v10653_v46 = vor.u32 %v11715_v47, %v10652_v54  ;;  %v11775_v47 = vld [vmem:[#allocation7 + $0xfec] sm:$0xf0]  ;;  %v398_v15 = vld [vmem:[%s12496_s2 + $0xd8] sm:$0xff] }
 0x1a9   : > { %v4166_v53 = vpop.f32.mrf.mxu2  ;;  %v4071_v44 = vpop.f32.mrf.mxu0  ;;  %4528 = vmatpush.bf16.msrb.mxu2 %v10669_v27  ;;  %v605_v9 = vld [vmem:[%s12496_s2 + $0x750] sm:$0xff]  ;;  %15320 = vst [vmem:[#allocation97_spill] sm:$0xff] %v13117_v37 }
 0x1aa   : > { %v4069_v6 = vadd.f32 %v4068_v21, %v4020_v1  ;;  %v10893_v1 = vor.u32 %v11775_v47, %v10892_v18  ;;  %v621_v27 = vld [vmem:[%s12496_s2 + $0x7d0] sm:$0xff]  ;;  %v10876_v18 = vld [vmem:[#allocation7 + $0xfc0] sm:$0xf] }
 0x1ab   : > { %v4120_v58 = vpop.f32.mrf.mxu1  ;;  %4431 = vmatpush.bf16.msrb.mxu0 %v10397_v13  ;;  %4480 = vmatpush.bf16.msrb.mxu1 %v10525_v45  ;;  %v13123_v13 = vpack.c.bf16 %v621_v27, %v605_v9  ;;  %v11771_v47 = vld [vmem:[#allocation7 + $0xfcc] sm:$0xf0]  ;;  %v400_v9 = vld [vmem:[%s12496_s2 + $0xe8] sm:$0xff] }
 0x1ac   : > { %v4118_v35 = vadd.f32 %v4117_v26, %v4069_v6  ;;  %4217 = vmatmul.bf16.gmra.mxu3 %v13091_v43  ;;  %4266 = vmatmul.bf16.gmra.mxu0 %v13093_v56  ;;  %v13119_v6 = vpack.c.bf16 %v619_v12, %v603_v8  ;;  %v383_v8 = vld [vmem:[%s12496_s2 + $0x60] sm:$0xff]  ;;  %v385_v27 = vld [vmem:[%s12496_s2 + $0x70] sm:$0xff] }
 0x1ad   : > { %4529 = vmatpush.bf16.msrb.mxu2 %v10653_v46  ;;  %4571 = vmatpush.bf16.msra.mxu3 %v10893_v1  ;;  %15323 = vst [vmem:[#allocation100_spill] sm:$0xff] %v13123_v13  ;;  %v10877_v1 = vor.u32 %v11771_v47, %v10876_v18  ;;  %v399_v12 = vld [vmem:[%s12496_s2 + $0xe0] sm:$0xff]  ;;  %v9118_v43 = vld [vmem:[#allocation7 + $0x210] sm:$0xf0] }
 0x1ae   : > { %4315 = vmatmul.bf16.gmra.mxu1 %v13095_v60  ;;  %4364 = vmatmul.bf16.gmra.mxu2 %v13097_v51  ;;  %v13103_v36 = vadd.f32 %v4166_v53, %v4118_v35  ;;  %15321 = vst [vmem:[#allocation98_spill] sm:$0xff] %v13119_v6  ;;  %v11329_v56 = vld [vmem:[#allocation7 + $0x204] sm:$0xf] }
 0x1af   : > { %v4022_v54 = vpop.f32.mrf.mxu3 }
 0x1b0   : > { %v4023_v21 = vadd.f32 %v4022_v54, %v12892_v20 }
 0x1b1   : > { %v4169_v26 = vpop.f32.mrf.mxu2  ;;  %v4073_v11 = vpop.f32.mrf.mxu0  ;;  %4572 = vmatpush.bf16.msra.mxu3 %v10877_v1 }
 0x1b2   : > { %v4072_v53 = vadd.f32 %v4071_v44, %v4023_v21 }
 0x1b3   : > { %v4122_v14 = vpop.f32.mrf.mxu1 }
 0x1b4   : > { %v4121_v63 = vadd.f32 %v4120_v58, %v4072_v53  ;;  %v13121_v58 = vpack.c.bf16 %v620_v5, %v604_v0  ;;  %v384_v0 = vld [vmem:[%s12496_s2 + $0x68] sm:$0xff] }
 0x1b6   : > { %v13111_v41 = vadd.f32 %v4169_v26, %v4121_v63  ;;  %15322 = vst [vmem:[#allocation99_spill] sm:$0xff] %v13121_v58 }
 0x1b7   : > { %v4024_v33 = vpop.f32.mrf.mxu3 }
 0x1b8   : > { %v4025_v31 = vadd.f32 %v4024_v33, %v12914_v34  ;;  %v401_v33 = vld [vmem:[%s12496_s2 + $0xf0] sm:$0xff] }
 0x1b9   : > { %v4171_v20 = vpop.f32.mrf.mxu2  ;;  %v4076_v44 = vpop.f32.mrf.mxu0  ;;  %v13149_v18 = vpack.c.bf16 %v401_v33, %v385_v27  ;;  %v415_v27 = vld [vmem:[%s12496_s2 + $0x160] sm:$0xff] }
 0x1ba   : > { %v4074_v45 = vadd.f32 %v4073_v11, %v4025_v31  ;;  %v431_v33 = vld [vmem:[%s12496_s2 + $0x1e0] sm:$0xff] }
 0x1bb   : > { %v4125_v46 = vpop.f32.mrf.mxu1  ;;  %15327 = vst [vmem:[#allocation104_spill] sm:$0xff] %v13149_v18 }
 0x1bc   : > { %v4123_v35 = vadd.f32 %v4122_v14, %v4074_v45  ;;  %4222 = vmatmul.bf16.gmra.mxu3 %v13117_v37  ;;  %4271 = vmatmul.bf16.gmra.mxu0 %v13119_v6  ;;  %v13143_v45 = vpack.c.bf16 %v398_v15, %v382_v39  ;;  %v11281_v6 = vld [vmem:[#allocation7 + $0x84] sm:$0xf] }
 0x1be   : > { %4320 = vmatmul.bf16.gmra.mxu1 %v13121_v58  ;;  %4369 = vmatmul.bf16.gmra.mxu2 %v13123_v13  ;;  %v13129_v34 = vadd.f32 %v4171_v20, %v4123_v35  ;;  %15324 = vst [vmem:[#allocation101_spill] sm:$0xff] %v13143_v45  ;;  %v13145_v35 = vpack.c.bf16 %v399_v12, %v383_v8 }
 0x1bf   : > { %v4027_v54 = vpop.f32.mrf.mxu3 }
 0x1c0   : > { %v4028_v21 = vadd.f32 %v4027_v54, %v12924_v32  ;;  %15325 = vst [vmem:[#allocation102_spill] sm:$0xff] %v13145_v35 }
 0x1c1   : > { %v4174_v26 = vpop.f32.mrf.mxu2  ;;  %v4078_v11 = vpop.f32.mrf.mxu0 }
 0x1c2   : > { %v4077_v53 = vadd.f32 %v4076_v44, %v4028_v21  ;;  %v10860_v21 = vld [vmem:[#allocation7 + $0xfa0] sm:$0xf] }
 0x1c3   : > { %v4127_v14 = vpop.f32.mrf.mxu1 }
 0x1c4   : > { %v4126_v63 = vadd.f32 %v4125_v46, %v4077_v53  ;;  %v13147_v46 = vpack.c.bf16 %v400_v9, %v384_v0  ;;  %v414_v0 = vld [vmem:[%s12496_s2 + $0x158] sm:$0xff] }
 0x1c5   : > { %v430_v9 = vld [vmem:[%s12496_s2 + $0x1d8] sm:$0xff] }
 0x1c6   : > { %v13137_v5 = vadd.f32 %v4174_v26, %v4126_v63  ;;  %15326 = vst [vmem:[#allocation103_spill] sm:$0xff] %v13147_v46  ;;  %v11767_v26 = vld [vmem:[#allocation7 + $0xfac] sm:$0xf0] }
 0x1c7   : > { %v4029_v31 = vpop.f32.mrf.mxu3  ;;  %v10861_v53 = vor.u32 %v11767_v26, %v10860_v21 }
 0x1c8   : > { %v4030_v20 = vadd.f32 %v4029_v31, %v12943_v10  ;;  %v416_v31 = vld [vmem:[%s12496_s2 + $0x168] sm:$0xff] }
 0x1c9   : > { %v4176_v32 = vpop.f32.mrf.mxu2  ;;  %v4237_v44 = vpop.f32.mrf.mxu0  ;;  %4573 = vmatpush.bf16.msra.mxu3 %v10861_v53  ;;  %v13171_v53 = vpack.c.bf16 %v431_v33, %v415_v27 }
 0x1ca   : > { %v4079_v47 = vadd.f32 %v4078_v11, %v4030_v20 }
 0x1cb   : > { %v4286_v54 = vpop.f32.mrf.mxu1  ;;  %15329 = vst [vmem:[#allocation106_spill] sm:$0xff] %v13171_v53 }
 0x1cc   : > { %v4128_v1 = vadd.f32 %v4127_v14, %v4079_v47  ;;  %4383 = vmatmul.bf16.vlgmr.msrb.gmra.mxu3 %v13143_v45  ;;  %4432 = vmatmul.bf16.vlgmr.msrb.gmra.mxu0 %v13145_v35  ;;  %v417_v47 = vld [vmem:[%s12496_s2 + $0x170] sm:$0xff] }
 0x1cd   : > { %v545_v35 = vld [vmem:[%s12496_s2 + $0x570] sm:$0xff] }
 0x1ce   : > { %4481 = vmatmul.bf16.vlgmr.msrb.gmra.mxu1 %v13147_v46  ;;  %4530 = vmatmul.bf16.vlgmr.msrb.gmra.mxu2 %v13149_v18  ;;  %v13155_v10 = vadd.f32 %v4176_v32, %v4128_v1  ;;  %v432_v32 = vld [vmem:[%s12496_s2 + $0x1e8] sm:$0xff]  ;;  %v433_v1 = vld [vmem:[%s12496_s2 + $0x1f0] sm:$0xff]  ;;  %v11353_v46 = vld [vmem:[#allocation7 + $0x2c4] sm:$0xf] }
 0x1cf   : > { %v4188_v11 = vpop.f32.mrf.mxu3  ;;  %v561_v45 = vld [vmem:[%s12496_s2 + $0x5f0] sm:$0xff] }
 0x1d0   : > { %v4189_v14 = vadd.f32 %v4188_v11, %v12955_v55  ;;  %v13169_v11 = vpack.c.bf16 %v430_v9, %v414_v0  ;;  %v11763_v0 = vld [vmem:[#allocation7 + $0xf8c] sm:$0xf0] }
 0x1d1   : > { %v4335_v63 = vpop.f32.mrf.mxu2  ;;  %v4239_v39 = vpop.f32.mrf.mxu0 }
 0x1d2   : > { %v4238_v15 = vadd.f32 %v4237_v44, %v4189_v14  ;;  %15328 = vst [vmem:[#allocation105_spill] sm:$0xff] %v13169_v11  ;;  %v13175_v14 = vpack.c.bf16 %v433_v1, %v417_v47  ;;  %v446_v1 = vld [vmem:[%s12496_s2 + $0x258] sm:$0xff] }
 0x1d3   : > { %v4288_v8 = vpop.f32.mrf.mxu1 }
 0x1d4   : > { %v4287_v12 = vadd.f32 %v4286_v54, %v4238_v15  ;;  %v13173_v54 = vpack.c.bf16 %v432_v32, %v416_v31  ;;  %15331 = vst [vmem:[#allocation108_spill] sm:$0xff] %v13175_v14 }
 0x1d6   : > { %v13163_v20 = vadd.f32 %v4335_v63, %v4287_v12  ;;  %15330 = vst [vmem:[#allocation107_spill] sm:$0xff] %v13173_v54  ;;  %v10844_v12 = vld [vmem:[#allocation7 + $0xf80] sm:$0xf] }
 0x1d7   : > { %v4190_v21 = vpop.f32.mrf.mxu3 }
 0x1d8   : > { %v4191_v26 = vadd.f32 %v4190_v21, %v12973_v61  ;;  %v462_v21 = vld [vmem:[%s12496_s2 + $0x2d8] sm:$0xff] }
 0x1d9   : > { %v4337_v55 = vpop.f32.mrf.mxu2  ;;  %v4242_v44 = vpop.f32.mrf.mxu0 }
 0x1da   : > { %v4240_v15 = vadd.f32 %v4239_v39, %v4191_v26  ;;  %v447_v26 = vld [vmem:[%s12496_s2 + $0x260] sm:$0xff] }
 0x1db   : > { %v4291_v18 = vpop.f32.mrf.mxu1 }
 0x1dc   : > { %v4289_v63 = vadd.f32 %v4288_v8, %v4240_v15  ;;  %4388 = vmatmul.bf16.gmra.mxu3 %v13169_v11  ;;  %4437 = vmatmul.bf16.gmra.mxu0 %v13171_v53  ;;  %v10845_v8 = vor.u32 %v11763_v0, %v10844_v12  ;;  %v448_v15 = vld [vmem:[%s12496_s2 + $0x268] sm:$0xff]  ;;  %v465_v53 = vld [vmem:[%s12496_s2 + $0x2f0] sm:$0xff] }
 0x1de   : > { %4486 = vmatmul.bf16.gmra.mxu1 %v13173_v54  ;;  %4535 = vmatmul.bf16.gmra.mxu2 %v13175_v14  ;;  %v13181_v61 = vadd.f32 %v4337_v55, %v4289_v63  ;;  %v463_v55 = vld [vmem:[%s12496_s2 + $0x2e0] sm:$0xff]  ;;  %v464_v14 = vld [vmem:[%s12496_s2 + $0x2e8] sm:$0xff]  ;;  %v449_v54 = vld [vmem:[%s12496_s2 + $0x270] sm:$0xff] }
 0x1df   : > { %v4193_v39 = vpop.f32.mrf.mxu3  ;;  %4574 = vmatpush.bf16.msra.mxu3 %v10845_v8  ;;  %v13197_v8 = vpack.c.bf16 %v463_v55, %v447_v26 }
 0x1e0   : > { %v4194_v9 = vadd.f32 %v4193_v39, %v12981_v2  ;;  %v13195_v39 = vpack.c.bf16 %v462_v21, %v446_v1 }
 0x1e1   : > { %v4340_v27 = vpop.f32.mrf.mxu2  ;;  %v4244_v33 = vpop.f32.mrf.mxu0  ;;  %15333 = vst [vmem:[#allocation110_spill] sm:$0xff] %v13197_v8 }
 0x1e2   : > { %v4243_v31 = vadd.f32 %v4242_v44, %v4194_v9  ;;  %15332 = vst [vmem:[#allocation109_spill] sm:$0xff] %v13195_v39  ;;  %v13201_v9 = vpack.c.bf16 %v465_v53, %v449_v54  ;;  %v10828_v53 = vld [vmem:[#allocation7 + $0xf60] sm:$0xf]  ;;  %v11759_v54 = vld [vmem:[#allocation7 + $0xf6c] sm:$0xf0] }
 0x1e3   : > { %v4293_v32 = vpop.f32.mrf.mxu1 }
 0x1e4   : > { %v4292_v47 = vadd.f32 %v4291_v18, %v4243_v31  ;;  %v13199_v18 = vpack.c.bf16 %v464_v14, %v448_v15  ;;  %15335 = vst [vmem:[#allocation112_spill] sm:$0xff] %v13201_v9  ;;  %v478_v15 = vld [vmem:[%s12496_s2 + $0x358] sm:$0xff] }
 0x1e6   : > { %v13189_v63 = vadd.f32 %v4340_v27, %v4292_v47  ;;  %15334 = vst [vmem:[#allocation111_spill] sm:$0xff] %v13199_v18 }
 0x1e7   : > { %v4195_v12 = vpop.f32.mrf.mxu3 }
 0x1e8   : > { %v4196_v0 = vadd.f32 %v4195_v12, %v12999_v17  ;;  %v494_v12 = vld [vmem:[%s12496_s2 + $0x3d8] sm:$0xff] }
 0x1e9   : > { %v4342_v2 = vpop.f32.mrf.mxu2  ;;  %v4247_v44 = vpop.f32.mrf.mxu0 }
 0x1ea   : > { %v4245_v31 = vadd.f32 %v4244_v33, %v4196_v0  ;;  %v10829_v33 = vor.u32 %v11759_v54, %v10828_v53  ;;  %v479_v0 = vld [vmem:[%s12496_s2 + $0x360] sm:$0xff] }
 0x1eb   : > { %v4296_v11 = vpop.f32.mrf.mxu1 }
 0x1ec   : > { %v4294_v27 = vadd.f32 %v4293_v32, %v4245_v31  ;;  %4393 = vmatmul.bf16.gmra.mxu3 %v13195_v39  ;;  %4442 = vmatmul.bf16.gmra.mxu0 %v13197_v8  ;;  %v480_v31 = vld [vmem:[%s12496_s2 + $0x368] sm:$0xff]  ;;  %v497_v8 = vld [vmem:[%s12496_s2 + $0x3f0] sm:$0xff] }
 0x1ed   : > { %4575 = vmatpush.bf16.msra.mxu3 %v10829_v33 }
 0x1ee   : > { %4491 = vmatmul.bf16.gmra.mxu1 %v13199_v18  ;;  %4540 = vmatmul.bf16.gmra.mxu2 %v13201_v9  ;;  %v13207_v17 = vadd.f32 %v4342_v2, %v4294_v27  ;;  %v495_v2 = vld [vmem:[%s12496_s2 + $0x3e0] sm:$0xff]  ;;  %v496_v9 = vld [vmem:[%s12496_s2 + $0x3e8] sm:$0xff]  ;;  %v481_v18 = vld [vmem:[%s12496_s2 + $0x370] sm:$0xff] }
 0x1ef   : > { %v4198_v14 = vpop.f32.mrf.mxu3  ;;  %v13223_v33 = vpack.c.bf16 %v495_v2, %v479_v0 }
 0x1f0   : > { %v4199_v32 = vadd.f32 %v4198_v14, %v13007_v7  ;;  %v13221_v14 = vpack.c.bf16 %v494_v12, %v478_v15 }
 0x1f1   : > { %v4345_v47 = vpop.f32.mrf.mxu2  ;;  %v4249_v1 = vpop.f32.mrf.mxu0  ;;  %15337 = vst [vmem:[#allocation114_spill] sm:$0xff] %v13223_v33 }
 0x1f2   : > { %v4248_v21 = vadd.f32 %v4247_v44, %v4199_v32  ;;  %15336 = vst [vmem:[#allocation113_spill] sm:$0xff] %v13221_v14  ;;  %v13227_v32 = vpack.c.bf16 %v497_v8, %v481_v18  ;;  %v10812_v8 = vld [vmem:[#allocation7 + $0xf40] sm:$0xf]  ;;  %v11755_v18 = vld [vmem:[#allocation7 + $0xf4c] sm:$0xf0] }
 0x1f3   : > { %v4298_v26 = vpop.f32.mrf.mxu1 }
 0x1f4   : > { %v4297_v55 = vadd.f32 %v4296_v11, %v4248_v21  ;;  %v13225_v11 = vpack.c.bf16 %v496_v9, %v480_v31  ;;  %15339 = vst [vmem:[#allocation116_spill] sm:$0xff] %v13227_v32  ;;  %v510_v31 = vld [vmem:[%s12496_s2 + $0x458] sm:$0xff] }
 0x1f6   : > { %v13215_v27 = vadd.f32 %v4345_v47, %v4297_v55  ;;  %15338 = vst [vmem:[#allocation115_spill] sm:$0xff] %v13225_v11 }
 0x1f7   : > { %v4200_v53 = vpop.f32.mrf.mxu3 }
 0x1f8   : > { %v4201_v54 = vadd.f32 %v4200_v53, %v13025_v57  ;;  %v526_v53 = vld [vmem:[%s12496_s2 + $0x4d8] sm:$0xff] }
 0x1f9   : > { %v4347_v7 = vpop.f32.mrf.mxu2  ;;  %v4252_v44 = vpop.f32.mrf.mxu0 }
 0x1fa   : > { %v4250_v21 = vadd.f32 %v4249_v1, %v4201_v54  ;;  %v10813_v1 = vor.u32 %v11755_v18, %v10812_v8  ;;  %v511_v54 = vld [vmem:[%s12496_s2 + $0x460] sm:$0xff] }
 0x1fb   : > { %v4301_v39 = vpop.f32.mrf.mxu1 }
 0x1fc   : > { %v4299_v47 = vadd.f32 %v4298_v26, %v4250_v21  ;;  %4398 = vmatmul.bf16.gmra.mxu3 %v13221_v14  ;;  %4447 = vmatmul.bf16.gmra.mxu0 %v13223_v33  ;;  %v512_v21 = vld [vmem:[%s12496_s2 + $0x468] sm:$0xff]  ;;  %v529_v33 = vld [vmem:[%s12496_s2 + $0x4f0] sm:$0xff] }
 0x1fd   : > { %4576 = vmatpush.bf16.msra.mxu3 %v10813_v1 }
 0x1fe   : > { %4496 = vmatmul.bf16.gmra.mxu1 %v13225_v11  ;;  %4545 = vmatmul.bf16.gmra.mxu2 %v13227_v32  ;;  %v13233_v57 = vadd.f32 %v4347_v7, %v4299_v47  ;;  %v527_v7 = vld [vmem:[%s12496_s2 + $0x4e0] sm:$0xff]  ;;  %v528_v32 = vld [vmem:[%s12496_s2 + $0x4e8] sm:$0xff]  ;;  %v513_v11 = vld [vmem:[%s12496_s2 + $0x470] sm:$0xff] }
 0x1ff   : > { %v4203_v9 = vpop.f32.mrf.mxu3  ;;  %v13249_v1 = vpack.c.bf16 %v527_v7, %v511_v54  ;;  %v11357_v7 = vld [vmem:[#allocation7 + $0x2e4] sm:$0xf] }
 0x200   : > { %v4204_v26 = vadd.f32 %v4203_v9, %v13033_v22  ;;  %v13247_v9 = vpack.c.bf16 %v526_v53, %v510_v31  ;;  %v11325_v31 = vld [vmem:[#allocation7 + $0x1e4] sm:$0xf]  ;;  %v9102_v53 = vld [vmem:[#allocation7 + $0x1f0] sm:$0xf0] }
 0x201   : > { %v4350_v55 = vpop.f32.mrf.mxu2  ;;  %v4254_v15 = vpop.f32.mrf.mxu0  ;;  %15341 = vst [vmem:[#allocation118_spill] sm:$0xff] %v13249_v1 }
 0x202   : > { %v4253_v12 = vadd.f32 %v4252_v44, %v4204_v26  ;;  %15340 = vst [vmem:[#allocation117_spill] sm:$0xff] %v13247_v9  ;;  %v13253_v26 = vpack.c.bf16 %v529_v33, %v513_v11  ;;  %v11751_v33 = vld [vmem:[#allocation7 + $0xf2c] sm:$0xf0] }
 0x203   : > { %v4303_v0 = vpop.f32.mrf.mxu1 }
 0x204   : > { %v4302_v2 = vadd.f32 %v4301_v39, %v4253_v12  ;;  %v13251_v39 = vpack.c.bf16 %v528_v32, %v512_v21  ;;  %15343 = vst [vmem:[#allocation120_spill] sm:$0xff] %v13253_v26  ;;  %v10796_v32 = vld [vmem:[#allocation7 + $0xf20] sm:$0xf] }
 0x205   : > { %v10797_v21 = vor.u32 %v11751_v33, %v10796_v32  ;;  %v542_v33 = vld [vmem:[%s12496_s2 + $0x558] sm:$0xff] }
 0x206   : > { %v13241_v47 = vadd.f32 %v4350_v55, %v4302_v2  ;;  %15342 = vst [vmem:[#allocation119_spill] sm:$0xff] %v13251_v39  ;;  %v11293_v2 = vld [vmem:[#allocation7 + $0xe4] sm:$0xf] }
 0x207   : > { %v4205_v8 = vpop.f32.mrf.mxu3  ;;  %4577 = vmatpush.bf16.msra.mxu3 %v10797_v21  ;;  %v9070_v21 = vld [vmem:[#allocation7 + $0x1b0] sm:$0xf0] }
 0x208   : > { %v4206_v18 = vadd.f32 %v4205_v8, %v13051_v28  ;;  %v8974_v28 = vld [vmem:[#allocation7 + $0xf0] sm:$0xf0] }
 0x209   : > { %v4352_v22 = vpop.f32.mrf.mxu2  ;;  %v4257_v44 = vpop.f32.mrf.mxu0  ;;  %v8977_v11 = vor.u32 %v11293_v2, %v8974_v28  ;;  %v9230_v8 = vld [vmem:[#allocation7 + $0x2f0] sm:$0xf0] }
 0x20a   : > { %v4255_v12 = vadd.f32 %v4254_v15, %v4206_v18  ;;  %v9105_v15 = vor.u32 %v11325_v31, %v9102_v53  ;;  %v11289_v18 = vld [vmem:[#allocation7 + $0xc4] sm:$0xf]  ;;  %v9214_v31 = vld [vmem:[#allocation7 + $0x2d0] sm:$0xf0] }
 0x20b   : > { %v4306_v14 = vpop.f32.mrf.mxu1  ;;  %4620 = vmatpush.bf16.msra.mxu0 %v8977_v11  ;;  %v558_v11 = vld [vmem:[%s12496_s2 + $0x5d8] sm:$0xff] }
 0x20c   : > { %v4304_v55 = vadd.f32 %v4303_v0, %v4255_v12  ;;  %4403 = vmatmul.bf16.gmra.mxu3 %v13247_v9  ;;  %4452 = vmatmul.bf16.gmra.mxu0 %v13249_v1  ;;  %v8958_v12 = vld [vmem:[#allocation7 + $0xd0] sm:$0xf0] }
 0x20d   : > { %4669 = vmatpush.bf16.msra.mxu1 %v9105_v15  ;;  %v9086_v9 = vld [vmem:[#allocation7 + $0x1d0] sm:$0xf0]  ;;  %v11285_v15 = vld [vmem:[#allocation7 + $0xa4] sm:$0xf] }
 0x20e   : > { %4501 = vmatmul.bf16.gmra.mxu1 %v13251_v39  ;;  %4550 = vmatmul.bf16.gmra.mxu2 %v13253_v26  ;;  %v13259_v54 = vadd.f32 %v4352_v22, %v4304_v55  ;;  %v9233_v26 = vor.u32 %v11357_v7, %v9230_v8  ;;  %v8961_v22 = vor.u32 %v11289_v18, %v8958_v12  ;;  %v11321_v55 = vld [vmem:[#allocation7 + $0x1c4] sm:$0xf]  ;;  %v8942_v7 = vld [vmem:[#allocation7 + $0xb0] sm:$0xf0] }
 0x20f   : > { %v4208_v0 = vpop.f32.mrf.mxu3  ;;  %v9089_v28 = vor.u32 %v11321_v55, %v9086_v9  ;;  %v8945_v9 = vor.u32 %v11285_v15, %v8942_v7  ;;  %v543_v18 = vld [vmem:[%s12496_s2 + $0x560] sm:$0xff]  ;;  %v13273_v15 = vpack.c.bf16 %v558_v11, %v542_v33 }
 0x210   : > { %v4209_v1 = vadd.f32 %v4208_v0, %v13059_v40  ;;  %4718 = vmatpush.bf16.msra.mxu2 %v9233_v26  ;;  %v9217_v40 = vor.u32 %v11353_v46, %v9214_v31  ;;  %v11317_v0 = vld [vmem:[#allocation7 + $0x1a4] sm:$0xf]  ;;  %4621 = vmatpush.bf16.msra.mxu0 %v8961_v22  ;;  %v544_v26 = vld [vmem:[%s12496_s2 + $0x568] sm:$0xff] }
 0x211   : > { %v4355_v39 = vpop.f32.mrf.mxu2  ;;  %v4259_v2 = vpop.f32.mrf.mxu0  ;;  %4670 = vmatpush.bf16.msra.mxu1 %v9089_v28  ;;  %v559_v12 = vld [vmem:[%s12496_s2 + $0x5e0] sm:$0xff]  ;;  %v9073_v55 = vor.u32 %v11317_v0, %v9070_v21  ;;  %v560_v31 = vld [vmem:[%s12496_s2 + $0x5e8] sm:$0xff]  ;;  %15344 = vst [vmem:[#allocation121_spill] sm:$0xff] %v13273_v15 }
 0x212   : > { %v4258_v53 = vadd.f32 %v4257_v44, %v4209_v1  ;;  %v11349_v1 = vld [vmem:[#allocation7 + $0x2a4] sm:$0xf]  ;;  %v9198_v44 = vld [vmem:[#allocation7 + $0x2b0] sm:$0xf0]  ;;  %v13275_v7 = vpack.c.bf16 %v559_v12, %v543_v18  ;;  %v13277_v37 = vpack.c.bf16 %v560_v31, %v544_v26 }
 0x213   : > { %v4308_v32 = vpop.f32.mrf.mxu1  ;;  %v9201_v13 = vor.u32 %v11349_v1, %v9198_v44  ;;  %v11313_v22 = vld [vmem:[#allocation7 + $0x184] sm:$0xf]  ;;  %v9166_v31 = vld [vmem:[#allocation7 + $0x270] sm:$0xf0] }
 0x214   : > { %v4307_v8 = vadd.f32 %v4306_v14, %v4258_v53  ;;  %4719 = vmatpush.bf16.msra.mxu2 %v9217_v40  ;;  %v8926_v14 = vld [vmem:[#allocation7 + $0x90] sm:$0xf0]  ;;  %15345 = vst [vmem:[#allocation122_spill] sm:$0xff] %v13275_v7  ;;  %4622 = vmatpush.bf16.msra.mxu0 %v8945_v9  ;;  %v11345_v0 = vld [vmem:[#allocation7 + $0x284] sm:$0xf]  ;;  %v13279_v40 = vpack.c.bf16 %v561_v45, %v545_v35 }
 0x215   : > { %4671 = vmatpush.bf16.msra.mxu1 %v9073_v55  ;;  %15346 = vst [vmem:[#allocation123_spill] sm:$0xff] %v13277_v37  ;;  %v8929_v51 = vor.u32 %v11281_v6, %v8926_v14  ;;  %v11277_v11 = vld [vmem:[#allocation7 + $0x64] sm:$0xf]  ;;  %v8910_v9 = vld [vmem:[#allocation7 + $0x70] sm:$0xf0] }
 0x216   : > { %v13267_v46 = vadd.f32 %v4355_v39, %v4307_v8  ;;  %v9054_v39 = vld [vmem:[#allocation7 + $0x190] sm:$0xf0]  ;;  %15347 = vst [vmem:[#allocation124_spill] sm:$0xff] %v13279_v40  ;;  %v11309_v18 = vld [vmem:[#allocation7 + $0x164] sm:$0xf] }
 0x217   : > { %v4210_v58 = vpop.f32.mrf.mxu3  ;;  %v9182_v8 = vld [vmem:[#allocation7 + $0x290] sm:$0xf0]  ;;  %v10780_v6 = vld [vmem:[#allocation7 + $0xf00] sm:$0xf]  ;;  %v11341_v12 = vld [vmem:[#allocation7 + $0x264] sm:$0xf] }
 0x218   : > { %v4211_v28 = vadd.f32 %v4210_v58, %v13077_v38  ;;  %4720 = vmatpush.bf16.msra.mxu2 %v9201_v13  ;;  %v9057_v38 = vor.u32 %v11313_v22, %v9054_v39  ;;  %v9185_v58 = vor.u32 %v11345_v0, %v9182_v8  ;;  %v9038_v45 = vld [vmem:[#allocation7 + $0x170] sm:$0xf0]  ;;  %4623 = vmatpush.bf16.msra.mxu0 %v8929_v51  ;;  %v11747_v13 = vld [vmem:[#allocation7 + $0xf0c] sm:$0xf0]  ;;  %v11273_v14 = vld [vmem:[#allocation7 + $0x44] sm:$0xf] }
 0x219   : > { %v4357_v53 = vpop.f32.mrf.mxu2  ;;  %v4262_v21 = vpop.f32.mrf.mxu0  ;;  %v10781_v55 = vor.u32 %v11747_v13, %v10780_v6  ;;  %v8894_v22 = vld [vmem:[#allocation7 + $0x50] sm:$0xf0]  ;;  %v11305_v0 = vld [vmem:[#allocation7 + $0x144] sm:$0xf] }
 0x21a   : > { %v4260_v1 = vadd.f32 %v4259_v2, %v4211_v28  ;;  %4672 = vmatpush.bf16.msra.mxu1 %v9057_v38  ;;  %v8913_v2 = vor.u32 %v11277_v11, %v8910_v9  ;;  %v9022_v51 = vld [vmem:[#allocation7 + $0x150] sm:$0xf0]  ;;  %v11337_v8 = vld [vmem:[#allocation7 + $0x244] sm:$0xf] }
 0x21b   : > { %v4311_v44 = vpop.f32.mrf.mxu1  ;;  %4578 = vmatpush.bf16.msra.mxu3 %v10781_v55  ;;  %v9150_v38 = vld [vmem:[#allocation7 + $0x250] sm:$0xf0]  ;;  %v9025_v9 = vor.u32 %v11305_v0, %v9022_v51  ;;  %v11269_v6 = vld [vmem:[#allocation7 + $0x24] sm:$0xf] }
 0x21c   : > { %v4309_v33 = vadd.f32 %v4308_v32, %v4260_v1  ;;  %4408 = vmatmul.bf16.gmra.mxu3 %v13273_v15  ;;  %4457 = vmatmul.bf16.gmra.mxu0 %v13275_v7  ;;  %v9041_v32 = vor.u32 %v11309_v18, %v9038_v45  ;;  %v590_v18 = vld [vmem:[%s12496_s2 + $0x6d8] sm:$0xff]  ;;  %v9153_v45 = vor.u32 %v11337_v8, %v9150_v38  ;;  %v8878_v13 = vld [vmem:[#allocation7 + $0x30] sm:$0xf0]  ;;  %v11333_v55 = vld [vmem:[#allocation7 + $0x224] sm:$0xf] }
 0x21d   : > { %4721 = vmatpush.bf16.msra.mxu2 %v9185_v58  ;;  %4624 = vmatpush.bf16.msra.mxu0 %v8913_v2  ;;  %v8897_v58 = vor.u32 %v11273_v14, %v8894_v22  ;;  %v575_v2 = vld [vmem:[%s12496_s2 + $0x660] sm:$0xff]  ;;  %v592_v14 = vld [vmem:[%s12496_s2 + $0x6e8] sm:$0xff]  ;;  %v577_v22 = vld [vmem:[%s12496_s2 + $0x670] sm:$0xff]  ;;  %v8881_v51 = vor.u32 %v11269_v6, %v8878_v13 }
 0x21e   : > { %4506 = vmatmul.bf16.gmra.mxu1 %v13277_v37  ;;  %4555 = vmatmul.bf16.gmra.mxu2 %v13279_v40  ;;  %v13285_v35 = vadd.f32 %v4357_v53, %v4309_v33  ;;  %v9169_v53 = vor.u32 %v11341_v12, %v9166_v31  ;;  %v11301_v12 = vld [vmem:[#allocation7 + $0x124] sm:$0xf]  ;;  %v9134_v31 = vld [vmem:[#allocation7 + $0x230] sm:$0xf0] }
 0x21f   : > { %v4213_v26 = vpop.f32.mrf.mxu3  ;;  %4673 = vmatpush.bf16.msra.mxu1 %v9041_v32  ;;  %v576_v32 = vld [vmem:[%s12496_s2 + $0x668] sm:$0xff]  ;;  %v593_v0 = vld [vmem:[%s12496_s2 + $0x6f0] sm:$0xff]  ;;  %v9137_v38 = vor.u32 %v11333_v55, %v9134_v31  ;;  %v11265_v37 = vld [vmem:[#allocation7 + $0x4] sm:$0xf] }
 0x220   : > { %v4214_v28 = vadd.f32 %v4213_v26, %v13085_v59  ;;  %v574_v59 = vld [vmem:[%s12496_s2 + $0x658] sm:$0xff]  ;;  %v13305_v6 = vpack.c.bf16 %v593_v0, %v577_v22  ;;  %v623_v22 = vld [vmem:[%s12496_s2 + $0x7e0] sm:$0xff]  ;;  %v608_v0 = vld [vmem:[%s12496_s2 + $0x768] sm:$0xff] }
 0x221   : > { %v4360_v39 = vpop.f32.mrf.mxu2  ;;  %v4264_v1 = vpop.f32.mrf.mxu0  ;;  %4722 = vmatpush.bf16.msra.mxu2 %v9169_v53  ;;  %4625 = vmatpush.bf16.msra.mxu0 %v8897_v58  ;;  %v13299_v60 = vpack.c.bf16 %v590_v18, %v574_v59 }
 0x222   : > { %v4263_v33 = vadd.f32 %v4262_v21, %v4214_v28  ;;  %v9006_v21 = vld [vmem:[#allocation7 + $0x130] sm:$0xf0]  ;;  %v591_v28 = vld [vmem:[%s12496_s2 + $0x6e0] sm:$0xff] }
 0x223   : > { %v4313_v11 = vpop.f32.mrf.mxu1  ;;  %4674 = vmatpush.bf16.msra.mxu1 %v9025_v9  ;;  %v9009_v53 = vor.u32 %v11301_v12, %v9006_v21  ;;  %v13303_v9 = vpack.c.bf16 %v592_v14, %v576_v32  ;;  %v622_v32 = vld [vmem:[%s12496_s2 + $0x7d8] sm:$0xff]  ;;  %v607_v14 = vld [vmem:[%s12496_s2 + $0x760] sm:$0xff] }
 0x224   : > { %v4312_v26 = vadd.f32 %v4311_v44, %v4263_v33  ;;  %v8862_v44 = vld [vmem:[#allocation7 + $0x10] sm:$0xf0]  ;;  %v11297_v33 = vld [vmem:[#allocation7 + $0x104] sm:$0xf] }
 0x225   : > { %4723 = vmatpush.bf16.msra.mxu2 %v9153_v45  ;;  %4626 = vmatpush.bf16.msra.mxu0 %v8881_v51  ;;  %v8865_v12 = vor.u32 %v11265_v37, %v8862_v44  ;;  %v11389_v37 = vld [vmem:[#allocation7 + $0x3e4] sm:$0xf] }
 0x226   : > { %v13293_v40 = vadd.f32 %v4360_v39, %v4312_v26  ;;  %v13301_v39 = vpack.c.bf16 %v591_v28, %v575_v2  ;;  %v8990_v26 = vld [vmem:[#allocation7 + $0x110] sm:$0xf0]  ;;  %v606_v28 = vld [vmem:[%s12496_s2 + $0x758] sm:$0xff] }
 0x227   : > { %v4215_v8 = vpop.f32.mrf.mxu3  ;;  %4675 = vmatpush.bf16.msra.mxu1 %v9009_v53  ;;  %v8993_v21 = vor.u32 %v11297_v33, %v8990_v26  ;;  %v624_v53 = vld [vmem:[%s12496_s2 + $0x7e8] sm:$0xff]  ;;  %v13325_v26 = vpack.c.bf16 %v622_v32, %v606_v28  ;;  %v386_v28 = vld [vmem:[%s12496_s2 + $0x78] sm:$0xff] }
 0x228   : > { %v4216_v7 = vadd.f32 %v4215_v8, %v13103_v36  ;;  %v9121_v36 = vor.u32 %v11329_v56, %v9118_v43  ;;  %v9358_v43 = vld [vmem:[#allocation7 + $0x3f0] sm:$0xf0]  ;;  %v402_v32 = vld [vmem:[%s12496_s2 + $0xf8] sm:$0xff] }
 0x229   : > { %v4362_v15 = vpop.f32.mrf.mxu2  ;;  %v4267_v58 = vpop.f32.mrf.mxu0  ;;  %4724 = vmatpush.bf16.msra.mxu2 %v9137_v38  ;;  %4627 = vmatpush.bf16.msra.mxu0 %v8865_v12  ;;  %v609_v8 = vld [vmem:[%s12496_s2 + $0x770] sm:$0xff] }
 0x22a   : > { %v4265_v45 = vadd.f32 %v4264_v1, %v4216_v7  ;;  %v9361_v7 = vor.u32 %v11389_v37, %v9358_v43  ;;  %v625_v38 = vld [vmem:[%s12496_s2 + $0x7f0] sm:$0xff]  ;;  %v11385_v37 = vld [vmem:[#allocation7 + $0x3c4] sm:$0xf] }
 0x22b   : > { %v4316_v13 = vpop.f32.mrf.mxu1  ;;  %4676 = vmatpush.bf16.msra.mxu1 %v8993_v21  ;;  %v13331_v12 = vpack.c.bf16 %v625_v38, %v609_v8  ;;  %v9342_v43 = vld [vmem:[#allocation7 + $0x3d0] sm:$0xf0]  ;;  %v13345_v8 = vpack.c.bf16 %v402_v32, %v386_v28 }
 0x22c   : > { %v4314_v59 = vadd.f32 %v4313_v11, %v4265_v45  ;;  %4413 = vmatmul.bf16.gmra.mxu3 %v13299_v60  ;;  %4462 = vmatmul.bf16.gmra.mxu0 %v13301_v39  ;;  %v13327_v45 = vpack.c.bf16 %v623_v22, %v607_v14 }
 0x22d   : > { %4725 = vmatpush.bf16.msra.mxu2 %v9121_v36  ;;  %4767 = vmatpush.bf16.msrb.mxu3 %v9361_v7  ;;  %v9345_v7 = vor.u32 %v11385_v37, %v9342_v43 }
 0x22e   : > { %4511 = vmatmul.bf16.gmra.mxu1 %v13303_v9  ;;  %4560 = vmatmul.bf16.gmra.mxu2 %v13305_v6  ;;  %v13311_v18 = vadd.f32 %v4362_v15, %v4314_v59 }
 0x22f   : > { %v4218_v56 = vpop.f32.mrf.mxu3 }
 0x230   : > { %v4219_v1 = vadd.f32 %v4218_v56, %v13111_v41 }
 0x231   : > { %v4365_v11 = vpop.f32.mrf.mxu2  ;;  %v4269_v55 = vpop.f32.mrf.mxu0  ;;  %4768 = vmatpush.bf16.msrb.mxu3 %v9345_v7 }
 0x232   : > { %v4268_v15 = vadd.f32 %v4267_v58, %v4219_v1 }
 0x233   : > { %v4318_v31 = vpop.f32.mrf.mxu1 }
 0x234   : > { %v4317_v2 = vadd.f32 %v4316_v13, %v4268_v15  ;;  %v13329_v13 = vpack.c.bf16 %v624_v53, %v608_v0 }
 0x236   : > { %v13319_v51 = vadd.f32 %v4365_v11, %v4317_v2 }
 0x237   : > { %v4220_v44 = vpop.f32.mrf.mxu3 }
 0x238   : > { %v4221_v33 = vadd.f32 %v4220_v44, %v13129_v34 }
 0x239   : > { %v4367_v41 = vpop.f32.mrf.mxu2  ;;  %v4272_v58 = vpop.f32.mrf.mxu0 }
 0x23a   : > { %v4270_v21 = vadd.f32 %v4269_v55, %v4221_v33 }
 0x23b   : > { %v4321_v36 = vpop.f32.mrf.mxu1 }
 0x23c   : > { %v4319_v59 = vadd.f32 %v4318_v31, %v4270_v21  ;;  %4418 = vmatmul.bf16.gmra.mxu3 %v13325_v26  ;;  %4467 = vmatmul.bf16.gmra.mxu0 %v13327_v45 }
 0x23e   : > { %4516 = vmatmul.bf16.gmra.mxu1 %v13329_v13  ;;  %4565 = vmatmul.bf16.gmra.mxu2 %v13331_v12  ;;  %v13337_v34 = vadd.f32 %v4367_v41, %v4319_v59 }
 0x23f   : > { %v4223_v56 = vpop.f32.mrf.mxu3 }
 0x240   : > { %v4224_v1 = vadd.f32 %v4223_v56, %v13137_v5 }
 0x241   : > { %v4370_v11 = vpop.f32.mrf.mxu2  ;;  %v4274_v55 = vpop.f32.mrf.mxu0 }
 0x242   : > { %v4273_v15 = vadd.f32 %v4272_v58, %v4224_v1  ;;  %v9326_v58 = vld [vmem:[#allocation7 + $0x3b0] sm:$0xf0] }
 0x243   : > { %v4323_v31 = vpop.f32.mrf.mxu1 }
 0x244   : > { %v4322_v2 = vadd.f32 %v4321_v36, %v4273_v15 }
 0x246   : > { %v13342_v14 = vadd.f32 %v4370_v11, %v4322_v2  ;;  %v418_v11 = vld [vmem:[%s12496_s2 + $0x178] sm:$0xff] }
 0x247   : > { %v4225_v22 = vpop.f32.mrf.mxu3 }
 0x248   : > { %v4226_v0 = vadd.f32 %v4225_v22, %v13155_v10  ;;  %v11381_v10 = vld [vmem:[#allocation7 + $0x3a4] sm:$0xf] }
 0x249   : > { %v4372_v53 = vpop.f32.mrf.mxu2  ;;  %v4433_v38 = vpop.f32.mrf.mxu0  ;;  %v9329_v36 = vor.u32 %v11381_v10, %v9326_v58 }
 0x24a   : > { %v4275_v44 = vadd.f32 %v4274_v55, %v4226_v0  ;;  %v434_v55 = vld [vmem:[%s12496_s2 + $0x1f8] sm:$0xff] }
 0x24b   : > { %v4482_v33 = vpop.f32.mrf.mxu1  ;;  %4769 = vmatpush.bf16.msrb.mxu3 %v9329_v36  ;;  %v13359_v32 = vpack.c.bf16 %v434_v55, %v418_v11 }
 0x24c   : > { %v4324_v5 = vadd.f32 %v4323_v31, %v4275_v44  ;;  %4579 = vmatmul.bf16.vlgmr.msra.gmra.mxu3 %v13345_v8  ;;  %4628 = vmatmul.bf16.vlgmr.msra.gmra.mxu0 %v12568_v23  ;;  %v9310_v44 = vld [vmem:[#allocation7 + $0x390] sm:$0xf0] }
 0x24e   : > { %4677 = vmatmul.bf16.vlgmr.msra.gmra.mxu1 %v12620_v52  ;;  %4726 = vmatmul.bf16.vlgmr.msra.gmra.mxu2 %v12668_v42  ;;  %v13351_v41 = vadd.f32 %v4372_v53, %v4324_v5 }
 0x24f   : > { %v4384_v21 = vpop.f32.mrf.mxu3 }
 0x250   : > { %v4385_v59 = vadd.f32 %v4384_v21, %v13163_v20 }
 0x251   : > { %v4531_v37 = vpop.f32.mrf.mxu2  ;;  %v4435_v43 = vpop.f32.mrf.mxu0 }
 0x252   : > { %v4434_v56 = vadd.f32 %v4433_v38, %v4385_v59 }
 0x253   : > { %v4484_v7 = vpop.f32.mrf.mxu1 }
 0x254   : > { %v4483_v1 = vadd.f32 %v4482_v33, %v4434_v56  ;;  %v466_v56 = vld [vmem:[%s12496_s2 + $0x2f8] sm:$0xff] }
 0x256   : > { %v13356_v15 = vadd.f32 %v4531_v37, %v4483_v1 }
 0x257   : > { %v4386_v31 = vpop.f32.mrf.mxu3 }
 0x258   : > { %v4387_v2 = vadd.f32 %v4386_v31, %v13181_v61  ;;  %v11377_v61 = vld [vmem:[#allocation7 + $0x384] sm:$0xf] }
 0x259   : > { %v4533_v28 = vpop.f32.mrf.mxu2  ;;  %v4438_v22 = vpop.f32.mrf.mxu0  ;;  %v9313_v5 = vor.u32 %v11377_v61, %v9310_v44 }
 0x25a   : > { %v4436_v0 = vadd.f32 %v4435_v43, %v4387_v2  ;;  %v450_v43 = vld [vmem:[%s12496_s2 + $0x278] sm:$0xff] }
 0x25b   : > { %v4487_v53 = vpop.f32.mrf.mxu1  ;;  %4770 = vmatpush.bf16.msrb.mxu3 %v9313_v5  ;;  %v13373_v31 = vpack.c.bf16 %v466_v56, %v450_v43 }
 0x25c   : > { %v4485_v20 = vadd.f32 %v4484_v7, %v4436_v0  ;;  %4584 = vmatmul.bf16.gmra.mxu3 %v13359_v32  ;;  %4633 = vmatmul.bf16.gmra.mxu0 %v12594_v16 }
 0x25e   : > { %4682 = vmatmul.bf16.gmra.mxu1 %v12644_v48  ;;  %4731 = vmatmul.bf16.gmra.mxu2 %v12688_v19  ;;  %v13365_v38 = vadd.f32 %v4533_v28, %v4485_v20 }
 0x25f   : > { %v4389_v33 = vpop.f32.mrf.mxu3 }
 0x260   : > { %v4390_v10 = vadd.f32 %v4389_v33, %v13189_v63 }
 0x261   : > { %v4536_v58 = vpop.f32.mrf.mxu2  ;;  %v4440_v21 = vpop.f32.mrf.mxu0 }
 0x262   : > { %v4439_v36 = vadd.f32 %v4438_v22, %v4390_v10 }
 0x263   : > { %v4489_v59 = vpop.f32.mrf.mxu1 }
 0x264   : > { %v4488_v37 = vadd.f32 %v4487_v53, %v4439_v36  ;;  %v9294_v53 = vld [vmem:[#allocation7 + $0x370] sm:$0xf0]  ;;  %v482_v36 = vld [vmem:[%s12496_s2 + $0x378] sm:$0xff] }
 0x266   : > { %v13370_v7 = vadd.f32 %v4536_v58, %v4488_v37 }
 0x267   : > { %v4391_v1 = vpop.f32.mrf.mxu3 }
 0x268   : > { %v4392_v11 = vadd.f32 %v4391_v1, %v13207_v17  ;;  %v11373_v17 = vld [vmem:[#allocation7 + $0x364] sm:$0xf] }
 0x269   : > { %v4538_v55 = vpop.f32.mrf.mxu2  ;;  %v4443_v2 = vpop.f32.mrf.mxu0  ;;  %v9297_v61 = vor.u32 %v11373_v17, %v9294_v53 }
 0x26a   : > { %v4441_v28 = vadd.f32 %v4440_v21, %v4392_v11 }
 0x26b   : > { %v4492_v0 = vpop.f32.mrf.mxu1  ;;  %4771 = vmatpush.bf16.msrb.mxu3 %v9297_v61 }
 0x26c   : > { %v4490_v63 = vadd.f32 %v4489_v59, %v4441_v28  ;;  %4589 = vmatmul.bf16.gmra.mxu3 %v13373_v31  ;;  %4638 = vmatmul.bf16.gmra.mxu0 %v12570_v24  ;;  %v498_v59 = vld [vmem:[%s12496_s2 + $0x3f8] sm:$0xff] }
 0x26d   : > { %v13387_v11 = vpack.c.bf16 %v498_v59, %v482_v36 }
 0x26e   : > { %4687 = vmatmul.bf16.gmra.mxu1 %v12572_v29  ;;  %4736 = vmatmul.bf16.gmra.mxu2 %v12574_v30  ;;  %v13379_v22 = vadd.f32 %v4538_v55, %v4490_v63 }
 0x26f   : > { %v4394_v20 = vpop.f32.mrf.mxu3 }
 0x270   : > { %v4395_v44 = vadd.f32 %v4394_v20, %v13215_v27 }
 0x271   : > { %v4541_v33 = vpop.f32.mrf.mxu2  ;;  %v4445_v5 = vpop.f32.mrf.mxu0 }
 0x272   : > { %v4444_v10 = vadd.f32 %v4443_v2, %v4395_v44 }
 0x273   : > { %v4494_v58 = vpop.f32.mrf.mxu1 }
 0x274   : > { %v4493_v21 = vadd.f32 %v4492_v0, %v4444_v10  ;;  %v9278_v0 = vld [vmem:[#allocation7 + $0x350] sm:$0xf0] }
 0x276   : > { %v13384_v37 = vadd.f32 %v4541_v33, %v4493_v21  ;;  %v530_v21 = vld [vmem:[%s12496_s2 + $0x4f8] sm:$0xff] }
 0x277   : > { %v4396_v43 = vpop.f32.mrf.mxu3 }
 0x278   : > { %v4397_v56 = vadd.f32 %v4396_v43, %v13233_v57  ;;  %v11369_v57 = vld [vmem:[#allocation7 + $0x344] sm:$0xf] }
 0x279   : > { %v4543_v1 = vpop.f32.mrf.mxu2  ;;  %v4448_v55 = vpop.f32.mrf.mxu0  ;;  %v9281_v53 = vor.u32 %v11369_v57, %v9278_v0  ;;  %v9486_v0 = vld [vmem:[#allocation7 + $0x4f0] sm:$0xf0] }
 0x27a   : > { %v4446_v28 = vadd.f32 %v4445_v5, %v4397_v56 }
 0x27b   : > { %v4497_v63 = vpop.f32.mrf.mxu1  ;;  %4772 = vmatpush.bf16.msrb.mxu3 %v9281_v53 }
 0x27c   : > { %v4495_v27 = vadd.f32 %v4494_v58, %v4446_v28  ;;  %4594 = vmatmul.bf16.gmra.mxu3 %v13387_v11  ;;  %4643 = vmatmul.bf16.gmra.mxu0 %v12596_v49  ;;  %v514_v58 = vld [vmem:[%s12496_s2 + $0x478] sm:$0xff] }
 0x27e   : > { %4692 = vmatmul.bf16.gmra.mxu1 %v12598_v50  ;;  %4741 = vmatmul.bf16.gmra.mxu2 %v12600_v25  ;;  %v13393_v2 = vadd.f32 %v4543_v1, %v4495_v27  ;;  %v13401_v1 = vpack.c.bf16 %v530_v21, %v514_v58  ;;  %v9262_v58 = vld [vmem:[#allocation7 + $0x330] sm:$0xf0] }
 0x27f   : > { %v4399_v17 = vpop.f32.mrf.mxu3 }
 0x280   : > { %v4400_v20 = vadd.f32 %v4399_v17, %v13241_v47  ;;  %15348 = vst [vmem:[#allocation125_spill] sm:$0xff] %v13401_v1  ;;  %v11421_v47 = vld [vmem:[#allocation7 + $0x4e4] sm:$0xf] }
 0x281   : > { %v4546_v61 = vpop.f32.mrf.mxu2  ;;  %v4450_v44 = vpop.f32.mrf.mxu0  ;;  %v11453_v17 = vld [vmem:[#allocation7 + $0x5e4] sm:$0xf] }
 0x282   : > { %v4449_v33 = vadd.f32 %v4448_v55, %v4400_v20  ;;  %v9489_v55 = vor.u32 %v11421_v47, %v9486_v0  ;;  %v11485_v20 = vld [vmem:[#allocation7 + $0x6e4] sm:$0xf] }
 0x283   : > { %v4499_v5 = vpop.f32.mrf.mxu1 }
 0x284   : > { %v4498_v10 = vadd.f32 %v4497_v63, %v4449_v33  ;;  %v9614_v63 = vld [vmem:[#allocation7 + $0x5f0] sm:$0xf0]  ;;  %4816 = vmatpush.bf16.msrb.mxu0 %v9489_v55 }
 0x286   : > { %v13398_v36 = vadd.f32 %v4546_v61, %v4498_v10  ;;  %v9742_v61 = vld [vmem:[#allocation7 + $0x6f0] sm:$0xf0]  ;;  %v11365_v10 = vld [vmem:[#allocation7 + $0x324] sm:$0xf] }
 0x287   : > { %v4401_v59 = vpop.f32.mrf.mxu3  ;;  %v9745_v33 = vor.u32 %v11485_v20, %v9742_v61  ;;  %v9265_v21 = vor.u32 %v11365_v10, %v9262_v58  ;;  %v11413_v61 = vld [vmem:[#allocation7 + $0x4a4] sm:$0xf]  ;;  %v9582_v58 = vld [vmem:[#allocation7 + $0x5b0] sm:$0xf0] }
 0x288   : > { %v4402_v43 = vadd.f32 %v4401_v59, %v13259_v54  ;;  %v9617_v54 = vor.u32 %v11453_v17, %v9614_v63  ;;  %v11417_v59 = vld [vmem:[#allocation7 + $0x4c4] sm:$0xf]  ;;  %v9726_v17 = vld [vmem:[#allocation7 + $0x6d0] sm:$0xf0] }
 0x289   : > { %v4548_v56 = vpop.f32.mrf.mxu2  ;;  %v4453_v28 = vpop.f32.mrf.mxu0  ;;  %4914 = vmatpush.bf16.msrb.mxu2 %v9745_v33  ;;  %4773 = vmatpush.bf16.msrb.mxu3 %v9265_v21  ;;  %v11445_v33 = vld [vmem:[#allocation7 + $0x5a4] sm:$0xf] }
 0x28a   : > { %v4451_v27 = vadd.f32 %v4450_v44, %v4402_v43  ;;  %4865 = vmatpush.bf16.msrb.mxu1 %v9617_v54  ;;  %v9470_v43 = vld [vmem:[#allocation7 + $0x4d0] sm:$0xf0]  ;;  %v9585_v21 = vor.u32 %v11445_v33, %v9582_v58 }
 0x28b   : > { %v4502_v57 = vpop.f32.mrf.mxu1  ;;  %v9454_v54 = vld [vmem:[#allocation7 + $0x4b0] sm:$0xf0] }
 0x28c   : > { %v4500_v53 = vadd.f32 %v4499_v5, %v4451_v27  ;;  %4599 = vmatmul.bf16.gmra.mxu3 %v13401_v1  ;;  %4648 = vmatmul.bf16.gmra.mxu0 %v12618_v3  ;;  %v11449_v27 = vld [vmem:[#allocation7 + $0x5c4] sm:$0xf]  ;;  %v9598_v3 = vld [vmem:[#allocation7 + $0x5d0] sm:$0xf0]  ;;  %v9457_v10 = vor.u32 %v11413_v61, %v9454_v54  ;;  %v562_v1 = vld [vmem:[%s12496_s2 + $0x5f8] sm:$0xff] }
 0x28d   : > { %v9694_v61 = vld [vmem:[#allocation7 + $0x690] sm:$0xf0] }
 0x28e   : > { %4697 = vmatmul.bf16.gmra.mxu1 %v12623_v4  ;;  %4746 = vmatmul.bf16.gmra.mxu2 %v12625_v62  ;;  %v13407_v44 = vadd.f32 %v4548_v56, %v4500_v53  ;;  %v9473_v4 = vor.u32 %v11417_v59, %v9470_v43  ;;  %v11481_v62 = vld [vmem:[#allocation7 + $0x6c4] sm:$0xf]  ;;  %v9601_v56 = vor.u32 %v11449_v27, %v9598_v3  ;;  %v9710_v59 = vld [vmem:[#allocation7 + $0x6b0] sm:$0xf0]  ;;  %v546_v43 = vld [vmem:[%s12496_s2 + $0x578] sm:$0xff] }
 0x28f   : > { %v4404_v5 = vpop.f32.mrf.mxu3  ;;  %v9729_v53 = vor.u32 %v11481_v62, %v9726_v17  ;;  %v11441_v27 = vld [vmem:[#allocation7 + $0x584] sm:$0xf]  ;;  %v13415_v17 = vpack.c.bf16 %v562_v1, %v546_v43  ;;  %v9422_v58 = vld [vmem:[#allocation7 + $0x470] sm:$0xf0] }
 0x290   : > { %v4405_v47 = vadd.f32 %v4404_v5, %v13267_v46  ;;  %4817 = vmatpush.bf16.msrb.mxu0 %v9473_v4  ;;  %4866 = vmatpush.bf16.msrb.mxu1 %v9601_v56  ;;  %v11477_v5 = vld [vmem:[#allocation7 + $0x6a4] sm:$0xf]  ;;  %v9550_v43 = vld [vmem:[#allocation7 + $0x570] sm:$0xf0] }
 0x291   : > { %v4551_v0 = vpop.f32.mrf.mxu2  ;;  %v4455_v63 = vpop.f32.mrf.mxu0  ;;  %4915 = vmatpush.bf16.msrb.mxu2 %v9729_v53  ;;  %v9713_v25 = vor.u32 %v11477_v5, %v9710_v59  ;;  %v11409_v4 = vld [vmem:[#allocation7 + $0x484] sm:$0xf]  ;;  %15349 = vst [vmem:[#allocation126_spill] sm:$0xff] %v13415_v17  ;;  %v9566_v53 = vld [vmem:[#allocation7 + $0x590] sm:$0xf0] }
 0x292   : > { %v4454_v55 = vadd.f32 %v4453_v28, %v4405_v47  ;;  %v9438_v28 = vld [vmem:[#allocation7 + $0x490] sm:$0xf0]  ;;  %v9569_v33 = vor.u32 %v11441_v27, %v9566_v53  ;;  %v11437_v5 = vld [vmem:[#allocation7 + $0x564] sm:$0xf] }
 0x293   : > { %v4504_v20 = vpop.f32.mrf.mxu1  ;;  %v9441_v56 = vor.u32 %v11409_v4, %v9438_v28  ;;  %v15351_v4 = vld [vmem:[#allocation29_spill] sm:$0xff]  ;;  %v15352_v28 = vld [vmem:[#allocation30_spill] sm:$0xff]  ;;  %v9246_v53 = vld [vmem:[#allocation7 + $0x310] sm:$0xf0] }
 0x294   : > { %v4503_v46 = vadd.f32 %v4502_v57, %v4454_v55  ;;  %4818 = vmatpush.bf16.msrb.mxu0 %v9457_v10  ;;  %4867 = vmatpush.bf16.msrb.mxu1 %v9585_v21  ;;  %v11473_v55 = vld [vmem:[#allocation7 + $0x684] sm:$0xf] }
 0x295   : > { %4916 = vmatpush.bf16.msrb.mxu2 %v9713_v25  ;;  %v11405_v25 = vld [vmem:[#allocation7 + $0x464] sm:$0xf] }
 0x296   : > { %v13412_v3 = vadd.f32 %v4551_v0, %v4503_v46  ;;  %v9697_v0 = vor.u32 %v11473_v55, %v9694_v61  ;;  %v9425_v1 = vor.u32 %v11405_v25, %v9422_v58  ;;  %v11469_v21 = vld [vmem:[#allocation7 + $0x664] sm:$0xf] }
 0x297   : > { %v4406_v62 = vpop.f32.mrf.mxu3  ;;  %v11401_v61 = vld [vmem:[#allocation7 + $0x444] sm:$0xf] }
 0x298   : > { %v4407_v47 = vadd.f32 %v4406_v62, %v13285_v35  ;;  %4819 = vmatpush.bf16.msrb.mxu0 %v9441_v56  ;;  %4868 = vmatpush.bf16.msrb.mxu1 %v9569_v33  ;;  %v15350_v35 = vld [vmem:[#allocation28_spill] sm:$0xff]  ;;  %v9678_v62 = vld [vmem:[#allocation7 + $0x670] sm:$0xf0]  ;;  %v11361_v56 = vld [vmem:[#allocation7 + $0x304] sm:$0xf] }
 0x299   : > { %v4553_v57 = vpop.f32.mrf.mxu2  ;;  %v4458_v54 = vpop.f32.mrf.mxu0  ;;  %4917 = vmatpush.bf16.msrb.mxu2 %v9697_v0  ;;  %v9681_v27 = vor.u32 %v11469_v21, %v9678_v62  ;;  %v9249_v55 = vor.u32 %v11361_v56, %v9246_v53  ;;  %v9406_v33 = vld [vmem:[#allocation7 + $0x450] sm:$0xf0]  ;;  %v11433_v0 = vld [vmem:[#allocation7 + $0x544] sm:$0xf] }
 0x29a   : > { %v4456_v46 = vadd.f32 %v4455_v63, %v4407_v47  ;;  %v9553_v63 = vor.u32 %v11437_v5, %v9550_v43  ;;  %v9409_v58 = vor.u32 %v11401_v61, %v9406_v33  ;;  %v9662_v5 = vld [vmem:[#allocation7 + $0x650] sm:$0xf0]  ;;  %v11397_v62 = vld [vmem:[#allocation7 + $0x424] sm:$0xf]  ;;  %v578_v33 = vld [vmem:[%s12496_s2 + $0x678] sm:$0xff] }
 0x29b   : > { %v4507_v10 = vpop.f32.mrf.mxu1  ;;  %4774 = vmatpush.bf16.msrb.mxu3 %v9249_v55  ;;  %v9518_v53 = vld [vmem:[#allocation7 + $0x530] sm:$0xf0] }
 0x29c   : > { %v4505_v59 = vadd.f32 %v4504_v20, %v4456_v46  ;;  %4604 = vmatmul.bf16.gmra.mxu3 %v13415_v17  ;;  %4653 = vmatmul.bf16.gmra.mxu0 %v15350_v35  ;;  %v9646_v61 = vld [vmem:[#allocation7 + $0x630] sm:$0xf0]  ;;  %v594_v35 = vld [vmem:[%s12496_s2 + $0x6f8] sm:$0xff] }
 0x29d   : > { %4820 = vmatpush.bf16.msrb.mxu0 %v9425_v1  ;;  %4869 = vmatpush.bf16.msrb.mxu1 %v9553_v63  ;;  %v9390_v63 = vld [vmem:[#allocation7 + $0x430] sm:$0xf0] }
 0x29e   : > { %4702 = vmatmul.bf16.gmra.mxu1 %v15351_v4  ;;  %4751 = vmatmul.bf16.gmra.mxu2 %v15352_v28  ;;  %v13421_v47 = vadd.f32 %v4553_v57, %v4505_v59  ;;  %v9534_v4 = vld [vmem:[#allocation7 + $0x550] sm:$0xf0]  ;;  %v11465_v28 = vld [vmem:[#allocation7 + $0x644] sm:$0xf]  ;;  %v9393_v56 = vor.u32 %v11397_v62, %v9390_v63 }
 0x29f   : > { %v4409_v20 = vpop.f32.mrf.mxu3  ;;  %4918 = vmatpush.bf16.msrb.mxu2 %v9681_v27  ;;  %v9537_v57 = vor.u32 %v11433_v0, %v9534_v4  ;;  %v9665_v59 = vor.u32 %v11465_v28, %v9662_v5  ;;  %v11429_v27 = vld [vmem:[#allocation7 + $0x524] sm:$0xf]  ;;  %v9374_v0 = vld [vmem:[#allocation7 + $0x410] sm:$0xf0]  ;;  %v13429_v5 = vpack.c.bf16 %v594_v35, %v578_v33 }
 0x2a0   : > { %v4410_v46 = vadd.f32 %v4409_v20, %v13293_v40  ;;  %v11461_v20 = vld [vmem:[#allocation7 + $0x624] sm:$0xf]  ;;  %v9521_v55 = vor.u32 %v11429_v27, %v9518_v53  ;;  %v9630_v62 = vld [vmem:[#allocation7 + $0x610] sm:$0xf0] }
 0x2a1   : > { %v4556_v25 = vpop.f32.mrf.mxu2  ;;  %v4460_v43 = vpop.f32.mrf.mxu0  ;;  %4821 = vmatpush.bf16.msrb.mxu0 %v9409_v58  ;;  %4870 = vmatpush.bf16.msrb.mxu1 %v9537_v57  ;;  %v9649_v17 = vor.u32 %v11461_v20, %v9646_v61  ;;  %v11393_v28 = vld [vmem:[#allocation7 + $0x404] sm:$0xf]  ;;  %15353 = vst [vmem:[#allocation127_spill] sm:$0xff] %v13429_v5  ;;  %v15354_v53 = vld [vmem:[#allocation31_spill] sm:$0xff] }
 0x2a2   : > { %v4459_v1 = vadd.f32 %v4458_v54, %v4410_v46  ;;  %v11425_v46 = vld [vmem:[#allocation7 + $0x504] sm:$0xf]  ;;  %v9377_v57 = vor.u32 %v11393_v28, %v9374_v0  ;;  %v9870_v33 = vld [vmem:[#allocation7 + $0x7f0] sm:$0xf0] }
 0x2a3   : > { %v4509_v21 = vpop.f32.mrf.mxu1  ;;  %4919 = vmatpush.bf16.msrb.mxu2 %v9665_v59  ;;  %v9502_v59 = vld [vmem:[#allocation7 + $0x510] sm:$0xf0]  ;;  %v15356_v35 = vld [vmem:[#allocation33_spill] sm:$0xff] }
 0x2a4   : > { %v4508_v40 = vadd.f32 %v4507_v10, %v4459_v1  ;;  %v11457_v1 = vld [vmem:[#allocation7 + $0x604] sm:$0xf]  ;;  %v9505_v27 = vor.u32 %v11425_v46, %v9502_v59  ;;  %v626_v59 = vld [vmem:[%s12496_s2 + $0x7f8] sm:$0xff] }
 0x2a5   : > { %4822 = vmatpush.bf16.msrb.mxu0 %v9393_v56  ;;  %4871 = vmatpush.bf16.msrb.mxu1 %v9521_v55  ;;  %v11517_v61 = vld [vmem:[#allocation7 + $0x7e4] sm:$0xf] }
 0x2a6   : > { %v13426_v4 = vadd.f32 %v4556_v25, %v4508_v40  ;;  %v9633_v25 = vor.u32 %v11457_v1, %v9630_v62  ;;  %v9873_v55 = vor.u32 %v11517_v61, %v9870_v33  ;;  %v15358_v33 = vld [vmem:[#allocation34_spill] sm:$0xff] }
 0x2a7   : > { %v4411_v54 = vpop.f32.mrf.mxu3  ;;  %4920 = vmatpush.bf16.msrb.mxu2 %v9649_v17 }
 0x2a8   : > { %v4412_v58 = vadd.f32 %v4411_v54, %v13311_v18  ;;  %v15355_v18 = vld [vmem:[#allocation32_spill] sm:$0xff]  ;;  %4963 = vmatpush.bf16.msra.mxu3 %v9873_v55  ;;  %v9854_v55 = vld [vmem:[#allocation7 + $0x7d0] sm:$0xf0] }
 0x2a9   : > { %v4558_v10 = vpop.f32.mrf.mxu2  ;;  %v4463_v63 = vpop.f32.mrf.mxu0  ;;  %4823 = vmatpush.bf16.msrb.mxu0 %v9377_v57  ;;  %4872 = vmatpush.bf16.msrb.mxu1 %v9505_v27  ;;  %v610_v57 = vld [vmem:[%s12496_s2 + $0x778] sm:$0xff]  ;;  %s12246_s2 = scalar_lea.hbm %s15000_s7, 256 }
 0x2aa   : > { %v4461_v40 = vadd.f32 %v4460_v43, %v4412_v58  ;;  %p12248_p7 = scmp.lt.s32.totalorder %s12246_s2, %s12242_s19 }
 0x2ab   : > { %v4512_v56 = vpop.f32.mrf.mxu1  ;;  %4921 = vmatpush.bf16.msrb.mxu2 %v9633_v25  ;;  %v13443_v25 = vpack.c.bf16 %v626_v59, %v610_v57 }
 0x2ac   : > { %v4510_v17 = vadd.f32 %v4509_v21, %v4461_v40  ;;  %4609 = vmatmul.bf16.gmra.mxu3 %v13429_v5  ;;  %4658 = vmatmul.bf16.gmra.mxu0 %v15354_v53  ;;  %v9774_v53 = vld [vmem:[#allocation7 + $0x730] sm:$0xf0]  ;;  %p12249_p8 = por %p12248_p7, %p12247_p13 }
 0x2ad   : > { %15357 = vst [vmem:[#allocation128_spill] sm:$0xff] %v13443_v25 }
 0x2ae   : > { %4707 = vmatmul.bf16.gmra.mxu1 %v15355_v18  ;;  %4756 = vmatmul.bf16.gmra.mxu2 %v15356_v35  ;;  %v13435_v20 = vadd.f32 %v4558_v10, %v4510_v17  ;;  %v15384_v18 = vld [vmem:[#allocation56_spill] sm:$0xff]  ;;  %p12250_p9 = pnand %p12249_p8, %p12245_p5 }
 0x2af   : > { %v4414_v43 = vpop.f32.mrf.mxu3 }
 0x2b0   : > { %v4415_v54 = vadd.f32 %v4414_v43, %v13319_v51  ;;  %v11513_v43 = vld [vmem:[#allocation7 + $0x7c4] sm:$0xf] }
 0x2b1   : > { %v4561_v28 = vpop.f32.mrf.mxu2  ;;  %v4465_v21 = vpop.f32.mrf.mxu0 }
 0x2b2   : > { %v4464_v0 = vadd.f32 %v4463_v63, %v4415_v54  ;;  %v15359_v63 = vld [vmem:[#allocation35_spill] sm:$0xff] }
 0x2b3   : > { %v4514_v46 = vpop.f32.mrf.mxu1 }
 0x2b4   : > { %v4513_v58 = vadd.f32 %v4512_v56, %v4464_v0  ;;  %v15360_v56 = vld [vmem:[#allocation36_spill] sm:$0xff] }
 0x2b6   : > { %v13440_v1 = vadd.f32 %v4561_v28, %v4513_v58 }
 0x2b7   : > { %v4416_v62 = vpop.f32.mrf.mxu3 }
 0x2b8   : > { %v4417_v10 = vadd.f32 %v4416_v62, %v13337_v34  ;;  %v9857_v34 = vor.u32 %v11513_v43, %v9854_v55 }
 0x2b9   : > { %v4563_v27 = vpop.f32.mrf.mxu2  ;;  %v4468_v40 = vpop.f32.mrf.mxu0 }
 0x2ba   : > { %v4466_v17 = vadd.f32 %v4465_v21, %v4417_v10  ;;  %4964 = vmatpush.bf16.msra.mxu3 %v9857_v34  ;;  %v12031_v10 = vld [vmem:[#allocation13] sm:$0xf] }
 0x2bb   : > { %v4517_v61 = vpop.f32.mrf.mxu1 }
 0x2bc   : > { %v4515_v51 = vadd.f32 %v4514_v46, %v4466_v17  ;;  %4614 = vmatmul.bf16.gmra.mxu3 %v13443_v25  ;;  %4663 = vmatmul.bf16.gmra.mxu0 %v15358_v33  ;;  %v13454_v17 = vperm.slane %v12031_v10, 1  ;;  %v15361_v33 = vld [vmem:[#allocation37_spill] sm:$0xff] }
 0x2be   : > { %4712 = vmatmul.bf16.gmra.mxu1 %v15359_v63  ;;  %4761 = vmatmul.bf16.gmra.mxu2 %v15360_v56  ;;  %v13449_v54 = vadd.f32 %v4563_v27, %v4515_v51 }
 0x2bf   : > { %v4419_v28 = vpop.f32.mrf.mxu3 }
 0x2c0   : > { %v4420_v0 = vadd.f32 %v4419_v28, %v13342_v14 }
 0x2c1   : > { %v4566_v58 = vpop.f32.mrf.mxu2  ;;  %v4470_v21 = vpop.f32.mrf.mxu0 }
 0x2c2   : > { %v4469_v46 = vadd.f32 %v4468_v40, %v4420_v0  ;;  %v15362_v40 = vld [vmem:[#allocation38_spill] sm:$0xff]  ;;  %v15364_v0 = vld [vmem:[#allocation40_spill] sm:$0xff] }
 0x2c3   : > { %v4519_v57 = vpop.f32.mrf.mxu1 }
 0x2c4   : > { %v4518_v59 = vadd.f32 %v4517_v61, %v4469_v46  ;;  %v15363_v61 = vld [vmem:[#allocation39_spill] sm:$0xff] }
 0x2c5   : > { %v9838_v46 = vld [vmem:[#allocation7 + $0x7b0] sm:$0xf0] }
 0x2c6   : > { %v13452_v62 = vadd.f32 %v4566_v58, %v4518_v59  ;;  %v11509_v58 = vld [vmem:[#allocation7 + $0x7a4] sm:$0xf] }
 0x2c7   : > { %v4421_v56 = vpop.f32.mrf.mxu3 }
 0x2c8   : > { %v4422_v63 = vadd.f32 %v4421_v56, %v13351_v41  ;;  %v9841_v56 = vor.u32 %v11509_v58, %v9838_v46 }
 0x2c9   : > { %v4568_v27 = vpop.f32.mrf.mxu2  ;;  %v4629_v51 = vpop.f32.mrf.mxu0 }
 0x2ca   : > { %v4471_v43 = vadd.f32 %v4470_v21, %v4422_v63  ;;  %v4630_v55 = vadd.f32 %v4629_v51, %v13454_v17  ;;  %4965 = vmatpush.bf16.msra.mxu3 %v9841_v56 }
 0x2cb   : > { %v4678_v14 = vpop.f32.mrf.mxu1 }
 0x2cc   : > { %v4520_v28 = vadd.f32 %v4519_v57, %v4471_v43  ;;  %v4679_v34 = vadd.f32 %v4678_v14, %v4630_v55  ;;  %4775 = vmatmul.bf16.vlgmr.msrb.gmra.mxu3 %v15361_v33  ;;  %4824 = vmatmul.bf16.vlgmr.msrb.gmra.mxu0 %v15362_v40  ;;  %v13468_v14 = vstv %s365_s12 }
 0x2cd   : > { %15365 = vst [vmem:[#allocation129_spill] sm:$0xff] %v13468_v14 }
 0x2ce   : > { %4873 = vmatmul.bf16.vlgmr.msrb.gmra.mxu1 %v15363_v61  ;;  %4922 = vmatmul.bf16.vlgmr.msrb.gmra.mxu2 %v15364_v0  ;;  %v13462_v41 = vadd.f32 %v4568_v27, %v4520_v28 }
 0x2cf   : > { %v4580_v63 = vpop.f32.mrf.mxu3 }
 0x2d0   : > { %v4581_v21 = vadd.f32 %v4580_v63, %v13356_v15 }
 0x2d1   : > { %v4727_v59 = vpop.f32.mrf.mxu2  ;;  %v4631_v10 = vpop.f32.mrf.mxu0 }
 0x2d2   : > { %v13465_v57 = vadd.f32 %v4727_v59, %v4679_v34  ;;  %v4632_v51 = vadd.f32 %v4631_v10, %v13454_v17  ;;  %v7037_v61 = vmul.f32 %v13468_v14, %v4581_v21  ;;  %vm6972_vm0 = vcmp.ge.f32.partialorder %v4581_v21, 0.0 }
 0x2d3   : > { %v4680_v43 = vpop.f32.mrf.mxu1 }
 0x2d4   : > { %v4681_v55 = vadd.f32 %v4680_v43, %v4632_v51  ;;  %v7101_v63 = vsel %vm6972_vm0, %v4581_v21, %v7037_v61  ;;  %v15366_v51 = vld [vmem:[#allocation41_spill] sm:$0xff]  ;;  %v15367_v43 = vld [vmem:[#allocation42_spill] sm:$0xff] }
 0x2d7   : > { %v4582_v0 = vpop.f32.mrf.mxu3 }
 0x2d8   : > { %v4583_v27 = vadd.f32 %v4582_v0, %v13365_v38  ;;  %v15369_v38 = vld [vmem:[#allocation43_spill] sm:$0xff]  ;;  %v15370_v0 = vld [vmem:[#allocation44_spill] sm:$0xff] }
 0x2d9   : > { %v4729_v28 = vpop.f32.mrf.mxu2  ;;  %v4634_v15 = vpop.f32.mrf.mxu0 }
 0x2da   : > { %v13472_v58 = vadd.f32 %v4729_v28, %v4681_v55  ;;  %vm6976_vm1 = vcmp.ge.f32.partialorder %v4583_v27, 0.0  ;;  %v7041_v34 = vmul.f32 %v13468_v14, %v4583_v27  ;;  %v4635_v46 = vadd.f32 %v4634_v15, %v13454_v17  ;;  %v11505_v55 = vld [vmem:[#allocation7 + $0x784] sm:$0xf]  ;;  %v9822_v28 = vld [vmem:[#allocation7 + $0x790] sm:$0xf0] }
 0x2db   : > { %v4683_v56 = vpop.f32.mrf.mxu1  ;;  %v9825_v33 = vor.u32 %v11505_v55, %v9822_v28 }
 0x2dc   : > { %v7105_v59 = vsel %vm6976_vm1, %v4583_v27, %v7041_v34  ;;  %v4684_v10 = vadd.f32 %v4683_v56, %v4635_v46  ;;  %4780 = vmatmul.bf16.gmra.mxu3 %v15366_v51  ;;  %4829 = vmatmul.bf16.gmra.mxu0 %v15367_v43 }
 0x2dd   : > { %v13478_v40 = vpack.c.bf16 %v7105_v59, %v7101_v63  ;;  %4966 = vmatpush.bf16.msra.mxu3 %v9825_v33 }
 0x2de   : > { %4878 = vmatmul.bf16.gmra.mxu1 %v15369_v38  ;;  %4927 = vmatmul.bf16.gmra.mxu2 %v15370_v0  ;;  %v15373_v0 = vld [vmem:[#allocation47_spill] sm:$0xff] }
 0x2df   : > { %15368 = vst [vmem:[#allocation130_spill] sm:$0xff] %v13478_v40  ;;  %v4585_v25 = vpop.f32.mrf.mxu3 }
 0x2e0   : > { %v4586_v15 = vadd.f32 %v4585_v25, %v13370_v7 }
 0x2e1   : > { %v4732_v35 = vpop.f32.mrf.mxu2  ;;  %v4636_v21 = vpop.f32.mrf.mxu0 }
 0x2e2   : > { %v13483_v61 = vadd.f32 %v4732_v35, %v4684_v10  ;;  %v4637_v27 = vadd.f32 %v4636_v21, %v13454_v17  ;;  %v7045_v63 = vmul.f32 %v13468_v14, %v4586_v15  ;;  %vm6980_vm2 = vcmp.ge.f32.partialorder %v4586_v15, 0.0  ;;  %v15371_v10 = vld [vmem:[#allocation45_spill] sm:$0xff]  ;;  %v15372_v21 = vld [vmem:[#allocation46_spill] sm:$0xff] }
 0x2e3   : > { %v4685_v34 = vpop.f32.mrf.mxu1 }
 0x2e4   : > { %v4686_v46 = vadd.f32 %v4685_v34, %v4637_v27  ;;  %v7109_v27 = vsel %vm6980_vm2, %v4586_v15, %v7045_v63 }
 0x2e7   : > { %v4587_v56 = vpop.f32.mrf.mxu3 }
 0x2e8   : > { %v4588_v59 = vadd.f32 %v4587_v56, %v13379_v22  ;;  %v15374_v22 = vld [vmem:[#allocation48_spill] sm:$0xff] }
 0x2e9   : > { %v4734_v40 = vpop.f32.mrf.mxu2  ;;  %v4639_v28 = vpop.f32.mrf.mxu0 }
 0x2ea   : > { %v13488_v55 = vadd.f32 %v4734_v40, %v4686_v46  ;;  %vm6984_vm3 = vcmp.ge.f32.partialorder %v4588_v59, 0.0  ;;  %v7049_v7 = vmul.f32 %v13468_v14, %v4588_v59  ;;  %v4640_v35 = vadd.f32 %v4639_v28, %v13454_v17  ;;  %v11501_v40 = vld [vmem:[#allocation7 + $0x764] sm:$0xf]  ;;  %v9806_v46 = vld [vmem:[#allocation7 + $0x770] sm:$0xf0] }
 0x2eb   : > { %v4688_v25 = vpop.f32.mrf.mxu1  ;;  %v9809_v38 = vor.u32 %v11501_v40, %v9806_v46  ;;  %v15377_v46 = vld [vmem:[#allocation50_spill] sm:$0xff] }
 0x2ec   : > { %v4689_v33 = vadd.f32 %v4688_v25, %v4640_v35  ;;  %4785 = vmatmul.bf16.gmra.mxu3 %v15371_v10  ;;  %4834 = vmatmul.bf16.gmra.mxu0 %v15372_v21  ;;  %v7113_v34 = vsel %vm6984_vm3, %v4588_v59, %v7049_v7 }
 0x2ed   : > { %v13496_v56 = vpack.c.bf16 %v7113_v34, %v7109_v27  ;;  %4967 = vmatpush.bf16.msra.mxu3 %v9809_v38 }
 0x2ee   : > { %4883 = vmatmul.bf16.gmra.mxu1 %v15373_v0  ;;  %4932 = vmatmul.bf16.gmra.mxu2 %v15374_v22 }
 0x2ef   : > { %15375 = vst [vmem:[#allocation131_spill] sm:$0xff] %v13496_v56  ;;  %v4590_v43 = vpop.f32.mrf.mxu3 }
 0x2f0   : > { %v4591_v28 = vadd.f32 %v4590_v43, %v13384_v37 }
 0x2f1   : > { %v4737_v51 = vpop.f32.mrf.mxu2  ;;  %v4641_v25 = vpop.f32.mrf.mxu0 }
 0x2f2   : > { %v13499_v35 = vadd.f32 %v4737_v51, %v4689_v33  ;;  %v4642_v15 = vadd.f32 %v4641_v25, %v13454_v17  ;;  %v7053_v22 = vmul.f32 %v13468_v14, %v4591_v28  ;;  %vm6988_vm4 = vcmp.ge.f32.partialorder %v4591_v28, 0.0  ;;  %v15376_v33 = vld [vmem:[#allocation49_spill] sm:$0xff] }
 0x2f3   : > { %v4690_v63 = vpop.f32.mrf.mxu1 }
 0x2f4   : > { %v4691_v59 = vadd.f32 %v4690_v63, %v4642_v15  ;;  %v7117_v25 = vsel %vm6988_vm4, %v4591_v28, %v7053_v22  ;;  %v15378_v63 = vld [vmem:[#allocation51_spill] sm:$0xff] }
 0x2f7   : > { %v4592_v7 = vpop.f32.mrf.mxu3 }
 0x2f8   : > { %v4593_v0 = vadd.f32 %v4592_v7, %v13393_v2  ;;  %v15379_v2 = vld [vmem:[#allocation52_spill] sm:$0xff]  ;;  %v9790_v7 = vld [vmem:[#allocation7 + $0x750] sm:$0xf0] }
 0x2f9   : > { %v4739_v27 = vpop.f32.mrf.mxu2  ;;  %v4644_v40 = vpop.f32.mrf.mxu0 }
 0x2fa   : > { %v13504_v34 = vadd.f32 %v4739_v27, %v4691_v59  ;;  %vm6992_vm5 = vcmp.ge.f32.partialorder %v4593_v0, 0.0  ;;  %v7057_v37 = vmul.f32 %v13468_v14, %v4593_v0  ;;  %v4645_v51 = vadd.f32 %v4644_v40, %v13454_v17  ;;  %v11497_v59 = vld [vmem:[#allocation7 + $0x744] sm:$0xf] }
 0x2fb   : > { %v4693_v43 = vpop.f32.mrf.mxu1  ;;  %v9793_v56 = vor.u32 %v11497_v59, %v9790_v7 }
 0x2fc   : > { %v4694_v38 = vadd.f32 %v4693_v43, %v4645_v51  ;;  %4790 = vmatmul.bf16.gmra.mxu3 %v15376_v33  ;;  %4839 = vmatmul.bf16.gmra.mxu0 %v15377_v46  ;;  %v7121_v15 = vsel %vm6992_vm5, %v4593_v0, %v7057_v37  ;;  %v15383_v33 = vld [vmem:[#allocation55_spill] sm:$0xff] }
 0x2fd   : > { %v13512_v27 = vpack.c.bf16 %v7121_v15, %v7117_v25  ;;  %4968 = vmatpush.bf16.msra.mxu3 %v9793_v56  ;;  %v11549_v56 = vld [vmem:[#allocation7 + $0x8e4] sm:$0xf] }
 0x2fe   : > { %4888 = vmatmul.bf16.gmra.mxu1 %v15378_v63  ;;  %4937 = vmatmul.bf16.gmra.mxu2 %v15379_v2  ;;  %v15382_v63 = vld [vmem:[#allocation54_spill] sm:$0xff] }
 0x2ff   : > { %15380 = vst [vmem:[#allocation132_spill] sm:$0xff] %v13512_v27  ;;  %v4595_v21 = vpop.f32.mrf.mxu3  ;;  %v15381_v27 = vld [vmem:[#allocation53_spill] sm:$0xff] }
 0x300   : > { %v4596_v40 = vadd.f32 %v4595_v21, %v13398_v36 }
 0x301   : > { %v4742_v10 = vpop.f32.mrf.mxu2  ;;  %v4646_v43 = vpop.f32.mrf.mxu0 }
 0x302   : > { %v13515_v51 = vadd.f32 %v4742_v10, %v4694_v38  ;;  %v4647_v22 = vadd.f32 %v4646_v43, %v13454_v17  ;;  %v7061_v37 = vmul.f32 %v13468_v14, %v4596_v40  ;;  %vm6996_vm6 = vcmp.ge.f32.partialorder %v4596_v40, 0.0  ;;  %v9998_v38 = vld [vmem:[#allocation7 + $0x8f0] sm:$0xf0]  ;;  %v11581_v43 = vld [vmem:[#allocation7 + $0x9e4] sm:$0xf] }
 0x303   : > { %v4695_v0 = vpop.f32.mrf.mxu1 }
 0x304   : > { %v4696_v28 = vadd.f32 %v4695_v0, %v4647_v22  ;;  %v7125_v22 = vsel %vm6996_vm6, %v4596_v40, %v7061_v37 }
 0x307   : > { %v4597_v2 = vpop.f32.mrf.mxu3 }
 0x308   : > { %v4598_v25 = vadd.f32 %v4597_v2, %v13407_v44  ;;  %v10001_v44 = vor.u32 %v11549_v56, %v9998_v38  ;;  %v10126_v2 = vld [vmem:[#allocation7 + $0x9f0] sm:$0xf0]  ;;  %v11577_v56 = vld [vmem:[#allocation7 + $0x9c4] sm:$0xf] }
 0x309   : > { %v4744_v15 = vpop.f32.mrf.mxu2  ;;  %v4649_v7 = vpop.f32.mrf.mxu0  ;;  %v10129_v5 = vor.u32 %v11581_v43, %v10126_v2  ;;  %v9966_v2 = vld [vmem:[#allocation7 + $0x8b0] sm:$0xf0] }
 0x30a   : > { %v13520_v59 = vadd.f32 %v4744_v15, %v4696_v28  ;;  %vm7000_vm7 = vcmp.ge.f32.partialorder %v4598_v25, 0.0  ;;  %v7065_v36 = vmul.f32 %v13468_v14, %v4598_v25  ;;  %v4650_v10 = vadd.f32 %v4649_v7, %v13454_v17  ;;  %v11613_v28 = vld [vmem:[#allocation7 + $0xae4] sm:$0xf]  ;;  %v10254_v15 = vld [vmem:[#allocation7 + $0xaf0] sm:$0xf0]  ;;  %5012 = vmatpush.bf16.msra.mxu0 %v10001_v44 }
 0x30b   : > { %v4698_v21 = vpop.f32.mrf.mxu1  ;;  %v11493_v7 = vld [vmem:[#allocation7 + $0x724] sm:$0xf]  ;;  %v10257_v50 = vor.u32 %v11613_v28, %v10254_v15  ;;  %5061 = vmatpush.bf16.msra.mxu1 %v10129_v5 }
 0x30c   : > { %v4699_v0 = vadd.f32 %v4698_v21, %v4650_v10  ;;  %4795 = vmatmul.bf16.gmra.mxu3 %v15381_v27  ;;  %4844 = vmatmul.bf16.gmra.mxu0 %v15382_v63  ;;  %v7129_v46 = vsel %vm7000_vm7, %v4598_v25, %v7065_v36  ;;  %v9777_v40 = vor.u32 %v11493_v7, %v9774_v53  ;;  %v11545_v10 = vld [vmem:[#allocation7 + $0x8c4] sm:$0xf]  ;;  %v9982_v21 = vld [vmem:[#allocation7 + $0x8d0] sm:$0xf0] }
 0x30d   : > { %v13528_v49 = vpack.c.bf16 %v7129_v46, %v7125_v22  ;;  %5110 = vmatpush.bf16.msra.mxu2 %v10257_v50  ;;  %v9985_v38 = vor.u32 %v11545_v10, %v9982_v21  ;;  %v10238_v63 = vld [vmem:[#allocation7 + $0xad0] sm:$0xf0]  ;;  %v11541_v50 = vld [vmem:[#allocation7 + $0x8a4] sm:$0xf] }
 0x30e   : > { %4893 = vmatmul.bf16.gmra.mxu1 %v15383_v33  ;;  %4942 = vmatmul.bf16.gmra.mxu2 %v15384_v18  ;;  %v10110_v18 = vld [vmem:[#allocation7 + $0x9d0] sm:$0xf0]  ;;  %v11609_v33 = vld [vmem:[#allocation7 + $0xac4] sm:$0xf]  ;;  %v9969_v15 = vor.u32 %v11541_v50, %v9966_v2 }
 0x30f   : > { %15385 = vst [vmem:[#allocation53_spill] sm:$0xff] %v13528_v49  ;;  %v4600_v37 = vpop.f32.mrf.mxu3  ;;  %4969 = vmatpush.bf16.msra.mxu3 %v9777_v40  ;;  %v10113_v22 = vor.u32 %v11577_v56, %v10110_v18  ;;  %v10241_v53 = vor.u32 %v11609_v33, %v10238_v63  ;;  %5013 = vmatpush.bf16.msra.mxu0 %v9985_v38  ;;  %v10094_v7 = vld [vmem:[#allocation7 + $0x9b0] sm:$0xf0]  ;;  %v11605_v40 = vld [vmem:[#allocation7 + $0xaa4] sm:$0xf] }
 0x310   : > { %v4601_v25 = vadd.f32 %v4600_v37, %v13412_v3  ;;  %v11573_v3 = vld [vmem:[#allocation7 + $0x9a4] sm:$0xf]  ;;  %v10222_v37 = vld [vmem:[#allocation7 + $0xab0] sm:$0xf0] }
 0x311   : > { %v4747_v36 = vpop.f32.mrf.mxu2  ;;  %v4651_v46 = vpop.f32.mrf.mxu0  ;;  %5062 = vmatpush.bf16.msra.mxu1 %v10113_v22  ;;  %5111 = vmatpush.bf16.msra.mxu2 %v10241_v53  ;;  %v10097_v10 = vor.u32 %v11573_v3, %v10094_v7  ;;  %v11537_v63 = vld [vmem:[#allocation7 + $0x884] sm:$0xf]  ;;  %v9950_v21 = vld [vmem:[#allocation7 + $0x890] sm:$0xf0] }
 0x312   : > { %v13531_v43 = vadd.f32 %v4747_v36, %v4699_v0  ;;  %v4652_v44 = vadd.f32 %v4651_v46, %v13454_v17  ;;  %v10225_v0 = vor.u32 %v11605_v40, %v10222_v37  ;;  %vm7004_vm8 = vcmp.ge.f32.partialorder %v4601_v25, 0.0  ;;  %v11569_v56 = vld [vmem:[#allocation7 + $0x984] sm:$0xf]  ;;  %v10078_v22 = vld [vmem:[#allocation7 + $0x990] sm:$0xf0] }
 0x313   : > { %v4700_v5 = vpop.f32.mrf.mxu1  ;;  %5014 = vmatpush.bf16.msra.mxu0 %v9969_v15  ;;  %v7069_v18 = vmul.f32 %v13468_v14, %v4601_v25  ;;  %v9953_v46 = vor.u32 %v11537_v63, %v9950_v21  ;;  %v11601_v53 = vld [vmem:[#allocation7 + $0xa84] sm:$0xf]  ;;  %v10081_v2 = vor.u32 %v11569_v56, %v10078_v22  ;;  %v9934_v37 = vld [vmem:[#allocation7 + $0x870] sm:$0xf0]  ;;  %v15387_v63 = vld [vmem:[#allocation58_spill] sm:$0xff] }
 0x314   : > { %v4701_v28 = vadd.f32 %v4700_v5, %v4652_v44  ;;  %v10206_v44 = vld [vmem:[#allocation7 + $0xa90] sm:$0xf0] }
 0x315   : > { %5063 = vmatpush.bf16.msra.mxu1 %v10097_v10  ;;  %5112 = vmatpush.bf16.msra.mxu2 %v10225_v0  ;;  %v10209_v3 = vor.u32 %v11601_v53, %v10206_v44  ;;  %v11565_v10 = vld [vmem:[#allocation7 + $0x964] sm:$0xf]  ;;  %v7133_v0 = vsel %vm7004_vm8, %v4601_v25, %v7069_v18  ;;  %v10062_v56 = vld [vmem:[#allocation7 + $0x970] sm:$0xf0] }
 0x316   : > { %v10190_v22 = vld [vmem:[#allocation7 + $0xa70] sm:$0xf0] }
 0x317   : > { %v4602_v33 = vpop.f32.mrf.mxu3  ;;  %5015 = vmatpush.bf16.msra.mxu0 %v9953_v46  ;;  %v15388_v44 = vld [vmem:[#allocation59_spill] sm:$0xff]  ;;  %v15389_v46 = vld [vmem:[#allocation60_spill] sm:$0xff] }
 0x318   : > { %v4603_v36 = vadd.f32 %v4602_v33, %v13421_v47  ;;  %v11533_v47 = vld [vmem:[#allocation7 + $0x864] sm:$0xf] }
 0x319   : > { %v4749_v38 = vpop.f32.mrf.mxu2  ;;  %v4654_v50 = vpop.f32.mrf.mxu0  ;;  %5064 = vmatpush.bf16.msra.mxu1 %v10081_v2  ;;  %5113 = vmatpush.bf16.msra.mxu2 %v10209_v3  ;;  %v9937_v21 = vor.u32 %v11533_v47, %v9934_v37  ;;  %v9758_v2 = vld [vmem:[#allocation7 + $0x710] sm:$0xf0]  ;;  %v10065_v3 = vor.u32 %v11565_v10, %v10062_v56  ;;  %v11561_v37 = vld [vmem:[#allocation7 + $0x944] sm:$0xf] }
 0x31a   : > { %v13536_v5 = vadd.f32 %v4749_v38, %v4701_v28  ;;  %vm7008_vm9 = vcmp.ge.f32.partialorder %v4603_v36, 0.0  ;;  %v7073_v15 = vmul.f32 %v13468_v14, %v4603_v36  ;;  %v4655_v7 = vadd.f32 %v4654_v50, %v13454_v17  ;;  %v15386_v28 = vld [vmem:[#allocation57_spill] sm:$0xff]  ;;  %v9918_v47 = vld [vmem:[#allocation7 + $0x850] sm:$0xf0] }
 0x31b   : > { %v4703_v40 = vpop.f32.mrf.mxu1  ;;  %v11597_v38 = vld [vmem:[#allocation7 + $0xa64] sm:$0xf]  ;;  %5016 = vmatpush.bf16.msra.mxu0 %v9937_v21 }
 0x31c   : > { %v4704_v33 = vadd.f32 %v4703_v40, %v4655_v7  ;;  %4800 = vmatmul.bf16.gmra.mxu3 %v15386_v28  ;;  %4849 = vmatmul.bf16.gmra.mxu0 %v15387_v63  ;;  %v7137_v53 = vsel %vm7008_vm9, %v4603_v36, %v7073_v15  ;;  %v11489_v50 = vld [vmem:[#allocation7 + $0x704] sm:$0xf]  ;;  %v10193_v49 = vor.u32 %v11597_v38, %v10190_v22  ;;  %v10174_v28 = vld [vmem:[#allocation7 + $0xa50] sm:$0xf0] }
 0x31d   : > { %v13546_v25 = vpack.c.bf16 %v7137_v53, %v7133_v0  ;;  %v9761_v18 = vor.u32 %v11489_v50, %v9758_v2  ;;  %5065 = vmatpush.bf16.msra.mxu1 %v10065_v3  ;;  %v11529_v40 = vld [vmem:[#allocation7 + $0x844] sm:$0xf]  ;;  %v9902_v53 = vld [vmem:[#allocation7 + $0x830] sm:$0xf0] }
 0x31e   : > { %4898 = vmatmul.bf16.gmra.mxu1 %v15388_v44  ;;  %4947 = vmatmul.bf16.gmra.mxu2 %v15389_v46  ;;  %v9921_v44 = vor.u32 %v11529_v40, %v9918_v47  ;;  %v10046_v46 = vld [vmem:[#allocation7 + $0x950] sm:$0xf0]  ;;  %v11593_v63 = vld [vmem:[#allocation7 + $0xa44] sm:$0xf] }
 0x31f   : > { %15390 = vst [vmem:[#allocation133_spill] sm:$0xff] %v13546_v25  ;;  %v4605_v7 = vpop.f32.mrf.mxu3  ;;  %5114 = vmatpush.bf16.msra.mxu2 %v10193_v49  ;;  %4970 = vmatpush.bf16.msra.mxu3 %v9761_v18  ;;  %v10049_v56 = vor.u32 %v11561_v37, %v10046_v46  ;;  %v10177_v38 = vor.u32 %v11593_v63, %v10174_v28  ;;  %v11525_v49 = vld [vmem:[#allocation7 + $0x824] sm:$0xf]  ;;  %v10030_v3 = vld [vmem:[#allocation7 + $0x930] sm:$0xf0] }
 0x320   : > { %v4606_v36 = vadd.f32 %v4605_v7, %v13426_v4  ;;  %5017 = vmatpush.bf16.msra.mxu0 %v9921_v44  ;;  %v11557_v4 = vld [vmem:[#allocation7 + $0x924] sm:$0xf]  ;;  %v9905_v2 = vor.u32 %v11525_v49, %v9902_v53  ;;  %v10158_v7 = vld [vmem:[#allocation7 + $0xa30] sm:$0xf0] }
 0x321   : > { %v4752_v15 = vpop.f32.mrf.mxu2  ;;  %v4656_v0 = vpop.f32.mrf.mxu0  ;;  %5066 = vmatpush.bf16.msra.mxu1 %v10049_v56  ;;  %v11589_v18 = vld [vmem:[#allocation7 + $0xa24] sm:$0xf]  ;;  %v10033_v40 = vor.u32 %v11557_v4, %v10030_v3  ;;  %v9886_v63 = vld [vmem:[#allocation7 + $0x810] sm:$0xf0] }
 0x322   : > { %v13549_v10 = vadd.f32 %v4752_v15, %v4704_v33  ;;  %v4657_v21 = vadd.f32 %v4656_v0, %v13454_v17  ;;  %v10161_v33 = vor.u32 %v11589_v18, %v10158_v7  ;;  %v11521_v28 = vld [vmem:[#allocation7 + $0x804] sm:$0xf]  ;;  %v7077_v44 = vmul.f32 %v13468_v14, %v4606_v36  ;;  %v10014_v56 = vld [vmem:[#allocation7 + $0x910] sm:$0xf0] }
 0x323   : > { %v4705_v22 = vpop.f32.mrf.mxu1  ;;  %5115 = vmatpush.bf16.msra.mxu2 %v10177_v38  ;;  %v11553_v46 = vld [vmem:[#allocation7 + $0x904] sm:$0xf]  ;;  %v9889_v0 = vor.u32 %v11521_v28, %v9886_v63  ;;  %vm7012_vm10 = vcmp.ge.f32.partialorder %v4606_v36, 0.0  ;;  %v15394_v28 = vld [vmem:[#allocation64_spill] sm:$0xff] }
 0x324   : > { %v4706_v50 = vadd.f32 %v4705_v22, %v4657_v21  ;;  %5018 = vmatpush.bf16.msra.mxu0 %v9905_v2  ;;  %v11585_v38 = vld [vmem:[#allocation7 + $0xa04] sm:$0xf]  ;;  %v10142_v21 = vld [vmem:[#allocation7 + $0xa10] sm:$0xf0]  ;;  %v10017_v53 = vor.u32 %v11553_v46, %v10014_v56 }
 0x325   : > { %5067 = vmatpush.bf16.msra.mxu1 %v10033_v40  ;;  %v10145_v4 = vor.u32 %v11585_v38, %v10142_v21  ;;  %v15391_v7 = vld [vmem:[#allocation61_spill] sm:$0xff]  ;;  %v15392_v40 = vld [vmem:[#allocation62_spill] sm:$0xff]  ;;  %v10382_v46 = vld [vmem:[#allocation7 + $0xbf0] sm:$0xf0] }
 0x326   : > { %v11645_v63 = vld [vmem:[#allocation7 + $0xbe4] sm:$0xf] }
 0x327   : > { %v4607_v47 = vpop.f32.mrf.mxu3  ;;  %5116 = vmatpush.bf16.msra.mxu2 %v10161_v33  ;;  %v7141_v33 = vsel %vm7012_vm10, %v4606_v36, %v7077_v44  ;;  %v10385_v56 = vor.u32 %v11645_v63, %v10382_v46 }
 0x328   : > { %v4608_v37 = vadd.f32 %v4607_v47, %v13435_v20  ;;  %5019 = vmatpush.bf16.msra.mxu0 %v9889_v0  ;;  %v15393_v47 = vld [vmem:[#allocation63_spill] sm:$0xff] }
 0x329   : > { %v4754_v15 = vpop.f32.mrf.mxu2  ;;  %v4659_v49 = vpop.f32.mrf.mxu0  ;;  %5068 = vmatpush.bf16.msra.mxu1 %v10017_v53  ;;  %5159 = vmatpush.bf16.msrb.mxu3 %v10385_v56  ;;  %v15396_v56 = vld [vmem:[#allocation65_spill] sm:$0xff] }
 0x32a   : > { %v13554_v22 = vadd.f32 %v4754_v15, %v4706_v50  ;;  %vm7016_vm11 = vcmp.ge.f32.partialorder %v4608_v37, 0.0  ;;  %v7081_v2 = vmul.f32 %v13468_v14, %v4608_v37  ;;  %v4660_v3 = vadd.f32 %v4659_v49, %v13454_v17 }
 0x32b   : > { %v4708_v18 = vpop.f32.mrf.mxu1  ;;  %5117 = vmatpush.bf16.msra.mxu2 %v10145_v4 }
 0x32c   : > { %v4709_v20 = vadd.f32 %v4708_v18, %v4660_v3  ;;  %4805 = vmatmul.bf16.gmra.mxu3 %v15391_v7  ;;  %4854 = vmatmul.bf16.gmra.mxu0 %v15392_v40  ;;  %v7145_v50 = vsel %vm7016_vm11, %v4608_v37, %v7081_v2 }
 0x32d   : > { %v13562_v15 = vpack.c.bf16 %v7145_v50, %v7141_v33 }
 0x32e   : > { %4903 = vmatmul.bf16.gmra.mxu1 %v15393_v47  ;;  %4952 = vmatmul.bf16.gmra.mxu2 %v15394_v28  ;;  %v10622_v47 = vld [vmem:[#allocation7 + $0xdd0] sm:$0xf0] }
 0x32f   : > { %15395 = vst [vmem:[#allocation134_spill] sm:$0xff] %v13562_v15  ;;  %v4610_v38 = vpop.f32.mrf.mxu3 }
 0x330   : > { %v4611_v0 = vadd.f32 %v4610_v38, %v13440_v1  ;;  %v15397_v38 = vld [vmem:[#allocation66_spill] sm:$0xff] }
 0x331   : > { %v4757_v21 = vpop.f32.mrf.mxu2  ;;  %v4661_v53 = vpop.f32.mrf.mxu0 }
 0x332   : > { %v13565_v49 = vadd.f32 %v4757_v21, %v4709_v20  ;;  %v4662_v36 = vadd.f32 %v4661_v53, %v13454_v17  ;;  %v7085_v2 = vmul.f32 %v13468_v14, %v4611_v0  ;;  %vm7020_vm12 = vcmp.ge.f32.partialorder %v4611_v0, 0.0 }
 0x333   : > { %v4710_v44 = vpop.f32.mrf.mxu1 }
 0x334   : > { %v4711_v37 = vadd.f32 %v4710_v44, %v4662_v36  ;;  %v7149_v21 = vsel %vm7020_vm12, %v4611_v0, %v7085_v2  ;;  %v15398_v36 = vld [vmem:[#allocation67_spill] sm:$0xff] }
 0x337   : > { %v4612_v4 = vpop.f32.mrf.mxu3 }
 0x338   : > { %v4613_v3 = vadd.f32 %v4612_v4, %v13449_v54  ;;  %v15399_v54 = vld [vmem:[#allocation68_spill] sm:$0xff]  ;;  %v10366_v4 = vld [vmem:[#allocation7 + $0xbd0] sm:$0xf0] }
 0x339   : > { %v4759_v18 = vpop.f32.mrf.mxu2  ;;  %v4664_v50 = vpop.f32.mrf.mxu0 }
 0x33a   : > { %v13570_v33 = vadd.f32 %v4759_v18, %v4711_v37  ;;  %vm7024_vm13 = vcmp.ge.f32.partialorder %v4613_v3, 0.0  ;;  %v7089_v1 = vmul.f32 %v13468_v14, %v4613_v3  ;;  %v4665_v20 = vadd.f32 %v4664_v50, %v13454_v17  ;;  %v11641_v37 = vld [vmem:[#allocation7 + $0xbc4] sm:$0xf] }
 0x33b   : > { %v4713_v63 = vpop.f32.mrf.mxu1  ;;  %v10369_v15 = vor.u32 %v11641_v37, %v10366_v4 }
 0x33c   : > { %v4714_v46 = vadd.f32 %v4713_v63, %v4665_v20  ;;  %4810 = vmatmul.bf16.gmra.mxu3 %v15396_v56  ;;  %4859 = vmatmul.bf16.gmra.mxu0 %v15397_v38  ;;  %v7153_v53 = vsel %vm7024_vm13, %v4613_v3, %v7089_v1 }
 0x33d   : > { %v13578_v44 = vpack.c.bf16 %v7153_v53, %v7149_v21  ;;  %5160 = vmatpush.bf16.msrb.mxu3 %v10369_v15  ;;  %v15402_v15 = vld [vmem:[#allocation70_spill] sm:$0xff] }
 0x33e   : > { %4908 = vmatmul.bf16.gmra.mxu1 %v15398_v36  ;;  %4957 = vmatmul.bf16.gmra.mxu2 %v15399_v54 }
 0x33f   : > { %15400 = vst [vmem:[#allocation135_spill] sm:$0xff] %v13578_v44  ;;  %v4615_v18 = vpop.f32.mrf.mxu3 }
 0x340   : > { %v4616_v50 = vadd.f32 %v4615_v18, %v13452_v62  ;;  %v15403_v18 = vld [vmem:[#allocation71_spill] sm:$0xff] }
 0x341   : > { %v4762_v25 = vpop.f32.mrf.mxu2  ;;  %v4666_v63 = vpop.f32.mrf.mxu0 }
 0x342   : > { %v13581_v20 = vadd.f32 %v4762_v25, %v4714_v46  ;;  %v4667_v0 = vadd.f32 %v4666_v63, %v13454_v17  ;;  %v7093_v54 = vmul.f32 %v13468_v14, %v4616_v50  ;;  %vm7028_vm14 = vcmp.ge.f32.partialorder %v4616_v50, 0.0  ;;  %v15401_v46 = vld [vmem:[#allocation69_spill] sm:$0xff]  ;;  %v15404_v63 = vld [vmem:[#allocation72_spill] sm:$0xff] }
 0x343   : > { %v4715_v2 = vpop.f32.mrf.mxu1 }
 0x344   : > { %v4716_v3 = vadd.f32 %v4715_v2, %v4667_v0  ;;  %v7157_v17 = vsel %vm7028_vm14, %v4616_v50, %v7093_v54  ;;  %v11637_v0 = vld [vmem:[#allocation7 + $0xba4] sm:$0xf]  ;;  %v10350_v2 = vld [vmem:[#allocation7 + $0xbb0] sm:$0xf0] }
 0x347   : > { %v4617_v1 = vpop.f32.mrf.mxu3 }
 0x348   : > { %v4618_v21 = vadd.f32 %v4617_v1, %v13462_v41  ;;  %v10353_v1 = vor.u32 %v11637_v0, %v10350_v2  ;;  %v15407_v0 = vld [vmem:[#allocation74_spill] sm:$0xff]  ;;  %v15409_v2 = vld [vmem:[#allocation76_spill] sm:$0xff] }
 0x349   : > { %v4764_v53 = vpop.f32.mrf.mxu2  ;;  %v4825_v37 = vpop.f32.mrf.mxu0 }
 0x34a   : > { %v13586_v44 = vadd.f32 %v4764_v53, %v4716_v3  ;;  %vm7032_vm15 = vcmp.ge.f32.partialorder %v4618_v21, 0.0  ;;  %v7097_v62 = vmul.f32 %v13468_v14, %v4618_v21  ;;  %5161 = vmatpush.bf16.msrb.mxu3 %v10353_v1 }
 0x34b   : > { %v4874_v25 = vpop.f32.mrf.mxu1 }
 0x34c   : > { %4971 = vmatmul.bf16.vlgmr.msra.gmra.mxu3 %v15401_v46  ;;  %5020 = vmatmul.bf16.vlgmr.msra.gmra.mxu0 %v15402_v15  ;;  %v7161_v4 = vsel %vm7032_vm15, %v4618_v21, %v7097_v62 }
 0x34d   : > { %v13593_v41 = vpack.c.bf16 %v7161_v4, %v7157_v17 }
 0x34e   : > { %5069 = vmatmul.bf16.vlgmr.msra.gmra.mxu1 %v15403_v18  ;;  %5118 = vmatmul.bf16.vlgmr.msra.gmra.mxu2 %v15404_v63  ;;  %v15406_v18 = vld [vmem:[#allocation73_spill] sm:$0xff] }
 0x34f   : > { %15405 = vst [vmem:[#allocation136_spill] sm:$0xff] %v13593_v41  ;;  %v4776_v3 = vpop.f32.mrf.mxu3 }
 0x350   : > { %v4777_v53 = vadd.f32 %v4776_v3, %v13465_v57  ;;  %v15408_v57 = vld [vmem:[#allocation75_spill] sm:$0xff] }
 0x351   : > { %v4923_v36 = vpop.f32.mrf.mxu2  ;;  %v4827_v38 = vpop.f32.mrf.mxu0 }
 0x352   : > { %v4826_v46 = vadd.f32 %v4825_v37, %v4777_v53 }
 0x353   : > { %v4876_v56 = vpop.f32.mrf.mxu1 }
 0x354   : > { %v4875_v15 = vadd.f32 %v4874_v25, %v4826_v46  ;;  %v10334_v25 = vld [vmem:[#allocation7 + $0xb90] sm:$0xf0] }
 0x356   : > { %v13596_v54 = vadd.f32 %v4923_v36, %v4875_v15  ;;  %v11633_v36 = vld [vmem:[#allocation7 + $0xb84] sm:$0xf] }
 0x357   : > { %v4778_v50 = vpop.f32.mrf.mxu3  ;;  %v10337_v15 = vor.u32 %v11633_v36, %v10334_v25  ;;  %v15411_v36 = vld [vmem:[#allocation78_spill] sm:$0xff]  ;;  %v15413_v25 = vld [vmem:[#allocation80_spill] sm:$0xff] }
 0x358   : > { %v4779_v21 = vadd.f32 %v4778_v50, %v13472_v58 }
 0x359   : > { %v4925_v62 = vpop.f32.mrf.mxu2  ;;  %v4830_v17 = vpop.f32.mrf.mxu0  ;;  %5162 = vmatpush.bf16.msrb.mxu3 %v10337_v15 }
 0x35a   : > { %v4828_v4 = vadd.f32 %v4827_v38, %v4779_v21 }
 0x35b   : > { %v4879_v41 = vpop.f32.mrf.mxu1 }
 0x35c   : > { %v4877_v63 = vadd.f32 %v4876_v56, %v4828_v4  ;;  %4976 = vmatmul.bf16.gmra.mxu3 %v15406_v18  ;;  %5025 = vmatmul.bf16.gmra.mxu0 %v15407_v0  ;;  %v15410_v18 = vld [vmem:[#allocation77_spill] sm:$0xff] }
 0x35e   : > { %5074 = vmatmul.bf16.gmra.mxu1 %v15408_v57  ;;  %5123 = vmatmul.bf16.gmra.mxu2 %v15409_v2  ;;  %v13603_v37 = vadd.f32 %v4925_v62, %v4877_v63 }
 0x35f   : > { %v4781_v46 = vpop.f32.mrf.mxu3 }
 0x360   : > { %v4782_v58 = vadd.f32 %v4781_v46, %v13483_v61  ;;  %v15412_v61 = vld [vmem:[#allocation79_spill] sm:$0xff] }
 0x361   : > { %v4928_v3 = vpop.f32.mrf.mxu2  ;;  %v4832_v38 = vpop.f32.mrf.mxu0  ;;  %v10318_v46 = vld [vmem:[#allocation7 + $0xb70] sm:$0xf0] }
 0x362   : > { %v4831_v56 = vadd.f32 %v4830_v17, %v4782_v58 }
 0x363   : > { %v4881_v1 = vpop.f32.mrf.mxu1 }
 0x364   : > { %v4880_v53 = vadd.f32 %v4879_v41, %v4831_v56  ;;  %v11629_v41 = vld [vmem:[#allocation7 + $0xb64] sm:$0xf] }
 0x365   : > { %v10321_v58 = vor.u32 %v11629_v41, %v10318_v46  ;;  %v15415_v41 = vld [vmem:[#allocation82_spill] sm:$0xff]  ;;  %v15417_v46 = vld [vmem:[#allocation84_spill] sm:$0xff] }
 0x366   : > { %v13606_v50 = vadd.f32 %v4928_v3, %v4880_v53 }
 0x367   : > { %v4783_v21 = vpop.f32.mrf.mxu3  ;;  %5163 = vmatpush.bf16.msrb.mxu3 %v10321_v58 }
 0x368   : > { %v4784_v4 = vadd.f32 %v4783_v21, %v13488_v55 }
 0x369   : > { %v4930_v2 = vpop.f32.mrf.mxu2  ;;  %v4835_v63 = vpop.f32.mrf.mxu0 }
 0x36a   : > { %v4833_v62 = vadd.f32 %v4832_v38, %v4784_v4 }
 0x36b   : > { %v4884_v57 = vpop.f32.mrf.mxu1 }
 0x36c   : > { %v4882_v0 = vadd.f32 %v4881_v1, %v4833_v62  ;;  %4981 = vmatmul.bf16.gmra.mxu3 %v15410_v18  ;;  %5030 = vmatmul.bf16.gmra.mxu0 %v15411_v36  ;;  %v15414_v18 = vld [vmem:[#allocation81_spill] sm:$0xff] }
 0x36e   : > { %5079 = vmatmul.bf16.gmra.mxu1 %v15412_v61  ;;  %5128 = vmatmul.bf16.gmra.mxu2 %v15413_v25  ;;  %v13613_v17 = vadd.f32 %v4930_v2, %v4882_v0 }
 0x36f   : > { %v4786_v15 = vpop.f32.mrf.mxu3 }
 0x370   : > { %v4787_v55 = vadd.f32 %v4786_v15, %v13499_v35  ;;  %v15416_v35 = vld [vmem:[#allocation83_spill] sm:$0xff] }
 0x371   : > { %v4933_v3 = vpop.f32.mrf.mxu2  ;;  %v4837_v38 = vpop.f32.mrf.mxu0  ;;  %v10302_v15 = vld [vmem:[#allocation7 + $0xb50] sm:$0xf0] }
 0x372   : > { %v4836_v56 = vadd.f32 %v4835_v63, %v4787_v55 }
 0x373   : > { %v4886_v1 = vpop.f32.mrf.mxu1 }
 0x374   : > { %v4885_v53 = vadd.f32 %v4884_v57, %v4836_v56  ;;  %v11625_v57 = vld [vmem:[#allocation7 + $0xb44] sm:$0xf] }
 0x375   : > { %v10305_v55 = vor.u32 %v11625_v57, %v10302_v15  ;;  %v11709_v57 = vld [vmem:[#allocation7 + $0xde4] sm:$0xf] }
 0x376   : > { %v13616_v21 = vadd.f32 %v4933_v3, %v4885_v53 }
 0x377   : > { %v4788_v4 = vpop.f32.mrf.mxu3  ;;  %5164 = vmatpush.bf16.msrb.mxu3 %v10305_v55  ;;  %v10638_v55 = vld [vmem:[#allocation7 + $0xdf0] sm:$0xf0] }
 0x378   : > { %v4789_v62 = vadd.f32 %v4788_v4, %v13504_v34 }
 0x379   : > { %v4935_v25 = vpop.f32.mrf.mxu2  ;;  %v4840_v0 = vpop.f32.mrf.mxu0 }
 0x37a   : > { %v4838_v2 = vadd.f32 %v4837_v38, %v4789_v62 }
 0x37b   : > { %v4889_v61 = vpop.f32.mrf.mxu1 }
 0x37c   : > { %v4887_v36 = vadd.f32 %v4886_v1, %v4838_v2  ;;  %4986 = vmatmul.bf16.gmra.mxu3 %v15414_v18  ;;  %5035 = vmatmul.bf16.gmra.mxu0 %v15415_v41  ;;  %v11677_v41 = vld [vmem:[#allocation7 + $0xce4] sm:$0xf]  ;;  %v10510_v18 = vld [vmem:[#allocation7 + $0xcf0] sm:$0xf0] }
 0x37e   : > { %5084 = vmatmul.bf16.gmra.mxu1 %v15416_v35  ;;  %5133 = vmatmul.bf16.gmra.mxu2 %v15417_v46  ;;  %v13623_v63 = vadd.f32 %v4935_v25, %v4887_v36 }
 0x37f   : > { %v4791_v58 = vpop.f32.mrf.mxu3 }
 0x380   : > { %v4792_v34 = vadd.f32 %v4791_v58, %v13515_v51  ;;  %v15418_v51 = vld [vmem:[#allocation85_spill] sm:$0xff]  ;;  %v15419_v58 = vld [vmem:[#allocation86_spill] sm:$0xff] }
 0x381   : > { %v4938_v3 = vpop.f32.mrf.mxu2  ;;  %v4842_v38 = vpop.f32.mrf.mxu0 }
 0x382   : > { %v4841_v56 = vadd.f32 %v4840_v0, %v4792_v34  ;;  %v10513_v0 = vor.u32 %v11677_v41, %v10510_v18  ;;  %v10766_v34 = vld [vmem:[#allocation7 + $0xef0] sm:$0xf0]  ;;  %v11705_v41 = vld [vmem:[#allocation7 + $0xdc4] sm:$0xf] }
 0x383   : > { %v4891_v1 = vpop.f32.mrf.mxu1  ;;  %v10494_v18 = vld [vmem:[#allocation7 + $0xcd0] sm:$0xf0] }
 0x384   : > { %v4890_v53 = vadd.f32 %v4889_v61, %v4841_v56  ;;  %v11741_v61 = vld [vmem:[#allocation7 + $0xee4] sm:$0xf]  ;;  %v15421_v56 = vld [vmem:[#allocation88_spill] sm:$0xff]  ;;  %5208 = vmatpush.bf16.msrb.mxu0 %v10513_v0 }
 0x386   : > { %v13626_v4 = vadd.f32 %v4938_v3, %v4890_v53  ;;  %v15420_v3 = vld [vmem:[#allocation87_spill] sm:$0xff]  ;;  %v10769_v53 = vor.u32 %v11741_v61, %v10766_v34  ;;  %v11669_v34 = vld [vmem:[#allocation7 + $0xca4] sm:$0xf] }
 0x387   : > { %v4793_v62 = vpop.f32.mrf.mxu3 }
 0x388   : > { %v4794_v2 = vadd.f32 %v4793_v62, %v13520_v59  ;;  %v10641_v59 = vor.u32 %v11709_v57, %v10638_v55  ;;  %v11621_v62 = vld [vmem:[#allocation7 + $0xb24] sm:$0xf]  ;;  %5306 = vmatpush.bf16.msrb.mxu2 %v10769_v53  ;;  %v10750_v57 = vld [vmem:[#allocation7 + $0xed0] sm:$0xf0] }
 0x389   : > { %v4940_v46 = vpop.f32.mrf.mxu2  ;;  %v4845_v36 = vpop.f32.mrf.mxu0  ;;  %v11701_v53 = vld [vmem:[#allocation7 + $0xda4] sm:$0xf] }
 0x38a   : > { %v4843_v25 = vadd.f32 %v4842_v38, %v4794_v2  ;;  %v10286_v2 = vld [vmem:[#allocation7 + $0xb30] sm:$0xf0]  ;;  %5257 = vmatpush.bf16.msrb.mxu1 %v10641_v59 }
 0x38b   : > { %v4894_v35 = vpop.f32.mrf.mxu1  ;;  %v10478_v59 = vld [vmem:[#allocation7 + $0xcb0] sm:$0xf0] }
 0x38c   : > { %v4892_v15 = vadd.f32 %v4891_v1, %v4843_v25  ;;  %4991 = vmatmul.bf16.gmra.mxu3 %v15418_v51  ;;  %5040 = vmatmul.bf16.gmra.mxu0 %v15419_v58  ;;  %v10289_v25 = vor.u32 %v11621_v62, %v10286_v2  ;;  %v11673_v58 = vld [vmem:[#allocation7 + $0xcc4] sm:$0xf]  ;;  %v10481_v2 = vor.u32 %v11669_v34, %v10478_v59 }
 0x38e   : > { %5089 = vmatmul.bf16.gmra.mxu1 %v15420_v3  ;;  %5138 = vmatmul.bf16.gmra.mxu2 %v15421_v56  ;;  %v13633_v38 = vadd.f32 %v4940_v46, %v4892_v15  ;;  %v10497_v3 = vor.u32 %v11673_v58, %v10494_v18  ;;  %v11737_v56 = vld [vmem:[#allocation7 + $0xec4] sm:$0xf]  ;;  %v10625_v46 = vor.u32 %v11705_v41, %v10622_v47  ;;  %v10734_v58 = vld [vmem:[#allocation7 + $0xeb0] sm:$0xf0] }
 0x38f   : > { %v4796_v1 = vpop.f32.mrf.mxu3  ;;  %5165 = vmatpush.bf16.msrb.mxu3 %v10289_v25  ;;  %v10753_v15 = vor.u32 %v11737_v56, %v10750_v57  ;;  %v11729_v57 = vld [vmem:[#allocation7 + $0xe84] sm:$0xf] }
 0x390   : > { %v4797_v51 = vadd.f32 %v4796_v1, %v13531_v43  ;;  %5209 = vmatpush.bf16.msrb.mxu0 %v10497_v3  ;;  %5258 = vmatpush.bf16.msrb.mxu1 %v10625_v46  ;;  %v10606_v43 = vld [vmem:[#allocation7 + $0xdb0] sm:$0xf0]  ;;  %v11733_v1 = vld [vmem:[#allocation7 + $0xea4] sm:$0xf] }
 0x391   : > { %v4943_v28 = vpop.f32.mrf.mxu2  ;;  %v4847_v55 = vpop.f32.mrf.mxu0  ;;  %5307 = vmatpush.bf16.msrb.mxu2 %v10753_v15  ;;  %v10609_v18 = vor.u32 %v11701_v53, %v10606_v43  ;;  %v10737_v40 = vor.u32 %v11733_v1, %v10734_v58  ;;  %v11697_v3 = vld [vmem:[#allocation7 + $0xd84] sm:$0xf]  ;;  %v10718_v46 = vld [vmem:[#allocation7 + $0xe90] sm:$0xf0] }
 0x392   : > { %v4846_v61 = vadd.f32 %v4845_v36, %v4797_v51  ;;  %v11665_v36 = vld [vmem:[#allocation7 + $0xc84] sm:$0xf]  ;;  %v10462_v51 = vld [vmem:[#allocation7 + $0xc90] sm:$0xf0]  ;;  %v10721_v34 = vor.u32 %v11729_v57, %v10718_v46 }
 0x393   : > { %v4896_v0 = vpop.f32.mrf.mxu1  ;;  %v10465_v41 = vor.u32 %v11665_v36, %v10462_v51  ;;  %v11661_v53 = vld [vmem:[#allocation7 + $0xc64] sm:$0xf]  ;;  %v10574_v58 = vld [vmem:[#allocation7 + $0xd70] sm:$0xf0]  ;;  %v15425_v51 = vld [vmem:[#allocation92_spill] sm:$0xff] }
 0x394   : > { %v4895_v62 = vadd.f32 %v4894_v35, %v4846_v61  ;;  %5210 = vmatpush.bf16.msrb.mxu0 %v10481_v2  ;;  %5259 = vmatpush.bf16.msrb.mxu1 %v10609_v18  ;;  %v10590_v35 = vld [vmem:[#allocation7 + $0xd90] sm:$0xf0]  ;;  %v15422_v43 = vld [vmem:[#allocation89_spill] sm:$0xff] }
 0x395   : > { %5308 = vmatpush.bf16.msrb.mxu2 %v10737_v40  ;;  %v10593_v61 = vor.u32 %v11697_v3, %v10590_v35  ;;  %v10446_v40 = vld [vmem:[#allocation7 + $0xc70] sm:$0xf0]  ;;  %v11725_v18 = vld [vmem:[#allocation7 + $0xe64] sm:$0xf] }
 0x396   : > { %v13636_v7 = vadd.f32 %v4943_v28, %v4895_v62  ;;  %v11693_v62 = vld [vmem:[#allocation7 + $0xd64] sm:$0xf]  ;;  %v10449_v1 = vor.u32 %v11661_v53, %v10446_v40  ;;  %v15424_v36 = vld [vmem:[#allocation91_spill] sm:$0xff] }
 0x397   : > { %v4798_v47 = vpop.f32.mrf.mxu3  ;;  %v10270_v35 = vld [vmem:[#allocation7 + $0xb10] sm:$0xf0]  ;;  %v11657_v46 = vld [vmem:[#allocation7 + $0xc44] sm:$0xf] }
 0x398   : > { %v4799_v56 = vadd.f32 %v4798_v47, %v13536_v5  ;;  %5211 = vmatpush.bf16.msrb.mxu0 %v10465_v41  ;;  %5260 = vmatpush.bf16.msrb.mxu1 %v10593_v61  ;;  %v15423_v5 = vld [vmem:[#allocation90_spill] sm:$0xff]  ;;  %v10702_v47 = vld [vmem:[#allocation7 + $0xe70] sm:$0xf0]  ;;  %v11617_v41 = vld [vmem:[#allocation7 + $0xb04] sm:$0xf] }
 0x399   : > { %v4945_v25 = vpop.f32.mrf.mxu2  ;;  %v4850_v15 = vpop.f32.mrf.mxu0  ;;  %5309 = vmatpush.bf16.msrb.mxu2 %v10721_v34  ;;  %v10705_v3 = vor.u32 %v11725_v18, %v10702_v47  ;;  %v10273_v57 = vor.u32 %v11617_v41, %v10270_v35  ;;  %v10430_v61 = vld [vmem:[#allocation7 + $0xc50] sm:$0xf0]  ;;  %v11689_v34 = vld [vmem:[#allocation7 + $0xd44] sm:$0xf] }
 0x39a   : > { %v4848_v59 = vadd.f32 %v4847_v55, %v4799_v56  ;;  %v10577_v55 = vor.u32 %v11693_v62, %v10574_v58  ;;  %v10433_v40 = vor.u32 %v11657_v46, %v10430_v61  ;;  %v10686_v62 = vld [vmem:[#allocation7 + $0xe50] sm:$0xf0]  ;;  %v11653_v47 = vld [vmem:[#allocation7 + $0xc24] sm:$0xf] }
 0x39b   : > { %v4899_v28 = vpop.f32.mrf.mxu1  ;;  %5166 = vmatpush.bf16.msrb.mxu3 %v10273_v57  ;;  %v10670_v46 = vld [vmem:[#allocation7 + $0xe30] sm:$0xf0]  ;;  %v11681_v57 = vld [vmem:[#allocation7 + $0xd04] sm:$0xf] }
 0x39c   : > { %v4897_v2 = vadd.f32 %v4896_v0, %v4848_v59  ;;  %4996 = vmatmul.bf16.gmra.mxu3 %v15422_v43  ;;  %5045 = vmatmul.bf16.gmra.mxu0 %v15423_v5 }
 0x39d   : > { %5212 = vmatpush.bf16.msrb.mxu0 %v10449_v1  ;;  %5261 = vmatpush.bf16.msrb.mxu1 %v10577_v55  ;;  %v10414_v55 = vld [vmem:[#allocation7 + $0xc30] sm:$0xf0] }
 0x39e   : > { %5094 = vmatmul.bf16.gmra.mxu1 %v15424_v36  ;;  %5143 = vmatmul.bf16.gmra.mxu2 %v15425_v51  ;;  %v13643_v56 = vadd.f32 %v4945_v25, %v4897_v2  ;;  %v10558_v36 = vld [vmem:[#allocation7 + $0xd50] sm:$0xf0]  ;;  %v11721_v51 = vld [vmem:[#allocation7 + $0xe44] sm:$0xf]  ;;  %v10417_v35 = vor.u32 %v11653_v47, %v10414_v55 }
 0x39f   : > { %v4801_v0 = vpop.f32.mrf.mxu3  ;;  %5310 = vmatpush.bf16.msrb.mxu2 %v10705_v3  ;;  %v10561_v25 = vor.u32 %v11689_v34, %v10558_v36  ;;  %v10689_v2 = vor.u32 %v11721_v51, %v10686_v62  ;;  %v11685_v3 = vld [vmem:[#allocation7 + $0xd24] sm:$0xf]  ;;  %v10398_v51 = vld [vmem:[#allocation7 + $0xc10] sm:$0xf0] }
 0x3a0   : > { %v4802_v59 = vadd.f32 %v4801_v0, %v13549_v10  ;;  %v10542_v10 = vld [vmem:[#allocation7 + $0xd30] sm:$0xf0]  ;;  %v11717_v0 = vld [vmem:[#allocation7 + $0xe24] sm:$0xf] }
 0x3a1   : > { %v4948_v53 = vpop.f32.mrf.mxu2  ;;  %v4852_v58 = vpop.f32.mrf.mxu0  ;;  %5213 = vmatpush.bf16.msrb.mxu0 %v10433_v40  ;;  %5262 = vmatpush.bf16.msrb.mxu1 %v10561_v25  ;;  %v10545_v61 = vor.u32 %v11685_v3, %v10542_v10  ;;  %v10673_v5 = vor.u32 %v11717_v0, %v10670_v46  ;;  %v11713_v62 = vld [vmem:[#allocation7 + $0xe04] sm:$0xf]  ;;  %v10654_v25 = vld [vmem:[#allocation7 + $0xe10] sm:$0xf0] }
 0x3a2   : > { %v4851_v18 = vadd.f32 %v4850_v15, %v4802_v59  ;;  %v11649_v15 = vld [vmem:[#allocation7 + $0xc04] sm:$0xf]  ;;  %v10657_v47 = vor.u32 %v11713_v62, %v10654_v25  ;;  %v10894_v46 = vld [vmem:[#allocation7 + $0xff0] sm:$0xf0] }
 0x3a3   : > { %v4901_v1 = vpop.f32.mrf.mxu1  ;;  %5311 = vmatpush.bf16.msrb.mxu2 %v10689_v2  ;;  %v10401_v40 = vor.u32 %v11649_v15, %v10398_v51  ;;  %v11773_v0 = vld [vmem:[#allocation7 + $0xfe4] sm:$0xf] }
 0x3a4   : > { %v4900_v41 = vadd.f32 %v4899_v28, %v4851_v18  ;;  %v10526_v28 = vld [vmem:[#allocation7 + $0xd10] sm:$0xf0] }
 0x3a5   : > { %5214 = vmatpush.bf16.msrb.mxu0 %v10417_v35  ;;  %5263 = vmatpush.bf16.msrb.mxu1 %v10545_v61  ;;  %v10529_v18 = vor.u32 %v11681_v57, %v10526_v28  ;;  %v15428_v35 = vld [vmem:[#allocation95_spill] sm:$0xff] }
 0x3a6   : > { %v13646_v43 = vadd.f32 %v4948_v53, %v4900_v41  ;;  %v15427_v41 = vld [vmem:[#allocation94_spill] sm:$0xff] }
 0x3a7   : > { %v4803_v36 = vpop.f32.mrf.mxu3  ;;  %5312 = vmatpush.bf16.msrb.mxu2 %v10673_v5  ;;  %v15426_v5 = vld [vmem:[#allocation93_spill] sm:$0xff] }
 0x3a8   : > { %v4804_v34 = vadd.f32 %v4803_v36, %v13554_v22  ;;  %v15429_v22 = vld [vmem:[#allocation96_spill] sm:$0xff]  ;;  %v10897_v36 = vor.u32 %v11773_v0, %v10894_v46  ;;  %v15431_v0 = vld [vmem:[#allocation98_spill] sm:$0xff] }
 0x3a9   : > { %v4950_v59 = vpop.f32.mrf.mxu2  ;;  %v4855_v2 = vpop.f32.mrf.mxu0  ;;  %5215 = vmatpush.bf16.msrb.mxu0 %v10401_v40  ;;  %5264 = vmatpush.bf16.msrb.mxu1 %v10529_v18  ;;  %v15433_v46 = vld [vmem:[#allocation100_spill] sm:$0xff] }
 0x3aa   : > { %v4853_v55 = vadd.f32 %v4852_v58, %v4804_v34  ;;  %5355 = vmatpush.bf16.msra.mxu3 %v10897_v36 }
 0x3ab   : > { %v4904_v53 = vpop.f32.mrf.mxu1  ;;  %5313 = vmatpush.bf16.msrb.mxu2 %v10657_v47 }
 0x3ac   : > { %v4902_v3 = vadd.f32 %v4901_v1, %v4853_v55  ;;  %5001 = vmatmul.bf16.gmra.mxu3 %v15426_v5  ;;  %5050 = vmatmul.bf16.gmra.mxu0 %v15427_v41 }
 0x3ae   : > { %5099 = vmatmul.bf16.gmra.mxu1 %v15428_v35  ;;  %5148 = vmatmul.bf16.gmra.mxu2 %v15429_v22  ;;  %v13653_v10 = vadd.f32 %v4950_v59, %v4902_v3  ;;  %v15430_v3 = vld [vmem:[#allocation97_spill] sm:$0xff]  ;;  %v11324_v35 = vld [vmem:[#allocation7 + $0x1d4] sm:$0xf0] }
 0x3af   : > { %v4806_v61 = vpop.f32.mrf.mxu3 }
 0x3b0   : > { %v4807_v58 = vadd.f32 %v4806_v61, %v13565_v49  ;;  %v15432_v49 = vld [vmem:[#allocation99_spill] sm:$0xff] }
 0x3b1   : > { %v4953_v15 = vpop.f32.mrf.mxu2  ;;  %v4857_v51 = vpop.f32.mrf.mxu0  ;;  %v10878_v61 = vld [vmem:[#allocation7 + $0xfd0] sm:$0xf0] }
 0x3b2   : > { %v4856_v1 = vadd.f32 %v4855_v2, %v4807_v58 }
 0x3b3   : > { %v4906_v57 = vpop.f32.mrf.mxu1 }
 0x3b4   : > { %v4905_v34 = vadd.f32 %v4904_v53, %v4856_v1  ;;  %v11769_v53 = vld [vmem:[#allocation7 + $0xfc4] sm:$0xf] }
 0x3b5   : > { %v10881_v58 = vor.u32 %v11769_v53, %v10878_v61  ;;  %v15435_v53 = vld [vmem:[#allocation102_spill] sm:$0xff]  ;;  %v15437_v61 = vld [vmem:[#allocation104_spill] sm:$0xff] }
 0x3b6   : > { %v13656_v40 = vadd.f32 %v4953_v15, %v4905_v34 }
 0x3b7   : > { %v4808_v28 = vpop.f32.mrf.mxu3  ;;  %5356 = vmatpush.bf16.msra.mxu3 %v10881_v58 }
 0x3b8   : > { %v4809_v62 = vadd.f32 %v4808_v28, %v13570_v33 }
 0x3b9   : > { %v4955_v25 = vpop.f32.mrf.mxu2  ;;  %v4860_v59 = vpop.f32.mrf.mxu0 }
 0x3ba   : > { %v4858_v18 = vadd.f32 %v4857_v51, %v4809_v62 }
 0x3bb   : > { %v4909_v47 = vpop.f32.mrf.mxu1 }
 0x3bc   : > { %v4907_v55 = vadd.f32 %v4906_v57, %v4858_v18  ;;  %5006 = vmatmul.bf16.gmra.mxu3 %v15430_v3  ;;  %5055 = vmatmul.bf16.gmra.mxu0 %v15431_v0  ;;  %v15434_v3 = vld [vmem:[#allocation101_spill] sm:$0xff] }
 0x3be   : > { %5104 = vmatmul.bf16.gmra.mxu1 %v15432_v49  ;;  %5153 = vmatmul.bf16.gmra.mxu2 %v15433_v46  ;;  %v13663_v2 = vadd.f32 %v4955_v25, %v4907_v55 }
 0x3bf   : > { %v4811_v36 = vpop.f32.mrf.mxu3 }
 0x3c0   : > { %v4812_v33 = vadd.f32 %v4811_v36, %v13581_v20  ;;  %v15436_v20 = vld [vmem:[#allocation103_spill] sm:$0xff] }
 0x3c1   : > { %v4958_v15 = vpop.f32.mrf.mxu2  ;;  %v4862_v51 = vpop.f32.mrf.mxu0  ;;  %v10862_v36 = vld [vmem:[#allocation7 + $0xfb0] sm:$0xf0] }
 0x3c2   : > { %v4861_v1 = vadd.f32 %v4860_v59, %v4812_v33 }
 0x3c3   : > { %v4911_v57 = vpop.f32.mrf.mxu1 }
 0x3c4   : > { %v4910_v34 = vadd.f32 %v4909_v47, %v4861_v1  ;;  %v11765_v47 = vld [vmem:[#allocation7 + $0xfa4] sm:$0xf] }
 0x3c5   : > { %v10865_v33 = vor.u32 %v11765_v47, %v10862_v36  ;;  %v15439_v47 = vld [vmem:[#allocation106_spill] sm:$0xff]  ;;  %v15441_v36 = vld [vmem:[#allocation108_spill] sm:$0xff] }
 0x3c6   : > { %v13666_v28 = vadd.f32 %v4958_v15, %v4910_v34 }
 0x3c7   : > { %v4813_v62 = vpop.f32.mrf.mxu3  ;;  %5357 = vmatpush.bf16.msra.mxu3 %v10865_v33 }
 0x3c8   : > { %v4814_v18 = vadd.f32 %v4813_v62, %v13586_v44 }
 0x3c9   : > { %v4960_v46 = vpop.f32.mrf.mxu2  ;;  %v5021_v25 = vpop.f32.mrf.mxu0 }
 0x3ca   : > { %v4863_v55 = vadd.f32 %v4862_v51, %v4814_v18 }
 0x3cb   : > { %v5070_v49 = vpop.f32.mrf.mxu1 }
 0x3cc   : > { %v4912_v0 = vadd.f32 %v4911_v57, %v4863_v55  ;;  %5167 = vmatmul.bf16.vlgmr.msrb.gmra.mxu3 %v15434_v3  ;;  %5216 = vmatmul.bf16.vlgmr.msrb.gmra.mxu0 %v15435_v53  ;;  %v15438_v3 = vld [vmem:[#allocation105_spill] sm:$0xff] }
 0x3ce   : > { %5265 = vmatmul.bf16.vlgmr.msrb.gmra.mxu1 %v15436_v20  ;;  %5314 = vmatmul.bf16.vlgmr.msrb.gmra.mxu2 %v15437_v61  ;;  %v13673_v59 = vadd.f32 %v4960_v46, %v4912_v0 }
 0x3cf   : > { %v4972_v58 = vpop.f32.mrf.mxu3 }
 0x3d0   : > { %v4973_v44 = vadd.f32 %v4972_v58, %v13596_v54  ;;  %v15440_v54 = vld [vmem:[#allocation107_spill] sm:$0xff] }
 0x3d1   : > { %v5119_v15 = vpop.f32.mrf.mxu2  ;;  %v5023_v51 = vpop.f32.mrf.mxu0  ;;  %v10846_v58 = vld [vmem:[#allocation7 + $0xf90] sm:$0xf0] }
 0x3d2   : > { %v5022_v1 = vadd.f32 %v5021_v25, %v4973_v44 }
 0x3d3   : > { %v5072_v57 = vpop.f32.mrf.mxu1 }
 0x3d4   : > { %v5071_v34 = vadd.f32 %v5070_v49, %v5022_v1  ;;  %v11761_v49 = vld [vmem:[#allocation7 + $0xf84] sm:$0xf] }
 0x3d5   : > { %v10849_v44 = vor.u32 %v11761_v49, %v10846_v58  ;;  %v15443_v49 = vld [vmem:[#allocation110_spill] sm:$0xff]  ;;  %v15445_v58 = vld [vmem:[#allocation112_spill] sm:$0xff] }
 0x3d6   : > { %v13676_v62 = vadd.f32 %v5119_v15, %v5071_v34 }
 0x3d7   : > { %v4974_v18 = vpop.f32.mrf.mxu3  ;;  %5358 = vmatpush.bf16.msra.mxu3 %v10849_v44 }
 0x3d8   : > { %v4975_v55 = vadd.f32 %v4974_v18, %v13603_v37 }
 0x3d9   : > { %v5121_v61 = vpop.f32.mrf.mxu2  ;;  %v5026_v0 = vpop.f32.mrf.mxu0 }
 0x3da   : > { %v5024_v46 = vadd.f32 %v5023_v51, %v4975_v55 }
 0x3db   : > { %v5075_v20 = vpop.f32.mrf.mxu1 }
 0x3dc   : > { %v5073_v53 = vadd.f32 %v5072_v57, %v5024_v46  ;;  %5172 = vmatmul.bf16.gmra.mxu3 %v15438_v3  ;;  %5221 = vmatmul.bf16.gmra.mxu0 %v15439_v47  ;;  %v15442_v3 = vld [vmem:[#allocation109_spill] sm:$0xff] }
 0x3de   : > { %5270 = vmatmul.bf16.gmra.mxu1 %v15440_v54  ;;  %5319 = vmatmul.bf16.gmra.mxu2 %v15441_v36  ;;  %v13683_v25 = vadd.f32 %v5121_v61, %v5073_v53 }
 0x3df   : > { %v4977_v33 = vpop.f32.mrf.mxu3 }
 0x3e0   : > { %v4978_v37 = vadd.f32 %v4977_v33, %v13606_v50  ;;  %v15444_v50 = vld [vmem:[#allocation111_spill] sm:$0xff] }
 0x3e1   : > { %v5124_v15 = vpop.f32.mrf.mxu2  ;;  %v5028_v51 = vpop.f32.mrf.mxu0  ;;  %v10830_v33 = vld [vmem:[#allocation7 + $0xf70] sm:$0xf0] }
 0x3e2   : > { %v5027_v1 = vadd.f32 %v5026_v0, %v4978_v37 }
 0x3e3   : > { %v5077_v57 = vpop.f32.mrf.mxu1 }
 0x3e4   : > { %v5076_v34 = vadd.f32 %v5075_v20, %v5027_v1  ;;  %v11757_v20 = vld [vmem:[#allocation7 + $0xf64] sm:$0xf] }
 0x3e5   : > { %v10833_v37 = vor.u32 %v11757_v20, %v10830_v33  ;;  %v15447_v20 = vld [vmem:[#allocation114_spill] sm:$0xff]  ;;  %v15449_v33 = vld [vmem:[#allocation116_spill] sm:$0xff] }
 0x3e6   : > { %v13686_v18 = vadd.f32 %v5124_v15, %v5076_v34 }
 0x3e7   : > { %v4979_v55 = vpop.f32.mrf.mxu3  ;;  %5359 = vmatpush.bf16.msra.mxu3 %v10833_v37 }
 0x3e8   : > { %v4980_v46 = vadd.f32 %v4979_v55, %v13613_v17 }
 0x3e9   : > { %v5126_v36 = vpop.f32.mrf.mxu2  ;;  %v5031_v53 = vpop.f32.mrf.mxu0 }
 0x3ea   : > { %v5029_v61 = vadd.f32 %v5028_v51, %v4980_v46 }
 0x3eb   : > { %v5080_v54 = vpop.f32.mrf.mxu1 }
 0x3ec   : > { %v5078_v47 = vadd.f32 %v5077_v57, %v5029_v61  ;;  %5177 = vmatmul.bf16.gmra.mxu3 %v15442_v3  ;;  %5226 = vmatmul.bf16.gmra.mxu0 %v15443_v49  ;;  %v15446_v3 = vld [vmem:[#allocation113_spill] sm:$0xff] }
 0x3ee   : > { %5275 = vmatmul.bf16.gmra.mxu1 %v15444_v50  ;;  %5324 = vmatmul.bf16.gmra.mxu2 %v15445_v58  ;;  %v13693_v0 = vadd.f32 %v5126_v36, %v5078_v47 }
 0x3ef   : > { %v4982_v44 = vpop.f32.mrf.mxu3 }
 0x3f0   : > { %v4983_v17 = vadd.f32 %v4982_v44, %v13616_v21  ;;  %v15448_v21 = vld [vmem:[#allocation115_spill] sm:$0xff] }
 0x3f1   : > { %v5129_v15 = vpop.f32.mrf.mxu2  ;;  %v5033_v51 = vpop.f32.mrf.mxu0  ;;  %v10814_v44 = vld [vmem:[#allocation7 + $0xf50] sm:$0xf0] }
 0x3f2   : > { %v5032_v1 = vadd.f32 %v5031_v53, %v4983_v17 }
 0x3f3   : > { %v5082_v57 = vpop.f32.mrf.mxu1 }
 0x3f4   : > { %v5081_v34 = vadd.f32 %v5080_v54, %v5032_v1  ;;  %v11753_v54 = vld [vmem:[#allocation7 + $0xf44] sm:$0xf] }
 0x3f5   : > { %v10817_v17 = vor.u32 %v11753_v54, %v10814_v44  ;;  %v9108_v54 = vld [vmem:[#allocation7 + $0x1e8] sm:$0xf] }
 0x3f6   : > { %v13696_v55 = vadd.f32 %v5129_v15, %v5081_v34 }
 0x3f7   : > { %v4984_v46 = vpop.f32.mrf.mxu3  ;;  %5360 = vmatpush.bf16.msra.mxu3 %v10817_v17  ;;  %v11328_v17 = vld [vmem:[#allocation7 + $0x1f4] sm:$0xf0] }
 0x3f8   : > { %v4985_v61 = vadd.f32 %v4984_v46, %v13623_v63 }
 0x3f9   : > { %v5131_v58 = vpop.f32.mrf.mxu2  ;;  %v5036_v47 = vpop.f32.mrf.mxu0 }
 0x3fa   : > { %v5034_v36 = vadd.f32 %v5033_v51, %v4985_v61 }
 0x3fb   : > { %v5085_v50 = vpop.f32.mrf.mxu1 }
 0x3fc   : > { %v5083_v49 = vadd.f32 %v5082_v57, %v5034_v36  ;;  %5182 = vmatmul.bf16.gmra.mxu3 %v15446_v3  ;;  %5231 = vmatmul.bf16.gmra.mxu0 %v15447_v20  ;;  %v8980_v20 = vld [vmem:[#allocation7 + $0xe8] sm:$0xf]  ;;  %v11296_v3 = vld [vmem:[#allocation7 + $0xf4] sm:$0xf0] }
 0x3fe   : > { %5280 = vmatmul.bf16.gmra.mxu1 %v15448_v21  ;;  %5329 = vmatmul.bf16.gmra.mxu2 %v15449_v33  ;;  %v13703_v53 = vadd.f32 %v5131_v58, %v5083_v49 }
 0x3ff   : > { %v4987_v37 = vpop.f32.mrf.mxu3 }
 0x400   : > { %v4988_v63 = vadd.f32 %v4987_v37, %v13626_v4  ;;  %v15450_v4 = vld [vmem:[#allocation117_spill] sm:$0xff]  ;;  %v15451_v37 = vld [vmem:[#allocation118_spill] sm:$0xff] }
 0x401   : > { %v5134_v15 = vpop.f32.mrf.mxu2  ;;  %v5038_v51 = vpop.f32.mrf.mxu0 }
 0x402   : > { %v5037_v1 = vadd.f32 %v5036_v47, %v4988_v63  ;;  %v8981_v47 = vor.u32 %v11296_v3, %v8980_v20  ;;  %v11360_v63 = vld [vmem:[#allocation7 + $0x2f4] sm:$0xf0]  ;;  %v9092_v20 = vld [vmem:[#allocation7 + $0x1c8] sm:$0xf] }
 0x403   : > { %v5087_v57 = vpop.f32.mrf.mxu1  ;;  %v11292_v3 = vld [vmem:[#allocation7 + $0xd4] sm:$0xf0] }
 0x404   : > { %v5086_v34 = vadd.f32 %v5085_v50, %v5037_v1  ;;  %v9236_v50 = vld [vmem:[#allocation7 + $0x2e8] sm:$0xf]  ;;  %v15453_v1 = vld [vmem:[#allocation120_spill] sm:$0xff]  ;;  %5404 = vmatpush.bf16.msra.mxu0 %v8981_v47 }
 0x406   : > { %v13706_v46 = vadd.f32 %v5134_v15, %v5086_v34  ;;  %v15452_v15 = vld [vmem:[#allocation119_spill] sm:$0xff]  ;;  %v9237_v34 = vor.u32 %v11360_v63, %v9236_v50  ;;  %v8948_v63 = vld [vmem:[#allocation7 + $0xa8] sm:$0xf] }
 0x407   : > { %v4989_v61 = vpop.f32.mrf.mxu3 }
 0x408   : > { %v4990_v36 = vadd.f32 %v4989_v61, %v13633_v38  ;;  %v9109_v38 = vor.u32 %v11328_v17, %v9108_v54  ;;  %v11749_v61 = vld [vmem:[#allocation7 + $0xf24] sm:$0xf]  ;;  %5502 = vmatpush.bf16.msra.mxu2 %v9237_v34  ;;  %v11356_v54 = vld [vmem:[#allocation7 + $0x2d4] sm:$0xf0]  ;;  %v9076_v34 = vld [vmem:[#allocation7 + $0x1a8] sm:$0xf] }
 0x409   : > { %v5136_v33 = vpop.f32.mrf.mxu2  ;;  %v5041_v49 = vpop.f32.mrf.mxu0 }
 0x40a   : > { %v5039_v58 = vadd.f32 %v5038_v51, %v4990_v36  ;;  %v10798_v36 = vld [vmem:[#allocation7 + $0xf30] sm:$0xf0]  ;;  %5453 = vmatpush.bf16.msra.mxu1 %v9109_v38  ;;  %v11288_v38 = vld [vmem:[#allocation7 + $0xb4] sm:$0xf0] }
 0x40b   : > { %v5090_v21 = vpop.f32.mrf.mxu1 }
 0x40c   : > { %v5088_v44 = vadd.f32 %v5087_v57, %v5039_v58  ;;  %5187 = vmatmul.bf16.gmra.mxu3 %v15450_v4  ;;  %5236 = vmatmul.bf16.gmra.mxu0 %v15451_v37  ;;  %v10801_v58 = vor.u32 %v11749_v61, %v10798_v36  ;;  %v8964_v37 = vld [vmem:[#allocation7 + $0xc8] sm:$0xf]  ;;  %v8949_v36 = vor.u32 %v11288_v38, %v8948_v63 }
 0x40e   : > { %5285 = vmatmul.bf16.gmra.mxu1 %v15452_v15  ;;  %5334 = vmatmul.bf16.gmra.mxu2 %v15453_v1  ;;  %v13713_v51 = vadd.f32 %v5136_v33, %v5088_v44  ;;  %v8965_v15 = vor.u32 %v11292_v3, %v8964_v37  ;;  %v9220_v1 = vld [vmem:[#allocation7 + $0x2c8] sm:$0xf]  ;;  %v9093_v33 = vor.u32 %v11324_v35, %v9092_v20  ;;  %v11352_v37 = vld [vmem:[#allocation7 + $0x2b4] sm:$0xf0] }
 0x40f   : > { %v4992_v57 = vpop.f32.mrf.mxu3  ;;  %5361 = vmatpush.bf16.msra.mxu3 %v10801_v58  ;;  %v9221_v44 = vor.u32 %v11356_v54, %v9220_v1  ;;  %v9188_v54 = vld [vmem:[#allocation7 + $0x288] sm:$0xf] }
 0x410   : > { %v4993_v4 = vadd.f32 %v4992_v57, %v13636_v7  ;;  %5405 = vmatpush.bf16.msra.mxu0 %v8965_v15  ;;  %5454 = vmatpush.bf16.msra.mxu1 %v9093_v33  ;;  %v11320_v7 = vld [vmem:[#allocation7 + $0x1b4] sm:$0xf0]  ;;  %v9204_v57 = vld [vmem:[#allocation7 + $0x2a8] sm:$0xf] }
 0x411   : > { %v5139_v22 = vpop.f32.mrf.mxu2  ;;  %v5043_v17 = vpop.f32.mrf.mxu0  ;;  %5503 = vmatpush.bf16.msra.mxu2 %v9221_v44  ;;  %v9077_v3 = vor.u32 %v11320_v7, %v9076_v34  ;;  %v9205_v41 = vor.u32 %v11352_v37, %v9204_v57  ;;  %v9060_v15 = vld [vmem:[#allocation7 + $0x188] sm:$0xf]  ;;  %v11348_v33 = vld [vmem:[#allocation7 + $0x294] sm:$0xf0]  ;;  %v15454_v7 = vld [vmem:[#allocation121_spill] sm:$0xff] }
 0x412   : > { %v5042_v50 = vadd.f32 %v5041_v49, %v4993_v4  ;;  %v8932_v49 = vld [vmem:[#allocation7 + $0x88] sm:$0xf]  ;;  %v11284_v4 = vld [vmem:[#allocation7 + $0x94] sm:$0xf0]  ;;  %v9189_v63 = vor.u32 %v11348_v33, %v9188_v54 }
 0x413   : > { %v5092_v47 = vpop.f32.mrf.mxu1  ;;  %v8933_v20 = vor.u32 %v11284_v4, %v8932_v49  ;;  %v8916_v34 = vld [vmem:[#allocation7 + $0x68] sm:$0xf]  ;;  %v11312_v37 = vld [vmem:[#allocation7 + $0x174] sm:$0xf0]  ;;  %v15456_v49 = vld [vmem:[#allocation123_spill] sm:$0xff] }
 0x414   : > { %v5091_v61 = vadd.f32 %v5090_v21, %v5042_v50  ;;  %5406 = vmatpush.bf16.msra.mxu0 %v8949_v36  ;;  %5455 = vmatpush.bf16.msra.mxu1 %v9077_v3  ;;  %v11316_v21 = vld [vmem:[#allocation7 + $0x194] sm:$0xf0]  ;;  %v9172_v3 = vld [vmem:[#allocation7 + $0x268] sm:$0xf] }
 0x415   : > { %5504 = vmatpush.bf16.msra.mxu2 %v9205_v41  ;;  %v9061_v50 = vor.u32 %v11316_v21, %v9060_v15  ;;  %v11280_v41 = vld [vmem:[#allocation7 + $0x74] sm:$0xf0]  ;;  %v10782_v21 = vld [vmem:[#allocation7 + $0xf10] sm:$0xf0]  ;;  %v8900_v33 = vld [vmem:[#allocation7 + $0x48] sm:$0xf] }
 0x416   : > { %v13716_v5 = vadd.f32 %v5139_v22, %v5091_v61  ;;  %v9044_v61 = vld [vmem:[#allocation7 + $0x168] sm:$0xf]  ;;  %v8917_v57 = vor.u32 %v11280_v41, %v8916_v34  ;;  %v15457_v4 = vld [vmem:[#allocation124_spill] sm:$0xff] }
 0x417   : > { %v4994_v35 = vpop.f32.mrf.mxu3 }
 0x418   : > { %v4995_v1 = vadd.f32 %v4994_v35, %v13643_v56  ;;  %5407 = vmatpush.bf16.msra.mxu0 %v8933_v20  ;;  %5456 = vmatpush.bf16.msra.mxu1 %v9061_v50  ;;  %v15455_v56 = vld [vmem:[#allocation122_spill] sm:$0xff]  ;;  %v11344_v35 = vld [vmem:[#allocation7 + $0x274] sm:$0xf0]  ;;  %v11745_v20 = vld [vmem:[#allocation7 + $0xf04] sm:$0xf] }
 0x419   : > { %v5141_v58 = vpop.f32.mrf.mxu2  ;;  %v5046_v44 = vpop.f32.mrf.mxu0  ;;  %5505 = vmatpush.bf16.msra.mxu2 %v9189_v63  ;;  %v9173_v15 = vor.u32 %v11344_v35, %v9172_v3  ;;  %v10785_v54 = vor.u32 %v11745_v20, %v10782_v21  ;;  %v11276_v50 = vld [vmem:[#allocation7 + $0x54] sm:$0xf0]  ;;  %v9028_v63 = vld [vmem:[#allocation7 + $0x148] sm:$0xf] }
 0x41a   : > { %v5044_v38 = vadd.f32 %v5043_v17, %v4995_v1  ;;  %v9045_v17 = vor.u32 %v11312_v37, %v9044_v61  ;;  %v8901_v41 = vor.u32 %v11276_v50, %v8900_v33  ;;  %v11340_v61 = vld [vmem:[#allocation7 + $0x254] sm:$0xf0]  ;;  %v8884_v35 = vld [vmem:[#allocation7 + $0x28] sm:$0xf] }
 0x41b   : > { %v5095_v22 = vpop.f32.mrf.mxu1  ;;  %5362 = vmatpush.bf16.msra.mxu3 %v10785_v54  ;;  %v11336_v33 = vld [vmem:[#allocation7 + $0x234] sm:$0xf0]  ;;  %v8996_v54 = vld [vmem:[#allocation7 + $0x108] sm:$0xf] }
 0x41c   : > { %v5093_v36 = vadd.f32 %v5092_v47, %v5044_v38  ;;  %5192 = vmatmul.bf16.gmra.mxu3 %v15454_v7  ;;  %5241 = vmatmul.bf16.gmra.mxu0 %v15455_v56 }
 0x41d   : > { %5408 = vmatpush.bf16.msra.mxu0 %v8917_v57  ;;  %5457 = vmatpush.bf16.msra.mxu1 %v9045_v17  ;;  %v11272_v17 = vld [vmem:[#allocation7 + $0x34] sm:$0xf0] }
 0x41e   : > { %5290 = vmatmul.bf16.gmra.mxu1 %v15456_v49  ;;  %5339 = vmatmul.bf16.gmra.mxu2 %v15457_v4  ;;  %v13723_v1 = vadd.f32 %v5141_v58, %v5093_v36  ;;  %v11308_v49 = vld [vmem:[#allocation7 + $0x154] sm:$0xf0]  ;;  %v9156_v4 = vld [vmem:[#allocation7 + $0x248] sm:$0xf]  ;;  %v8885_v21 = vor.u32 %v11272_v17, %v8884_v35 }
 0x41f   : > { %v4997_v47 = vpop.f32.mrf.mxu3  ;;  %5506 = vmatpush.bf16.msra.mxu2 %v9173_v15  ;;  %v9029_v58 = vor.u32 %v11308_v49, %v9028_v63  ;;  %v9157_v36 = vor.u32 %v11340_v61, %v9156_v4  ;;  %v9012_v15 = vld [vmem:[#allocation7 + $0x128] sm:$0xf]  ;;  %v11268_v4 = vld [vmem:[#allocation7 + $0x14] sm:$0xf0] }
 0x420   : > { %v4998_v38 = vadd.f32 %v4997_v47, %v13646_v43  ;;  %v11304_v43 = vld [vmem:[#allocation7 + $0x134] sm:$0xf0]  ;;  %v9140_v47 = vld [vmem:[#allocation7 + $0x228] sm:$0xf] }
 0x421   : > { %v5144_v34 = vpop.f32.mrf.mxu2  ;;  %v5048_v37 = vpop.f32.mrf.mxu0  ;;  %5409 = vmatpush.bf16.msra.mxu0 %v8901_v41  ;;  %5458 = vmatpush.bf16.msra.mxu1 %v9029_v58  ;;  %v9013_v50 = vor.u32 %v11304_v43, %v9012_v15  ;;  %v9141_v56 = vor.u32 %v11336_v33, %v9140_v47  ;;  %v9124_v61 = vld [vmem:[#allocation7 + $0x208] sm:$0xf]  ;;  %v11332_v58 = vld [vmem:[#allocation7 + $0x214] sm:$0xf0] }
 0x422   : > { %v5047_v3 = vadd.f32 %v5046_v44, %v4998_v38  ;;  %v8868_v44 = vld [vmem:[#allocation7 + $0x8] sm:$0xf]  ;;  %v9125_v35 = vor.u32 %v11332_v58, %v9124_v61 }
 0x423   : > { %v5097_v57 = vpop.f32.mrf.mxu1  ;;  %5507 = vmatpush.bf16.msra.mxu2 %v9157_v36  ;;  %v8869_v41 = vor.u32 %v11268_v4, %v8868_v44  ;;  %v9348_v58 = vld [vmem:[#allocation7 + $0x3c8] sm:$0xf] }
 0x424   : > { %v5096_v20 = vadd.f32 %v5095_v22, %v5047_v3  ;;  %v11300_v22 = vld [vmem:[#allocation7 + $0x114] sm:$0xf0] }
 0x425   : > { %5410 = vmatpush.bf16.msra.mxu0 %v8885_v21  ;;  %5459 = vmatpush.bf16.msra.mxu1 %v9013_v50  ;;  %v8997_v3 = vor.u32 %v11300_v22, %v8996_v54 }
 0x426   : > { %v13726_v7 = vadd.f32 %v5144_v34, %v5096_v20  ;;  %v11392_v20 = vld [vmem:[#allocation7 + $0x3f4] sm:$0xf0] }
 0x427   : > { %v4999_v49 = vpop.f32.mrf.mxu3  ;;  %5508 = vmatpush.bf16.msra.mxu2 %v9141_v56  ;;  %v9364_v56 = vld [vmem:[#allocation7 + $0x3e8] sm:$0xf] }
 0x428   : > { %v5000_v63 = vadd.f32 %v4999_v49, %v13653_v10  ;;  %v9365_v43 = vor.u32 %v11392_v20, %v9364_v56 }
 0x429   : > { %v5146_v38 = vpop.f32.mrf.mxu2  ;;  %v5051_v36 = vpop.f32.mrf.mxu0  ;;  %5411 = vmatpush.bf16.msra.mxu0 %v8869_v41  ;;  %5460 = vmatpush.bf16.msra.mxu1 %v8997_v3 }
 0x42a   : > { %v5049_v17 = vadd.f32 %v5048_v37, %v5000_v63  ;;  %5551 = vmatpush.bf16.msrb.mxu3 %v9365_v43 }
 0x42b   : > { %v5100_v34 = vpop.f32.mrf.mxu1  ;;  %5509 = vmatpush.bf16.msra.mxu2 %v9125_v35 }
 0x42c   : > { %v5098_v15 = vadd.f32 %v5097_v57, %v5049_v17  ;;  %5197 = vmatmul.bf16.gmra.mxu3 %v13299_v60  ;;  %5246 = vmatmul.bf16.gmra.mxu0 %v13301_v39 }
 0x42e   : > { %5295 = vmatmul.bf16.gmra.mxu1 %v13303_v9  ;;  %5344 = vmatmul.bf16.gmra.mxu2 %v13305_v6  ;;  %v13733_v10 = vadd.f32 %v5146_v38, %v5098_v15 }
 0x42f   : > { %v5002_v21 = vpop.f32.mrf.mxu3 }
 0x430   : > { %v5003_v37 = vadd.f32 %v5002_v21, %v13656_v40 }
 0x431   : > { %v5149_v47 = vpop.f32.mrf.mxu2  ;;  %v5053_v33 = vpop.f32.mrf.mxu0 }
 0x432   : > { %v5052_v57 = vadd.f32 %v5051_v36, %v5003_v37  ;;  %v11388_v36 = vld [vmem:[#allocation7 + $0x3d4] sm:$0xf0] }
 0x433   : > { %v5102_v50 = vpop.f32.mrf.mxu1  ;;  %v9349_v35 = vor.u32 %v11388_v36, %v9348_v58 }
 0x434   : > { %v5101_v49 = vadd.f32 %v5100_v34, %v5052_v57 }
 0x435   : > { %5552 = vmatpush.bf16.msrb.mxu3 %v9349_v35 }
 0x436   : > { %v13736_v44 = vadd.f32 %v5149_v47, %v5101_v49 }
 0x437   : > { %v5004_v4 = vpop.f32.mrf.mxu3 }
 0x438   : > { %v5005_v54 = vadd.f32 %v5004_v4, %v13663_v2  ;;  %v9332_v4 = vld [vmem:[#allocation7 + $0x3a8] sm:$0xf] }
 0x439   : > { %v5151_v63 = vpop.f32.mrf.mxu2  ;;  %v5056_v38 = vpop.f32.mrf.mxu0 }
 0x43a   : > { %v5054_v41 = vadd.f32 %v5053_v33, %v5005_v54  ;;  %v11384_v54 = vld [vmem:[#allocation7 + $0x3b4] sm:$0xf0] }
 0x43b   : > { %v5105_v22 = vpop.f32.mrf.mxu1 }
 0x43c   : > { %v5103_v61 = vadd.f32 %v5102_v50, %v5054_v41  ;;  %5202 = vmatmul.bf16.gmra.mxu3 %v13325_v26  ;;  %5251 = vmatmul.bf16.gmra.mxu0 %v13327_v45 }
 0x43e   : > { %5300 = vmatmul.bf16.gmra.mxu1 %v13329_v13  ;;  %5349 = vmatmul.bf16.gmra.mxu2 %v13331_v12  ;;  %v13743_v40 = vadd.f32 %v5151_v63, %v5103_v61 }
 0x43f   : > { %v5007_v3 = vpop.f32.mrf.mxu3 }
 0x440   : > { %v5008_v2 = vadd.f32 %v5007_v3, %v13666_v28 }
 0x441   : > { %v5154_v17 = vpop.f32.mrf.mxu2  ;;  %v5058_v34 = vpop.f32.mrf.mxu0 }
 0x442   : > { %v5057_v15 = vadd.f32 %v5056_v38, %v5008_v2  ;;  %v9333_v38 = vor.u32 %v11384_v54, %v9332_v4 }
 0x443   : > { %v5107_v56 = vpop.f32.mrf.mxu1 }
 0x444   : > { %v5106_v20 = vadd.f32 %v5105_v22, %v5057_v15  ;;  %5553 = vmatpush.bf16.msrb.mxu3 %v9333_v38 }
 0x446   : > { %v13746_v21 = vadd.f32 %v5154_v17, %v5106_v20 }
 0x447   : > { %v5009_v43 = vpop.f32.mrf.mxu3 }
 0x448   : > { %v5010_v37 = vadd.f32 %v5009_v43, %v13673_v59  ;;  %v9316_v43 = vld [vmem:[#allocation7 + $0x388] sm:$0xf] }
 0x449   : > { %v5156_v47 = vpop.f32.mrf.mxu2  ;;  %v5217_v33 = vpop.f32.mrf.mxu0 }
 0x44a   : > { %v5059_v57 = vadd.f32 %v5058_v34, %v5010_v37  ;;  %v11380_v37 = vld [vmem:[#allocation7 + $0x394] sm:$0xf0] }
 0x44b   : > { %v5266_v50 = vpop.f32.mrf.mxu1 }
 0x44c   : > { %v5108_v49 = vadd.f32 %v5107_v56, %v5059_v57  ;;  %5363 = vmatmul.bf16.vlgmr.msra.gmra.mxu3 %v13345_v8  ;;  %5412 = vmatmul.bf16.vlgmr.msra.gmra.mxu0 %v12568_v23 }
 0x44e   : > { %5461 = vmatmul.bf16.vlgmr.msra.gmra.mxu1 %v12620_v52  ;;  %5510 = vmatmul.bf16.vlgmr.msra.gmra.mxu2 %v12668_v42  ;;  %v13753_v28 = vadd.f32 %v5156_v47, %v5108_v49 }
 0x44f   : > { %v5168_v63 = vpop.f32.mrf.mxu3 }
 0x450   : > { %v5169_v59 = vadd.f32 %v5168_v63, %v13676_v62 }
 0x451   : > { %v5315_v41 = vpop.f32.mrf.mxu2  ;;  %v5219_v22 = vpop.f32.mrf.mxu0 }
 0x452   : > { %v5218_v61 = vadd.f32 %v5217_v33, %v5169_v59  ;;  %v9317_v33 = vor.u32 %v11380_v37, %v9316_v43 }
 0x453   : > { %v5268_v58 = vpop.f32.mrf.mxu1 }
 0x454   : > { %v5267_v36 = vadd.f32 %v5266_v50, %v5218_v61  ;;  %5554 = vmatpush.bf16.msrb.mxu3 %v9317_v33 }
 0x456   : > { %v13756_v3 = vadd.f32 %v5315_v41, %v5267_v36 }
 0x457   : > { %v5170_v35 = vpop.f32.mrf.mxu3 }
 0x458   : > { %v5171_v2 = vadd.f32 %v5170_v35, %v13683_v25  ;;  %v9300_v35 = vld [vmem:[#allocation7 + $0x368] sm:$0xf] }
 0x459   : > { %v5317_v17 = vpop.f32.mrf.mxu2  ;;  %v5222_v34 = vpop.f32.mrf.mxu0 }
 0x45a   : > { %v5220_v15 = vadd.f32 %v5219_v22, %v5171_v2  ;;  %v11376_v2 = vld [vmem:[#allocation7 + $0x374] sm:$0xf0] }
 0x45b   : > { %v5271_v56 = vpop.f32.mrf.mxu1 }
 0x45c   : > { %v5269_v20 = vadd.f32 %v5268_v58, %v5220_v15  ;;  %5368 = vmatmul.bf16.gmra.mxu3 %v13359_v32  ;;  %5417 = vmatmul.bf16.gmra.mxu0 %v12594_v16 }
 0x45e   : > { %5466 = vmatmul.bf16.gmra.mxu1 %v12644_v48  ;;  %5515 = vmatmul.bf16.gmra.mxu2 %v12688_v19  ;;  %v13763_v62 = vadd.f32 %v5317_v17, %v5269_v20 }
 0x45f   : > { %v5173_v47 = vpop.f32.mrf.mxu3 }
 0x460   : > { %v5174_v25 = vadd.f32 %v5173_v47, %v13686_v18 }
 0x461   : > { %v5320_v57 = vpop.f32.mrf.mxu2  ;;  %v5224_v50 = vpop.f32.mrf.mxu0 }
 0x462   : > { %v5223_v49 = vadd.f32 %v5222_v34, %v5174_v25  ;;  %v9301_v34 = vor.u32 %v11376_v2, %v9300_v35 }
 0x463   : > { %v5273_v4 = vpop.f32.mrf.mxu1 }
 0x464   : > { %v5272_v54 = vadd.f32 %v5271_v56, %v5223_v49  ;;  %5555 = vmatpush.bf16.msrb.mxu3 %v9301_v34 }
 0x466   : > { %v13766_v63 = vadd.f32 %v5320_v57, %v5272_v54 }
 0x467   : > { %v5175_v38 = vpop.f32.mrf.mxu3 }
 0x468   : > { %v5176_v59 = vadd.f32 %v5175_v38, %v13693_v0  ;;  %v15458_v38 = vld [vmem:[#allocation22_spill] sm:$0xff] }
 0x469   : > { %v5322_v41 = vpop.f32.mrf.mxu2  ;;  %v5227_v22 = vpop.f32.mrf.mxu0 }
 0x46a   : > { %v5225_v61 = vadd.f32 %v5224_v50, %v5176_v59  ;;  %v15460_v59 = vld [vmem:[#allocation24_spill] sm:$0xff] }
 0x46b   : > { %v5276_v58 = vpop.f32.mrf.mxu1 }
 0x46c   : > { %v5274_v36 = vadd.f32 %v5273_v4, %v5225_v61  ;;  %5373 = vmatmul.bf16.gmra.mxu3 %v13373_v31  ;;  %5422 = vmatmul.bf16.gmra.mxu0 %v12570_v24  ;;  %v11372_v61 = vld [vmem:[#allocation7 + $0x354] sm:$0xf0] }
 0x46e   : > { %5471 = vmatmul.bf16.gmra.mxu1 %v12572_v29  ;;  %5520 = vmatmul.bf16.gmra.mxu2 %v12574_v30  ;;  %v13773_v18 = vadd.f32 %v5322_v41, %v5274_v36 }
 0x46f   : > { %v5178_v17 = vpop.f32.mrf.mxu3 }
 0x470   : > { %v5179_v0 = vadd.f32 %v5178_v17, %v13696_v55  ;;  %v15459_v55 = vld [vmem:[#allocation23_spill] sm:$0xff] }
 0x471   : > { %v5325_v15 = vpop.f32.mrf.mxu2  ;;  %v5229_v56 = vpop.f32.mrf.mxu0 }
 0x472   : > { %v5228_v20 = vadd.f32 %v5227_v22, %v5179_v0  ;;  %v9284_v22 = vld [vmem:[#allocation7 + $0x348] sm:$0xf] }
 0x473   : > { %v5278_v43 = vpop.f32.mrf.mxu1  ;;  %v9285_v36 = vor.u32 %v11372_v61, %v9284_v22  ;;  %v15462_v61 = vld [vmem:[#allocation25_spill] sm:$0xff] }
 0x474   : > { %v5277_v37 = vadd.f32 %v5276_v58, %v5228_v20 }
 0x475   : > { %5556 = vmatpush.bf16.msrb.mxu3 %v9285_v36  ;;  %v11488_v36 = vld [vmem:[#allocation7 + $0x6f4] sm:$0xf0] }
 0x476   : > { %v13776_v47 = vadd.f32 %v5325_v15, %v5277_v37 }
 0x477   : > { %v5180_v33 = vpop.f32.mrf.mxu3 }
 0x478   : > { %v5181_v25 = vadd.f32 %v5180_v33, %v13703_v53 }
 0x479   : > { %v5327_v57 = vpop.f32.mrf.mxu2  ;;  %v5232_v50 = vpop.f32.mrf.mxu0 }
 0x47a   : > { %v5230_v49 = vadd.f32 %v5229_v56, %v5181_v25 }
 0x47b   : > { %v5281_v4 = vpop.f32.mrf.mxu1 }
 0x47c   : > { %v5279_v54 = vadd.f32 %v5278_v43, %v5230_v49  ;;  %5378 = vmatmul.bf16.gmra.mxu3 %v13387_v11  ;;  %5427 = vmatmul.bf16.gmra.mxu0 %v15458_v38  ;;  %v11424_v49 = vld [vmem:[#allocation7 + $0x4f4] sm:$0xf0] }
 0x47e   : > { %5476 = vmatmul.bf16.gmra.mxu1 %v15459_v55  ;;  %5525 = vmatmul.bf16.gmra.mxu2 %v15460_v59  ;;  %v13783_v41 = vadd.f32 %v5327_v57, %v5279_v54  ;;  %v9492_v57 = vld [vmem:[#allocation7 + $0x4e8] sm:$0xf]  ;;  %v11452_v59 = vld [vmem:[#allocation7 + $0x5d4] sm:$0xf0] }
 0x47f   : > { %v5183_v58 = vpop.f32.mrf.mxu3  ;;  %v9620_v54 = vld [vmem:[#allocation7 + $0x5e8] sm:$0xf] }
 0x480   : > { %v5184_v53 = vadd.f32 %v5183_v58, %v13706_v46  ;;  %v15461_v46 = vld [vmem:[#allocation125_spill] sm:$0xff]  ;;  %v11456_v58 = vld [vmem:[#allocation7 + $0x5f4] sm:$0xf0] }
 0x481   : > { %v5330_v35 = vpop.f32.mrf.mxu2  ;;  %v5234_v2 = vpop.f32.mrf.mxu0 }
 0x482   : > { %v5233_v17 = vadd.f32 %v5232_v50, %v5184_v53  ;;  %v9493_v50 = vor.u32 %v11424_v49, %v9492_v57  ;;  %v15463_v53 = vld [vmem:[#allocation26_spill] sm:$0xff]  ;;  %v11420_v57 = vld [vmem:[#allocation7 + $0x4d4] sm:$0xf0] }
 0x483   : > { %v5283_v34 = vpop.f32.mrf.mxu1  ;;  %v9604_v49 = vld [vmem:[#allocation7 + $0x5c8] sm:$0xf] }
 0x484   : > { %v5282_v0 = vadd.f32 %v5281_v4, %v5233_v17  ;;  %v9748_v4 = vld [vmem:[#allocation7 + $0x6e8] sm:$0xf]  ;;  %5600 = vmatpush.bf16.msrb.mxu0 %v9493_v50 }
 0x485   : > { %v9749_v17 = vor.u32 %v11488_v36, %v9748_v4  ;;  %v9460_v36 = vld [vmem:[#allocation7 + $0x4a8] sm:$0xf] }
 0x486   : > { %v13786_v15 = vadd.f32 %v5330_v35, %v5282_v0  ;;  %v15464_v35 = vld [vmem:[#allocation27_spill] sm:$0xff]  ;;  %v9268_v0 = vld [vmem:[#allocation7 + $0x328] sm:$0xf] }
 0x487   : > { %v5185_v56 = vpop.f32.mrf.mxu3  ;;  %5698 = vmatpush.bf16.msrb.mxu2 %v9749_v17  ;;  %v9588_v17 = vld [vmem:[#allocation7 + $0x5a8] sm:$0xf] }
 0x488   : > { %v5186_v20 = vadd.f32 %v5185_v56, %v13713_v51  ;;  %v9621_v51 = vor.u32 %v11456_v58, %v9620_v54  ;;  %v11368_v56 = vld [vmem:[#allocation7 + $0x334] sm:$0xf0] }
 0x489   : > { %v5332_v43 = vpop.f32.mrf.mxu2  ;;  %v5237_v37 = vpop.f32.mrf.mxu0  ;;  %v11484_v54 = vld [vmem:[#allocation7 + $0x6d4] sm:$0xf0] }
 0x48a   : > { %v5235_v33 = vadd.f32 %v5234_v2, %v5186_v20  ;;  %v9269_v20 = vor.u32 %v11368_v56, %v9268_v0  ;;  %5649 = vmatpush.bf16.msrb.mxu1 %v9621_v51  ;;  %v11416_v51 = vld [vmem:[#allocation7 + $0x4b4] sm:$0xf0] }
 0x48b   : > { %v5286_v25 = vpop.f32.mrf.mxu1  ;;  %v9461_v56 = vor.u32 %v11416_v51, %v9460_v36 }
 0x48c   : > { %v5284_v22 = vadd.f32 %v5283_v34, %v5235_v33  ;;  %5383 = vmatmul.bf16.gmra.mxu3 %v15461_v46  ;;  %5432 = vmatmul.bf16.gmra.mxu0 %v15462_v61  ;;  %v9476_v33 = vld [vmem:[#allocation7 + $0x4c8] sm:$0xf] }
 0x48d   : > { %5557 = vmatpush.bf16.msrb.mxu3 %v9269_v20 }
 0x48e   : > { %5481 = vmatmul.bf16.gmra.mxu1 %v15463_v53  ;;  %5530 = vmatmul.bf16.gmra.mxu2 %v15464_v35  ;;  %v13793_v2 = vadd.f32 %v5332_v43, %v5284_v22  ;;  %v9477_v53 = vor.u32 %v11420_v57, %v9476_v33  ;;  %v9732_v35 = vld [vmem:[#allocation7 + $0x6c8] sm:$0xf]  ;;  %v9605_v43 = vor.u32 %v11452_v59, %v9604_v49  ;;  %v11480_v33 = vld [vmem:[#allocation7 + $0x6b4] sm:$0xf0] }
 0x48f   : > { %v5188_v34 = vpop.f32.mrf.mxu3  ;;  %v9733_v22 = vor.u32 %v11484_v54, %v9732_v35  ;;  %v9700_v54 = vld [vmem:[#allocation7 + $0x688] sm:$0xf] }
 0x490   : > { %v5189_v61 = vadd.f32 %v5188_v34, %v13716_v5  ;;  %5601 = vmatpush.bf16.msrb.mxu0 %v9477_v53  ;;  %5650 = vmatpush.bf16.msrb.mxu1 %v9605_v43  ;;  %v11448_v5 = vld [vmem:[#allocation7 + $0x5b4] sm:$0xf0]  ;;  %v9716_v34 = vld [vmem:[#allocation7 + $0x6a8] sm:$0xf] }
 0x491   : > { %v5335_v46 = vpop.f32.mrf.mxu2  ;;  %v5239_v58 = vpop.f32.mrf.mxu0  ;;  %5699 = vmatpush.bf16.msrb.mxu2 %v9733_v22  ;;  %v9589_v57 = vor.u32 %v11448_v5, %v9588_v17  ;;  %v9717_v55 = vor.u32 %v11480_v33, %v9716_v34  ;;  %v9572_v53 = vld [vmem:[#allocation7 + $0x588] sm:$0xf]  ;;  %v11476_v43 = vld [vmem:[#allocation7 + $0x694] sm:$0xf0] }
 0x492   : > { %v5238_v4 = vadd.f32 %v5237_v37, %v5189_v61  ;;  %v9444_v37 = vld [vmem:[#allocation7 + $0x488] sm:$0xf]  ;;  %v11412_v61 = vld [vmem:[#allocation7 + $0x494] sm:$0xf0]  ;;  %v9701_v36 = vor.u32 %v11476_v43, %v9700_v54 }
 0x493   : > { %v5288_v50 = vpop.f32.mrf.mxu1  ;;  %v9445_v49 = vor.u32 %v11412_v61, %v9444_v37  ;;  %v9428_v17 = vld [vmem:[#allocation7 + $0x468] sm:$0xf]  ;;  %v11440_v33 = vld [vmem:[#allocation7 + $0x574] sm:$0xf0]  ;;  %v15467_v37 = vld [vmem:[#allocation29_spill] sm:$0xff] }
 0x494   : > { %v5287_v0 = vadd.f32 %v5286_v25, %v5238_v4  ;;  %5602 = vmatpush.bf16.msrb.mxu0 %v9461_v56  ;;  %5651 = vmatpush.bf16.msrb.mxu1 %v9589_v57  ;;  %v11444_v25 = vld [vmem:[#allocation7 + $0x594] sm:$0xf0]  ;;  %v15465_v5 = vld [vmem:[#allocation126_spill] sm:$0xff] }
 0x495   : > { %5700 = vmatpush.bf16.msrb.mxu2 %v9717_v55  ;;  %v9573_v4 = vor.u32 %v11444_v25, %v9572_v53  ;;  %v11408_v55 = vld [vmem:[#allocation7 + $0x474] sm:$0xf0]  ;;  %v9684_v57 = vld [vmem:[#allocation7 + $0x668] sm:$0xf] }
 0x496   : > { %v13796_v38 = vadd.f32 %v5335_v46, %v5287_v0  ;;  %v9556_v0 = vld [vmem:[#allocation7 + $0x568] sm:$0xf]  ;;  %v9429_v34 = vor.u32 %v11408_v55, %v9428_v17  ;;  %v11364_v25 = vld [vmem:[#allocation7 + $0x314] sm:$0xf0] }
 0x497   : > { %v5190_v59 = vpop.f32.mrf.mxu3  ;;  %v15468_v61 = vld [vmem:[#allocation30_spill] sm:$0xff] }
 0x498   : > { %v5191_v35 = vadd.f32 %v5190_v59, %v13723_v1  ;;  %5603 = vmatpush.bf16.msrb.mxu0 %v9445_v49  ;;  %5652 = vmatpush.bf16.msrb.mxu1 %v9573_v4  ;;  %v15466_v1 = vld [vmem:[#allocation28_spill] sm:$0xff]  ;;  %v9252_v49 = vld [vmem:[#allocation7 + $0x308] sm:$0xf] }
 0x499   : > { %v5337_v20 = vpop.f32.mrf.mxu2  ;;  %v5242_v22 = vpop.f32.mrf.mxu0  ;;  %5701 = vmatpush.bf16.msrb.mxu2 %v9701_v36  ;;  %v11472_v59 = vld [vmem:[#allocation7 + $0x674] sm:$0xf0]  ;;  %v9253_v54 = vor.u32 %v11364_v25, %v9252_v49  ;;  %v9412_v43 = vld [vmem:[#allocation7 + $0x448] sm:$0xf] }
 0x49a   : > { %v5240_v51 = vadd.f32 %v5239_v58, %v5191_v35  ;;  %v9557_v58 = vor.u32 %v11440_v33, %v9556_v0  ;;  %v9685_v53 = vor.u32 %v11472_v59, %v9684_v57  ;;  %v11404_v4 = vld [vmem:[#allocation7 + $0x454] sm:$0xf0]  ;;  %v9540_v36 = vld [vmem:[#allocation7 + $0x548] sm:$0xf] }
 0x49b   : > { %v5291_v46 = vpop.f32.mrf.mxu1  ;;  %v9413_v55 = vor.u32 %v11404_v4, %v9412_v43  ;;  %v11468_v0 = vld [vmem:[#allocation7 + $0x654] sm:$0xf0]  ;;  %5558 = vmatpush.bf16.msrb.mxu3 %v9253_v54  ;;  %v9396_v59 = vld [vmem:[#allocation7 + $0x428] sm:$0xf] }
 0x49c   : > { %v5289_v56 = vadd.f32 %v5288_v50, %v5240_v51  ;;  %5388 = vmatmul.bf16.gmra.mxu3 %v15465_v5  ;;  %5437 = vmatmul.bf16.gmra.mxu0 %v15466_v1  ;;  %v11464_v43 = vld [vmem:[#allocation7 + $0x634] sm:$0xf0]  ;;  %v9508_v54 = vld [vmem:[#allocation7 + $0x508] sm:$0xf] }
 0x49d   : > { %5604 = vmatpush.bf16.msrb.mxu0 %v9429_v34  ;;  %5653 = vmatpush.bf16.msrb.mxu1 %v9557_v58  ;;  %v11400_v58 = vld [vmem:[#allocation7 + $0x434] sm:$0xf0] }
 0x49e   : > { %5486 = vmatmul.bf16.gmra.mxu1 %v15467_v37  ;;  %5535 = vmatmul.bf16.gmra.mxu2 %v15468_v61  ;;  %v13803_v35 = vadd.f32 %v5337_v20, %v5289_v56  ;;  %v11436_v37 = vld [vmem:[#allocation7 + $0x554] sm:$0xf0]  ;;  %v9668_v61 = vld [vmem:[#allocation7 + $0x648] sm:$0xf]  ;;  %v9397_v25 = vor.u32 %v11400_v58, %v9396_v59 }
 0x49f   : > { %v5193_v50 = vpop.f32.mrf.mxu3  ;;  %5702 = vmatpush.bf16.msrb.mxu2 %v9685_v53  ;;  %v9541_v20 = vor.u32 %v11436_v37, %v9540_v36  ;;  %v9669_v56 = vor.u32 %v11468_v0, %v9668_v61  ;;  %v9524_v53 = vld [vmem:[#allocation7 + $0x528] sm:$0xf]  ;;  %v11396_v61 = vld [vmem:[#allocation7 + $0x414] sm:$0xf0] }
 0x4a0   : > { %v5194_v51 = vadd.f32 %v5193_v50, %v13726_v7  ;;  %v11432_v7 = vld [vmem:[#allocation7 + $0x534] sm:$0xf0]  ;;  %v9652_v50 = vld [vmem:[#allocation7 + $0x628] sm:$0xf] }
 0x4a1   : > { %v5340_v17 = vpop.f32.mrf.mxu2  ;;  %v5244_v33 = vpop.f32.mrf.mxu0  ;;  %5605 = vmatpush.bf16.msrb.mxu0 %v9413_v55  ;;  %5654 = vmatpush.bf16.msrb.mxu1 %v9541_v20  ;;  %v9525_v4 = vor.u32 %v11432_v7, %v9524_v53  ;;  %v9653_v1 = vor.u32 %v11464_v43, %v9652_v50  ;;  %v9636_v0 = vld [vmem:[#allocation7 + $0x608] sm:$0xf]  ;;  %v11460_v20 = vld [vmem:[#allocation7 + $0x614] sm:$0xf0] }
 0x4a2   : > { %v5243_v57 = vadd.f32 %v5242_v22, %v5194_v51  ;;  %v9380_v22 = vld [vmem:[#allocation7 + $0x408] sm:$0xf]  ;;  %v9637_v59 = vor.u32 %v11460_v20, %v9636_v0  ;;  %v11520_v43 = vld [vmem:[#allocation7 + $0x7f4] sm:$0xf0] }
 0x4a3   : > { %v5293_v34 = vpop.f32.mrf.mxu1  ;;  %5703 = vmatpush.bf16.msrb.mxu2 %v9669_v56  ;;  %v9381_v55 = vor.u32 %v11396_v61, %v9380_v22  ;;  %v9876_v50 = vld [vmem:[#allocation7 + $0x7e8] sm:$0xf] }
 0x4a4   : > { %v5292_v49 = vadd.f32 %v5291_v46, %v5243_v57  ;;  %v11428_v46 = vld [vmem:[#allocation7 + $0x514] sm:$0xf0] }
 0x4a5   : > { %5606 = vmatpush.bf16.msrb.mxu0 %v9397_v25  ;;  %5655 = vmatpush.bf16.msrb.mxu1 %v9525_v4  ;;  %v9509_v57 = vor.u32 %v11428_v46, %v9508_v54  ;;  %v15471_v25 = vld [vmem:[#allocation32_spill] sm:$0xff] }
 0x4a6   : > { %v13806_v5 = vadd.f32 %v5340_v17, %v5292_v49  ;;  %v15470_v49 = vld [vmem:[#allocation31_spill] sm:$0xff] }
 0x4a7   : > { %v5195_v37 = vpop.f32.mrf.mxu3  ;;  %5704 = vmatpush.bf16.msrb.mxu2 %v9653_v1  ;;  %v15469_v1 = vld [vmem:[#allocation127_spill] sm:$0xff] }
 0x4a8   : > { %v5196_v36 = vadd.f32 %v5195_v37, %v13733_v10  ;;  %v15472_v10 = vld [vmem:[#allocation33_spill] sm:$0xff]  ;;  %v9877_v37 = vor.u32 %v11520_v43, %v9876_v50  ;;  %v15474_v50 = vld [vmem:[#allocation34_spill] sm:$0xff]  ;;  %v15476_v43 = vld [vmem:[#allocation36_spill] sm:$0xff] }
 0x4a9   : > { %v5342_v51 = vpop.f32.mrf.mxu2  ;;  %v5247_v56 = vpop.f32.mrf.mxu0  ;;  %5607 = vmatpush.bf16.msrb.mxu0 %v9381_v55  ;;  %5656 = vmatpush.bf16.msrb.mxu1 %v9509_v57 }
 0x4aa   : > { %v5245_v58 = vadd.f32 %v5244_v33, %v5196_v36  ;;  %5747 = vmatpush.bf16.msra.mxu3 %v9877_v37 }
 0x4ab   : > { %v5296_v17 = vpop.f32.mrf.mxu1  ;;  %5705 = vmatpush.bf16.msrb.mxu2 %v9637_v59 }
 0x4ac   : > { %v5294_v53 = vadd.f32 %v5293_v34, %v5245_v58  ;;  %5393 = vmatmul.bf16.gmra.mxu3 %v15469_v1  ;;  %5442 = vmatmul.bf16.gmra.mxu0 %v15470_v49 }
 0x4ae   : > { %5491 = vmatmul.bf16.gmra.mxu1 %v15471_v25  ;;  %5540 = vmatmul.bf16.gmra.mxu2 %v15472_v10  ;;  %v13813_v7 = vadd.f32 %v5342_v51, %v5294_v53  ;;  %v15473_v53 = vld [vmem:[#allocation128_spill] sm:$0xff] }
 0x4af   : > { %v5198_v4 = vpop.f32.mrf.mxu3  ;;  %v11496_v10 = vld [vmem:[#allocation7 + $0x734] sm:$0xf0] }
 0x4b0   : > { %v5199_v33 = vadd.f32 %v5198_v4, %v13736_v44  ;;  %v15475_v44 = vld [vmem:[#allocation35_spill] sm:$0xff] }
 0x4b1   : > { %v5345_v22 = vpop.f32.mrf.mxu2  ;;  %v5249_v61 = vpop.f32.mrf.mxu0 }
 0x4b2   : > { %v5248_v34 = vadd.f32 %v5247_v56, %v5199_v33  ;;  %v9860_v56 = vld [vmem:[#allocation7 + $0x7c8] sm:$0xf] }
 0x4b3   : > { %v5298_v54 = vpop.f32.mrf.mxu1 }
 0x4b4   : > { %v5297_v36 = vadd.f32 %v5296_v17, %v5248_v34  ;;  %v11516_v17 = vld [vmem:[#allocation7 + $0x7d4] sm:$0xf0] }
 0x4b5   : > { %v9861_v37 = vor.u32 %v11516_v17, %v9860_v56 }
 0x4b6   : > { %v13816_v55 = vadd.f32 %v5345_v22, %v5297_v36 }
 0x4b7   : > { %v5200_v46 = vpop.f32.mrf.mxu3  ;;  %5748 = vmatpush.bf16.msra.mxu3 %v9861_v37 }
 0x4b8   : > { %v5201_v0 = vadd.f32 %v5200_v46, %v13743_v40 }
 0x4b9   : > { %v5347_v20 = vpop.f32.mrf.mxu2  ;;  %v5252_v51 = vpop.f32.mrf.mxu0 }
 0x4ba   : > { %v5250_v57 = vadd.f32 %v5249_v61, %v5201_v0  ;;  %v12032_v0 = vld [vmem:[#allocation13] sm:$0xf] }
 0x4bb   : > { %v5301_v59 = vpop.f32.mrf.mxu1 }
 0x4bc   : > { %v5299_v58 = vadd.f32 %v5298_v54, %v5250_v57  ;;  %5398 = vmatmul.bf16.gmra.mxu3 %v15473_v53  ;;  %5447 = vmatmul.bf16.gmra.mxu0 %v15474_v50  ;;  %v13828_v57 = vperm.slane %v12032_v0, 2  ;;  %v15477_v50 = vld [vmem:[#allocation37_spill] sm:$0xff] }
 0x4be   : > { %5496 = vmatmul.bf16.gmra.mxu1 %v15475_v44  ;;  %5545 = vmatmul.bf16.gmra.mxu2 %v15476_v43  ;;  %v13823_v4 = vadd.f32 %v5347_v20, %v5299_v58 }
 0x4bf   : > { %v5203_v33 = vpop.f32.mrf.mxu3 }
 0x4c0   : > { %v5204_v40 = vadd.f32 %v5203_v33, %v13746_v21 }
 0x4c1   : > { %v5350_v22 = vpop.f32.mrf.mxu2  ;;  %v5254_v61 = vpop.f32.mrf.mxu0 }
 0x4c2   : > { %v5253_v34 = vadd.f32 %v5252_v51, %v5204_v40  ;;  %v15478_v51 = vld [vmem:[#allocation38_spill] sm:$0xff]  ;;  %v15480_v40 = vld [vmem:[#allocation40_spill] sm:$0xff] }
 0x4c3   : > { %v5303_v54 = vpop.f32.mrf.mxu1 }
 0x4c4   : > { %v5302_v36 = vadd.f32 %v5301_v59, %v5253_v34  ;;  %v15479_v59 = vld [vmem:[#allocation39_spill] sm:$0xff]  ;;  %v11512_v34 = vld [vmem:[#allocation7 + $0x7b4] sm:$0xf0] }
 0x4c6   : > { %v13826_v46 = vadd.f32 %v5350_v22, %v5302_v36  ;;  %v9844_v22 = vld [vmem:[#allocation7 + $0x7a8] sm:$0xf] }
 0x4c7   : > { %v5205_v43 = vpop.f32.mrf.mxu3 }
 0x4c8   : > { %v5206_v44 = vadd.f32 %v5205_v43, %v13753_v28  ;;  %v9845_v28 = vor.u32 %v11512_v34, %v9844_v22 }
 0x4c9   : > { %v5352_v20 = vpop.f32.mrf.mxu2  ;;  %v5413_v58 = vpop.f32.mrf.mxu0 }
 0x4ca   : > { %v5255_v56 = vadd.f32 %v5254_v61, %v5206_v44  ;;  %v5414_v17 = vadd.f32 %v5413_v58, %v13828_v57  ;;  %5749 = vmatpush.bf16.msra.mxu3 %v9845_v28 }
 0x4cb   : > { %v5462_v21 = vpop.f32.mrf.mxu1 }
 0x4cc   : > { %v5304_v33 = vadd.f32 %v5303_v54, %v5255_v56  ;;  %v5463_v37 = vadd.f32 %v5462_v21, %v5414_v17  ;;  %5559 = vmatmul.bf16.vlgmr.msrb.gmra.mxu3 %v15477_v50  ;;  %5608 = vmatmul.bf16.vlgmr.msrb.gmra.mxu0 %v15478_v51 }
 0x4ce   : > { %5657 = vmatmul.bf16.vlgmr.msrb.gmra.mxu1 %v15479_v59  ;;  %5706 = vmatmul.bf16.vlgmr.msrb.gmra.mxu2 %v15480_v40  ;;  %v13836_v36 = vadd.f32 %v5352_v20, %v5304_v33 }
 0x4cf   : > { %v5364_v43 = vpop.f32.mrf.mxu3 }
 0x4d0   : > { %v5365_v44 = vadd.f32 %v5364_v43, %v13756_v3 }
 0x4d1   : > { %v5511_v61 = vpop.f32.mrf.mxu2  ;;  %v5415_v0 = vpop.f32.mrf.mxu0 }
 0x4d2   : > { %v13839_v54 = vadd.f32 %v5511_v61, %v5463_v37  ;;  %v5416_v58 = vadd.f32 %v5415_v0, %v13828_v57  ;;  %v7038_v40 = vmul.f32 %v13468_v14, %v5365_v44  ;;  %vm6973_vm0 = vcmp.ge.f32.partialorder %v5365_v44, 0.0  ;;  %v15481_v0 = vld [vmem:[#allocation41_spill] sm:$0xff] }
 0x4d3   : > { %v5464_v56 = vpop.f32.mrf.mxu1 }
 0x4d4   : > { %v5465_v17 = vadd.f32 %v5464_v56, %v5416_v58  ;;  %v7102_v28 = vsel %vm6973_vm0, %v5365_v44, %v7038_v40  ;;  %v15482_v58 = vld [vmem:[#allocation42_spill] sm:$0xff] }
 0x4d7   : > { %v5366_v21 = vpop.f32.mrf.mxu3 }
 0x4d8   : > { %v5367_v59 = vadd.f32 %v5366_v21, %v13763_v62  ;;  %v15484_v62 = vld [vmem:[#allocation43_spill] sm:$0xff]  ;;  %v9828_v21 = vld [vmem:[#allocation7 + $0x788] sm:$0xf] }
 0x4d9   : > { %v5513_v20 = vpop.f32.mrf.mxu2  ;;  %v5418_v22 = vpop.f32.mrf.mxu0 }
 0x4da   : > { %v13844_v33 = vadd.f32 %v5513_v20, %v5465_v17  ;;  %vm6977_vm1 = vcmp.ge.f32.partialorder %v5367_v59, 0.0  ;;  %v7042_v3 = vmul.f32 %v13468_v14, %v5367_v59  ;;  %v5419_v37 = vadd.f32 %v5418_v22, %v13828_v57  ;;  %v15485_v17 = vld [vmem:[#allocation44_spill] sm:$0xff] }
 0x4db   : > { %v5467_v34 = vpop.f32.mrf.mxu1  ;;  %v11508_v20 = vld [vmem:[#allocation7 + $0x794] sm:$0xf0] }
 0x4dc   : > { %v7106_v43 = vsel %vm6977_vm1, %v5367_v59, %v7042_v3  ;;  %v5468_v61 = vadd.f32 %v5467_v34, %v5419_v37  ;;  %5564 = vmatmul.bf16.gmra.mxu3 %v15481_v0  ;;  %5613 = vmatmul.bf16.gmra.mxu0 %v15482_v58  ;;  %v9829_v51 = vor.u32 %v11508_v20, %v9828_v21 }
 0x4dd   : > { %v13850_v56 = vpack.c.bf16 %v7106_v43, %v7102_v28 }
 0x4de   : > { %5662 = vmatmul.bf16.gmra.mxu1 %v15484_v62  ;;  %5711 = vmatmul.bf16.gmra.mxu2 %v15485_v17  ;;  %v15488_v17 = vld [vmem:[#allocation47_spill] sm:$0xff] }
 0x4df   : > { %15483 = vst [vmem:[#allocation137_spill] sm:$0xff] %v13850_v56  ;;  %v5369_v50 = vpop.f32.mrf.mxu3  ;;  %5750 = vmatpush.bf16.msra.mxu3 %v9829_v51 }
 0x4e0   : > { %v5370_v22 = vadd.f32 %v5369_v50, %v13766_v63 }
 0x4e1   : > { %v5516_v53 = vpop.f32.mrf.mxu2  ;;  %v5420_v40 = vpop.f32.mrf.mxu0 }
 0x4e2   : > { %v13855_v59 = vadd.f32 %v5516_v53, %v5468_v61  ;;  %v5421_v44 = vadd.f32 %v5420_v40, %v13828_v57  ;;  %v7046_v28 = vmul.f32 %v13468_v14, %v5370_v22  ;;  %vm6981_vm2 = vcmp.ge.f32.partialorder %v5370_v22, 0.0  ;;  %v15486_v61 = vld [vmem:[#allocation45_spill] sm:$0xff]  ;;  %v15487_v40 = vld [vmem:[#allocation46_spill] sm:$0xff] }
 0x4e3   : > { %v5469_v3 = vpop.f32.mrf.mxu1 }
 0x4e4   : > { %v5470_v37 = vadd.f32 %v5469_v3, %v5421_v44  ;;  %v7110_v44 = vsel %vm6981_vm2, %v5370_v22, %v7046_v28 }
 0x4e7   : > { %v5371_v34 = vpop.f32.mrf.mxu3 }
 0x4e8   : > { %v5372_v43 = vadd.f32 %v5371_v34, %v13773_v18  ;;  %v15489_v18 = vld [vmem:[#allocation48_spill] sm:$0xff] }
 0x4e9   : > { %v5518_v56 = vpop.f32.mrf.mxu2  ;;  %v5423_v20 = vpop.f32.mrf.mxu0 }
 0x4ea   : > { %v13860_v21 = vadd.f32 %v5518_v56, %v5470_v37  ;;  %vm6985_vm3 = vcmp.ge.f32.partialorder %v5372_v43, 0.0  ;;  %v7050_v63 = vmul.f32 %v13468_v14, %v5372_v43  ;;  %v5424_v53 = vadd.f32 %v5423_v20, %v13828_v57  ;;  %v9812_v56 = vld [vmem:[#allocation7 + $0x768] sm:$0xf]  ;;  %v11504_v37 = vld [vmem:[#allocation7 + $0x774] sm:$0xf0] }
 0x4eb   : > { %v5472_v50 = vpop.f32.mrf.mxu1  ;;  %v9813_v62 = vor.u32 %v11504_v37, %v9812_v56  ;;  %v15492_v37 = vld [vmem:[#allocation50_spill] sm:$0xff] }
 0x4ec   : > { %v5473_v51 = vadd.f32 %v5472_v50, %v5424_v53  ;;  %5569 = vmatmul.bf16.gmra.mxu3 %v15486_v61  ;;  %5618 = vmatmul.bf16.gmra.mxu0 %v15487_v40  ;;  %v7114_v3 = vsel %vm6985_vm3, %v5372_v43, %v7050_v63 }
 0x4ed   : > { %v13868_v34 = vpack.c.bf16 %v7114_v3, %v7110_v44  ;;  %5751 = vmatpush.bf16.msra.mxu3 %v9813_v62 }
 0x4ee   : > { %5667 = vmatmul.bf16.gmra.mxu1 %v15488_v17  ;;  %5716 = vmatmul.bf16.gmra.mxu2 %v15489_v18 }
 0x4ef   : > { %15490 = vst [vmem:[#allocation138_spill] sm:$0xff] %v13868_v34  ;;  %v5374_v58 = vpop.f32.mrf.mxu3 }
 0x4f0   : > { %v5375_v20 = vadd.f32 %v5374_v58, %v13776_v47 }
 0x4f1   : > { %v5521_v0 = vpop.f32.mrf.mxu2  ;;  %v5425_v50 = vpop.f32.mrf.mxu0 }
 0x4f2   : > { %v13871_v53 = vadd.f32 %v5521_v0, %v5473_v51  ;;  %v5426_v22 = vadd.f32 %v5425_v50, %v13828_v57  ;;  %v7054_v18 = vmul.f32 %v13468_v14, %v5375_v20  ;;  %vm6989_vm4 = vcmp.ge.f32.partialorder %v5375_v20, 0.0  ;;  %v15491_v51 = vld [vmem:[#allocation49_spill] sm:$0xff] }
 0x4f3   : > { %v5474_v28 = vpop.f32.mrf.mxu1 }
 0x4f4   : > { %v5475_v43 = vadd.f32 %v5474_v28, %v5426_v22  ;;  %v7118_v50 = vsel %vm6989_vm4, %v5375_v20, %v7054_v18  ;;  %v15493_v28 = vld [vmem:[#allocation51_spill] sm:$0xff] }
 0x4f7   : > { %v5376_v63 = vpop.f32.mrf.mxu3 }
 0x4f8   : > { %v5377_v17 = vadd.f32 %v5376_v63, %v13783_v41  ;;  %v15494_v41 = vld [vmem:[#allocation52_spill] sm:$0xff] }
 0x4f9   : > { %v5523_v44 = vpop.f32.mrf.mxu2  ;;  %v5428_v56 = vpop.f32.mrf.mxu0  ;;  %v11500_v63 = vld [vmem:[#allocation7 + $0x754] sm:$0xf0] }
 0x4fa   : > { %v13876_v3 = vadd.f32 %v5523_v44, %v5475_v43  ;;  %vm6993_vm5 = vcmp.ge.f32.partialorder %v5377_v17, 0.0  ;;  %v7058_v47 = vmul.f32 %v13468_v14, %v5377_v17  ;;  %v5429_v0 = vadd.f32 %v5428_v56, %v13828_v57  ;;  %v9796_v43 = vld [vmem:[#allocation7 + $0x748] sm:$0xf] }
 0x4fb   : > { %v5477_v58 = vpop.f32.mrf.mxu1  ;;  %v9797_v34 = vor.u32 %v11500_v63, %v9796_v43 }
 0x4fc   : > { %v5478_v62 = vadd.f32 %v5477_v58, %v5429_v0  ;;  %5574 = vmatmul.bf16.gmra.mxu3 %v15491_v51  ;;  %5623 = vmatmul.bf16.gmra.mxu0 %v15492_v37  ;;  %v7122_v22 = vsel %vm6993_vm5, %v5377_v17, %v7058_v47  ;;  %v15497_v37 = vld [vmem:[#allocation55_spill] sm:$0xff]  ;;  %v15498_v51 = vld [vmem:[#allocation56_spill] sm:$0xff] }
 0x4fd   : > { %v13884_v44 = vpack.c.bf16 %v7122_v22, %v7118_v50  ;;  %5752 = vmatpush.bf16.msra.mxu3 %v9797_v34  ;;  %v10004_v34 = vld [vmem:[#allocation7 + $0x8e8] sm:$0xf] }
 0x4fe   : > { %5672 = vmatmul.bf16.gmra.mxu1 %v15493_v28  ;;  %5721 = vmatmul.bf16.gmra.mxu2 %v15494_v41 }
 0x4ff   : > { %15495 = vst [vmem:[#allocation139_spill] sm:$0xff] %v13884_v44  ;;  %v5379_v40 = vpop.f32.mrf.mxu3  ;;  %v15496_v44 = vld [vmem:[#allocation54_spill] sm:$0xff] }
 0x500   : > { %v5380_v56 = vadd.f32 %v5379_v40, %v13786_v15 }
 0x501   : > { %v5526_v61 = vpop.f32.mrf.mxu2  ;;  %v5430_v58 = vpop.f32.mrf.mxu0 }
 0x502   : > { %v13887_v0 = vadd.f32 %v5526_v61, %v5478_v62  ;;  %v5431_v18 = vadd.f32 %v5430_v58, %v13828_v57  ;;  %v7062_v47 = vmul.f32 %v13468_v14, %v5380_v56  ;;  %vm6997_vm6 = vcmp.ge.f32.partialorder %v5380_v56, 0.0  ;;  %v11552_v62 = vld [vmem:[#allocation7 + $0x8f4] sm:$0xf0]  ;;  %v10132_v58 = vld [vmem:[#allocation7 + $0x9e8] sm:$0xf] }
 0x503   : > { %v5479_v17 = vpop.f32.mrf.mxu1 }
 0x504   : > { %v5480_v20 = vadd.f32 %v5479_v17, %v5431_v18  ;;  %v7126_v18 = vsel %vm6997_vm6, %v5380_v56, %v7062_v47 }
 0x507   : > { %v5381_v41 = vpop.f32.mrf.mxu3 }
 0x508   : > { %v5382_v50 = vadd.f32 %v5381_v41, %v13793_v2  ;;  %v10005_v2 = vor.u32 %v11552_v62, %v10004_v34  ;;  %v11584_v41 = vld [vmem:[#allocation7 + $0x9f4] sm:$0xf0]  ;;  %v10116_v34 = vld [vmem:[#allocation7 + $0x9c8] sm:$0xf] }
 0x509   : > { %v5528_v22 = vpop.f32.mrf.mxu2  ;;  %v5433_v63 = vpop.f32.mrf.mxu0  ;;  %v10133_v25 = vor.u32 %v11584_v41, %v10132_v58  ;;  %v11544_v41 = vld [vmem:[#allocation7 + $0x8b4] sm:$0xf0] }
 0x50a   : > { %v13892_v43 = vadd.f32 %v5528_v22, %v5480_v20  ;;  %vm7001_vm7 = vcmp.ge.f32.partialorder %v5382_v50, 0.0  ;;  %v7066_v15 = vmul.f32 %v13468_v14, %v5382_v50  ;;  %v5434_v61 = vadd.f32 %v5433_v63, %v13828_v57  ;;  %v10260_v20 = vld [vmem:[#allocation7 + $0xae8] sm:$0xf]  ;;  %v11616_v22 = vld [vmem:[#allocation7 + $0xaf4] sm:$0xf0]  ;;  %5796 = vmatpush.bf16.msra.mxu0 %v10005_v2 }
 0x50b   : > { %v5482_v40 = vpop.f32.mrf.mxu1  ;;  %v9780_v63 = vld [vmem:[#allocation7 + $0x728] sm:$0xf]  ;;  %v10261_v49 = vor.u32 %v11616_v22, %v10260_v20  ;;  %5845 = vmatpush.bf16.msra.mxu1 %v10133_v25 }
 0x50c   : > { %v5483_v17 = vadd.f32 %v5482_v40, %v5434_v61  ;;  %5579 = vmatmul.bf16.gmra.mxu3 %v15381_v27  ;;  %5628 = vmatmul.bf16.gmra.mxu0 %v15496_v44  ;;  %v7130_v28 = vsel %vm7001_vm7, %v5382_v50, %v7066_v15  ;;  %v9781_v56 = vor.u32 %v11496_v10, %v9780_v63  ;;  %v9988_v61 = vld [vmem:[#allocation7 + $0x8c8] sm:$0xf]  ;;  %v11548_v40 = vld [vmem:[#allocation7 + $0x8d4] sm:$0xf0] }
 0x50d   : > { %v13900_v1 = vpack.c.bf16 %v7130_v28, %v7126_v18  ;;  %5894 = vmatpush.bf16.msra.mxu2 %v10261_v49  ;;  %v9989_v62 = vor.u32 %v11548_v40, %v9988_v61  ;;  %v11612_v44 = vld [vmem:[#allocation7 + $0xad4] sm:$0xf0]  ;;  %v9972_v49 = vld [vmem:[#allocation7 + $0x8a8] sm:$0xf] }
 0x50e   : > { %5677 = vmatmul.bf16.gmra.mxu1 %v15497_v37  ;;  %5726 = vmatmul.bf16.gmra.mxu2 %v15498_v51  ;;  %v11580_v51 = vld [vmem:[#allocation7 + $0x9d4] sm:$0xf0]  ;;  %v10244_v37 = vld [vmem:[#allocation7 + $0xac8] sm:$0xf]  ;;  %v9973_v22 = vor.u32 %v11544_v41, %v9972_v49 }
 0x50f   : > { %15499 = vst [vmem:[#allocation140_spill] sm:$0xff] %v13900_v1  ;;  %v5384_v47 = vpop.f32.mrf.mxu3  ;;  %5753 = vmatpush.bf16.msra.mxu3 %v9781_v56  ;;  %v10117_v18 = vor.u32 %v11580_v51, %v10116_v34  ;;  %v10245_v10 = vor.u32 %v11612_v44, %v10244_v37  ;;  %5797 = vmatpush.bf16.msra.mxu0 %v9989_v62  ;;  %v11576_v63 = vld [vmem:[#allocation7 + $0x9b4] sm:$0xf0]  ;;  %v10228_v56 = vld [vmem:[#allocation7 + $0xaa8] sm:$0xf] }
 0x510   : > { %v5385_v50 = vadd.f32 %v5384_v47, %v13796_v38  ;;  %v10100_v38 = vld [vmem:[#allocation7 + $0x9a8] sm:$0xf]  ;;  %v11608_v47 = vld [vmem:[#allocation7 + $0xab4] sm:$0xf0] }
 0x511   : > { %v5531_v15 = vpop.f32.mrf.mxu2  ;;  %v5435_v28 = vpop.f32.mrf.mxu0  ;;  %5846 = vmatpush.bf16.msra.mxu1 %v10117_v18  ;;  %5895 = vmatpush.bf16.msra.mxu2 %v10245_v10  ;;  %v10101_v61 = vor.u32 %v11576_v63, %v10100_v38  ;;  %v9956_v44 = vld [vmem:[#allocation7 + $0x888] sm:$0xf]  ;;  %v11540_v40 = vld [vmem:[#allocation7 + $0x894] sm:$0xf0] }
 0x512   : > { %v13903_v58 = vadd.f32 %v5531_v15, %v5483_v17  ;;  %v5436_v2 = vadd.f32 %v5435_v28, %v13828_v57  ;;  %v10229_v17 = vor.u32 %v11608_v47, %v10228_v56  ;;  %vm7005_vm8 = vcmp.ge.f32.partialorder %v5385_v50, 0.0  ;;  %v10084_v34 = vld [vmem:[#allocation7 + $0x988] sm:$0xf]  ;;  %v11572_v18 = vld [vmem:[#allocation7 + $0x994] sm:$0xf0] }
 0x513   : > { %v5484_v25 = vpop.f32.mrf.mxu1  ;;  %5798 = vmatpush.bf16.msra.mxu0 %v9973_v22  ;;  %v7070_v51 = vmul.f32 %v13468_v14, %v5385_v50  ;;  %v9957_v28 = vor.u32 %v11540_v40, %v9956_v44  ;;  %v10212_v10 = vld [vmem:[#allocation7 + $0xa88] sm:$0xf]  ;;  %v10085_v41 = vor.u32 %v11572_v18, %v10084_v34  ;;  %v11536_v47 = vld [vmem:[#allocation7 + $0x874] sm:$0xf0] }
 0x514   : > { %v5485_v20 = vadd.f32 %v5484_v25, %v5436_v2  ;;  %v11604_v2 = vld [vmem:[#allocation7 + $0xa94] sm:$0xf0]  ;;  %v15501_v44 = vld [vmem:[#allocation58_spill] sm:$0xff] }
 0x515   : > { %5847 = vmatpush.bf16.msra.mxu1 %v10101_v61  ;;  %5896 = vmatpush.bf16.msra.mxu2 %v10229_v17  ;;  %v10213_v38 = vor.u32 %v11604_v2, %v10212_v10  ;;  %v10068_v61 = vld [vmem:[#allocation7 + $0x968] sm:$0xf]  ;;  %v7134_v17 = vsel %vm7005_vm8, %v5385_v50, %v7070_v51  ;;  %v11568_v34 = vld [vmem:[#allocation7 + $0x974] sm:$0xf0]  ;;  %v15502_v2 = vld [vmem:[#allocation59_spill] sm:$0xff] }
 0x516   : > { %v11600_v18 = vld [vmem:[#allocation7 + $0xa74] sm:$0xf0] }
 0x517   : > { %v5386_v37 = vpop.f32.mrf.mxu3  ;;  %5799 = vmatpush.bf16.msra.mxu0 %v9957_v28  ;;  %v15503_v28 = vld [vmem:[#allocation60_spill] sm:$0xff] }
 0x518   : > { %v5387_v15 = vadd.f32 %v5386_v37, %v13803_v35  ;;  %v9940_v35 = vld [vmem:[#allocation7 + $0x868] sm:$0xf] }
 0x519   : > { %v5533_v62 = vpop.f32.mrf.mxu2  ;;  %v5438_v49 = vpop.f32.mrf.mxu0  ;;  %5848 = vmatpush.bf16.msra.mxu1 %v10085_v41  ;;  %5897 = vmatpush.bf16.msra.mxu2 %v10213_v38  ;;  %v9941_v40 = vor.u32 %v11536_v47, %v9940_v35  ;;  %v11492_v41 = vld [vmem:[#allocation7 + $0x714] sm:$0xf0]  ;;  %v10069_v38 = vor.u32 %v11568_v34, %v10068_v61  ;;  %v10052_v47 = vld [vmem:[#allocation7 + $0x948] sm:$0xf] }
 0x51a   : > { %v13908_v25 = vadd.f32 %v5533_v62, %v5485_v20  ;;  %vm7009_vm9 = vcmp.ge.f32.partialorder %v5387_v15, 0.0  ;;  %v7074_v22 = vmul.f32 %v13468_v14, %v5387_v15  ;;  %v5439_v63 = vadd.f32 %v5438_v49, %v13828_v57  ;;  %v15500_v20 = vld [vmem:[#allocation57_spill] sm:$0xff]  ;;  %v10196_v62 = vld [vmem:[#allocation7 + $0xa68] sm:$0xf]  ;;  %v11532_v35 = vld [vmem:[#allocation7 + $0x854] sm:$0xf0] }
 0x51b   : > { %v5487_v56 = vpop.f32.mrf.mxu1  ;;  %v9764_v49 = vld [vmem:[#allocation7 + $0x708] sm:$0xf]  ;;  %v10197_v1 = vor.u32 %v11600_v18, %v10196_v62  ;;  %5800 = vmatpush.bf16.msra.mxu0 %v9941_v40 }
 0x51c   : > { %v5488_v37 = vadd.f32 %v5487_v56, %v5439_v63  ;;  %5584 = vmatmul.bf16.gmra.mxu3 %v15500_v20  ;;  %5633 = vmatmul.bf16.gmra.mxu0 %v15501_v44  ;;  %v7138_v10 = vsel %vm7009_vm9, %v5387_v15, %v7074_v22  ;;  %v9765_v51 = vor.u32 %v11492_v41, %v9764_v49  ;;  %v9924_v56 = vld [vmem:[#allocation7 + $0x848] sm:$0xf]  ;;  %v11596_v20 = vld [vmem:[#allocation7 + $0xa54] sm:$0xf0] }
 0x51d   : > { %v13918_v50 = vpack.c.bf16 %v7138_v10, %v7134_v17  ;;  %5849 = vmatpush.bf16.msra.mxu1 %v10069_v38  ;;  %5898 = vmatpush.bf16.msra.mxu2 %v10197_v1  ;;  %v10180_v44 = vld [vmem:[#allocation7 + $0xa48] sm:$0xf]  ;;  %v11528_v10 = vld [vmem:[#allocation7 + $0x834] sm:$0xf0] }
 0x51e   : > { %5682 = vmatmul.bf16.gmra.mxu1 %v15502_v2  ;;  %5731 = vmatmul.bf16.gmra.mxu2 %v15503_v28  ;;  %v9925_v2 = vor.u32 %v11532_v35, %v9924_v56  ;;  %v11564_v28 = vld [vmem:[#allocation7 + $0x954] sm:$0xf0]  ;;  %v10181_v62 = vor.u32 %v11596_v20, %v10180_v44  ;;  %v9908_v1 = vld [vmem:[#allocation7 + $0x828] sm:$0xf] }
 0x51f   : > { %15504 = vst [vmem:[#allocation141_spill] sm:$0xff] %v13918_v50  ;;  %v5389_v63 = vpop.f32.mrf.mxu3  ;;  %5754 = vmatpush.bf16.msra.mxu3 %v9765_v51  ;;  %v10053_v34 = vor.u32 %v11564_v28, %v10052_v47  ;;  %v9909_v41 = vor.u32 %v11528_v10, %v9908_v1  ;;  %v11560_v38 = vld [vmem:[#allocation7 + $0x934] sm:$0xf0]  ;;  %v10164_v51 = vld [vmem:[#allocation7 + $0xa28] sm:$0xf] }
 0x520   : > { %v5390_v15 = vadd.f32 %v5389_v63, %v13806_v5  ;;  %5801 = vmatpush.bf16.msra.mxu0 %v9925_v2  ;;  %v10036_v5 = vld [vmem:[#allocation7 + $0x928] sm:$0xf]  ;;  %v11592_v63 = vld [vmem:[#allocation7 + $0xa34] sm:$0xf0] }
 0x521   : > { %v5536_v22 = vpop.f32.mrf.mxu2  ;;  %v5440_v17 = vpop.f32.mrf.mxu0  ;;  %5850 = vmatpush.bf16.msra.mxu1 %v10053_v34  ;;  %5899 = vmatpush.bf16.msra.mxu2 %v10181_v62  ;;  %v10037_v56 = vor.u32 %v11560_v38, %v10036_v5  ;;  %v9892_v20 = vld [vmem:[#allocation7 + $0x808] sm:$0xf]  ;;  %v11524_v44 = vld [vmem:[#allocation7 + $0x814] sm:$0xf0] }
 0x522   : > { %v13921_v61 = vadd.f32 %v5536_v22, %v5488_v37  ;;  %v5441_v40 = vadd.f32 %v5440_v17, %v13828_v57  ;;  %v10165_v37 = vor.u32 %v11592_v63, %v10164_v51  ;;  %v10020_v28 = vld [vmem:[#allocation7 + $0x908] sm:$0xf]  ;;  %v7078_v2 = vmul.f32 %v13468_v14, %v5390_v15  ;;  %v11556_v34 = vld [vmem:[#allocation7 + $0x914] sm:$0xf0]  ;;  %v15505_v63 = vld [vmem:[#allocation61_spill] sm:$0xff] }
 0x523   : > { %v5489_v18 = vpop.f32.mrf.mxu1  ;;  %v9893_v17 = vor.u32 %v11524_v44, %v9892_v20  ;;  %v10148_v62 = vld [vmem:[#allocation7 + $0xa08] sm:$0xf]  ;;  %vm7013_vm10 = vcmp.ge.f32.partialorder %v5390_v15, 0.0  ;;  %v10021_v10 = vor.u32 %v11556_v34, %v10020_v28  ;;  %v15508_v20 = vld [vmem:[#allocation64_spill] sm:$0xff] }
 0x524   : > { %v5490_v49 = vadd.f32 %v5489_v18, %v5441_v40  ;;  %5802 = vmatpush.bf16.msra.mxu0 %v9909_v41  ;;  %v11588_v40 = vld [vmem:[#allocation7 + $0xa14] sm:$0xf0]  ;;  %v10388_v44 = vld [vmem:[#allocation7 + $0xbe8] sm:$0xf] }
 0x525   : > { %5851 = vmatpush.bf16.msra.mxu1 %v10037_v56  ;;  %5900 = vmatpush.bf16.msra.mxu2 %v10165_v37  ;;  %v10149_v5 = vor.u32 %v11588_v40, %v10148_v62  ;;  %v15506_v56 = vld [vmem:[#allocation62_spill] sm:$0xff]  ;;  %v7142_v37 = vsel %vm7013_vm10, %v5390_v15, %v7078_v2  ;;  %v11648_v28 = vld [vmem:[#allocation7 + $0xbf4] sm:$0xf0] }
 0x526   : > { %v10389_v34 = vor.u32 %v11648_v28, %v10388_v44 }
 0x527   : > { %v5391_v35 = vpop.f32.mrf.mxu3 }
 0x528   : > { %v5392_v47 = vadd.f32 %v5391_v35, %v13813_v7  ;;  %5803 = vmatpush.bf16.msra.mxu0 %v9893_v17  ;;  %v15507_v35 = vld [vmem:[#allocation63_spill] sm:$0xff]  ;;  %5943 = vmatpush.bf16.msrb.mxu3 %v10389_v34  ;;  %v15510_v34 = vld [vmem:[#allocation65_spill] sm:$0xff] }
 0x529   : > { %v5538_v22 = vpop.f32.mrf.mxu2  ;;  %v5443_v1 = vpop.f32.mrf.mxu0  ;;  %5852 = vmatpush.bf16.msra.mxu1 %v10021_v10  ;;  %5901 = vmatpush.bf16.msra.mxu2 %v10149_v5 }
 0x52a   : > { %v13926_v18 = vadd.f32 %v5538_v22, %v5490_v49  ;;  %vm7017_vm11 = vcmp.ge.f32.partialorder %v5392_v47, 0.0  ;;  %v7082_v41 = vmul.f32 %v13468_v14, %v5392_v47  ;;  %v5444_v38 = vadd.f32 %v5443_v1, %v13828_v57 }
 0x52b   : > { %v5492_v51 = vpop.f32.mrf.mxu1 }
 0x52c   : > { %v5493_v7 = vadd.f32 %v5492_v51, %v5444_v38  ;;  %5589 = vmatmul.bf16.gmra.mxu3 %v15505_v63  ;;  %5638 = vmatmul.bf16.gmra.mxu0 %v15506_v56  ;;  %v7146_v49 = vsel %vm7017_vm11, %v5392_v47, %v7082_v41 }
 0x52d   : > { %v13934_v22 = vpack.c.bf16 %v7146_v49, %v7142_v37 }
 0x52e   : > { %5687 = vmatmul.bf16.gmra.mxu1 %v15507_v35  ;;  %5736 = vmatmul.bf16.gmra.mxu2 %v15508_v20  ;;  %v11708_v35 = vld [vmem:[#allocation7 + $0xdd4] sm:$0xf0] }
 0x52f   : > { %15509 = vst [vmem:[#allocation142_spill] sm:$0xff] %v13934_v22  ;;  %v5394_v62 = vpop.f32.mrf.mxu3 }
 0x530   : > { %v5395_v17 = vadd.f32 %v5394_v62, %v13816_v55  ;;  %v15511_v62 = vld [vmem:[#allocation66_spill] sm:$0xff] }
 0x531   : > { %v5541_v40 = vpop.f32.mrf.mxu2  ;;  %v5445_v10 = vpop.f32.mrf.mxu0 }
 0x532   : > { %v13937_v1 = vadd.f32 %v5541_v40, %v5493_v7  ;;  %v5446_v15 = vadd.f32 %v5445_v10, %v13828_v57  ;;  %v7086_v41 = vmul.f32 %v13468_v14, %v5395_v17  ;;  %vm7021_vm12 = vcmp.ge.f32.partialorder %v5395_v17, 0.0 }
 0x533   : > { %v5494_v2 = vpop.f32.mrf.mxu1 }
 0x534   : > { %v5495_v47 = vadd.f32 %v5494_v2, %v5446_v15  ;;  %v7150_v40 = vsel %vm7021_vm12, %v5395_v17, %v7086_v41  ;;  %v15512_v15 = vld [vmem:[#allocation67_spill] sm:$0xff] }
 0x537   : > { %v5396_v5 = vpop.f32.mrf.mxu3 }
 0x538   : > { %v5397_v38 = vadd.f32 %v5396_v5, %v13823_v4  ;;  %v15513_v4 = vld [vmem:[#allocation68_spill] sm:$0xff] }
 0x539   : > { %v5543_v51 = vpop.f32.mrf.mxu2  ;;  %v5448_v49 = vpop.f32.mrf.mxu0  ;;  %v11644_v5 = vld [vmem:[#allocation7 + $0xbd4] sm:$0xf0] }
 0x53a   : > { %v13942_v37 = vadd.f32 %v5543_v51, %v5495_v47  ;;  %vm7025_vm13 = vcmp.ge.f32.partialorder %v5397_v38, 0.0  ;;  %v7090_v55 = vmul.f32 %v13468_v14, %v5397_v38  ;;  %v5449_v7 = vadd.f32 %v5448_v49, %v13828_v57  ;;  %v10372_v47 = vld [vmem:[#allocation7 + $0xbc8] sm:$0xf] }
 0x53b   : > { %v5497_v44 = vpop.f32.mrf.mxu1  ;;  %v10373_v22 = vor.u32 %v11644_v5, %v10372_v47 }
 0x53c   : > { %v5498_v28 = vadd.f32 %v5497_v44, %v5449_v7  ;;  %5594 = vmatmul.bf16.gmra.mxu3 %v15510_v34  ;;  %5643 = vmatmul.bf16.gmra.mxu0 %v15511_v62  ;;  %v7154_v10 = vsel %vm7025_vm13, %v5397_v38, %v7090_v55 }
 0x53d   : > { %v13950_v2 = vpack.c.bf16 %v7154_v10, %v7150_v40  ;;  %5944 = vmatpush.bf16.msrb.mxu3 %v10373_v22  ;;  %v15516_v22 = vld [vmem:[#allocation70_spill] sm:$0xff] }
 0x53e   : > { %5692 = vmatmul.bf16.gmra.mxu1 %v15512_v15  ;;  %5741 = vmatmul.bf16.gmra.mxu2 %v15513_v4 }
 0x53f   : > { %15514 = vst [vmem:[#allocation143_spill] sm:$0xff] %v13950_v2  ;;  %v5399_v51 = vpop.f32.mrf.mxu3 }
 0x540   : > { %v5400_v49 = vadd.f32 %v5399_v51, %v13826_v46  ;;  %v15517_v51 = vld [vmem:[#allocation71_spill] sm:$0xff] }
 0x541   : > { %v5546_v50 = vpop.f32.mrf.mxu2  ;;  %v5450_v44 = vpop.f32.mrf.mxu0 }
 0x542   : > { %v13953_v7 = vadd.f32 %v5546_v50, %v5498_v28  ;;  %v5451_v17 = vadd.f32 %v5450_v44, %v13828_v57  ;;  %v7094_v4 = vmul.f32 %v13468_v14, %v5400_v49  ;;  %vm7029_vm14 = vcmp.ge.f32.partialorder %v5400_v49, 0.0  ;;  %v15515_v28 = vld [vmem:[#allocation69_spill] sm:$0xff]  ;;  %v15518_v44 = vld [vmem:[#allocation72_spill] sm:$0xff] }
 0x543   : > { %v5499_v41 = vpop.f32.mrf.mxu1 }
 0x544   : > { %v5500_v38 = vadd.f32 %v5499_v41, %v5451_v17  ;;  %v7158_v57 = vsel %vm7029_vm14, %v5400_v49, %v7094_v4  ;;  %v10356_v17 = vld [vmem:[#allocation7 + $0xba8] sm:$0xf]  ;;  %v11640_v41 = vld [vmem:[#allocation7 + $0xbb4] sm:$0xf0] }
 0x547   : > { %v5401_v55 = vpop.f32.mrf.mxu3 }
 0x548   : > { %v5402_v40 = vadd.f32 %v5401_v55, %v13836_v36  ;;  %v10357_v55 = vor.u32 %v11640_v41, %v10356_v17  ;;  %v15521_v17 = vld [vmem:[#allocation74_spill] sm:$0xff]  ;;  %v15523_v41 = vld [vmem:[#allocation76_spill] sm:$0xff] }
 0x549   : > { %v5548_v10 = vpop.f32.mrf.mxu2  ;;  %v5609_v47 = vpop.f32.mrf.mxu0 }
 0x54a   : > { %v13958_v2 = vadd.f32 %v5548_v10, %v5500_v38  ;;  %vm7033_vm15 = vcmp.ge.f32.partialorder %v5402_v40, 0.0  ;;  %v7098_v46 = vmul.f32 %v13468_v14, %v5402_v40  ;;  %5945 = vmatpush.bf16.msrb.mxu3 %v10357_v55 }
 0x54b   : > { %v5658_v50 = vpop.f32.mrf.mxu1 }
 0x54c   : > { %5755 = vmatmul.bf16.vlgmr.msra.gmra.mxu3 %v15515_v28  ;;  %5804 = vmatmul.bf16.vlgmr.msra.gmra.mxu0 %v15516_v22  ;;  %v7162_v5 = vsel %vm7033_vm15, %v5402_v40, %v7098_v46 }
 0x54d   : > { %v13965_v36 = vpack.c.bf16 %v7162_v5, %v7158_v57 }
 0x54e   : > { %5853 = vmatmul.bf16.vlgmr.msra.gmra.mxu1 %v15517_v51  ;;  %5902 = vmatmul.bf16.vlgmr.msra.gmra.mxu2 %v15518_v44  ;;  %v15520_v51 = vld [vmem:[#allocation73_spill] sm:$0xff] }
 0x54f   : > { %15519 = vst [vmem:[#allocation144_spill] sm:$0xff] %v13965_v36  ;;  %v5560_v38 = vpop.f32.mrf.mxu3 }
 0x550   : > { %v5561_v10 = vadd.f32 %v5560_v38, %v13839_v54  ;;  %v15522_v54 = vld [vmem:[#allocation75_spill] sm:$0xff] }
 0x551   : > { %v5707_v15 = vpop.f32.mrf.mxu2  ;;  %v5611_v62 = vpop.f32.mrf.mxu0 }
 0x552   : > { %v5610_v28 = vadd.f32 %v5609_v47, %v5561_v10 }
 0x553   : > { %v5660_v34 = vpop.f32.mrf.mxu1 }
 0x554   : > { %v5659_v22 = vadd.f32 %v5658_v50, %v5610_v28  ;;  %v11636_v50 = vld [vmem:[#allocation7 + $0xb94] sm:$0xf0] }
 0x556   : > { %v13968_v4 = vadd.f32 %v5707_v15, %v5659_v22  ;;  %v10340_v15 = vld [vmem:[#allocation7 + $0xb88] sm:$0xf] }
 0x557   : > { %v5562_v49 = vpop.f32.mrf.mxu3  ;;  %v10341_v22 = vor.u32 %v11636_v50, %v10340_v15  ;;  %v15525_v15 = vld [vmem:[#allocation78_spill] sm:$0xff]  ;;  %v15527_v50 = vld [vmem:[#allocation80_spill] sm:$0xff] }
 0x558   : > { %v5563_v40 = vadd.f32 %v5562_v49, %v13844_v33 }
 0x559   : > { %v5709_v46 = vpop.f32.mrf.mxu2  ;;  %v5614_v57 = vpop.f32.mrf.mxu0  ;;  %5946 = vmatpush.bf16.msrb.mxu3 %v10341_v22 }
 0x55a   : > { %v5612_v5 = vadd.f32 %v5611_v62, %v5563_v40 }
 0x55b   : > { %v5663_v36 = vpop.f32.mrf.mxu1 }
 0x55c   : > { %v5661_v44 = vadd.f32 %v5660_v34, %v5612_v5  ;;  %5760 = vmatmul.bf16.gmra.mxu3 %v15520_v51  ;;  %5809 = vmatmul.bf16.gmra.mxu0 %v15521_v17  ;;  %v15524_v51 = vld [vmem:[#allocation77_spill] sm:$0xff] }
 0x55e   : > { %5858 = vmatmul.bf16.gmra.mxu1 %v15522_v54  ;;  %5907 = vmatmul.bf16.gmra.mxu2 %v15523_v41  ;;  %v13975_v47 = vadd.f32 %v5709_v46, %v5661_v44 }
 0x55f   : > { %v5565_v28 = vpop.f32.mrf.mxu3 }
 0x560   : > { %v5566_v33 = vadd.f32 %v5565_v28, %v13855_v59  ;;  %v15526_v59 = vld [vmem:[#allocation79_spill] sm:$0xff]  ;;  %v11632_v28 = vld [vmem:[#allocation7 + $0xb74] sm:$0xf0] }
 0x561   : > { %v5712_v38 = vpop.f32.mrf.mxu2  ;;  %v5616_v62 = vpop.f32.mrf.mxu0 }
 0x562   : > { %v5615_v34 = vadd.f32 %v5614_v57, %v5566_v33 }
 0x563   : > { %v5665_v55 = vpop.f32.mrf.mxu1 }
 0x564   : > { %v5664_v10 = vadd.f32 %v5663_v36, %v5615_v34  ;;  %v10324_v36 = vld [vmem:[#allocation7 + $0xb68] sm:$0xf] }
 0x565   : > { %v10325_v33 = vor.u32 %v11632_v28, %v10324_v36  ;;  %v15529_v36 = vld [vmem:[#allocation82_spill] sm:$0xff]  ;;  %v15531_v28 = vld [vmem:[#allocation84_spill] sm:$0xff] }
 0x566   : > { %v13978_v49 = vadd.f32 %v5712_v38, %v5664_v10 }
 0x567   : > { %v5567_v40 = vpop.f32.mrf.mxu3  ;;  %5947 = vmatpush.bf16.msrb.mxu3 %v10325_v33 }
 0x568   : > { %v5568_v5 = vadd.f32 %v5567_v40, %v13860_v21 }
 0x569   : > { %v5714_v41 = vpop.f32.mrf.mxu2  ;;  %v5619_v44 = vpop.f32.mrf.mxu0 }
 0x56a   : > { %v5617_v46 = vadd.f32 %v5616_v62, %v5568_v5 }
 0x56b   : > { %v5668_v54 = vpop.f32.mrf.mxu1 }
 0x56c   : > { %v5666_v17 = vadd.f32 %v5665_v55, %v5617_v46  ;;  %5765 = vmatmul.bf16.gmra.mxu3 %v15524_v51  ;;  %5814 = vmatmul.bf16.gmra.mxu0 %v15525_v15  ;;  %v15528_v51 = vld [vmem:[#allocation81_spill] sm:$0xff] }
 0x56e   : > { %5863 = vmatmul.bf16.gmra.mxu1 %v15526_v59  ;;  %5912 = vmatmul.bf16.gmra.mxu2 %v15527_v50  ;;  %v13985_v57 = vadd.f32 %v5714_v41, %v5666_v17 }
 0x56f   : > { %v5570_v22 = vpop.f32.mrf.mxu3 }
 0x570   : > { %v5571_v21 = vadd.f32 %v5570_v22, %v13871_v53  ;;  %v15530_v53 = vld [vmem:[#allocation83_spill] sm:$0xff]  ;;  %v11628_v22 = vld [vmem:[#allocation7 + $0xb54] sm:$0xf0] }
 0x571   : > { %v5717_v38 = vpop.f32.mrf.mxu2  ;;  %v5621_v62 = vpop.f32.mrf.mxu0 }
 0x572   : > { %v5620_v34 = vadd.f32 %v5619_v44, %v5571_v21 }
 0x573   : > { %v5670_v55 = vpop.f32.mrf.mxu1 }
 0x574   : > { %v5669_v10 = vadd.f32 %v5668_v54, %v5620_v34  ;;  %v10308_v54 = vld [vmem:[#allocation7 + $0xb48] sm:$0xf] }
 0x575   : > { %v10309_v21 = vor.u32 %v11628_v22, %v10308_v54  ;;  %v10644_v54 = vld [vmem:[#allocation7 + $0xde8] sm:$0xf] }
 0x576   : > { %v13988_v40 = vadd.f32 %v5717_v38, %v5669_v10 }
 0x577   : > { %v5572_v5 = vpop.f32.mrf.mxu3  ;;  %5948 = vmatpush.bf16.msrb.mxu3 %v10309_v21  ;;  %v11712_v21 = vld [vmem:[#allocation7 + $0xdf4] sm:$0xf0] }
 0x578   : > { %v5573_v46 = vadd.f32 %v5572_v5, %v13876_v3 }
 0x579   : > { %v5719_v50 = vpop.f32.mrf.mxu2  ;;  %v5624_v17 = vpop.f32.mrf.mxu0 }
 0x57a   : > { %v5622_v41 = vadd.f32 %v5621_v62, %v5573_v46 }
 0x57b   : > { %v5673_v59 = vpop.f32.mrf.mxu1 }
 0x57c   : > { %v5671_v15 = vadd.f32 %v5670_v55, %v5622_v41  ;;  %5770 = vmatmul.bf16.gmra.mxu3 %v15528_v51  ;;  %5819 = vmatmul.bf16.gmra.mxu0 %v15529_v36  ;;  %v10516_v36 = vld [vmem:[#allocation7 + $0xce8] sm:$0xf]  ;;  %v11680_v51 = vld [vmem:[#allocation7 + $0xcf4] sm:$0xf0] }
 0x57e   : > { %5868 = vmatmul.bf16.gmra.mxu1 %v15530_v53  ;;  %5917 = vmatmul.bf16.gmra.mxu2 %v15531_v28  ;;  %v13995_v44 = vadd.f32 %v5719_v50, %v5671_v15 }
 0x57f   : > { %v5575_v33 = vpop.f32.mrf.mxu3 }
 0x580   : > { %v5576_v3 = vadd.f32 %v5575_v33, %v13887_v0  ;;  %v15532_v0 = vld [vmem:[#allocation85_spill] sm:$0xff]  ;;  %v15533_v33 = vld [vmem:[#allocation86_spill] sm:$0xff] }
 0x581   : > { %v5722_v38 = vpop.f32.mrf.mxu2  ;;  %v5626_v62 = vpop.f32.mrf.mxu0 }
 0x582   : > { %v5625_v34 = vadd.f32 %v5624_v17, %v5576_v3  ;;  %v10517_v17 = vor.u32 %v11680_v51, %v10516_v36  ;;  %v11744_v3 = vld [vmem:[#allocation7 + $0xef4] sm:$0xf0]  ;;  %v10628_v36 = vld [vmem:[#allocation7 + $0xdc8] sm:$0xf] }
 0x583   : > { %v5675_v55 = vpop.f32.mrf.mxu1  ;;  %v11676_v51 = vld [vmem:[#allocation7 + $0xcd4] sm:$0xf0] }
 0x584   : > { %v5674_v10 = vadd.f32 %v5673_v59, %v5625_v34  ;;  %v10772_v59 = vld [vmem:[#allocation7 + $0xee8] sm:$0xf]  ;;  %v15535_v34 = vld [vmem:[#allocation88_spill] sm:$0xff]  ;;  %5992 = vmatpush.bf16.msrb.mxu0 %v10517_v17 }
 0x586   : > { %v13998_v5 = vadd.f32 %v5722_v38, %v5674_v10  ;;  %v15534_v38 = vld [vmem:[#allocation87_spill] sm:$0xff]  ;;  %v10773_v10 = vor.u32 %v11744_v3, %v10772_v59  ;;  %v10484_v3 = vld [vmem:[#allocation7 + $0xca8] sm:$0xf] }
 0x587   : > { %v5577_v46 = vpop.f32.mrf.mxu3 }
 0x588   : > { %v5578_v41 = vadd.f32 %v5577_v46, %v13892_v43  ;;  %v10645_v43 = vor.u32 %v11712_v21, %v10644_v54  ;;  %v10292_v46 = vld [vmem:[#allocation7 + $0xb28] sm:$0xf]  ;;  %6090 = vmatpush.bf16.msrb.mxu2 %v10773_v10  ;;  %v11740_v54 = vld [vmem:[#allocation7 + $0xed4] sm:$0xf0] }
 0x589   : > { %v5724_v28 = vpop.f32.mrf.mxu2  ;;  %v5629_v15 = vpop.f32.mrf.mxu0  ;;  %v10612_v10 = vld [vmem:[#allocation7 + $0xda8] sm:$0xf] }
 0x58a   : > { %v5627_v50 = vadd.f32 %v5626_v62, %v5578_v41  ;;  %v11624_v41 = vld [vmem:[#allocation7 + $0xb34] sm:$0xf0]  ;;  %6041 = vmatpush.bf16.msrb.mxu1 %v10645_v43 }
 0x58b   : > { %v5678_v53 = vpop.f32.mrf.mxu1  ;;  %v11672_v43 = vld [vmem:[#allocation7 + $0xcb4] sm:$0xf0] }
 0x58c   : > { %v5676_v22 = vadd.f32 %v5675_v55, %v5627_v50  ;;  %5775 = vmatmul.bf16.gmra.mxu3 %v15532_v0  ;;  %5824 = vmatmul.bf16.gmra.mxu0 %v15533_v33  ;;  %v10293_v50 = vor.u32 %v11624_v41, %v10292_v46  ;;  %v10500_v33 = vld [vmem:[#allocation7 + $0xcc8] sm:$0xf]  ;;  %v10485_v41 = vor.u32 %v11672_v43, %v10484_v3 }
 0x58e   : > { %5873 = vmatmul.bf16.gmra.mxu1 %v15534_v38  ;;  %5922 = vmatmul.bf16.gmra.mxu2 %v15535_v34  ;;  %v14005_v62 = vadd.f32 %v5724_v28, %v5676_v22  ;;  %v10501_v38 = vor.u32 %v11676_v51, %v10500_v33  ;;  %v10756_v34 = vld [vmem:[#allocation7 + $0xec8] sm:$0xf]  ;;  %v10629_v28 = vor.u32 %v11708_v35, %v10628_v36  ;;  %v11736_v33 = vld [vmem:[#allocation7 + $0xeb4] sm:$0xf0] }
 0x58f   : > { %v5580_v55 = vpop.f32.mrf.mxu3  ;;  %5949 = vmatpush.bf16.msrb.mxu3 %v10293_v50  ;;  %v10757_v22 = vor.u32 %v11740_v54, %v10756_v34  ;;  %v10724_v54 = vld [vmem:[#allocation7 + $0xe88] sm:$0xf] }
 0x590   : > { %v5581_v0 = vadd.f32 %v5580_v55, %v13903_v58  ;;  %5993 = vmatpush.bf16.msrb.mxu0 %v10501_v38  ;;  %6042 = vmatpush.bf16.msrb.mxu1 %v10629_v28  ;;  %v11704_v58 = vld [vmem:[#allocation7 + $0xdb4] sm:$0xf0]  ;;  %v10740_v55 = vld [vmem:[#allocation7 + $0xea8] sm:$0xf] }
 0x591   : > { %v5727_v20 = vpop.f32.mrf.mxu2  ;;  %v5631_v21 = vpop.f32.mrf.mxu0  ;;  %6091 = vmatpush.bf16.msrb.mxu2 %v10757_v22  ;;  %v10613_v51 = vor.u32 %v11704_v58, %v10612_v10  ;;  %v10741_v56 = vor.u32 %v11736_v33, %v10740_v55  ;;  %v10596_v38 = vld [vmem:[#allocation7 + $0xd88] sm:$0xf]  ;;  %v11732_v28 = vld [vmem:[#allocation7 + $0xe94] sm:$0xf0]  ;;  %v15536_v58 = vld [vmem:[#allocation89_spill] sm:$0xff] }
 0x592   : > { %v5630_v59 = vadd.f32 %v5629_v15, %v5581_v0  ;;  %v10468_v15 = vld [vmem:[#allocation7 + $0xc88] sm:$0xf]  ;;  %v11668_v0 = vld [vmem:[#allocation7 + $0xc94] sm:$0xf0]  ;;  %v10725_v3 = vor.u32 %v11732_v28, %v10724_v54 }
 0x593   : > { %v5680_v17 = vpop.f32.mrf.mxu1  ;;  %v10469_v36 = vor.u32 %v11668_v0, %v10468_v15  ;;  %v10452_v10 = vld [vmem:[#allocation7 + $0xc68] sm:$0xf]  ;;  %v11696_v33 = vld [vmem:[#allocation7 + $0xd74] sm:$0xf0]  ;;  %v15538_v15 = vld [vmem:[#allocation91_spill] sm:$0xff] }
 0x594   : > { %v5679_v46 = vadd.f32 %v5678_v53, %v5630_v59  ;;  %5994 = vmatpush.bf16.msrb.mxu0 %v10485_v41  ;;  %6043 = vmatpush.bf16.msrb.mxu1 %v10613_v51  ;;  %v11700_v53 = vld [vmem:[#allocation7 + $0xd94] sm:$0xf0]  ;;  %v10708_v51 = vld [vmem:[#allocation7 + $0xe68] sm:$0xf] }
 0x595   : > { %6092 = vmatpush.bf16.msrb.mxu2 %v10741_v56  ;;  %v10597_v59 = vor.u32 %v11700_v53, %v10596_v38  ;;  %v11664_v56 = vld [vmem:[#allocation7 + $0xc74] sm:$0xf0]  ;;  %v10436_v28 = vld [vmem:[#allocation7 + $0xc48] sm:$0xf] }
 0x596   : > { %v14008_v63 = vadd.f32 %v5727_v20, %v5679_v46  ;;  %v10580_v46 = vld [vmem:[#allocation7 + $0xd68] sm:$0xf]  ;;  %v10453_v55 = vor.u32 %v11664_v56, %v10452_v10  ;;  %v15539_v0 = vld [vmem:[#allocation92_spill] sm:$0xff] }
 0x597   : > { %v5582_v35 = vpop.f32.mrf.mxu3  ;;  %v11620_v53 = vld [vmem:[#allocation7 + $0xb14] sm:$0xf0] }
 0x598   : > { %v5583_v34 = vadd.f32 %v5582_v35, %v13908_v25  ;;  %5995 = vmatpush.bf16.msrb.mxu0 %v10469_v36  ;;  %6044 = vmatpush.bf16.msrb.mxu1 %v10597_v59  ;;  %v15537_v25 = vld [vmem:[#allocation90_spill] sm:$0xff]  ;;  %v11728_v35 = vld [vmem:[#allocation7 + $0xe74] sm:$0xf0] }
 0x599   : > { %v5729_v50 = vpop.f32.mrf.mxu2  ;;  %v5634_v22 = vpop.f32.mrf.mxu0  ;;  %6093 = vmatpush.bf16.msrb.mxu2 %v10725_v3  ;;  %v10709_v38 = vor.u32 %v11728_v35, %v10708_v51  ;;  %v10276_v36 = vld [vmem:[#allocation7 + $0xb08] sm:$0xf]  ;;  %v11660_v59 = vld [vmem:[#allocation7 + $0xc54] sm:$0xf0] }
 0x59a   : > { %v5632_v43 = vadd.f32 %v5631_v21, %v5583_v34  ;;  %v10581_v21 = vor.u32 %v11696_v33, %v10580_v46  ;;  %v10277_v54 = vor.u32 %v11620_v53, %v10276_v36  ;;  %v10564_v3 = vld [vmem:[#allocation7 + $0xd48] sm:$0xf]  ;;  %v10437_v56 = vor.u32 %v11660_v59, %v10436_v28  ;;  %v11724_v46 = vld [vmem:[#allocation7 + $0xe54] sm:$0xf0] }
 0x59b   : > { %v5683_v20 = vpop.f32.mrf.mxu1  ;;  %v10420_v35 = vld [vmem:[#allocation7 + $0xc28] sm:$0xf]  ;;  %v11720_v28 = vld [vmem:[#allocation7 + $0xe34] sm:$0xf0] }
 0x59c   : > { %v5681_v41 = vadd.f32 %v5680_v17, %v5632_v43  ;;  %5780 = vmatmul.bf16.gmra.mxu3 %v15536_v58  ;;  %5829 = vmatmul.bf16.gmra.mxu0 %v15537_v25 }
 0x59d   : > { %5996 = vmatpush.bf16.msrb.mxu0 %v10453_v55  ;;  %6045 = vmatpush.bf16.msrb.mxu1 %v10581_v21  ;;  %v11656_v21 = vld [vmem:[#allocation7 + $0xc34] sm:$0xf0] }
 0x59e   : > { %5878 = vmatmul.bf16.gmra.mxu1 %v15538_v15  ;;  %5927 = vmatmul.bf16.gmra.mxu2 %v15539_v0  ;;  %v14015_v34 = vadd.f32 %v5729_v50, %v5681_v41  ;;  %v11692_v15 = vld [vmem:[#allocation7 + $0xd54] sm:$0xf0]  ;;  %v10692_v0 = vld [vmem:[#allocation7 + $0xe48] sm:$0xf]  ;;  %v10421_v53 = vor.u32 %v11656_v21, %v10420_v35 }
 0x59f   : > { %v5585_v17 = vpop.f32.mrf.mxu3  ;;  %6094 = vmatpush.bf16.msrb.mxu2 %v10709_v38  ;;  %5950 = vmatpush.bf16.msrb.mxu3 %v10277_v54  ;;  %v10565_v50 = vor.u32 %v11692_v15, %v10564_v3  ;;  %v10693_v41 = vor.u32 %v11724_v46, %v10692_v0  ;;  %v10548_v38 = vld [vmem:[#allocation7 + $0xd28] sm:$0xf]  ;;  %v11652_v0 = vld [vmem:[#allocation7 + $0xc14] sm:$0xf0] }
 0x5a0   : > { %v5586_v43 = vadd.f32 %v5585_v17, %v13921_v61  ;;  %v11688_v61 = vld [vmem:[#allocation7 + $0xd34] sm:$0xf0]  ;;  %v10676_v17 = vld [vmem:[#allocation7 + $0xe28] sm:$0xf] }
 0x5a1   : > { %v5732_v10 = vpop.f32.mrf.mxu2  ;;  %v5636_v33 = vpop.f32.mrf.mxu0  ;;  %5997 = vmatpush.bf16.msrb.mxu0 %v10437_v56  ;;  %6046 = vmatpush.bf16.msrb.mxu1 %v10565_v50  ;;  %v10549_v59 = vor.u32 %v11688_v61, %v10548_v38  ;;  %v10677_v25 = vor.u32 %v11720_v28, %v10676_v17  ;;  %v10532_v54 = vld [vmem:[#allocation7 + $0xd08] sm:$0xf]  ;;  %v11716_v50 = vld [vmem:[#allocation7 + $0xe14] sm:$0xf0] }
 0x5a2   : > { %v5635_v51 = vadd.f32 %v5634_v22, %v5586_v43  ;;  %v10404_v22 = vld [vmem:[#allocation7 + $0xc08] sm:$0xf]  ;;  %v11776_v28 = vld [vmem:[#allocation7 + $0xff4] sm:$0xf0] }
 0x5a3   : > { %v5685_v55 = vpop.f32.mrf.mxu1  ;;  %6095 = vmatpush.bf16.msrb.mxu2 %v10693_v41  ;;  %v10405_v56 = vor.u32 %v11652_v0, %v10404_v22  ;;  %v10660_v46 = vld [vmem:[#allocation7 + $0xe08] sm:$0xf] }
 0x5a4   : > { %v5684_v36 = vadd.f32 %v5683_v20, %v5635_v51  ;;  %v11684_v20 = vld [vmem:[#allocation7 + $0xd14] sm:$0xf0]  ;;  %v10661_v35 = vor.u32 %v11716_v50, %v10660_v46  ;;  %v10900_v17 = vld [vmem:[#allocation7 + $0xfe8] sm:$0xf] }
 0x5a5   : > { %5998 = vmatpush.bf16.msrb.mxu0 %v10421_v53  ;;  %6047 = vmatpush.bf16.msrb.mxu1 %v10549_v59  ;;  %v10533_v51 = vor.u32 %v11684_v20, %v10532_v54  ;;  %v15542_v53 = vld [vmem:[#allocation95_spill] sm:$0xff] }
 0x5a6   : > { %v14018_v58 = vadd.f32 %v5732_v10, %v5684_v36  ;;  %v15541_v36 = vld [vmem:[#allocation94_spill] sm:$0xff] }
 0x5a7   : > { %v5587_v15 = vpop.f32.mrf.mxu3  ;;  %6096 = vmatpush.bf16.msrb.mxu2 %v10677_v25  ;;  %v15540_v25 = vld [vmem:[#allocation93_spill] sm:$0xff] }
 0x5a8   : > { %v5588_v3 = vadd.f32 %v5587_v15, %v13926_v18  ;;  %v15543_v18 = vld [vmem:[#allocation96_spill] sm:$0xff]  ;;  %v10901_v15 = vor.u32 %v11776_v28, %v10900_v17  ;;  %v15545_v17 = vld [vmem:[#allocation98_spill] sm:$0xff] }
 0x5a9   : > { %v5734_v43 = vpop.f32.mrf.mxu2  ;;  %v5639_v41 = vpop.f32.mrf.mxu0  ;;  %5999 = vmatpush.bf16.msrb.mxu0 %v10405_v56  ;;  %6048 = vmatpush.bf16.msrb.mxu1 %v10533_v51  ;;  %v15547_v28 = vld [vmem:[#allocation100_spill] sm:$0xff] }
 0x5aa   : > { %v5637_v21 = vadd.f32 %v5636_v33, %v5588_v3  ;;  %6139 = vmatpush.bf16.msra.mxu3 %v10901_v15 }
 0x5ab   : > { %v5688_v10 = vpop.f32.mrf.mxu1  ;;  %6097 = vmatpush.bf16.msrb.mxu2 %v10661_v35 }
 0x5ac   : > { %v5686_v38 = vadd.f32 %v5685_v55, %v5637_v21  ;;  %5785 = vmatmul.bf16.gmra.mxu3 %v15540_v25  ;;  %5834 = vmatmul.bf16.gmra.mxu0 %v15541_v36 }
 0x5ae   : > { %5883 = vmatmul.bf16.gmra.mxu1 %v15542_v53  ;;  %5932 = vmatmul.bf16.gmra.mxu2 %v15543_v18  ;;  %v14025_v61 = vadd.f32 %v5734_v43, %v5686_v38  ;;  %v15544_v38 = vld [vmem:[#allocation97_spill] sm:$0xff]  ;;  %v9094_v53 = vld [vmem:[#allocation7 + $0x1d8] sm:$0xf0] }
 0x5af   : > { %v5590_v59 = vpop.f32.mrf.mxu3 }
 0x5b0   : > { %v5591_v33 = vadd.f32 %v5590_v59, %v13937_v1  ;;  %v15546_v1 = vld [vmem:[#allocation99_spill] sm:$0xff]  ;;  %v11772_v59 = vld [vmem:[#allocation7 + $0xfd4] sm:$0xf0] }
 0x5b1   : > { %v5737_v22 = vpop.f32.mrf.mxu2  ;;  %v5641_v0 = vpop.f32.mrf.mxu0 }
 0x5b2   : > { %v5640_v55 = vadd.f32 %v5639_v41, %v5591_v33 }
 0x5b3   : > { %v5690_v54 = vpop.f32.mrf.mxu1 }
 0x5b4   : > { %v5689_v3 = vadd.f32 %v5688_v10, %v5640_v55  ;;  %v10884_v10 = vld [vmem:[#allocation7 + $0xfc8] sm:$0xf] }
 0x5b5   : > { %v10885_v33 = vor.u32 %v11772_v59, %v10884_v10  ;;  %v15549_v10 = vld [vmem:[#allocation102_spill] sm:$0xff]  ;;  %v15551_v59 = vld [vmem:[#allocation104_spill] sm:$0xff] }
 0x5b6   : > { %v14028_v56 = vadd.f32 %v5737_v22, %v5689_v3 }
 0x5b7   : > { %v5592_v20 = vpop.f32.mrf.mxu3  ;;  %6140 = vmatpush.bf16.msra.mxu3 %v10885_v33 }
 0x5b8   : > { %v5593_v46 = vadd.f32 %v5592_v20, %v13942_v37 }
 0x5b9   : > { %v5739_v50 = vpop.f32.mrf.mxu2  ;;  %v5644_v43 = vpop.f32.mrf.mxu0 }
 0x5ba   : > { %v5642_v51 = vadd.f32 %v5641_v0, %v5593_v46 }
 0x5bb   : > { %v5693_v35 = vpop.f32.mrf.mxu1 }
 0x5bc   : > { %v5691_v21 = vadd.f32 %v5690_v54, %v5642_v51  ;;  %5790 = vmatmul.bf16.gmra.mxu3 %v15544_v38  ;;  %5839 = vmatmul.bf16.gmra.mxu0 %v15545_v17  ;;  %v15548_v38 = vld [vmem:[#allocation101_spill] sm:$0xff] }
 0x5be   : > { %5888 = vmatmul.bf16.gmra.mxu1 %v15546_v1  ;;  %5937 = vmatmul.bf16.gmra.mxu2 %v15547_v28  ;;  %v14035_v41 = vadd.f32 %v5739_v50, %v5691_v21 }
 0x5bf   : > { %v5595_v15 = vpop.f32.mrf.mxu3 }
 0x5c0   : > { %v5596_v37 = vadd.f32 %v5595_v15, %v13953_v7  ;;  %v15550_v7 = vld [vmem:[#allocation103_spill] sm:$0xff]  ;;  %v11768_v15 = vld [vmem:[#allocation7 + $0xfb4] sm:$0xf0] }
 0x5c1   : > { %v5742_v22 = vpop.f32.mrf.mxu2  ;;  %v5646_v0 = vpop.f32.mrf.mxu0 }
 0x5c2   : > { %v5645_v55 = vadd.f32 %v5644_v43, %v5596_v37 }
 0x5c3   : > { %v5695_v54 = vpop.f32.mrf.mxu1 }
 0x5c4   : > { %v5694_v3 = vadd.f32 %v5693_v35, %v5645_v55  ;;  %v10868_v35 = vld [vmem:[#allocation7 + $0xfa8] sm:$0xf] }
 0x5c5   : > { %v10869_v37 = vor.u32 %v11768_v15, %v10868_v35  ;;  %v15553_v35 = vld [vmem:[#allocation106_spill] sm:$0xff]  ;;  %v15555_v15 = vld [vmem:[#allocation108_spill] sm:$0xff] }
 0x5c6   : > { %v14038_v20 = vadd.f32 %v5742_v22, %v5694_v3 }
 0x5c7   : > { %v5597_v46 = vpop.f32.mrf.mxu3  ;;  %6141 = vmatpush.bf16.msra.mxu3 %v10869_v37 }
 0x5c8   : > { %v5598_v51 = vadd.f32 %v5597_v46, %v13958_v2 }
 0x5c9   : > { %v5744_v28 = vpop.f32.mrf.mxu2  ;;  %v5805_v50 = vpop.f32.mrf.mxu0 }
 0x5ca   : > { %v5647_v21 = vadd.f32 %v5646_v0, %v5598_v51 }
 0x5cb   : > { %v5854_v1 = vpop.f32.mrf.mxu1 }
 0x5cc   : > { %v5696_v17 = vadd.f32 %v5695_v54, %v5647_v21  ;;  %5951 = vmatmul.bf16.vlgmr.msrb.gmra.mxu3 %v15548_v38  ;;  %6000 = vmatmul.bf16.vlgmr.msrb.gmra.mxu0 %v15549_v10  ;;  %v15552_v38 = vld [vmem:[#allocation105_spill] sm:$0xff] }
 0x5ce   : > { %6049 = vmatmul.bf16.vlgmr.msrb.gmra.mxu1 %v15550_v7  ;;  %6098 = vmatmul.bf16.vlgmr.msrb.gmra.mxu2 %v15551_v59  ;;  %v14045_v43 = vadd.f32 %v5744_v28, %v5696_v17 }
 0x5cf   : > { %v5756_v33 = vpop.f32.mrf.mxu3 }
 0x5d0   : > { %v5757_v2 = vadd.f32 %v5756_v33, %v13968_v4  ;;  %v15554_v4 = vld [vmem:[#allocation107_spill] sm:$0xff]  ;;  %v11764_v33 = vld [vmem:[#allocation7 + $0xf94] sm:$0xf0] }
 0x5d1   : > { %v5903_v22 = vpop.f32.mrf.mxu2  ;;  %v5807_v0 = vpop.f32.mrf.mxu0 }
 0x5d2   : > { %v5806_v55 = vadd.f32 %v5805_v50, %v5757_v2 }
 0x5d3   : > { %v5856_v54 = vpop.f32.mrf.mxu1 }
 0x5d4   : > { %v5855_v3 = vadd.f32 %v5854_v1, %v5806_v55  ;;  %v10852_v1 = vld [vmem:[#allocation7 + $0xf88] sm:$0xf] }
 0x5d5   : > { %v10853_v2 = vor.u32 %v11764_v33, %v10852_v1  ;;  %v15557_v1 = vld [vmem:[#allocation110_spill] sm:$0xff]  ;;  %v15559_v33 = vld [vmem:[#allocation112_spill] sm:$0xff] }
 0x5d6   : > { %v14048_v46 = vadd.f32 %v5903_v22, %v5855_v3 }
 0x5d7   : > { %v5758_v51 = vpop.f32.mrf.mxu3  ;;  %6142 = vmatpush.bf16.msra.mxu3 %v10853_v2 }
 0x5d8   : > { %v5759_v21 = vadd.f32 %v5758_v51, %v13975_v47 }
 0x5d9   : > { %v5905_v59 = vpop.f32.mrf.mxu2  ;;  %v5810_v17 = vpop.f32.mrf.mxu0 }
 0x5da   : > { %v5808_v28 = vadd.f32 %v5807_v0, %v5759_v21 }
 0x5db   : > { %v5859_v7 = vpop.f32.mrf.mxu1 }
 0x5dc   : > { %v5857_v10 = vadd.f32 %v5856_v54, %v5808_v28  ;;  %5956 = vmatmul.bf16.gmra.mxu3 %v15552_v38  ;;  %6005 = vmatmul.bf16.gmra.mxu0 %v15553_v35  ;;  %v15556_v38 = vld [vmem:[#allocation109_spill] sm:$0xff] }
 0x5de   : > { %6054 = vmatmul.bf16.gmra.mxu1 %v15554_v4  ;;  %6103 = vmatmul.bf16.gmra.mxu2 %v15555_v15  ;;  %v14055_v50 = vadd.f32 %v5905_v59, %v5857_v10 }
 0x5df   : > { %v5761_v37 = vpop.f32.mrf.mxu3 }
 0x5e0   : > { %v5762_v47 = vadd.f32 %v5761_v37, %v13978_v49  ;;  %v15558_v49 = vld [vmem:[#allocation111_spill] sm:$0xff]  ;;  %v11760_v37 = vld [vmem:[#allocation7 + $0xf74] sm:$0xf0] }
 0x5e1   : > { %v5908_v22 = vpop.f32.mrf.mxu2  ;;  %v5812_v0 = vpop.f32.mrf.mxu0 }
 0x5e2   : > { %v5811_v55 = vadd.f32 %v5810_v17, %v5762_v47 }
 0x5e3   : > { %v5861_v54 = vpop.f32.mrf.mxu1 }
 0x5e4   : > { %v5860_v3 = vadd.f32 %v5859_v7, %v5811_v55  ;;  %v10836_v7 = vld [vmem:[#allocation7 + $0xf68] sm:$0xf] }
 0x5e5   : > { %v10837_v47 = vor.u32 %v11760_v37, %v10836_v7  ;;  %v15561_v7 = vld [vmem:[#allocation114_spill] sm:$0xff]  ;;  %v15563_v37 = vld [vmem:[#allocation116_spill] sm:$0xff] }
 0x5e6   : > { %v14058_v51 = vadd.f32 %v5908_v22, %v5860_v3 }
 0x5e7   : > { %v5763_v21 = vpop.f32.mrf.mxu3  ;;  %6143 = vmatpush.bf16.msra.mxu3 %v10837_v47 }
 0x5e8   : > { %v5764_v28 = vadd.f32 %v5763_v21, %v13985_v57 }
 0x5e9   : > { %v5910_v15 = vpop.f32.mrf.mxu2  ;;  %v5815_v10 = vpop.f32.mrf.mxu0 }
 0x5ea   : > { %v5813_v59 = vadd.f32 %v5812_v0, %v5764_v28 }
 0x5eb   : > { %v5864_v4 = vpop.f32.mrf.mxu1 }
 0x5ec   : > { %v5862_v35 = vadd.f32 %v5861_v54, %v5813_v59  ;;  %5961 = vmatmul.bf16.gmra.mxu3 %v15556_v38  ;;  %6010 = vmatmul.bf16.gmra.mxu0 %v15557_v1  ;;  %v15560_v38 = vld [vmem:[#allocation113_spill] sm:$0xff] }
 0x5ee   : > { %6059 = vmatmul.bf16.gmra.mxu1 %v15558_v49  ;;  %6108 = vmatmul.bf16.gmra.mxu2 %v15559_v33  ;;  %v14065_v17 = vadd.f32 %v5910_v15, %v5862_v35 }
 0x5ef   : > { %v5766_v2 = vpop.f32.mrf.mxu3 }
 0x5f0   : > { %v5767_v57 = vadd.f32 %v5766_v2, %v13988_v40  ;;  %v15562_v40 = vld [vmem:[#allocation115_spill] sm:$0xff]  ;;  %v11756_v2 = vld [vmem:[#allocation7 + $0xf54] sm:$0xf0] }
 0x5f1   : > { %v5913_v22 = vpop.f32.mrf.mxu2  ;;  %v5817_v0 = vpop.f32.mrf.mxu0 }
 0x5f2   : > { %v5816_v55 = vadd.f32 %v5815_v10, %v5767_v57 }
 0x5f3   : > { %v5866_v54 = vpop.f32.mrf.mxu1 }
 0x5f4   : > { %v5865_v3 = vadd.f32 %v5864_v4, %v5816_v55  ;;  %v10820_v4 = vld [vmem:[#allocation7 + $0xf48] sm:$0xf] }
 0x5f5   : > { %v10821_v57 = vor.u32 %v11756_v2, %v10820_v4  ;;  %v11326_v4 = vld [vmem:[#allocation7 + $0x1ec] sm:$0xf] }
 0x5f6   : > { %v14068_v21 = vadd.f32 %v5913_v22, %v5865_v3 }
 0x5f7   : > { %v5768_v28 = vpop.f32.mrf.mxu3  ;;  %6144 = vmatpush.bf16.msra.mxu3 %v10821_v57  ;;  %v9110_v57 = vld [vmem:[#allocation7 + $0x1f8] sm:$0xf0] }
 0x5f8   : > { %v5769_v59 = vadd.f32 %v5768_v28, %v13995_v44 }
 0x5f9   : > { %v5915_v33 = vpop.f32.mrf.mxu2  ;;  %v5820_v35 = vpop.f32.mrf.mxu0 }
 0x5fa   : > { %v5818_v15 = vadd.f32 %v5817_v0, %v5769_v59 }
 0x5fb   : > { %v5869_v49 = vpop.f32.mrf.mxu1 }
 0x5fc   : > { %v5867_v1 = vadd.f32 %v5866_v54, %v5818_v15  ;;  %5966 = vmatmul.bf16.gmra.mxu3 %v15560_v38  ;;  %6015 = vmatmul.bf16.gmra.mxu0 %v15561_v7  ;;  %v11294_v7 = vld [vmem:[#allocation7 + $0xec] sm:$0xf]  ;;  %v8982_v38 = vld [vmem:[#allocation7 + $0xf8] sm:$0xf0] }
 0x5fe   : > { %6064 = vmatmul.bf16.gmra.mxu1 %v15562_v40  ;;  %6113 = vmatmul.bf16.gmra.mxu2 %v15563_v37  ;;  %v14075_v10 = vadd.f32 %v5915_v33, %v5867_v1 }
 0x5ff   : > { %v5771_v47 = vpop.f32.mrf.mxu3 }
 0x600   : > { %v5772_v44 = vadd.f32 %v5771_v47, %v13998_v5  ;;  %v15564_v5 = vld [vmem:[#allocation117_spill] sm:$0xff]  ;;  %v15565_v47 = vld [vmem:[#allocation118_spill] sm:$0xff] }
 0x601   : > { %v5918_v22 = vpop.f32.mrf.mxu2  ;;  %v5822_v0 = vpop.f32.mrf.mxu0 }
 0x602   : > { %v5821_v55 = vadd.f32 %v5820_v35, %v5772_v44  ;;  %v8985_v35 = vor.u32 %v11294_v7, %v8982_v38  ;;  %v9238_v44 = vld [vmem:[#allocation7 + $0x2f8] sm:$0xf0]  ;;  %v11322_v7 = vld [vmem:[#allocation7 + $0x1cc] sm:$0xf] }
 0x603   : > { %v5871_v54 = vpop.f32.mrf.mxu1  ;;  %v8966_v38 = vld [vmem:[#allocation7 + $0xd8] sm:$0xf0] }
 0x604   : > { %v5870_v3 = vadd.f32 %v5869_v49, %v5821_v55  ;;  %v11358_v49 = vld [vmem:[#allocation7 + $0x2ec] sm:$0xf]  ;;  %v15567_v55 = vld [vmem:[#allocation120_spill] sm:$0xff]  ;;  %6188 = vmatpush.bf16.msra.mxu0 %v8985_v35 }
 0x606   : > { %v14078_v28 = vadd.f32 %v5918_v22, %v5870_v3  ;;  %v15566_v22 = vld [vmem:[#allocation119_spill] sm:$0xff]  ;;  %v9241_v3 = vor.u32 %v11358_v49, %v9238_v44  ;;  %v11286_v44 = vld [vmem:[#allocation7 + $0xac] sm:$0xf] }
 0x607   : > { %v5773_v59 = vpop.f32.mrf.mxu3 }
 0x608   : > { %v5774_v15 = vadd.f32 %v5773_v59, %v14005_v62  ;;  %v9113_v62 = vor.u32 %v11326_v4, %v9110_v57  ;;  %v10804_v59 = vld [vmem:[#allocation7 + $0xf28] sm:$0xf]  ;;  %6286 = vmatpush.bf16.msra.mxu2 %v9241_v3  ;;  %v9222_v4 = vld [vmem:[#allocation7 + $0x2d8] sm:$0xf0]  ;;  %v11318_v3 = vld [vmem:[#allocation7 + $0x1ac] sm:$0xf] }
 0x609   : > { %v5920_v37 = vpop.f32.mrf.mxu2  ;;  %v5825_v1 = vpop.f32.mrf.mxu0 }
 0x60a   : > { %v5823_v33 = vadd.f32 %v5822_v0, %v5774_v15  ;;  %v11752_v15 = vld [vmem:[#allocation7 + $0xf34] sm:$0xf0]  ;;  %6237 = vmatpush.bf16.msra.mxu1 %v9113_v62  ;;  %v8950_v62 = vld [vmem:[#allocation7 + $0xb8] sm:$0xf0] }
 0x60b   : > { %v5874_v40 = vpop.f32.mrf.mxu1 }
 0x60c   : > { %v5872_v2 = vadd.f32 %v5871_v54, %v5823_v33  ;;  %5971 = vmatmul.bf16.gmra.mxu3 %v15564_v5  ;;  %6020 = vmatmul.bf16.gmra.mxu0 %v15565_v47  ;;  %v10805_v33 = vor.u32 %v11752_v15, %v10804_v59  ;;  %v11290_v47 = vld [vmem:[#allocation7 + $0xcc] sm:$0xf]  ;;  %v8953_v15 = vor.u32 %v11286_v44, %v8950_v62 }
 0x60e   : > { %6069 = vmatmul.bf16.gmra.mxu1 %v15566_v22  ;;  %6118 = vmatmul.bf16.gmra.mxu2 %v15567_v55  ;;  %v14085_v0 = vadd.f32 %v5920_v37, %v5872_v2  ;;  %v8969_v22 = vor.u32 %v11290_v47, %v8966_v38  ;;  %v11354_v55 = vld [vmem:[#allocation7 + $0x2cc] sm:$0xf]  ;;  %v9097_v37 = vor.u32 %v11322_v7, %v9094_v53  ;;  %v9206_v47 = vld [vmem:[#allocation7 + $0x2b8] sm:$0xf0] }
 0x60f   : > { %v5776_v54 = vpop.f32.mrf.mxu3  ;;  %6145 = vmatpush.bf16.msra.mxu3 %v10805_v33  ;;  %v9225_v2 = vor.u32 %v11354_v55, %v9222_v4  ;;  %v11346_v4 = vld [vmem:[#allocation7 + $0x28c] sm:$0xf] }
 0x610   : > { %v5777_v5 = vadd.f32 %v5776_v54, %v14008_v63  ;;  %6189 = vmatpush.bf16.msra.mxu0 %v8969_v22  ;;  %6238 = vmatpush.bf16.msra.mxu1 %v9097_v37  ;;  %v9078_v63 = vld [vmem:[#allocation7 + $0x1b8] sm:$0xf0]  ;;  %v11350_v54 = vld [vmem:[#allocation7 + $0x2ac] sm:$0xf] }
 0x611   : > { %v5923_v18 = vpop.f32.mrf.mxu2  ;;  %v5827_v57 = vpop.f32.mrf.mxu0  ;;  %6287 = vmatpush.bf16.msra.mxu2 %v9225_v2  ;;  %v9081_v38 = vor.u32 %v11318_v3, %v9078_v63  ;;  %v9209_v36 = vor.u32 %v11350_v54, %v9206_v47  ;;  %v11314_v22 = vld [vmem:[#allocation7 + $0x18c] sm:$0xf]  ;;  %v9190_v37 = vld [vmem:[#allocation7 + $0x298] sm:$0xf0]  ;;  %v15568_v63 = vld [vmem:[#allocation121_spill] sm:$0xff] }
 0x612   : > { %v5826_v49 = vadd.f32 %v5825_v1, %v5777_v5  ;;  %v11282_v1 = vld [vmem:[#allocation7 + $0x8c] sm:$0xf]  ;;  %v8934_v5 = vld [vmem:[#allocation7 + $0x98] sm:$0xf0]  ;;  %v9193_v44 = vor.u32 %v11346_v4, %v9190_v37 }
 0x613   : > { %v5876_v35 = vpop.f32.mrf.mxu1  ;;  %v8937_v7 = vor.u32 %v11282_v1, %v8934_v5  ;;  %v11278_v3 = vld [vmem:[#allocation7 + $0x6c] sm:$0xf]  ;;  %v9046_v47 = vld [vmem:[#allocation7 + $0x178] sm:$0xf0]  ;;  %v15570_v1 = vld [vmem:[#allocation123_spill] sm:$0xff] }
 0x614   : > { %v5875_v59 = vadd.f32 %v5874_v40, %v5826_v49  ;;  %6190 = vmatpush.bf16.msra.mxu0 %v8953_v15  ;;  %6239 = vmatpush.bf16.msra.mxu1 %v9081_v38  ;;  %v9062_v40 = vld [vmem:[#allocation7 + $0x198] sm:$0xf0]  ;;  %v11342_v38 = vld [vmem:[#allocation7 + $0x26c] sm:$0xf] }
 0x615   : > { %6288 = vmatpush.bf16.msra.mxu2 %v9209_v36  ;;  %v9065_v49 = vor.u32 %v11314_v22, %v9062_v40  ;;  %v8918_v36 = vld [vmem:[#allocation7 + $0x78] sm:$0xf0]  ;;  %v11748_v40 = vld [vmem:[#allocation7 + $0xf14] sm:$0xf0]  ;;  %v11274_v37 = vld [vmem:[#allocation7 + $0x4c] sm:$0xf] }
 0x616   : > { %v14088_v25 = vadd.f32 %v5923_v18, %v5875_v59  ;;  %v11310_v59 = vld [vmem:[#allocation7 + $0x16c] sm:$0xf]  ;;  %v8921_v54 = vor.u32 %v11278_v3, %v8918_v36  ;;  %v15571_v5 = vld [vmem:[#allocation124_spill] sm:$0xff] }
 0x617   : > { %v5778_v53 = vpop.f32.mrf.mxu3 }
 0x618   : > { %v5779_v55 = vadd.f32 %v5778_v53, %v14015_v34  ;;  %6191 = vmatpush.bf16.msra.mxu0 %v8937_v7  ;;  %6240 = vmatpush.bf16.msra.mxu1 %v9065_v49  ;;  %v15569_v34 = vld [vmem:[#allocation122_spill] sm:$0xff]  ;;  %v9174_v53 = vld [vmem:[#allocation7 + $0x278] sm:$0xf0] }
 0x619   : > { %v5925_v33 = vpop.f32.mrf.mxu2  ;;  %v5830_v2 = vpop.f32.mrf.mxu0  ;;  %6289 = vmatpush.bf16.msra.mxu2 %v9193_v44  ;;  %v9177_v22 = vor.u32 %v11342_v38, %v9174_v53  ;;  %v10788_v7 = vld [vmem:[#allocation7 + $0xf08] sm:$0xf]  ;;  %v8902_v49 = vld [vmem:[#allocation7 + $0x58] sm:$0xf0]  ;;  %v11306_v44 = vld [vmem:[#allocation7 + $0x14c] sm:$0xf] }
 0x61a   : > { %v5828_v62 = vadd.f32 %v5827_v57, %v5779_v55  ;;  %v9049_v57 = vor.u32 %v11310_v59, %v9046_v47  ;;  %v10789_v4 = vor.u32 %v11748_v40, %v10788_v7  ;;  %v8905_v36 = vor.u32 %v11274_v37, %v8902_v49  ;;  %v9158_v59 = vld [vmem:[#allocation7 + $0x258] sm:$0xf0]  ;;  %v11270_v53 = vld [vmem:[#allocation7 + $0x2c] sm:$0xf] }
 0x61b   : > { %v5879_v18 = vpop.f32.mrf.mxu1  ;;  %v9142_v37 = vld [vmem:[#allocation7 + $0x238] sm:$0xf0] }
 0x61c   : > { %v5877_v15 = vadd.f32 %v5876_v35, %v5828_v62  ;;  %5976 = vmatmul.bf16.gmra.mxu3 %v15568_v63  ;;  %6025 = vmatmul.bf16.gmra.mxu0 %v15569_v34 }
 0x61d   : > { %6192 = vmatpush.bf16.msra.mxu0 %v8921_v54  ;;  %6241 = vmatpush.bf16.msra.mxu1 %v9049_v57  ;;  %v8886_v57 = vld [vmem:[#allocation7 + $0x38] sm:$0xf0] }
 0x61e   : > { %6074 = vmatmul.bf16.gmra.mxu1 %v15570_v1  ;;  %6123 = vmatmul.bf16.gmra.mxu2 %v15571_v5  ;;  %v14095_v55 = vadd.f32 %v5925_v33, %v5877_v15  ;;  %v9030_v1 = vld [vmem:[#allocation7 + $0x158] sm:$0xf0]  ;;  %v11338_v5 = vld [vmem:[#allocation7 + $0x24c] sm:$0xf]  ;;  %v8889_v40 = vor.u32 %v11270_v53, %v8886_v57 }
 0x61f   : > { %v5781_v35 = vpop.f32.mrf.mxu3  ;;  %6290 = vmatpush.bf16.msra.mxu2 %v9177_v22  ;;  %6146 = vmatpush.bf16.msra.mxu3 %v10789_v4  ;;  %v9033_v33 = vor.u32 %v11306_v44, %v9030_v1  ;;  %v9161_v15 = vor.u32 %v11338_v5, %v9158_v59  ;;  %v11302_v22 = vld [vmem:[#allocation7 + $0x12c] sm:$0xf]  ;;  %v8870_v5 = vld [vmem:[#allocation7 + $0x18] sm:$0xf0] }
 0x620   : > { %v5782_v62 = vadd.f32 %v5781_v35, %v14018_v58  ;;  %v9014_v58 = vld [vmem:[#allocation7 + $0x138] sm:$0xf0]  ;;  %v11334_v35 = vld [vmem:[#allocation7 + $0x22c] sm:$0xf] }
 0x621   : > { %v5928_v3 = vpop.f32.mrf.mxu2  ;;  %v5832_v47 = vpop.f32.mrf.mxu0  ;;  %6193 = vmatpush.bf16.msra.mxu0 %v8905_v36  ;;  %6242 = vmatpush.bf16.msra.mxu1 %v9033_v33  ;;  %v9017_v49 = vor.u32 %v11302_v22, %v9014_v58  ;;  %v9145_v34 = vor.u32 %v11334_v35, %v9142_v37  ;;  %v11298_v4 = vld [vmem:[#allocation7 + $0x10c] sm:$0xf]  ;;  %v9126_v33 = vld [vmem:[#allocation7 + $0x218] sm:$0xf0] }
 0x622   : > { %v5831_v38 = vadd.f32 %v5830_v2, %v5782_v62  ;;  %v11266_v2 = vld [vmem:[#allocation7 + $0xc] sm:$0xf] }
 0x623   : > { %v5881_v54 = vpop.f32.mrf.mxu1  ;;  %6291 = vmatpush.bf16.msra.mxu2 %v9161_v15  ;;  %v8873_v36 = vor.u32 %v11266_v2, %v8870_v5  ;;  %v11330_v59 = vld [vmem:[#allocation7 + $0x20c] sm:$0xf] }
 0x624   : > { %v5880_v7 = vadd.f32 %v5879_v18, %v5831_v38  ;;  %v8998_v18 = vld [vmem:[#allocation7 + $0x118] sm:$0xf0]  ;;  %v9129_v53 = vor.u32 %v11330_v59, %v9126_v33  ;;  %v11386_v33 = vld [vmem:[#allocation7 + $0x3cc] sm:$0xf] }
 0x625   : > { %6194 = vmatpush.bf16.msra.mxu0 %v8889_v40  ;;  %6243 = vmatpush.bf16.msra.mxu1 %v9017_v49  ;;  %v9001_v38 = vor.u32 %v11298_v4, %v8998_v18 }
 0x626   : > { %v14098_v63 = vadd.f32 %v5928_v3, %v5880_v7  ;;  %v9366_v7 = vld [vmem:[#allocation7 + $0x3f8] sm:$0xf0] }
 0x627   : > { %v5783_v1 = vpop.f32.mrf.mxu3  ;;  %6292 = vmatpush.bf16.msra.mxu2 %v9145_v34  ;;  %v11390_v34 = vld [vmem:[#allocation7 + $0x3ec] sm:$0xf] }
 0x628   : > { %v5784_v44 = vadd.f32 %v5783_v1, %v14025_v61  ;;  %v9369_v58 = vor.u32 %v11390_v34, %v9366_v7 }
 0x629   : > { %v5930_v62 = vpop.f32.mrf.mxu2  ;;  %v5835_v15 = vpop.f32.mrf.mxu0  ;;  %6195 = vmatpush.bf16.msra.mxu0 %v8873_v36  ;;  %6244 = vmatpush.bf16.msra.mxu1 %v9001_v38 }
 0x62a   : > { %v5833_v57 = vadd.f32 %v5832_v47, %v5784_v44  ;;  %6335 = vmatpush.bf16.msrb.mxu3 %v9369_v58 }
 0x62b   : > { %v5884_v3 = vpop.f32.mrf.mxu1  ;;  %6293 = vmatpush.bf16.msra.mxu2 %v9129_v53 }
 0x62c   : > { %v5882_v22 = vadd.f32 %v5881_v54, %v5833_v57  ;;  %5981 = vmatmul.bf16.gmra.mxu3 %v13299_v60  ;;  %6030 = vmatmul.bf16.gmra.mxu0 %v13301_v39 }
 0x62e   : > { %6079 = vmatmul.bf16.gmra.mxu1 %v13303_v9  ;;  %6128 = vmatmul.bf16.gmra.mxu2 %v13305_v6  ;;  %v14105_v61 = vadd.f32 %v5930_v62, %v5882_v22 }
 0x62f   : > { %v5786_v40 = vpop.f32.mrf.mxu3 }
 0x630   : > { %v5787_v47 = vadd.f32 %v5786_v40, %v14028_v56 }
 0x631   : > { %v5933_v35 = vpop.f32.mrf.mxu2  ;;  %v5837_v37 = vpop.f32.mrf.mxu0 }
 0x632   : > { %v5836_v54 = vadd.f32 %v5835_v15, %v5787_v47  ;;  %v9350_v15 = vld [vmem:[#allocation7 + $0x3d8] sm:$0xf0] }
 0x633   : > { %v5886_v49 = vpop.f32.mrf.mxu1  ;;  %v9353_v53 = vor.u32 %v11386_v33, %v9350_v15 }
 0x634   : > { %v5885_v1 = vadd.f32 %v5884_v3, %v5836_v54 }
 0x635   : > { %6336 = vmatpush.bf16.msrb.mxu3 %v9353_v53 }
 0x636   : > { %v14108_v2 = vadd.f32 %v5933_v35, %v5885_v1 }
 0x637   : > { %v5788_v5 = vpop.f32.mrf.mxu3 }
 0x638   : > { %v5789_v4 = vadd.f32 %v5788_v5, %v14035_v41  ;;  %v11382_v5 = vld [vmem:[#allocation7 + $0x3ac] sm:$0xf] }
 0x639   : > { %v5935_v44 = vpop.f32.mrf.mxu2  ;;  %v5840_v62 = vpop.f32.mrf.mxu0 }
 0x63a   : > { %v5838_v36 = vadd.f32 %v5837_v37, %v5789_v4  ;;  %v9334_v4 = vld [vmem:[#allocation7 + $0x3b8] sm:$0xf0] }
 0x63b   : > { %v5889_v18 = vpop.f32.mrf.mxu1 }
 0x63c   : > { %v5887_v59 = vadd.f32 %v5886_v49, %v5838_v36  ;;  %5986 = vmatmul.bf16.gmra.mxu3 %v13325_v26  ;;  %6035 = vmatmul.bf16.gmra.mxu0 %v13327_v45 }
 0x63e   : > { %6084 = vmatmul.bf16.gmra.mxu1 %v13329_v13  ;;  %6133 = vmatmul.bf16.gmra.mxu2 %v13331_v12  ;;  %v14115_v56 = vadd.f32 %v5935_v44, %v5887_v59 }
 0x63f   : > { %v5791_v38 = vpop.f32.mrf.mxu3 }
 0x640   : > { %v5792_v41 = vadd.f32 %v5791_v38, %v14038_v20 }
 0x641   : > { %v5938_v57 = vpop.f32.mrf.mxu2  ;;  %v5842_v3 = vpop.f32.mrf.mxu0 }
 0x642   : > { %v5841_v22 = vadd.f32 %v5840_v62, %v5792_v41  ;;  %v9337_v62 = vor.u32 %v11382_v5, %v9334_v4 }
 0x643   : > { %v5891_v34 = vpop.f32.mrf.mxu1 }
 0x644   : > { %v5890_v7 = vadd.f32 %v5889_v18, %v5841_v22  ;;  %6337 = vmatpush.bf16.msrb.mxu3 %v9337_v62  ;;  %v11378_v22 = vld [vmem:[#allocation7 + $0x38c] sm:$0xf] }
 0x646   : > { %v14118_v40 = vadd.f32 %v5938_v57, %v5890_v7 }
 0x647   : > { %v5793_v58 = vpop.f32.mrf.mxu3 }
 0x648   : > { %v5794_v47 = vadd.f32 %v5793_v58, %v14045_v43 }
 0x649   : > { %v5940_v35 = vpop.f32.mrf.mxu2  ;;  %v6001_v37 = vpop.f32.mrf.mxu0 }
 0x64a   : > { %v5843_v54 = vadd.f32 %v5842_v3, %v5794_v47 }
 0x64b   : > { %v6050_v49 = vpop.f32.mrf.mxu1 }
 0x64c   : > { %v5892_v1 = vadd.f32 %v5891_v34, %v5843_v54  ;;  %6147 = vmatmul.bf16.vlgmr.msra.gmra.mxu3 %v13345_v8  ;;  %6196 = vmatmul.bf16.vlgmr.msra.gmra.mxu0 %v12568_v23  ;;  %v9318_v34 = vld [vmem:[#allocation7 + $0x398] sm:$0xf0] }
 0x64d   : > { %v9321_v58 = vor.u32 %v11378_v22, %v9318_v34  ;;  %v15572_v34 = vld [vmem:[#allocation22_spill] sm:$0xff] }
 0x64e   : > { %6245 = vmatmul.bf16.vlgmr.msra.gmra.mxu1 %v12620_v52  ;;  %6294 = vmatmul.bf16.vlgmr.msra.gmra.mxu2 %v12668_v42  ;;  %v14125_v20 = vadd.f32 %v5940_v35, %v5892_v1 }
 0x64f   : > { %v5952_v44 = vpop.f32.mrf.mxu3  ;;  %6338 = vmatpush.bf16.msrb.mxu3 %v9321_v58 }
 0x650   : > { %v5953_v43 = vadd.f32 %v5952_v44, %v14048_v46 }
 0x651   : > { %v6099_v36 = vpop.f32.mrf.mxu2  ;;  %v6003_v18 = vpop.f32.mrf.mxu0 }
 0x652   : > { %v6002_v59 = vadd.f32 %v6001_v37, %v5953_v43  ;;  %v11374_v43 = vld [vmem:[#allocation7 + $0x36c] sm:$0xf] }
 0x653   : > { %v6052_v33 = vpop.f32.mrf.mxu1 }
 0x654   : > { %v6051_v15 = vadd.f32 %v6050_v49, %v6002_v59 }
 0x656   : > { %v14128_v38 = vadd.f32 %v6099_v36, %v6051_v15  ;;  %v9302_v36 = vld [vmem:[#allocation7 + $0x378] sm:$0xf0] }
 0x657   : > { %v5954_v23 = vpop.f32.mrf.mxu3  ;;  %v9305_v59 = vor.u32 %v11374_v43, %v9302_v36 }
 0x658   : > { %v5955_v52 = vadd.f32 %v5954_v23, %v14055_v50 }
 0x659   : > { %v6101_v42 = vpop.f32.mrf.mxu2  ;;  %v6006_v53 = vpop.f32.mrf.mxu0  ;;  %6339 = vmatpush.bf16.msrb.mxu3 %v9305_v59  ;;  %v11422_v59 = vld [vmem:[#allocation7 + $0x4ec] sm:$0xf] }
 0x65a   : > { %v6004_v41 = vadd.f32 %v6003_v18, %v5955_v52 }
 0x65b   : > { %v6055_v57 = vpop.f32.mrf.mxu1 }
 0x65c   : > { %v6053_v3 = vadd.f32 %v6052_v33, %v6004_v41  ;;  %6152 = vmatmul.bf16.gmra.mxu3 %v13359_v32  ;;  %6201 = vmatmul.bf16.gmra.mxu0 %v12594_v16 }
 0x65e   : > { %6250 = vmatmul.bf16.gmra.mxu1 %v12644_v48  ;;  %6299 = vmatmul.bf16.gmra.mxu2 %v12688_v19  ;;  %v14135_v46 = vadd.f32 %v6101_v42, %v6053_v3 }
 0x65f   : > { %v5957_v7 = vpop.f32.mrf.mxu3 }
 0x660   : > { %v5958_v50 = vadd.f32 %v5957_v7, %v14058_v51  ;;  %v15574_v7 = vld [vmem:[#allocation24_spill] sm:$0xff] }
 0x661   : > { %v6104_v47 = vpop.f32.mrf.mxu2  ;;  %v6008_v35 = vpop.f32.mrf.mxu0 }
 0x662   : > { %v6007_v37 = vadd.f32 %v6006_v53, %v5958_v50  ;;  %v11370_v50 = vld [vmem:[#allocation7 + $0x34c] sm:$0xf] }
 0x663   : > { %v6057_v54 = vpop.f32.mrf.mxu1 }
 0x664   : > { %v6056_v49 = vadd.f32 %v6055_v57, %v6007_v37 }
 0x666   : > { %v14138_v1 = vadd.f32 %v6104_v47, %v6056_v49  ;;  %v9286_v47 = vld [vmem:[#allocation7 + $0x358] sm:$0xf0] }
 0x667   : > { %v5959_v16 = vpop.f32.mrf.mxu3  ;;  %v9289_v37 = vor.u32 %v11370_v50, %v9286_v47  ;;  %v11418_v50 = vld [vmem:[#allocation7 + $0x4cc] sm:$0xf]  ;;  %v9478_v47 = vld [vmem:[#allocation7 + $0x4d8] sm:$0xf0] }
 0x668   : > { %v5960_v48 = vadd.f32 %v5959_v16, %v14065_v17 }
 0x669   : > { %v6106_v19 = vpop.f32.mrf.mxu2  ;;  %v6011_v5 = vpop.f32.mrf.mxu0  ;;  %6340 = vmatpush.bf16.msrb.mxu3 %v9289_v37 }
 0x66a   : > { %v6009_v4 = vadd.f32 %v6008_v35, %v5960_v48 }
 0x66b   : > { %v6060_v44 = vpop.f32.mrf.mxu1 }
 0x66c   : > { %v6058_v62 = vadd.f32 %v6057_v54, %v6009_v4  ;;  %6157 = vmatmul.bf16.gmra.mxu3 %v13373_v31  ;;  %6206 = vmatmul.bf16.gmra.mxu0 %v12570_v24 }
 0x66e   : > { %6255 = vmatmul.bf16.gmra.mxu1 %v12572_v29  ;;  %6304 = vmatmul.bf16.gmra.mxu2 %v12574_v30  ;;  %v14145_v51 = vadd.f32 %v6106_v19, %v6058_v62 }
 0x66f   : > { %v5962_v18 = vpop.f32.mrf.mxu3 }
 0x670   : > { %v5963_v17 = vadd.f32 %v5962_v18, %v14068_v21  ;;  %v15573_v21 = vld [vmem:[#allocation23_spill] sm:$0xff] }
 0x671   : > { %v6109_v33 = vpop.f32.mrf.mxu2  ;;  %v6013_v15 = vpop.f32.mrf.mxu0 }
 0x672   : > { %v6012_v23 = vadd.f32 %v6011_v5, %v5963_v17  ;;  %v9494_v17 = vld [vmem:[#allocation7 + $0x4f8] sm:$0xf0] }
 0x673   : > { %v6062_v52 = vpop.f32.mrf.mxu1 }
 0x674   : > { %v6061_v42 = vadd.f32 %v6060_v44, %v6012_v23  ;;  %v15576_v23 = vld [vmem:[#allocation25_spill] sm:$0xff] }
 0x676   : > { %v14148_v53 = vadd.f32 %v6109_v33, %v6061_v42  ;;  %v11454_v33 = vld [vmem:[#allocation7 + $0x5ec] sm:$0xf]  ;;  %v9622_v42 = vld [vmem:[#allocation7 + $0x5f8] sm:$0xf0] }
 0x677   : > { %v5964_v24 = vpop.f32.mrf.mxu3 }
 0x678   : > { %v5965_v29 = vadd.f32 %v5964_v24, %v14075_v10  ;;  %v11486_v24 = vld [vmem:[#allocation7 + $0x6ec] sm:$0xf] }
 0x679   : > { %v6111_v30 = vpop.f32.mrf.mxu2  ;;  %v6016_v41 = vpop.f32.mrf.mxu0 }
 0x67a   : > { %v6014_v57 = vadd.f32 %v6013_v15, %v5965_v29  ;;  %v9750_v29 = vld [vmem:[#allocation7 + $0x6f8] sm:$0xf0] }
 0x67b   : > { %v6065_v3 = vpop.f32.mrf.mxu1 }
 0x67c   : > { %v6063_v22 = vadd.f32 %v6062_v52, %v6014_v57  ;;  %6162 = vmatmul.bf16.gmra.mxu3 %v13387_v11  ;;  %6211 = vmatmul.bf16.gmra.mxu0 %v15572_v34  ;;  %v9497_v52 = vor.u32 %v11422_v59, %v9494_v17  ;;  %v9753_v57 = vor.u32 %v11486_v24, %v9750_v29  ;;  %v9270_v34 = vld [vmem:[#allocation7 + $0x338] sm:$0xf0]  ;;  %v11414_v59 = vld [vmem:[#allocation7 + $0x4ac] sm:$0xf] }
 0x67d   : > { %v9462_v17 = vld [vmem:[#allocation7 + $0x4b8] sm:$0xf0] }
 0x67e   : > { %6260 = vmatmul.bf16.gmra.mxu1 %v15573_v21  ;;  %6309 = vmatmul.bf16.gmra.mxu2 %v15574_v7  ;;  %v14155_v58 = vadd.f32 %v6111_v30, %v6063_v22  ;;  %v15577_v30 = vld [vmem:[#allocation26_spill] sm:$0xff] }
 0x67f   : > { %v5967_v35 = vpop.f32.mrf.mxu3  ;;  %v11366_v22 = vld [vmem:[#allocation7 + $0x32c] sm:$0xf]  ;;  %6384 = vmatpush.bf16.msrb.mxu0 %v9497_v52  ;;  %6482 = vmatpush.bf16.msrb.mxu2 %v9753_v57 }
 0x680   : > { %v5968_v10 = vadd.f32 %v5967_v35, %v14078_v28  ;;  %v15575_v28 = vld [vmem:[#allocation125_spill] sm:$0xff]  ;;  %v9273_v7 = vor.u32 %v11366_v22, %v9270_v34  ;;  %v11450_v35 = vld [vmem:[#allocation7 + $0x5cc] sm:$0xf] }
 0x681   : > { %v6114_v54 = vpop.f32.mrf.mxu2  ;;  %v6018_v49 = vpop.f32.mrf.mxu0  ;;  %v11478_v52 = vld [vmem:[#allocation7 + $0x6ac] sm:$0xf] }
 0x682   : > { %v6017_v16 = vadd.f32 %v6016_v41, %v5968_v10  ;;  %v15578_v41 = vld [vmem:[#allocation27_spill] sm:$0xff]  ;;  %6341 = vmatpush.bf16.msrb.mxu3 %v9273_v7  ;;  %v11442_v57 = vld [vmem:[#allocation7 + $0x58c] sm:$0xf] }
 0x683   : > { %v6067_v48 = vpop.f32.mrf.mxu1  ;;  %v11474_v7 = vld [vmem:[#allocation7 + $0x68c] sm:$0xf] }
 0x684   : > { %v6066_v19 = vadd.f32 %v6065_v3, %v6017_v16  ;;  %v11482_v16 = vld [vmem:[#allocation7 + $0x6cc] sm:$0xf] }
 0x686   : > { %v14158_v5 = vadd.f32 %v6114_v54, %v6066_v19  ;;  %v9481_v54 = vor.u32 %v11418_v50, %v9478_v47  ;;  %v9702_v50 = vld [vmem:[#allocation7 + $0x698] sm:$0xf0] }
 0x687   : > { %v5969_v4 = vpop.f32.mrf.mxu3 }
 0x688   : > { %v5970_v44 = vadd.f32 %v5969_v4, %v14085_v0  ;;  %v9625_v0 = vor.u32 %v11454_v33, %v9622_v42  ;;  %6385 = vmatpush.bf16.msrb.mxu0 %v9481_v54  ;;  %v11446_v33 = vld [vmem:[#allocation7 + $0x5ac] sm:$0xf]  ;;  %v9718_v42 = vld [vmem:[#allocation7 + $0x6b8] sm:$0xf0] }
 0x689   : > { %v6116_v62 = vpop.f32.mrf.mxu2  ;;  %v6021_v43 = vpop.f32.mrf.mxu0  ;;  %v9721_v29 = vor.u32 %v11478_v52, %v9718_v42  ;;  %v11362_v42 = vld [vmem:[#allocation7 + $0x30c] sm:$0xf] }
 0x68a   : > { %v6019_v36 = vadd.f32 %v6018_v49, %v5970_v44  ;;  %6433 = vmatpush.bf16.msrb.mxu1 %v9625_v0  ;;  %v9606_v49 = vld [vmem:[#allocation7 + $0x5d8] sm:$0xf0] }
 0x68b   : > { %v6070_v18 = vpop.f32.mrf.mxu1  ;;  %v9609_v4 = vor.u32 %v11450_v35, %v9606_v49  ;;  %v9446_v0 = vld [vmem:[#allocation7 + $0x498] sm:$0xf0]  ;;  %v11406_v49 = vld [vmem:[#allocation7 + $0x46c] sm:$0xf] }
 0x68c   : > { %v6068_v15 = vadd.f32 %v6067_v48, %v6019_v36  ;;  %6167 = vmatmul.bf16.gmra.mxu3 %v15575_v28  ;;  %6216 = vmatmul.bf16.gmra.mxu0 %v15576_v23  ;;  %v9734_v48 = vld [vmem:[#allocation7 + $0x6d8] sm:$0xf0]  ;;  %v9465_v23 = vor.u32 %v11414_v59, %v9462_v17  ;;  %v11470_v17 = vld [vmem:[#allocation7 + $0x66c] sm:$0xf] }
 0x68d   : > { %v9737_v44 = vor.u32 %v11482_v16, %v9734_v48  ;;  %v9430_v16 = vld [vmem:[#allocation7 + $0x478] sm:$0xf0]  ;;  %v11438_v48 = vld [vmem:[#allocation7 + $0x56c] sm:$0xf] }
 0x68e   : > { %6265 = vmatmul.bf16.gmra.mxu1 %v15577_v30  ;;  %6314 = vmatmul.bf16.gmra.mxu2 %v15578_v41  ;;  %v14165_v3 = vadd.f32 %v6116_v62, %v6068_v15  ;;  %v9558_v59 = vld [vmem:[#allocation7 + $0x578] sm:$0xf0] }
 0x68f   : > { %v5972_v21 = vpop.f32.mrf.mxu3  ;;  %6434 = vmatpush.bf16.msrb.mxu1 %v9609_v4  ;;  %6483 = vmatpush.bf16.msrb.mxu2 %v9737_v44  ;;  %v15579_v44 = vld [vmem:[#allocation126_spill] sm:$0xff] }
 0x690   : > { %v5973_v37 = vadd.f32 %v5972_v21, %v14088_v25  ;;  %v9590_v25 = vld [vmem:[#allocation7 + $0x5b8] sm:$0xf0]  ;;  %6386 = vmatpush.bf16.msrb.mxu0 %v9465_v23  ;;  %v15582_v23 = vld [vmem:[#allocation30_spill] sm:$0xff] }
 0x691   : > { %v6119_v10 = vpop.f32.mrf.mxu2  ;;  %v6023_v19 = vpop.f32.mrf.mxu0  ;;  %v9593_v24 = vor.u32 %v11446_v33, %v9590_v25  ;;  %v9686_v33 = vld [vmem:[#allocation7 + $0x678] sm:$0xf0] }
 0x692   : > { %v6022_v62 = vadd.f32 %v6021_v43, %v5973_v37  ;;  %v11410_v43 = vld [vmem:[#allocation7 + $0x48c] sm:$0xf]  ;;  %v9705_v37 = vor.u32 %v11474_v7, %v9702_v50  ;;  %v9689_v25 = vor.u32 %v11470_v17, %v9686_v33  ;;  %v9670_v50 = vld [vmem:[#allocation7 + $0x658] sm:$0xf0] }
 0x693   : > { %v6072_v36 = vpop.f32.mrf.mxu1  ;;  %6435 = vmatpush.bf16.msrb.mxu1 %v9593_v24  ;;  %6484 = vmatpush.bf16.msrb.mxu2 %v9721_v29  ;;  %v9449_v21 = vor.u32 %v11410_v43, %v9446_v0  ;;  %v9254_v24 = vld [vmem:[#allocation7 + $0x318] sm:$0xf0]  ;;  %v11434_v0 = vld [vmem:[#allocation7 + $0x54c] sm:$0xf] }
 0x694   : > { %v6071_v15 = vadd.f32 %v6070_v18, %v6022_v62  ;;  %v9574_v18 = vld [vmem:[#allocation7 + $0x598] sm:$0xf0]  ;;  %v9433_v62 = vor.u32 %v11406_v49, %v9430_v16  ;;  %v9257_v29 = vor.u32 %v11362_v42, %v9254_v24  ;;  %v11466_v7 = vld [vmem:[#allocation7 + $0x64c] sm:$0xf] }
 0x695   : > { %v9577_v35 = vor.u32 %v11442_v57, %v9574_v18  ;;  %6387 = vmatpush.bf16.msrb.mxu0 %v9449_v21  ;;  %v9414_v43 = vld [vmem:[#allocation7 + $0x458] sm:$0xf0]  ;;  %v11398_v16 = vld [vmem:[#allocation7 + $0x42c] sm:$0xf] }
 0x696   : > { %v14168_v30 = vadd.f32 %v6119_v10, %v6071_v15  ;;  %v15581_v15 = vld [vmem:[#allocation29_spill] sm:$0xff]  ;;  %v9542_v18 = vld [vmem:[#allocation7 + $0x558] sm:$0xf0]  ;;  %6342 = vmatpush.bf16.msrb.mxu3 %v9257_v29  ;;  %v11426_v42 = vld [vmem:[#allocation7 + $0x50c] sm:$0xf] }
 0x697   : > { %v5974_v41 = vpop.f32.mrf.mxu3  ;;  %6436 = vmatpush.bf16.msrb.mxu1 %v9577_v35  ;;  %6485 = vmatpush.bf16.msrb.mxu2 %v9705_v37  ;;  %v9673_v37 = vor.u32 %v11466_v7, %v9670_v50  ;;  %v9654_v17 = vld [vmem:[#allocation7 + $0x638] sm:$0xf0]  ;;  %v15583_v50 = vld [vmem:[#allocation127_spill] sm:$0xff] }
 0x698   : > { %v5975_v22 = vadd.f32 %v5974_v41, %v14095_v55  ;;  %v15580_v55 = vld [vmem:[#allocation28_spill] sm:$0xff]  ;;  %v11402_v41 = vld [vmem:[#allocation7 + $0x44c] sm:$0xf] }
 0x699   : > { %v6121_v34 = vpop.f32.mrf.mxu2  ;;  %v6026_v47 = vpop.f32.mrf.mxu0  ;;  %6388 = vmatpush.bf16.msrb.mxu0 %v9433_v62  ;;  %v9417_v21 = vor.u32 %v11402_v41, %v9414_v43  ;;  %v11458_v41 = vld [vmem:[#allocation7 + $0x60c] sm:$0xf]  ;;  %v9638_v43 = vld [vmem:[#allocation7 + $0x618] sm:$0xf0] }
 0x69a   : > { %v6024_v54 = vadd.f32 %v6023_v19, %v5975_v22  ;;  %v9561_v19 = vor.u32 %v11438_v48, %v9558_v59  ;;  %v9398_v48 = vld [vmem:[#allocation7 + $0x438] sm:$0xf0]  ;;  %v11462_v59 = vld [vmem:[#allocation7 + $0x62c] sm:$0xf] }
 0x69b   : > { %v6075_v10 = vpop.f32.mrf.mxu1  ;;  %6486 = vmatpush.bf16.msrb.mxu2 %v9689_v25  ;;  %v9401_v62 = vor.u32 %v11398_v16, %v9398_v48  ;;  %v9382_v25 = vld [vmem:[#allocation7 + $0x418] sm:$0xf0]  ;;  %v11518_v16 = vld [vmem:[#allocation7 + $0x7ec] sm:$0xf] }
 0x69c   : > { %v6073_v4 = vadd.f32 %v6072_v36, %v6024_v54  ;;  %6172 = vmatmul.bf16.gmra.mxu3 %v15579_v44  ;;  %6221 = vmatmul.bf16.gmra.mxu0 %v15580_v55  ;;  %v9878_v48 = vld [vmem:[#allocation7 + $0x7f8] sm:$0xf0] }
 0x69d   : > { %6437 = vmatpush.bf16.msrb.mxu1 %v9561_v19  ;;  %6389 = vmatpush.bf16.msrb.mxu0 %v9417_v21  ;;  %v9641_v21 = vor.u32 %v11458_v41, %v9638_v43  ;;  %v15590_v41 = vld [vmem:[#allocation36_spill] sm:$0xff]  ;;  %v11514_v43 = vld [vmem:[#allocation7 + $0x7cc] sm:$0xf] }
 0x69e   : > { %6270 = vmatmul.bf16.gmra.mxu1 %v15581_v15  ;;  %6319 = vmatmul.bf16.gmra.mxu2 %v15582_v23  ;;  %v14175_v52 = vadd.f32 %v6121_v34, %v6073_v4  ;;  %v9545_v34 = vor.u32 %v11434_v0, %v9542_v18  ;;  %v11430_v4 = vld [vmem:[#allocation7 + $0x52c] sm:$0xf]  ;;  %v9657_v15 = vor.u32 %v11462_v59, %v9654_v17 }
 0x69f   : > { %v5977_v36 = vpop.f32.mrf.mxu3  ;;  %6487 = vmatpush.bf16.msrb.mxu2 %v9673_v37  ;;  %v15585_v37 = vld [vmem:[#allocation32_spill] sm:$0xff] }
 0x6a0   : > { %v5978_v57 = vadd.f32 %v5977_v36, %v14098_v63  ;;  %v9526_v63 = vld [vmem:[#allocation7 + $0x538] sm:$0xf0] }
 0x6a1   : > { %v6124_v22 = vpop.f32.mrf.mxu2  ;;  %v6028_v35 = vpop.f32.mrf.mxu0  ;;  %6438 = vmatpush.bf16.msrb.mxu1 %v9545_v34  ;;  %v9529_v33 = vor.u32 %v11430_v4, %v9526_v63  ;;  %6390 = vmatpush.bf16.msrb.mxu0 %v9401_v62  ;;  %v15584_v34 = vld [vmem:[#allocation31_spill] sm:$0xff] }
 0x6a2   : > { %v6027_v54 = vadd.f32 %v6026_v47, %v5978_v57  ;;  %v11394_v47 = vld [vmem:[#allocation7 + $0x40c] sm:$0xf] }
 0x6a3   : > { %v6077_v49 = vpop.f32.mrf.mxu1  ;;  %6488 = vmatpush.bf16.msrb.mxu2 %v9657_v15  ;;  %v9385_v29 = vor.u32 %v11394_v47, %v9382_v25 }
 0x6a4   : > { %v6076_v55 = vadd.f32 %v6075_v10, %v6027_v54  ;;  %v9510_v10 = vld [vmem:[#allocation7 + $0x518] sm:$0xf0] }
 0x6a5   : > { %6439 = vmatpush.bf16.msrb.mxu1 %v9529_v33  ;;  %v9513_v57 = vor.u32 %v11426_v42, %v9510_v10  ;;  %6391 = vmatpush.bf16.msrb.mxu0 %v9385_v29  ;;  %v15587_v29 = vld [vmem:[#allocation128_spill] sm:$0xff]  ;;  %v15588_v10 = vld [vmem:[#allocation34_spill] sm:$0xff] }
 0x6a6   : > { %v14178_v23 = vadd.f32 %v6124_v22, %v6076_v55  ;;  %v9881_v55 = vor.u32 %v11518_v16, %v9878_v48  ;;  %v12033_v48 = vld [vmem:[#allocation13] sm:$0xf] }
 0x6a7   : > { %v5979_v19 = vpop.f32.mrf.mxu3  ;;  %6489 = vmatpush.bf16.msrb.mxu2 %v9641_v21 }
 0x6a8   : > { %v5980_v24 = vadd.f32 %v5979_v19, %v14105_v61  ;;  %v15586_v61 = vld [vmem:[#allocation33_spill] sm:$0xff]  ;;  %6531 = vmatpush.bf16.msra.mxu3 %v9881_v55 }
 0x6a9   : > { %v6126_v36 = vpop.f32.mrf.mxu2  ;;  %v6031_v0 = vpop.f32.mrf.mxu0  ;;  %6440 = vmatpush.bf16.msrb.mxu1 %v9513_v57 }
 0x6aa   : > { %v6029_v18 = vadd.f32 %v6028_v35, %v5980_v24 }
 0x6ab   : > { %v6080_v22 = vpop.f32.mrf.mxu1 }
 0x6ac   : > { %v6078_v7 = vadd.f32 %v6077_v49, %v6029_v18  ;;  %6177 = vmatmul.bf16.gmra.mxu3 %v15583_v50  ;;  %6226 = vmatmul.bf16.gmra.mxu0 %v15584_v34 }
 0x6ae   : > { %6275 = vmatmul.bf16.gmra.mxu1 %v15585_v37  ;;  %6324 = vmatmul.bf16.gmra.mxu2 %v15586_v61  ;;  %v14185_v54 = vadd.f32 %v6126_v36, %v6078_v7 }
 0x6af   : > { %v5982_v4 = vpop.f32.mrf.mxu3 }
 0x6b0   : > { %v5983_v35 = vadd.f32 %v5982_v4, %v14108_v2  ;;  %v15589_v2 = vld [vmem:[#allocation35_spill] sm:$0xff]  ;;  %v14200_v4 = vperm.slane %v12033_v48, 3 }
 0x6b1   : > { %v6129_v62 = vpop.f32.mrf.mxu2  ;;  %v6033_v63 = vpop.f32.mrf.mxu0 }
 0x6b2   : > { %v6032_v49 = vadd.f32 %v6031_v0, %v5983_v35  ;;  %v9862_v0 = vld [vmem:[#allocation7 + $0x7d8] sm:$0xf0] }
 0x6b3   : > { %v6082_v59 = vpop.f32.mrf.mxu1  ;;  %v9865_v21 = vor.u32 %v11514_v43, %v9862_v0 }
 0x6b4   : > { %v6081_v17 = vadd.f32 %v6080_v22, %v6032_v49 }
 0x6b5   : > { %6532 = vmatpush.bf16.msra.mxu3 %v9865_v21 }
 0x6b6   : > { %v14188_v33 = vadd.f32 %v6129_v62, %v6081_v17 }
 0x6b7   : > { %v5984_v15 = vpop.f32.mrf.mxu3 }
 0x6b8   : > { %v5985_v19 = vadd.f32 %v5984_v15, %v14115_v56 }
 0x6b9   : > { %v6131_v47 = vpop.f32.mrf.mxu2  ;;  %v6036_v25 = vpop.f32.mrf.mxu0 }
 0x6ba   : > { %v6034_v42 = vadd.f32 %v6033_v63, %v5985_v19  ;;  %v15591_v19 = vld [vmem:[#allocation37_spill] sm:$0xff] }
 0x6bb   : > { %v6085_v24 = vpop.f32.mrf.mxu1 }
 0x6bc   : > { %v6083_v36 = vadd.f32 %v6082_v59, %v6034_v42  ;;  %6182 = vmatmul.bf16.gmra.mxu3 %v15587_v29  ;;  %6231 = vmatmul.bf16.gmra.mxu0 %v15588_v10  ;;  %v15594_v42 = vld [vmem:[#allocation40_spill] sm:$0xff] }
 0x6be   : > { %6280 = vmatmul.bf16.gmra.mxu1 %v15589_v2  ;;  %6329 = vmatmul.bf16.gmra.mxu2 %v15590_v41  ;;  %v14195_v57 = vadd.f32 %v6131_v47, %v6083_v36  ;;  %v15592_v47 = vld [vmem:[#allocation38_spill] sm:$0xff]  ;;  %v9846_v36 = vld [vmem:[#allocation7 + $0x7b8] sm:$0xf0] }
 0x6bf   : > { %v5987_v18 = vpop.f32.mrf.mxu3 }
 0x6c0   : > { %v5988_v56 = vadd.f32 %v5987_v18, %v14118_v40 }
 0x6c1   : > { %v6134_v22 = vpop.f32.mrf.mxu2  ;;  %v6038_v7 = vpop.f32.mrf.mxu0 }
 0x6c2   : > { %v6037_v34 = vadd.f32 %v6036_v25, %v5988_v56  ;;  %v15593_v25 = vld [vmem:[#allocation39_spill] sm:$0xff] }
 0x6c3   : > { %v6087_v37 = vpop.f32.mrf.mxu1 }
 0x6c4   : > { %v6086_v61 = vadd.f32 %v6085_v24, %v6037_v34  ;;  %v11510_v24 = vld [vmem:[#allocation7 + $0x7ac] sm:$0xf] }
 0x6c6   : > { %v14198_v16 = vadd.f32 %v6134_v22, %v6086_v61 }
 0x6c7   : > { %v5989_v55 = vpop.f32.mrf.mxu3 }
 0x6c8   : > { %v5990_v35 = vadd.f32 %v5989_v55, %v14125_v20  ;;  %v9849_v20 = vor.u32 %v11510_v24, %v9846_v36 }
 0x6c9   : > { %v6136_v62 = vpop.f32.mrf.mxu2  ;;  %v6197_v63 = vpop.f32.mrf.mxu0 }
 0x6ca   : > { %v6039_v49 = vadd.f32 %v6038_v7, %v5990_v35  ;;  %v6198_v59 = vadd.f32 %v6197_v63, %v14200_v4  ;;  %6533 = vmatpush.bf16.msra.mxu3 %v9849_v20 }
 0x6cb   : > { %v6246_v40 = vpop.f32.mrf.mxu1 }
 0x6cc   : > { %v6088_v17 = vadd.f32 %v6087_v37, %v6039_v49  ;;  %v6247_v15 = vadd.f32 %v6246_v40, %v6198_v59  ;;  %6343 = vmatmul.bf16.vlgmr.msrb.gmra.mxu3 %v15591_v19  ;;  %6392 = vmatmul.bf16.vlgmr.msrb.gmra.mxu0 %v15592_v47  ;;  %v15595_v40 = vld [vmem:[#allocation41_spill] sm:$0xff]  ;;  %v15598_v19 = vld [vmem:[#allocation44_spill] sm:$0xff]  ;;  %v11506_v47 = vld [vmem:[#allocation7 + $0x78c] sm:$0xf] }
 0x6ce   : > { %6441 = vmatmul.bf16.vlgmr.msrb.gmra.mxu1 %v15593_v25  ;;  %6490 = vmatmul.bf16.vlgmr.msrb.gmra.mxu2 %v15594_v42  ;;  %v14208_v10 = vadd.f32 %v6136_v62, %v6088_v17  ;;  %v15596_v17 = vld [vmem:[#allocation42_spill] sm:$0xff]  ;;  %v9830_v25 = vld [vmem:[#allocation7 + $0x798] sm:$0xf0] }
 0x6cf   : > { %v6148_v2 = vpop.f32.mrf.mxu3  ;;  %v9833_v42 = vor.u32 %v11506_v47, %v9830_v25 }
 0x6d0   : > { %v6149_v41 = vadd.f32 %v6148_v2, %v14128_v38 }
 0x6d1   : > { %v6295_v43 = vpop.f32.mrf.mxu2  ;;  %v6199_v21 = vpop.f32.mrf.mxu0  ;;  %6534 = vmatpush.bf16.msra.mxu3 %v9833_v42 }
 0x6d2   : > { %v14211_v0 = vadd.f32 %v6295_v43, %v6247_v15  ;;  %v6200_v18 = vadd.f32 %v6199_v21, %v14200_v4  ;;  %v7039_v34 = vmul.f32 %v13468_v14, %v6149_v41  ;;  %vm6974_vm0 = vcmp.ge.f32.partialorder %v6149_v41, 0.0 }
 0x6d3   : > { %v6248_v56 = vpop.f32.mrf.mxu1 }
 0x6d4   : > { %v6249_v22 = vadd.f32 %v6248_v56, %v6200_v18  ;;  %v7103_v63 = vsel %vm6974_vm0, %v6149_v41, %v7039_v34 }
 0x6d7   : > { %v6150_v7 = vpop.f32.mrf.mxu3 }
 0x6d8   : > { %v6151_v37 = vadd.f32 %v6150_v7, %v14135_v46  ;;  %v15597_v46 = vld [vmem:[#allocation43_spill] sm:$0xff] }
 0x6d9   : > { %v6297_v61 = vpop.f32.mrf.mxu2  ;;  %v6202_v55 = vpop.f32.mrf.mxu0 }
 0x6da   : > { %v14216_v48 = vadd.f32 %v6297_v61, %v6249_v22  ;;  %vm6978_vm1 = vcmp.ge.f32.partialorder %v6151_v37, 0.0  ;;  %v7043_v38 = vmul.f32 %v13468_v14, %v6151_v37  ;;  %v6203_v35 = vadd.f32 %v6202_v55, %v14200_v4 }
 0x6db   : > { %v6251_v62 = vpop.f32.mrf.mxu1 }
 0x6dc   : > { %v7107_v49 = vsel %vm6978_vm1, %v6151_v37, %v7043_v38  ;;  %v6252_v59 = vadd.f32 %v6251_v62, %v6203_v35  ;;  %6348 = vmatmul.bf16.gmra.mxu3 %v15595_v40  ;;  %6397 = vmatmul.bf16.gmra.mxu0 %v15596_v17  ;;  %v15599_v62 = vld [vmem:[#allocation45_spill] sm:$0xff]  ;;  %v15601_v40 = vld [vmem:[#allocation47_spill] sm:$0xff]  ;;  %v11502_v17 = vld [vmem:[#allocation7 + $0x76c] sm:$0xf] }
 0x6dd   : > { %v14222_v15 = vpack.c.bf16 %v7107_v49, %v7103_v63  ;;  %v15600_v63 = vld [vmem:[#allocation46_spill] sm:$0xff] }
 0x6de   : > { %6446 = vmatmul.bf16.gmra.mxu1 %v15597_v46  ;;  %6495 = vmatmul.bf16.gmra.mxu2 %v15598_v19  ;;  %v9814_v46 = vld [vmem:[#allocation7 + $0x778] sm:$0xf0] }
 0x6df   : > { %v6153_v24 = vpop.f32.mrf.mxu3  ;;  %v9817_v47 = vor.u32 %v11502_v17, %v9814_v46 }
 0x6e0   : > { %v6154_v36 = vadd.f32 %v6153_v24, %v14138_v1 }
 0x6e1   : > { %v6300_v20 = vpop.f32.mrf.mxu2  ;;  %v6204_v41 = vpop.f32.mrf.mxu0  ;;  %6535 = vmatpush.bf16.msra.mxu3 %v9817_v47 }
 0x6e2   : > { %v14227_v2 = vadd.f32 %v6300_v20, %v6252_v59  ;;  %v6205_v43 = vadd.f32 %v6204_v41, %v14200_v4  ;;  %v7047_v22 = vmul.f32 %v13468_v14, %v6154_v36  ;;  %vm6982_vm2 = vcmp.ge.f32.partialorder %v6154_v36, 0.0 }
 0x6e3   : > { %v6253_v21 = vpop.f32.mrf.mxu1 }
 0x6e4   : > { %v6254_v18 = vadd.f32 %v6253_v21, %v6205_v43  ;;  %v7111_v49 = vsel %vm6982_vm2, %v6154_v36, %v7047_v22 }
 0x6e7   : > { %v6155_v56 = vpop.f32.mrf.mxu3 }
 0x6e8   : > { %v6156_v7 = vadd.f32 %v6155_v56, %v14145_v51  ;;  %v15602_v51 = vld [vmem:[#allocation48_spill] sm:$0xff] }
 0x6e9   : > { %v6302_v34 = vpop.f32.mrf.mxu2  ;;  %v6207_v61 = vpop.f32.mrf.mxu0 }
 0x6ea   : > { %v14232_v37 = vadd.f32 %v6302_v34, %v6254_v18  ;;  %vm6986_vm3 = vcmp.ge.f32.partialorder %v6156_v7, 0.0  ;;  %v7051_v1 = vmul.f32 %v13468_v14, %v6156_v7  ;;  %v6208_v55 = vadd.f32 %v6207_v61, %v14200_v4 }
 0x6eb   : > { %v6256_v38 = vpop.f32.mrf.mxu1 }
 0x6ec   : > { %v6257_v35 = vadd.f32 %v6256_v38, %v6208_v55  ;;  %6353 = vmatmul.bf16.gmra.mxu3 %v15599_v62  ;;  %6402 = vmatmul.bf16.gmra.mxu0 %v15600_v63  ;;  %v7115_v59 = vsel %vm6986_vm3, %v6156_v7, %v7051_v1  ;;  %v15604_v62 = vld [vmem:[#allocation50_spill] sm:$0xff] }
 0x6ed   : > { %v14240_v19 = vpack.c.bf16 %v7115_v59, %v7111_v49  ;;  %v15605_v59 = vld [vmem:[#allocation51_spill] sm:$0xff] }
 0x6ee   : > { %6451 = vmatmul.bf16.gmra.mxu1 %v15601_v40  ;;  %6500 = vmatmul.bf16.gmra.mxu2 %v15602_v51  ;;  %v11498_v40 = vld [vmem:[#allocation7 + $0x74c] sm:$0xf]  ;;  %v9798_v51 = vld [vmem:[#allocation7 + $0x758] sm:$0xf0] }
 0x6ef   : > { %v6158_v25 = vpop.f32.mrf.mxu3  ;;  %v9801_v46 = vor.u32 %v11498_v40, %v9798_v51  ;;  %v11614_v40 = vld [vmem:[#allocation7 + $0xaec] sm:$0xf]  ;;  %v10262_v51 = vld [vmem:[#allocation7 + $0xaf8] sm:$0xf0] }
 0x6f0   : > { %v6159_v42 = vadd.f32 %v6158_v25, %v14148_v53 }
 0x6f1   : > { %v6305_v24 = vpop.f32.mrf.mxu2  ;;  %v6209_v41 = vpop.f32.mrf.mxu0  ;;  %6536 = vmatpush.bf16.msra.mxu3 %v9801_v46 }
 0x6f2   : > { %v14243_v20 = vadd.f32 %v6305_v24, %v6257_v35  ;;  %v6210_v36 = vadd.f32 %v6209_v41, %v14200_v4  ;;  %v7055_v56 = vmul.f32 %v13468_v14, %v6159_v42  ;;  %vm6990_vm4 = vcmp.ge.f32.partialorder %v6159_v42, 0.0  ;;  %v15603_v35 = vld [vmem:[#allocation49_spill] sm:$0xff] }
 0x6f3   : > { %v6258_v43 = vpop.f32.mrf.mxu1 }
 0x6f4   : > { %v6259_v21 = vadd.f32 %v6258_v43, %v6210_v36  ;;  %v7119_v63 = vsel %vm6990_vm4, %v6159_v42, %v7055_v56 }
 0x6f7   : > { %v6160_v18 = vpop.f32.mrf.mxu3 }
 0x6f8   : > { %v6161_v22 = vadd.f32 %v6160_v18, %v14155_v58  ;;  %v15606_v58 = vld [vmem:[#allocation52_spill] sm:$0xff] }
 0x6f9   : > { %v6307_v7 = vpop.f32.mrf.mxu2  ;;  %v6212_v61 = vpop.f32.mrf.mxu0 }
 0x6fa   : > { %v14248_v34 = vadd.f32 %v6307_v7, %v6259_v21  ;;  %vm6994_vm5 = vcmp.ge.f32.partialorder %v6161_v22, 0.0  ;;  %v7059_v53 = vmul.f32 %v13468_v14, %v6161_v22  ;;  %v6213_v1 = vadd.f32 %v6212_v61, %v14200_v4 }
 0x6fb   : > { %v6261_v55 = vpop.f32.mrf.mxu1 }
 0x6fc   : > { %v6262_v38 = vadd.f32 %v6261_v55, %v6213_v1  ;;  %6358 = vmatmul.bf16.gmra.mxu3 %v15603_v35  ;;  %6407 = vmatmul.bf16.gmra.mxu0 %v15604_v62  ;;  %v7123_v49 = vsel %vm6994_vm5, %v6161_v22, %v7059_v53  ;;  %v10006_v35 = vld [vmem:[#allocation7 + $0x8f8] sm:$0xf0]  ;;  %v11582_v62 = vld [vmem:[#allocation7 + $0x9ec] sm:$0xf] }
 0x6fd   : > { %v14256_v17 = vpack.c.bf16 %v7123_v49, %v7119_v63 }
 0x6fe   : > { %6456 = vmatmul.bf16.gmra.mxu1 %v15605_v59  ;;  %6505 = vmatmul.bf16.gmra.mxu2 %v15606_v58  ;;  %v15607_v59 = vld [vmem:[#allocation54_spill] sm:$0xff]  ;;  %v10134_v58 = vld [vmem:[#allocation7 + $0x9f8] sm:$0xf0] }
 0x6ff   : > { %v6163_v47 = vpop.f32.mrf.mxu3 }
 0x700   : > { %v6164_v25 = vadd.f32 %v6163_v47, %v14158_v5  ;;  %v15608_v47 = vld [vmem:[#allocation55_spill] sm:$0xff] }
 0x701   : > { %v6310_v24 = vpop.f32.mrf.mxu2  ;;  %v6214_v36 = vpop.f32.mrf.mxu0 }
 0x702   : > { %v14259_v41 = vadd.f32 %v6310_v24, %v6262_v38  ;;  %v6215_v42 = vadd.f32 %v6214_v36, %v14200_v4  ;;  %v7063_v18 = vmul.f32 %v13468_v14, %v6164_v25  ;;  %vm6998_vm6 = vcmp.ge.f32.partialorder %v6164_v25, 0.0  ;;  %v11550_v38 = vld [vmem:[#allocation7 + $0x8ec] sm:$0xf]  ;;  %v15609_v24 = vld [vmem:[#allocation56_spill] sm:$0xff] }
 0x703   : > { %v6263_v43 = vpop.f32.mrf.mxu1  ;;  %v11494_v36 = vld [vmem:[#allocation7 + $0x72c] sm:$0xf] }
 0x704   : > { %v6264_v21 = vadd.f32 %v6263_v43, %v6215_v42  ;;  %v7127_v63 = vsel %vm6998_vm6, %v6164_v25, %v7063_v18  ;;  %v9782_v42 = vld [vmem:[#allocation7 + $0x738] sm:$0xf0]  ;;  %v10137_v43 = vor.u32 %v11582_v62, %v10134_v58  ;;  %v11546_v18 = vld [vmem:[#allocation7 + $0x8cc] sm:$0xf] }
 0x705   : > { %v9785_v25 = vor.u32 %v11494_v36, %v9782_v42  ;;  %v10102_v36 = vld [vmem:[#allocation7 + $0x9b8] sm:$0xf0]  ;;  %v11606_v42 = vld [vmem:[#allocation7 + $0xaac] sm:$0xf] }
 0x706   : > { %6629 = vmatpush.bf16.msra.mxu1 %v10137_v43  ;;  %v10230_v43 = vld [vmem:[#allocation7 + $0xab8] sm:$0xf0] }
 0x707   : > { %v6165_v56 = vpop.f32.mrf.mxu3  ;;  %6537 = vmatpush.bf16.msra.mxu3 %v9785_v25 }
 0x708   : > { %v6166_v22 = vadd.f32 %v6165_v56, %v14165_v3  ;;  %v10009_v3 = vor.u32 %v11550_v38, %v10006_v35  ;;  %v11610_v38 = vld [vmem:[#allocation7 + $0xacc] sm:$0xf]  ;;  %v10246_v35 = vld [vmem:[#allocation7 + $0xad8] sm:$0xf0] }
 0x709   : > { %v6312_v7 = vpop.f32.mrf.mxu2  ;;  %v6217_v53 = vpop.f32.mrf.mxu0  ;;  %v10249_v58 = vor.u32 %v11610_v38, %v10246_v35  ;;  %v10086_v38 = vld [vmem:[#allocation7 + $0x998] sm:$0xf0]  ;;  %v11602_v35 = vld [vmem:[#allocation7 + $0xa8c] sm:$0xf] }
 0x70a   : > { %v14264_v61 = vadd.f32 %v6312_v7, %v6264_v21  ;;  %vm7002_vm7 = vcmp.ge.f32.partialorder %v6166_v22, 0.0  ;;  %v7067_v5 = vmul.f32 %v13468_v14, %v6166_v22  ;;  %v6218_v1 = vadd.f32 %v6217_v53, %v14200_v4  ;;  %6580 = vmatpush.bf16.msra.mxu0 %v10009_v3  ;;  %v9990_v7 = vld [vmem:[#allocation7 + $0x8d8] sm:$0xf0]  ;;  %v11578_v53 = vld [vmem:[#allocation7 + $0x9cc] sm:$0xf] }
 0x70b   : > { %v6266_v55 = vpop.f32.mrf.mxu1  ;;  %v10265_v21 = vor.u32 %v11614_v40, %v10262_v51  ;;  %v11542_v51 = vld [vmem:[#allocation7 + $0x8ac] sm:$0xf] }
 0x70c   : > { %v6267_v49 = vadd.f32 %v6266_v55, %v6218_v1  ;;  %6363 = vmatmul.bf16.gmra.mxu3 %v15381_v27  ;;  %6412 = vmatmul.bf16.gmra.mxu0 %v15607_v59  ;;  %v7131_v46 = vsel %vm7002_vm7, %v6166_v22, %v7067_v5  ;;  %v9993_v1 = vor.u32 %v11546_v18, %v9990_v7  ;;  %v10118_v55 = vld [vmem:[#allocation7 + $0x9d8] sm:$0xf0]  ;;  %v11538_v18 = vld [vmem:[#allocation7 + $0x88c] sm:$0xf] }
 0x70d   : > { %v14272_v56 = vpack.c.bf16 %v7131_v46, %v7127_v63  ;;  %6678 = vmatpush.bf16.msra.mxu2 %v10265_v21  ;;  %v10121_v59 = vor.u32 %v11578_v53, %v10118_v55  ;;  %v9974_v46 = vld [vmem:[#allocation7 + $0x8b8] sm:$0xf0]  ;;  %v11570_v53 = vld [vmem:[#allocation7 + $0x98c] sm:$0xf] }
 0x70e   : > { %6461 = vmatmul.bf16.gmra.mxu1 %v15608_v47  ;;  %6510 = vmatmul.bf16.gmra.mxu2 %v15609_v24  ;;  %v9977_v24 = vor.u32 %v11542_v51, %v9974_v46  ;;  %v9958_v7 = vld [vmem:[#allocation7 + $0x898] sm:$0xf0] }
 0x70f   : > { %v6168_v27 = vpop.f32.mrf.mxu3  ;;  %6581 = vmatpush.bf16.msra.mxu0 %v9993_v1  ;;  %6630 = vmatpush.bf16.msra.mxu1 %v10121_v59  ;;  %v9961_v55 = vor.u32 %v11538_v18, %v9958_v7  ;;  %v11598_v18 = vld [vmem:[#allocation7 + $0xa6c] sm:$0xf]  ;;  %v10198_v7 = vld [vmem:[#allocation7 + $0xa78] sm:$0xf0] }
 0x710   : > { %v6169_v22 = vadd.f32 %v6168_v27, %v14168_v30  ;;  %v11574_v30 = vld [vmem:[#allocation7 + $0x9ac] sm:$0xf] }
 0x711   : > { %v6315_v5 = vpop.f32.mrf.mxu2  ;;  %v6219_v63 = vpop.f32.mrf.mxu0  ;;  %6679 = vmatpush.bf16.msra.mxu2 %v10249_v58  ;;  %v10105_v21 = vor.u32 %v11574_v30, %v10102_v36  ;;  %v11566_v36 = vld [vmem:[#allocation7 + $0x96c] sm:$0xf] }
 0x712   : > { %v14275_v62 = vadd.f32 %v6315_v5, %v6267_v49  ;;  %v6220_v3 = vadd.f32 %v6219_v63, %v14200_v4  ;;  %v10233_v49 = vor.u32 %v11606_v42, %v10230_v43  ;;  %vm7006_vm8 = vcmp.ge.f32.partialorder %v6169_v22, 0.0  ;;  %v10214_v63 = vld [vmem:[#allocation7 + $0xa98] sm:$0xf0] }
 0x713   : > { %v6268_v40 = vpop.f32.mrf.mxu1  ;;  %6582 = vmatpush.bf16.msra.mxu0 %v9977_v24  ;;  %v7071_v25 = vmul.f32 %v13468_v14, %v6169_v22  ;;  %6631 = vmatpush.bf16.msra.mxu1 %v10105_v21  ;;  %v9942_v24 = vld [vmem:[#allocation7 + $0x878] sm:$0xf0]  ;;  %v15611_v21 = vld [vmem:[#allocation58_spill] sm:$0xff] }
 0x714   : > { %v6269_v47 = vadd.f32 %v6268_v40, %v6220_v3  ;;  %v10089_v3 = vor.u32 %v11570_v53, %v10086_v38  ;;  %v10217_v40 = vor.u32 %v11602_v35, %v10214_v63  ;;  %v11490_v38 = vld [vmem:[#allocation7 + $0x70c] sm:$0xf]  ;;  %v9766_v35 = vld [vmem:[#allocation7 + $0x718] sm:$0xf0] }
 0x715   : > { %6680 = vmatpush.bf16.msra.mxu2 %v10233_v49  ;;  %v7135_v42 = vsel %vm7006_vm8, %v6169_v22, %v7071_v25  ;;  %v9769_v25 = vor.u32 %v11490_v38, %v9766_v35  ;;  %v10038_v35 = vld [vmem:[#allocation7 + $0x938] sm:$0xf0] }
 0x717   : > { %v6170_v27 = vpop.f32.mrf.mxu3  ;;  %6583 = vmatpush.bf16.msra.mxu0 %v9961_v55  ;;  %6632 = vmatpush.bf16.msra.mxu1 %v10089_v3  ;;  %v15613_v55 = vld [vmem:[#allocation60_spill] sm:$0xff] }
 0x718   : > { %v6171_v5 = vadd.f32 %v6170_v27, %v14175_v52  ;;  %v11534_v52 = vld [vmem:[#allocation7 + $0x86c] sm:$0xf]  ;;  %v10070_v27 = vld [vmem:[#allocation7 + $0x978] sm:$0xf0]  ;;  %6538 = vmatpush.bf16.msra.mxu3 %v9769_v25 }
 0x719   : > { %v6317_v1 = vpop.f32.mrf.mxu2  ;;  %v6222_v58 = vpop.f32.mrf.mxu0  ;;  %6681 = vmatpush.bf16.msra.mxu2 %v10217_v40  ;;  %v9945_v49 = vor.u32 %v11534_v52, %v9942_v24  ;;  %v10073_v63 = vor.u32 %v11566_v36, %v10070_v27  ;;  %v11530_v40 = vld [vmem:[#allocation7 + $0x84c] sm:$0xf]  ;;  %v10054_v24 = vld [vmem:[#allocation7 + $0x958] sm:$0xf0] }
 0x71a   : > { %v14280_v59 = vadd.f32 %v6317_v1, %v6269_v47  ;;  %vm7010_vm9 = vcmp.ge.f32.partialorder %v6171_v5, 0.0  ;;  %v7075_v51 = vmul.f32 %v13468_v14, %v6171_v5  ;;  %v6223_v46 = vadd.f32 %v6222_v58, %v14200_v4  ;;  %v15610_v47 = vld [vmem:[#allocation57_spill] sm:$0xff]  ;;  %v15612_v1 = vld [vmem:[#allocation59_spill] sm:$0xff] }
 0x71b   : > { %v6271_v30 = vpop.f32.mrf.mxu1  ;;  %v10201_v58 = vor.u32 %v11598_v18, %v10198_v7  ;;  %6584 = vmatpush.bf16.msra.mxu0 %v9945_v49  ;;  %6633 = vmatpush.bf16.msra.mxu1 %v10073_v63  ;;  %v11590_v63 = vld [vmem:[#allocation7 + $0xa2c] sm:$0xf] }
 0x71c   : > { %v6272_v43 = vadd.f32 %v6271_v30, %v6223_v46  ;;  %6368 = vmatmul.bf16.gmra.mxu3 %v15610_v47  ;;  %6417 = vmatmul.bf16.gmra.mxu0 %v15611_v21  ;;  %v7139_v53 = vsel %vm7010_vm9, %v6171_v5, %v7075_v51  ;;  %v9926_v46 = vld [vmem:[#allocation7 + $0x858] sm:$0xf0]  ;;  %v11562_v30 = vld [vmem:[#allocation7 + $0x94c] sm:$0xf] }
 0x71d   : > { %v14290_v22 = vpack.c.bf16 %v7139_v53, %v7135_v42  ;;  %6682 = vmatpush.bf16.msra.mxu2 %v10201_v58  ;;  %v9929_v52 = vor.u32 %v11530_v40, %v9926_v46  ;;  %v11594_v47 = vld [vmem:[#allocation7 + $0xa4c] sm:$0xf]  ;;  %v10182_v21 = vld [vmem:[#allocation7 + $0xa58] sm:$0xf0]  ;;  %v10057_v27 = vor.u32 %v11562_v30, %v10054_v24 }
 0x71e   : > { %6466 = vmatmul.bf16.gmra.mxu1 %v15612_v1  ;;  %6515 = vmatmul.bf16.gmra.mxu2 %v15613_v55  ;;  %v10185_v18 = vor.u32 %v11594_v47, %v10182_v21  ;;  %v11526_v53 = vld [vmem:[#allocation7 + $0x82c] sm:$0xf]  ;;  %v9910_v1 = vld [vmem:[#allocation7 + $0x838] sm:$0xf0] }
 0x71f   : > { %v6173_v3 = vpop.f32.mrf.mxu3  ;;  %6585 = vmatpush.bf16.msra.mxu0 %v9929_v52  ;;  %6634 = vmatpush.bf16.msra.mxu1 %v10057_v27  ;;  %v9913_v38 = vor.u32 %v11526_v53, %v9910_v1  ;;  %v10166_v58 = vld [vmem:[#allocation7 + $0xa38] sm:$0xf0]  ;;  %v11522_v40 = vld [vmem:[#allocation7 + $0x80c] sm:$0xf] }
 0x720   : > { %v6174_v5 = vadd.f32 %v6173_v3, %v14178_v23  ;;  %v11558_v23 = vld [vmem:[#allocation7 + $0x92c] sm:$0xf]  ;;  %v9894_v46 = vld [vmem:[#allocation7 + $0x818] sm:$0xf0] }
 0x721   : > { %v6320_v51 = vpop.f32.mrf.mxu2  ;;  %v6224_v42 = vpop.f32.mrf.mxu0  ;;  %6683 = vmatpush.bf16.msra.mxu2 %v10185_v18  ;;  %v10041_v25 = vor.u32 %v11558_v23, %v10038_v35  ;;  %v11554_v30 = vld [vmem:[#allocation7 + $0x90c] sm:$0xf]  ;;  %v9897_v47 = vor.u32 %v11522_v40, %v9894_v46  ;;  %v10022_v21 = vld [vmem:[#allocation7 + $0x918] sm:$0xf0]  ;;  %v15614_v35 = vld [vmem:[#allocation61_spill] sm:$0xff] }
 0x722   : > { %v14293_v36 = vadd.f32 %v6320_v51, %v6272_v43  ;;  %v6225_v49 = vadd.f32 %v6224_v42, %v14200_v4  ;;  %v10169_v43 = vor.u32 %v11590_v63, %v10166_v58  ;;  %v7079_v51 = vmul.f32 %v13468_v14, %v6174_v5  ;;  %v11586_v42 = vld [vmem:[#allocation7 + $0xa0c] sm:$0xf]  ;;  %v10150_v27 = vld [vmem:[#allocation7 + $0xa18] sm:$0xf0] }
 0x723   : > { %v6273_v7 = vpop.f32.mrf.mxu1  ;;  %6586 = vmatpush.bf16.msra.mxu0 %v9913_v38  ;;  %6635 = vmatpush.bf16.msra.mxu1 %v10041_v25  ;;  %vm7014_vm10 = vcmp.ge.f32.partialorder %v6174_v5, 0.0  ;;  %v10153_v53 = vor.u32 %v11586_v42, %v10150_v27  ;;  %v15615_v63 = vld [vmem:[#allocation62_spill] sm:$0xff]  ;;  %v15616_v25 = vld [vmem:[#allocation63_spill] sm:$0xff]  ;;  %v10390_v40 = vld [vmem:[#allocation7 + $0xbf8] sm:$0xf0] }
 0x724   : > { %v6274_v55 = vadd.f32 %v6273_v7, %v6225_v49  ;;  %v10025_v7 = vor.u32 %v11554_v30, %v10022_v21  ;;  %v7143_v58 = vsel %vm7014_vm10, %v6174_v5, %v7079_v51 }
 0x725   : > { %6684 = vmatpush.bf16.msra.mxu2 %v10169_v43  ;;  %v15617_v43 = vld [vmem:[#allocation64_spill] sm:$0xff] }
 0x727   : > { %v6175_v3 = vpop.f32.mrf.mxu3  ;;  %6587 = vmatpush.bf16.msra.mxu0 %v9897_v47  ;;  %6636 = vmatpush.bf16.msra.mxu1 %v10025_v7 }
 0x728   : > { %v6176_v52 = vadd.f32 %v6175_v3, %v14185_v54  ;;  %v11646_v3 = vld [vmem:[#allocation7 + $0xbec] sm:$0xf] }
 0x729   : > { %v6322_v24 = vpop.f32.mrf.mxu2  ;;  %v6227_v49 = vpop.f32.mrf.mxu0  ;;  %6685 = vmatpush.bf16.msra.mxu2 %v10153_v53  ;;  %v10393_v30 = vor.u32 %v11646_v3, %v10390_v40  ;;  %v15620_v3 = vld [vmem:[#allocation67_spill] sm:$0xff] }
 0x72a   : > { %v14298_v18 = vadd.f32 %v6322_v24, %v6274_v55  ;;  %vm7018_vm11 = vcmp.ge.f32.partialorder %v6176_v52, 0.0  ;;  %v7083_v1 = vmul.f32 %v13468_v14, %v6176_v52  ;;  %v6228_v23 = vadd.f32 %v6227_v49, %v14200_v4 }
 0x72b   : > { %v6276_v38 = vpop.f32.mrf.mxu1  ;;  %6727 = vmatpush.bf16.msrb.mxu3 %v10393_v30  ;;  %v11642_v30 = vld [vmem:[#allocation7 + $0xbcc] sm:$0xf] }
 0x72c   : > { %v6277_v54 = vadd.f32 %v6276_v38, %v6228_v23  ;;  %6373 = vmatmul.bf16.gmra.mxu3 %v15614_v35  ;;  %6422 = vmatmul.bf16.gmra.mxu0 %v15615_v63  ;;  %v7147_v55 = vsel %vm7018_vm11, %v6176_v52, %v7083_v1 }
 0x72d   : > { %v14306_v46 = vpack.c.bf16 %v7147_v55, %v7143_v58  ;;  %v15618_v58 = vld [vmem:[#allocation65_spill] sm:$0xff]  ;;  %v15619_v55 = vld [vmem:[#allocation66_spill] sm:$0xff] }
 0x72e   : > { %6471 = vmatmul.bf16.gmra.mxu1 %v15616_v25  ;;  %6520 = vmatmul.bf16.gmra.mxu2 %v15617_v43 }
 0x72f   : > { %v6178_v24 = vpop.f32.mrf.mxu3 }
 0x730   : > { %v6179_v47 = vadd.f32 %v6178_v24, %v14188_v33  ;;  %v10374_v24 = vld [vmem:[#allocation7 + $0xbd8] sm:$0xf0] }
 0x731   : > { %v6325_v21 = vpop.f32.mrf.mxu2  ;;  %v6229_v27 = vpop.f32.mrf.mxu0 }
 0x732   : > { %v14309_v42 = vadd.f32 %v6325_v21, %v6277_v54  ;;  %v6230_v5 = vadd.f32 %v6229_v27, %v14200_v4  ;;  %v7087_v7 = vmul.f32 %v13468_v14, %v6179_v47  ;;  %vm7022_vm12 = vcmp.ge.f32.partialorder %v6179_v47, 0.0 }
 0x733   : > { %v6278_v51 = vpop.f32.mrf.mxu1  ;;  %v10377_v27 = vor.u32 %v11642_v30, %v10374_v24  ;;  %v11638_v30 = vld [vmem:[#allocation7 + $0xbac] sm:$0xf]  ;;  %v10358_v24 = vld [vmem:[#allocation7 + $0xbb8] sm:$0xf0] }
 0x734   : > { %v6279_v52 = vadd.f32 %v6278_v51, %v6230_v5  ;;  %v7151_v25 = vsel %vm7022_vm12, %v6179_v47, %v7087_v7 }
 0x735   : > { %6728 = vmatpush.bf16.msrb.mxu3 %v10377_v27  ;;  %v10361_v27 = vor.u32 %v11638_v30, %v10358_v24  ;;  %v10342_v30 = vld [vmem:[#allocation7 + $0xb98] sm:$0xf0] }
 0x737   : > { %v6180_v49 = vpop.f32.mrf.mxu3 }
 0x738   : > { %v6181_v53 = vadd.f32 %v6180_v49, %v14195_v57  ;;  %v15621_v57 = vld [vmem:[#allocation68_spill] sm:$0xff] }
 0x739   : > { %v6327_v1 = vpop.f32.mrf.mxu2  ;;  %v6232_v38 = vpop.f32.mrf.mxu0  ;;  %6729 = vmatpush.bf16.msrb.mxu3 %v10361_v27 }
 0x73a   : > { %v14314_v23 = vadd.f32 %v6327_v1, %v6279_v52  ;;  %vm7026_vm13 = vcmp.ge.f32.partialorder %v6181_v53, 0.0  ;;  %v7091_v33 = vmul.f32 %v13468_v14, %v6181_v53  ;;  %v6233_v54 = vadd.f32 %v6232_v38, %v14200_v4 }
 0x73b   : > { %v6281_v35 = vpop.f32.mrf.mxu1 }
 0x73c   : > { %v6282_v63 = vadd.f32 %v6281_v35, %v6233_v54  ;;  %6378 = vmatmul.bf16.gmra.mxu3 %v15618_v58  ;;  %6427 = vmatmul.bf16.gmra.mxu0 %v15619_v55  ;;  %v7155_v43 = vsel %vm7026_vm13, %v6181_v53, %v7091_v33  ;;  %v15622_v55 = vld [vmem:[#allocation69_spill] sm:$0xff] }
 0x73d   : > { %v14322_v40 = vpack.c.bf16 %v7155_v43, %v7151_v25  ;;  %v15623_v25 = vld [vmem:[#allocation70_spill] sm:$0xff] }
 0x73e   : > { %6476 = vmatmul.bf16.gmra.mxu1 %v15620_v3  ;;  %6525 = vmatmul.bf16.gmra.mxu2 %v15621_v57  ;;  %v15624_v3 = vld [vmem:[#allocation71_spill] sm:$0xff]  ;;  %v15625_v57 = vld [vmem:[#allocation72_spill] sm:$0xff] }
 0x73f   : > { %v6183_v21 = vpop.f32.mrf.mxu3 }
 0x740   : > { %v6184_v5 = vadd.f32 %v6183_v21, %v14198_v16 }
 0x741   : > { %v6330_v51 = vpop.f32.mrf.mxu2  ;;  %v6234_v49 = vpop.f32.mrf.mxu0 }
 0x742   : > { %v14325_v52 = vadd.f32 %v6330_v51, %v6282_v63  ;;  %v6235_v47 = vadd.f32 %v6234_v49, %v14200_v4  ;;  %v7095_v38 = vmul.f32 %v13468_v14, %v6184_v5  ;;  %vm7030_vm14 = vcmp.ge.f32.partialorder %v6184_v5, 0.0 }
 0x743   : > { %v6283_v7 = vpop.f32.mrf.mxu1 }
 0x744   : > { %v6284_v53 = vadd.f32 %v6283_v7, %v6235_v47  ;;  %v7159_v4 = vsel %vm7030_vm14, %v6184_v5, %v7095_v38 }
 0x747   : > { %v6185_v1 = vpop.f32.mrf.mxu3 }
 0x748   : > { %v6186_v33 = vadd.f32 %v6185_v1, %v14208_v10 }
 0x749   : > { %v6332_v54 = vpop.f32.mrf.mxu2  ;;  %v6393_v58 = vpop.f32.mrf.mxu0 }
 0x74a   : > { %v14330_v35 = vadd.f32 %v6332_v54, %v6284_v53  ;;  %vm7034_vm15 = vcmp.ge.f32.partialorder %v6186_v33, 0.0  ;;  %v7099_v16 = vmul.f32 %v13468_v14, %v6186_v33 }
 0x74b   : > { %v6442_v63 = vpop.f32.mrf.mxu1 }
 0x74c   : > { %6539 = vmatmul.bf16.vlgmr.msra.gmra.mxu3 %v15622_v55  ;;  %6588 = vmatmul.bf16.vlgmr.msra.gmra.mxu0 %v15623_v25  ;;  %v7163_v43 = vsel %vm7034_vm15, %v6186_v33, %v7099_v16 }
 0x74d   : > { %v14337_v10 = vpack.c.bf16 %v7163_v43, %v7159_v4  ;;  %v15627_v43 = vld [vmem:[#allocation73_spill] sm:$0xff] }
 0x74e   : > { %6637 = vmatmul.bf16.vlgmr.msra.gmra.mxu1 %v15624_v3  ;;  %6686 = vmatmul.bf16.vlgmr.msra.gmra.mxu2 %v15625_v57  ;;  %v15628_v3 = vld [vmem:[#allocation74_spill] sm:$0xff]  ;;  %v15630_v57 = vld [vmem:[#allocation76_spill] sm:$0xff] }
 0x74f   : > { %15626 = vst [vmem:[#allocation22_spill] sm:$0xff] %v14337_v10  ;;  %v6344_v21 = vpop.f32.mrf.mxu3 }
 0x750   : > { %v6345_v51 = vadd.f32 %v6344_v21, %v14211_v0  ;;  %v15629_v0 = vld [vmem:[#allocation75_spill] sm:$0xff] }
 0x751   : > { %v6491_v49 = vpop.f32.mrf.mxu2  ;;  %v6395_v47 = vpop.f32.mrf.mxu0 }
 0x752   : > { %v6394_v7 = vadd.f32 %v6393_v58, %v6345_v51 }
 0x753   : > { %v6444_v53 = vpop.f32.mrf.mxu1 }
 0x754   : > { %v6443_v1 = vadd.f32 %v6442_v63, %v6394_v7  ;;  %v11634_v63 = vld [vmem:[#allocation7 + $0xb8c] sm:$0xf] }
 0x755   : > { %v10345_v21 = vor.u32 %v11634_v63, %v10342_v30  ;;  %v10326_v63 = vld [vmem:[#allocation7 + $0xb78] sm:$0xf0] }
 0x756   : > { %v14340_v5 = vadd.f32 %v6491_v49, %v6443_v1 }
 0x757   : > { %v6346_v38 = vpop.f32.mrf.mxu3  ;;  %6730 = vmatpush.bf16.msrb.mxu3 %v10345_v21 }
 0x758   : > { %v6347_v33 = vadd.f32 %v6346_v38, %v14216_v48 }
 0x759   : > { %v6493_v54 = vpop.f32.mrf.mxu2  ;;  %v6398_v16 = vpop.f32.mrf.mxu0 }
 0x75a   : > { %v6396_v55 = vadd.f32 %v6395_v47, %v6347_v33 }
 0x75b   : > { %v6447_v25 = vpop.f32.mrf.mxu1 }
 0x75c   : > { %v6445_v4 = vadd.f32 %v6444_v53, %v6396_v55  ;;  %6544 = vmatmul.bf16.gmra.mxu3 %v15627_v43  ;;  %6593 = vmatmul.bf16.gmra.mxu0 %v15628_v3  ;;  %v15631_v3 = vld [vmem:[#allocation77_spill] sm:$0xff] }
 0x75e   : > { %6642 = vmatmul.bf16.gmra.mxu1 %v15629_v0  ;;  %6691 = vmatmul.bf16.gmra.mxu2 %v15630_v57  ;;  %v14347_v58 = vadd.f32 %v6493_v54, %v6445_v4  ;;  %v15632_v0 = vld [vmem:[#allocation78_spill] sm:$0xff]  ;;  %v15634_v57 = vld [vmem:[#allocation80_spill] sm:$0xff] }
 0x75f   : > { %v6349_v24 = vpop.f32.mrf.mxu3 }
 0x760   : > { %v6350_v48 = vadd.f32 %v6349_v24, %v14227_v2  ;;  %v15633_v2 = vld [vmem:[#allocation79_spill] sm:$0xff] }
 0x761   : > { %v6496_v27 = vpop.f32.mrf.mxu2  ;;  %v6400_v51 = vpop.f32.mrf.mxu0 }
 0x762   : > { %v6399_v49 = vadd.f32 %v6398_v16, %v6350_v48 }
 0x763   : > { %v6449_v47 = vpop.f32.mrf.mxu1 }
 0x764   : > { %v6448_v7 = vadd.f32 %v6447_v25, %v6399_v49  ;;  %v11630_v25 = vld [vmem:[#allocation7 + $0xb6c] sm:$0xf] }
 0x765   : > { %v10329_v24 = vor.u32 %v11630_v25, %v10326_v63  ;;  %v10310_v25 = vld [vmem:[#allocation7 + $0xb58] sm:$0xf0] }
 0x766   : > { %v14350_v53 = vadd.f32 %v6496_v27, %v6448_v7 }
 0x767   : > { %v6351_v1 = vpop.f32.mrf.mxu3  ;;  %6731 = vmatpush.bf16.msrb.mxu3 %v10329_v24 }
 0x768   : > { %v6352_v38 = vadd.f32 %v6351_v1, %v14232_v37 }
 0x769   : > { %v6498_v33 = vpop.f32.mrf.mxu2  ;;  %v6403_v54 = vpop.f32.mrf.mxu0 }
 0x76a   : > { %v6401_v55 = vadd.f32 %v6400_v51, %v6352_v38 }
 0x76b   : > { %v6452_v4 = vpop.f32.mrf.mxu1 }
 0x76c   : > { %v6450_v43 = vadd.f32 %v6449_v47, %v6401_v55  ;;  %6549 = vmatmul.bf16.gmra.mxu3 %v15631_v3  ;;  %6598 = vmatmul.bf16.gmra.mxu0 %v15632_v0  ;;  %v15635_v0 = vld [vmem:[#allocation81_spill] sm:$0xff] }
 0x76e   : > { %6647 = vmatmul.bf16.gmra.mxu1 %v15633_v2  ;;  %6696 = vmatmul.bf16.gmra.mxu2 %v15634_v57  ;;  %v14357_v16 = vadd.f32 %v6498_v33, %v6450_v43  ;;  %v15636_v2 = vld [vmem:[#allocation82_spill] sm:$0xff]  ;;  %v15638_v57 = vld [vmem:[#allocation84_spill] sm:$0xff] }
 0x76f   : > { %v6354_v30 = vpop.f32.mrf.mxu3 }
 0x770   : > { %v6355_v37 = vadd.f32 %v6354_v30, %v14243_v20  ;;  %v15637_v20 = vld [vmem:[#allocation83_spill] sm:$0xff] }
 0x771   : > { %v6501_v21 = vpop.f32.mrf.mxu2  ;;  %v6405_v48 = vpop.f32.mrf.mxu0 }
 0x772   : > { %v6404_v27 = vadd.f32 %v6403_v54, %v6355_v37 }
 0x773   : > { %v6454_v51 = vpop.f32.mrf.mxu1 }
 0x774   : > { %v6453_v49 = vadd.f32 %v6452_v4, %v6404_v27  ;;  %v11626_v4 = vld [vmem:[#allocation7 + $0xb4c] sm:$0xf] }
 0x775   : > { %v10313_v30 = vor.u32 %v11626_v4, %v10310_v25  ;;  %v15640_v4 = vld [vmem:[#allocation86_spill] sm:$0xff]  ;;  %v10646_v25 = vld [vmem:[#allocation7 + $0xdf8] sm:$0xf0] }
 0x776   : > { %v14360_v47 = vadd.f32 %v6501_v21, %v6453_v49 }
 0x777   : > { %v6356_v7 = vpop.f32.mrf.mxu3  ;;  %6732 = vmatpush.bf16.msrb.mxu3 %v10313_v30  ;;  %v15641_v30 = vld [vmem:[#allocation87_spill] sm:$0xff] }
 0x778   : > { %v6357_v1 = vadd.f32 %v6356_v7, %v14248_v34 }
 0x779   : > { %v6503_v38 = vpop.f32.mrf.mxu2  ;;  %v6408_v33 = vpop.f32.mrf.mxu0 }
 0x77a   : > { %v6406_v55 = vadd.f32 %v6405_v48, %v6357_v1 }
 0x77b   : > { %v6457_v43 = vpop.f32.mrf.mxu1 }
 0x77c   : > { %v6455_v3 = vadd.f32 %v6454_v51, %v6406_v55  ;;  %6554 = vmatmul.bf16.gmra.mxu3 %v15635_v0  ;;  %6603 = vmatmul.bf16.gmra.mxu0 %v15636_v2  ;;  %v11678_v0 = vld [vmem:[#allocation7 + $0xcec] sm:$0xf]  ;;  %v10518_v2 = vld [vmem:[#allocation7 + $0xcf8] sm:$0xf0] }
 0x77e   : > { %6652 = vmatmul.bf16.gmra.mxu1 %v15637_v20  ;;  %6701 = vmatmul.bf16.gmra.mxu2 %v15638_v57  ;;  %v14367_v54 = vadd.f32 %v6503_v38, %v6455_v3  ;;  %v11710_v20 = vld [vmem:[#allocation7 + $0xdec] sm:$0xf] }
 0x77f   : > { %v6359_v63 = vpop.f32.mrf.mxu3 }
 0x780   : > { %v6360_v34 = vadd.f32 %v6359_v63, %v14259_v41  ;;  %v15639_v41 = vld [vmem:[#allocation85_spill] sm:$0xff]  ;;  %v10774_v63 = vld [vmem:[#allocation7 + $0xef8] sm:$0xf0] }
 0x781   : > { %v6506_v24 = vpop.f32.mrf.mxu2  ;;  %v6410_v37 = vpop.f32.mrf.mxu0 }
 0x782   : > { %v6409_v21 = vadd.f32 %v6408_v33, %v6360_v34  ;;  %v10521_v33 = vor.u32 %v11678_v0, %v10518_v2  ;;  %v15642_v34 = vld [vmem:[#allocation88_spill] sm:$0xff]  ;;  %v11706_v0 = vld [vmem:[#allocation7 + $0xdcc] sm:$0xf] }
 0x783   : > { %v6459_v48 = vpop.f32.mrf.mxu1 }
 0x784   : > { %v6458_v27 = vadd.f32 %v6457_v43, %v6409_v21  ;;  %v11742_v43 = vld [vmem:[#allocation7 + $0xeec] sm:$0xf]  ;;  %6776 = vmatpush.bf16.msrb.mxu0 %v10521_v33 }
 0x785   : > { %v11622_v21 = vld [vmem:[#allocation7 + $0xb2c] sm:$0xf] }
 0x786   : > { %v14370_v51 = vadd.f32 %v6506_v24, %v6458_v27  ;;  %v10777_v24 = vor.u32 %v11742_v43, %v10774_v63  ;;  %v10294_v27 = vld [vmem:[#allocation7 + $0xb38] sm:$0xf0]  ;;  %v11670_v63 = vld [vmem:[#allocation7 + $0xcac] sm:$0xf] }
 0x787   : > { %v6361_v49 = vpop.f32.mrf.mxu3 }
 0x788   : > { %v6362_v7 = vadd.f32 %v6361_v49, %v14264_v61  ;;  %v10649_v61 = vor.u32 %v11710_v20, %v10646_v25  ;;  %v10297_v49 = vor.u32 %v11622_v21, %v10294_v27  ;;  %6874 = vmatpush.bf16.msrb.mxu2 %v10777_v24  ;;  %v10758_v20 = vld [vmem:[#allocation7 + $0xed8] sm:$0xf0]  ;;  %v11702_v24 = vld [vmem:[#allocation7 + $0xdac] sm:$0xf] }
 0x789   : > { %v6508_v1 = vpop.f32.mrf.mxu2  ;;  %v6413_v38 = vpop.f32.mrf.mxu0 }
 0x78a   : > { %v6411_v55 = vadd.f32 %v6410_v37, %v6362_v7  ;;  %6825 = vmatpush.bf16.msrb.mxu1 %v10649_v61  ;;  %v11674_v7 = vld [vmem:[#allocation7 + $0xccc] sm:$0xf]  ;;  %6733 = vmatpush.bf16.msrb.mxu3 %v10297_v49  ;;  %v10486_v61 = vld [vmem:[#allocation7 + $0xcb8] sm:$0xf0] }
 0x78b   : > { %v6462_v3 = vpop.f32.mrf.mxu1  ;;  %v10489_v27 = vor.u32 %v11670_v63, %v10486_v61 }
 0x78c   : > { %v6460_v57 = vadd.f32 %v6459_v48, %v6411_v55  ;;  %6559 = vmatmul.bf16.gmra.mxu3 %v15639_v41  ;;  %6608 = vmatmul.bf16.gmra.mxu0 %v15640_v4  ;;  %v10502_v55 = vld [vmem:[#allocation7 + $0xcd8] sm:$0xf0] }
 0x78d   : > { %v10505_v4 = vor.u32 %v11674_v7, %v10502_v55  ;;  %v10742_v7 = vld [vmem:[#allocation7 + $0xeb8] sm:$0xf0] }
 0x78e   : > { %6657 = vmatmul.bf16.gmra.mxu1 %v15641_v30  ;;  %6706 = vmatmul.bf16.gmra.mxu2 %v15642_v34  ;;  %v14377_v37 = vadd.f32 %v6508_v1, %v6460_v57  ;;  %v10630_v30 = vld [vmem:[#allocation7 + $0xdd8] sm:$0xf0]  ;;  %v11738_v34 = vld [vmem:[#allocation7 + $0xecc] sm:$0xf] }
 0x78f   : > { %v6364_v48 = vpop.f32.mrf.mxu3  ;;  %v10633_v1 = vor.u32 %v11706_v0, %v10630_v30  ;;  %v10761_v57 = vor.u32 %v11738_v34, %v10758_v20  ;;  %6777 = vmatpush.bf16.msrb.mxu0 %v10505_v4  ;;  %v10470_v0 = vld [vmem:[#allocation7 + $0xc98] sm:$0xf0]  ;;  %v11730_v20 = vld [vmem:[#allocation7 + $0xe8c] sm:$0xf] }
 0x790   : > { %v6365_v2 = vadd.f32 %v6364_v48, %v14275_v62  ;;  %v10614_v62 = vld [vmem:[#allocation7 + $0xdb8] sm:$0xf0]  ;;  %v11734_v48 = vld [vmem:[#allocation7 + $0xeac] sm:$0xf] }
 0x791   : > { %v6511_v41 = vpop.f32.mrf.mxu2  ;;  %v6415_v25 = vpop.f32.mrf.mxu0  ;;  %6826 = vmatpush.bf16.msrb.mxu1 %v10633_v1  ;;  %6875 = vmatpush.bf16.msrb.mxu2 %v10761_v57  ;;  %v10617_v55 = vor.u32 %v11702_v24, %v10614_v62  ;;  %v10745_v14 = vor.u32 %v11734_v48, %v10742_v7  ;;  %v10726_v1 = vld [vmem:[#allocation7 + $0xe98] sm:$0xf0]  ;;  %v11662_v24 = vld [vmem:[#allocation7 + $0xc6c] sm:$0xf]  ;;  %v15643_v62 = vld [vmem:[#allocation89_spill] sm:$0xff] }
 0x792   : > { %v6414_v43 = vadd.f32 %v6413_v38, %v6365_v2  ;;  %v11666_v38 = vld [vmem:[#allocation7 + $0xc8c] sm:$0xf]  ;;  %v10729_v63 = vor.u32 %v11730_v20, %v10726_v1  ;;  %v10582_v7 = vld [vmem:[#allocation7 + $0xd78] sm:$0xf0] }
 0x793   : > { %v6464_v33 = vpop.f32.mrf.mxu1  ;;  %6778 = vmatpush.bf16.msrb.mxu0 %v10489_v27  ;;  %v11698_v2 = vld [vmem:[#allocation7 + $0xd8c] sm:$0xf]  ;;  %v10473_v34 = vor.u32 %v11666_v38, %v10470_v0  ;;  %v15645_v38 = vld [vmem:[#allocation91_spill] sm:$0xff]  ;;  %v15646_v0 = vld [vmem:[#allocation92_spill] sm:$0xff] }
 0x794   : > { %v6463_v21 = vadd.f32 %v6462_v3, %v6414_v43  ;;  %v10598_v3 = vld [vmem:[#allocation7 + $0xd98] sm:$0xf0]  ;;  %v11658_v1 = vld [vmem:[#allocation7 + $0xc4c] sm:$0xf] }
 0x795   : > { %6827 = vmatpush.bf16.msrb.mxu1 %v10617_v55  ;;  %6876 = vmatpush.bf16.msrb.mxu2 %v10745_v14  ;;  %v10601_v43 = vor.u32 %v11698_v2, %v10598_v3  ;;  %v10454_v14 = vld [vmem:[#allocation7 + $0xc78] sm:$0xf0]  ;;  %v11726_v55 = vld [vmem:[#allocation7 + $0xe6c] sm:$0xf] }
 0x796   : > { %v14380_v10 = vadd.f32 %v6511_v41, %v6463_v21  ;;  %v11694_v21 = vld [vmem:[#allocation7 + $0xd6c] sm:$0xf]  ;;  %v10457_v48 = vor.u32 %v11662_v24, %v10454_v14  ;;  %v10278_v3 = vld [vmem:[#allocation7 + $0xb18] sm:$0xf0] }
 0x797   : > { %v6366_v49 = vpop.f32.mrf.mxu3  ;;  %6779 = vmatpush.bf16.msrb.mxu0 %v10473_v34  ;;  %v11618_v34 = vld [vmem:[#allocation7 + $0xb0c] sm:$0xf] }
 0x798   : > { %v6367_v4 = vadd.f32 %v6366_v49, %v14280_v59  ;;  %v15644_v59 = vld [vmem:[#allocation90_spill] sm:$0xff]  ;;  %v10710_v49 = vld [vmem:[#allocation7 + $0xe78] sm:$0xf0]  ;;  %v10281_v20 = vor.u32 %v11618_v34, %v10278_v3 }
 0x799   : > { %v6513_v30 = vpop.f32.mrf.mxu2  ;;  %v6418_v57 = vpop.f32.mrf.mxu0  ;;  %6828 = vmatpush.bf16.msrb.mxu1 %v10601_v43  ;;  %6877 = vmatpush.bf16.msrb.mxu2 %v10729_v63  ;;  %v10713_v2 = vor.u32 %v11726_v55, %v10710_v49  ;;  %v10438_v43 = vld [vmem:[#allocation7 + $0xc58] sm:$0xf0]  ;;  %v11690_v63 = vld [vmem:[#allocation7 + $0xd4c] sm:$0xf] }
 0x79a   : > { %v6416_v61 = vadd.f32 %v6415_v25, %v6367_v4  ;;  %v10585_v25 = vor.u32 %v11694_v21, %v10582_v7  ;;  %v10441_v14 = vor.u32 %v11658_v1, %v10438_v43  ;;  %v10694_v21 = vld [vmem:[#allocation7 + $0xe58] sm:$0xf0]  ;;  %6734 = vmatpush.bf16.msrb.mxu3 %v10281_v20  ;;  %v11654_v49 = vld [vmem:[#allocation7 + $0xc2c] sm:$0xf] }
 0x79b   : > { %v6467_v41 = vpop.f32.mrf.mxu1  ;;  %6780 = vmatpush.bf16.msrb.mxu0 %v10457_v48  ;;  %v11718_v34 = vld [vmem:[#allocation7 + $0xe2c] sm:$0xf]  ;;  %v10678_v3 = vld [vmem:[#allocation7 + $0xe38] sm:$0xf0] }
 0x79c   : > { %v6465_v27 = vadd.f32 %v6464_v33, %v6416_v61  ;;  %6564 = vmatmul.bf16.gmra.mxu3 %v15643_v62  ;;  %6613 = vmatmul.bf16.gmra.mxu0 %v15644_v59  ;;  %v10566_v62 = vld [vmem:[#allocation7 + $0xd58] sm:$0xf0]  ;;  %v11722_v59 = vld [vmem:[#allocation7 + $0xe4c] sm:$0xf]  ;;  %v10681_v1 = vor.u32 %v11718_v34, %v10678_v3 }
 0x79d   : > { %6829 = vmatpush.bf16.msrb.mxu1 %v10585_v25  ;;  %6878 = vmatpush.bf16.msrb.mxu2 %v10713_v2  ;;  %v11774_v3 = vld [vmem:[#allocation7 + $0xfec] sm:$0xf] }
 0x79e   : > { %6662 = vmatmul.bf16.gmra.mxu1 %v15645_v38  ;;  %6711 = vmatmul.bf16.gmra.mxu2 %v15646_v0  ;;  %v14387_v4 = vadd.f32 %v6513_v30, %v6465_v27  ;;  %v10569_v30 = vor.u32 %v11690_v63, %v10566_v62  ;;  %v10697_v27 = vor.u32 %v11722_v59, %v10694_v21  ;;  %v10422_v38 = vld [vmem:[#allocation7 + $0xc38] sm:$0xf0]  ;;  %v11686_v0 = vld [vmem:[#allocation7 + $0xd2c] sm:$0xf] }
 0x79f   : > { %v6369_v33 = vpop.f32.mrf.mxu3  ;;  %6781 = vmatpush.bf16.msrb.mxu0 %v10441_v14  ;;  %v10425_v2 = vor.u32 %v11654_v49, %v10422_v38  ;;  %v10406_v63 = vld [vmem:[#allocation7 + $0xc18] sm:$0xf0]  ;;  %v11714_v21 = vld [vmem:[#allocation7 + $0xe0c] sm:$0xf] }
 0x7a0   : > { %v6370_v61 = vadd.f32 %v6369_v33, %v14293_v36  ;;  %v10550_v36 = vld [vmem:[#allocation7 + $0xd38] sm:$0xf0] }
 0x7a1   : > { %v6516_v24 = vpop.f32.mrf.mxu2  ;;  %v6420_v7 = vpop.f32.mrf.mxu0  ;;  %6830 = vmatpush.bf16.msrb.mxu1 %v10569_v30  ;;  %6879 = vmatpush.bf16.msrb.mxu2 %v10697_v27  ;;  %v10553_v33 = vor.u32 %v11686_v0, %v10550_v36  ;;  %v10662_v30 = vld [vmem:[#allocation7 + $0xe18] sm:$0xf0]  ;;  %v15649_v36 = vld [vmem:[#allocation95_spill] sm:$0xff] }
 0x7a2   : > { %v6419_v55 = vadd.f32 %v6418_v57, %v6370_v61  ;;  %v11650_v57 = vld [vmem:[#allocation7 + $0xc0c] sm:$0xf]  ;;  %v10665_v49 = vor.u32 %v11714_v21, %v10662_v30 }
 0x7a3   : > { %v6469_v48 = vpop.f32.mrf.mxu1  ;;  %6782 = vmatpush.bf16.msrb.mxu0 %v10425_v2  ;;  %v11682_v61 = vld [vmem:[#allocation7 + $0xd0c] sm:$0xf]  ;;  %v10409_v59 = vor.u32 %v11650_v57, %v10406_v63 }
 0x7a4   : > { %v6468_v25 = vadd.f32 %v6467_v41, %v6419_v55  ;;  %v10534_v41 = vld [vmem:[#allocation7 + $0xd18] sm:$0xf0]  ;;  %v15648_v2 = vld [vmem:[#allocation94_spill] sm:$0xff] }
 0x7a5   : > { %6831 = vmatpush.bf16.msrb.mxu1 %v10553_v33  ;;  %6880 = vmatpush.bf16.msrb.mxu2 %v10681_v1  ;;  %v10537_v55 = vor.u32 %v11682_v61, %v10534_v41  ;;  %v10902_v33 = vld [vmem:[#allocation7 + $0xff8] sm:$0xf0] }
 0x7a6   : > { %v14390_v43 = vadd.f32 %v6516_v24, %v6468_v25  ;;  %v15647_v25 = vld [vmem:[#allocation93_spill] sm:$0xff] }
 0x7a7   : > { %v6371_v20 = vpop.f32.mrf.mxu3  ;;  %6783 = vmatpush.bf16.msrb.mxu0 %v10409_v59 }
 0x7a8   : > { %v6372_v14 = vadd.f32 %v6371_v20, %v14298_v18  ;;  %v15650_v18 = vld [vmem:[#allocation96_spill] sm:$0xff]  ;;  %v10905_v20 = vor.u32 %v11774_v3, %v10902_v33 }
 0x7a9   : > { %v6518_v62 = vpop.f32.mrf.mxu2  ;;  %v6423_v27 = vpop.f32.mrf.mxu0  ;;  %6832 = vmatpush.bf16.msrb.mxu1 %v10537_v55  ;;  %6881 = vmatpush.bf16.msrb.mxu2 %v10665_v49 }
 0x7aa   : > { %v6421_v38 = vadd.f32 %v6420_v7, %v6372_v14  ;;  %6923 = vmatpush.bf16.msra.mxu3 %v10905_v20 }
 0x7ab   : > { %v6472_v24 = vpop.f32.mrf.mxu1 }
 0x7ac   : > { %v6470_v0 = vadd.f32 %v6469_v48, %v6421_v38  ;;  %6569 = vmatmul.bf16.gmra.mxu3 %v15647_v25  ;;  %6618 = vmatmul.bf16.gmra.mxu0 %v15648_v2  ;;  %v15652_v25 = vld [vmem:[#allocation98_spill] sm:$0xff]  ;;  %v15654_v2 = vld [vmem:[#allocation100_spill] sm:$0xff] }
 0x7ae   : > { %6667 = vmatmul.bf16.gmra.mxu1 %v15649_v36  ;;  %6716 = vmatmul.bf16.gmra.mxu2 %v15650_v18  ;;  %v14397_v34 = vadd.f32 %v6518_v62, %v6470_v0  ;;  %v15651_v0 = vld [vmem:[#allocation97_spill] sm:$0xff]  ;;  %v10886_v36 = vld [vmem:[#allocation7 + $0xfd8] sm:$0xf0] }
 0x7af   : > { %v6374_v1 = vpop.f32.mrf.mxu3 }
 0x7b0   : > { %v6375_v7 = vadd.f32 %v6374_v1, %v14309_v42  ;;  %v15653_v42 = vld [vmem:[#allocation99_spill] sm:$0xff] }
 0x7b1   : > { %v6521_v57 = vpop.f32.mrf.mxu2  ;;  %v6425_v63 = vpop.f32.mrf.mxu0 }
 0x7b2   : > { %v6424_v48 = vadd.f32 %v6423_v27, %v6375_v7 }
 0x7b3   : > { %v6474_v61 = vpop.f32.mrf.mxu1 }
 0x7b4   : > { %v6473_v14 = vadd.f32 %v6472_v24, %v6424_v48  ;;  %v11770_v24 = vld [vmem:[#allocation7 + $0xfcc] sm:$0xf] }
 0x7b5   : > { %v10889_v3 = vor.u32 %v11770_v24, %v10886_v36 }
 0x7b6   : > { %v14400_v59 = vadd.f32 %v6521_v57, %v6473_v14 }
 0x7b7   : > { %v6376_v41 = vpop.f32.mrf.mxu3  ;;  %6924 = vmatpush.bf16.msra.mxu3 %v10889_v3 }
 0x7b8   : > { %v6377_v21 = vadd.f32 %v6376_v41, %v14314_v23 }
 0x7b9   : > { %v6523_v30 = vpop.f32.mrf.mxu2  ;;  %v6428_v62 = vpop.f32.mrf.mxu0 }
 0x7ba   : > { %v6426_v55 = vadd.f32 %v6425_v63, %v6377_v21 }
 0x7bb   : > { %v6477_v49 = vpop.f32.mrf.mxu1 }
 0x7bc   : > { %v6475_v38 = vadd.f32 %v6474_v61, %v6426_v55  ;;  %6574 = vmatmul.bf16.gmra.mxu3 %v15651_v0  ;;  %6623 = vmatmul.bf16.gmra.mxu0 %v15652_v25  ;;  %v15656_v0 = vld [vmem:[#allocation102_spill] sm:$0xff]  ;;  %v15658_v25 = vld [vmem:[#allocation104_spill] sm:$0xff] }
 0x7be   : > { %6672 = vmatmul.bf16.gmra.mxu1 %v15653_v42  ;;  %6721 = vmatmul.bf16.gmra.mxu2 %v15654_v2  ;;  %v14407_v27 = vadd.f32 %v6523_v30, %v6475_v38  ;;  %v15655_v38 = vld [vmem:[#allocation101_spill] sm:$0xff]  ;;  %v10870_v42 = vld [vmem:[#allocation7 + $0xfb8] sm:$0xf0] }
 0x7bf   : > { %v6379_v18 = vpop.f32.mrf.mxu3 }
 0x7c0   : > { %v6380_v23 = vadd.f32 %v6379_v18, %v14325_v52  ;;  %v15657_v52 = vld [vmem:[#allocation103_spill] sm:$0xff] }
 0x7c1   : > { %v6526_v33 = vpop.f32.mrf.mxu2  ;;  %v6430_v1 = vpop.f32.mrf.mxu0 }
 0x7c2   : > { %v6429_v20 = vadd.f32 %v6428_v62, %v6380_v23 }
 0x7c3   : > { %v6479_v7 = vpop.f32.mrf.mxu1 }
 0x7c4   : > { %v6478_v57 = vadd.f32 %v6477_v49, %v6429_v20  ;;  %v11766_v49 = vld [vmem:[#allocation7 + $0xfac] sm:$0xf] }
 0x7c5   : > { %v10873_v24 = vor.u32 %v11766_v49, %v10870_v42 }
 0x7c6   : > { %v14410_v63 = vadd.f32 %v6526_v33, %v6478_v57 }
 0x7c7   : > { %v6381_v48 = vpop.f32.mrf.mxu3  ;;  %6925 = vmatpush.bf16.msra.mxu3 %v10873_v24 }
 0x7c8   : > { %v6382_v61 = vadd.f32 %v6381_v48, %v14330_v35 }
 0x7c9   : > { %v6528_v14 = vpop.f32.mrf.mxu2  ;;  %v6589_v41 = vpop.f32.mrf.mxu0 }
 0x7ca   : > { %v6431_v21 = vadd.f32 %v6430_v1, %v6382_v61 }
 0x7cb   : > { %v6638_v30 = vpop.f32.mrf.mxu1 }
 0x7cc   : > { %v6480_v55 = vadd.f32 %v6479_v7, %v6431_v21  ;;  %6735 = vmatmul.bf16.vlgmr.msrb.gmra.mxu3 %v15655_v38  ;;  %6784 = vmatmul.bf16.vlgmr.msrb.gmra.mxu0 %v15656_v0  ;;  %v15660_v38 = vld [vmem:[#allocation106_spill] sm:$0xff]  ;;  %v15662_v0 = vld [vmem:[#allocation108_spill] sm:$0xff] }
 0x7ce   : > { %6833 = vmatmul.bf16.vlgmr.msrb.gmra.mxu1 %v15657_v52  ;;  %6882 = vmatmul.bf16.vlgmr.msrb.gmra.mxu2 %v15658_v25  ;;  %v14417_v62 = vadd.f32 %v6528_v14, %v6480_v55  ;;  %v15659_v55 = vld [vmem:[#allocation105_spill] sm:$0xff]  ;;  %v10854_v52 = vld [vmem:[#allocation7 + $0xf98] sm:$0xf0] }
 0x7cf   : > { %v6540_v2 = vpop.f32.mrf.mxu3 }
 0x7d0   : > { %v6541_v35 = vadd.f32 %v6540_v2, %v14340_v5  ;;  %v15661_v5 = vld [vmem:[#allocation107_spill] sm:$0xff] }
 0x7d1   : > { %v6687_v36 = vpop.f32.mrf.mxu2  ;;  %v6591_v18 = vpop.f32.mrf.mxu0 }
 0x7d2   : > { %v6590_v3 = vadd.f32 %v6589_v41, %v6541_v35 }
 0x7d3   : > { %v6640_v23 = vpop.f32.mrf.mxu1 }
 0x7d4   : > { %v6639_v33 = vadd.f32 %v6638_v30, %v6590_v3  ;;  %v11762_v30 = vld [vmem:[#allocation7 + $0xf8c] sm:$0xf] }
 0x7d5   : > { %v10857_v49 = vor.u32 %v11762_v30, %v10854_v52 }
 0x7d6   : > { %v14420_v1 = vadd.f32 %v6687_v36, %v6639_v33 }
 0x7d7   : > { %v6542_v20 = vpop.f32.mrf.mxu3  ;;  %6926 = vmatpush.bf16.msra.mxu3 %v10857_v49 }
 0x7d8   : > { %v6543_v7 = vadd.f32 %v6542_v20, %v14347_v58 }
 0x7d9   : > { %v6689_v57 = vpop.f32.mrf.mxu2  ;;  %v6594_v48 = vpop.f32.mrf.mxu0 }
 0x7da   : > { %v6592_v61 = vadd.f32 %v6591_v18, %v6543_v7 }
 0x7db   : > { %v6643_v14 = vpop.f32.mrf.mxu1 }
 0x7dc   : > { %v6641_v21 = vadd.f32 %v6640_v23, %v6592_v61  ;;  %6740 = vmatmul.bf16.gmra.mxu3 %v15659_v55  ;;  %6789 = vmatmul.bf16.gmra.mxu0 %v15660_v38  ;;  %v15664_v55 = vld [vmem:[#allocation110_spill] sm:$0xff]  ;;  %v15666_v38 = vld [vmem:[#allocation112_spill] sm:$0xff] }
 0x7de   : > { %6838 = vmatmul.bf16.gmra.mxu1 %v15661_v5  ;;  %6887 = vmatmul.bf16.gmra.mxu2 %v15662_v0  ;;  %v14427_v41 = vadd.f32 %v6689_v57, %v6641_v21  ;;  %v15663_v21 = vld [vmem:[#allocation109_spill] sm:$0xff]  ;;  %v10838_v5 = vld [vmem:[#allocation7 + $0xf78] sm:$0xf0] }
 0x7df   : > { %v6545_v25 = vpop.f32.mrf.mxu3 }
 0x7e0   : > { %v6546_v58 = vadd.f32 %v6545_v25, %v14350_v53  ;;  %v15665_v53 = vld [vmem:[#allocation111_spill] sm:$0xff] }
 0x7e1   : > { %v6692_v42 = vpop.f32.mrf.mxu2  ;;  %v6596_v2 = vpop.f32.mrf.mxu0 }
 0x7e2   : > { %v6595_v24 = vadd.f32 %v6594_v48, %v6546_v58 }
 0x7e3   : > { %v6645_v35 = vpop.f32.mrf.mxu1 }
 0x7e4   : > { %v6644_v36 = vadd.f32 %v6643_v14, %v6595_v24  ;;  %v11758_v14 = vld [vmem:[#allocation7 + $0xf6c] sm:$0xf] }
 0x7e5   : > { %v10841_v30 = vor.u32 %v11758_v14, %v10838_v5 }
 0x7e6   : > { %v14430_v18 = vadd.f32 %v6692_v42, %v6644_v36 }
 0x7e7   : > { %v6547_v3 = vpop.f32.mrf.mxu3  ;;  %6927 = vmatpush.bf16.msra.mxu3 %v10841_v30 }
 0x7e8   : > { %v6548_v23 = vadd.f32 %v6547_v3, %v14357_v16 }
 0x7e9   : > { %v6694_v33 = vpop.f32.mrf.mxu2  ;;  %v6599_v20 = vpop.f32.mrf.mxu0 }
 0x7ea   : > { %v6597_v7 = vadd.f32 %v6596_v2, %v6548_v23 }
 0x7eb   : > { %v6648_v57 = vpop.f32.mrf.mxu1 }
 0x7ec   : > { %v6646_v61 = vadd.f32 %v6645_v35, %v6597_v7  ;;  %6745 = vmatmul.bf16.gmra.mxu3 %v15663_v21  ;;  %6794 = vmatmul.bf16.gmra.mxu0 %v15664_v55  ;;  %v15668_v21 = vld [vmem:[#allocation114_spill] sm:$0xff]  ;;  %v15670_v55 = vld [vmem:[#allocation116_spill] sm:$0xff] }
 0x7ee   : > { %6843 = vmatmul.bf16.gmra.mxu1 %v15665_v53  ;;  %6892 = vmatmul.bf16.gmra.mxu2 %v15666_v38  ;;  %v14437_v48 = vadd.f32 %v6694_v33, %v6646_v61  ;;  %v15667_v61 = vld [vmem:[#allocation113_spill] sm:$0xff]  ;;  %v10822_v53 = vld [vmem:[#allocation7 + $0xf58] sm:$0xf0] }
 0x7ef   : > { %v6550_v0 = vpop.f32.mrf.mxu3 }
 0x7f0   : > { %v6551_v16 = vadd.f32 %v6550_v0, %v14360_v47  ;;  %v15669_v47 = vld [vmem:[#allocation115_spill] sm:$0xff] }
 0x7f1   : > { %v6697_v52 = vpop.f32.mrf.mxu2  ;;  %v6601_v25 = vpop.f32.mrf.mxu0 }
 0x7f2   : > { %v6600_v49 = vadd.f32 %v6599_v20, %v6551_v16 }
 0x7f3   : > { %v6650_v58 = vpop.f32.mrf.mxu1 }
 0x7f4   : > { %v6649_v42 = vadd.f32 %v6648_v57, %v6600_v49  ;;  %v11754_v57 = vld [vmem:[#allocation7 + $0xf4c] sm:$0xf] }
 0x7f5   : > { %v10825_v14 = vor.u32 %v11754_v57, %v10822_v53  ;;  %v11824_v57 = vld [vmem:[#allocation9 + $0x174] sm:$0xf0]  ;;  %v15673_v53 = vld [vmem:[#allocation119_spill] sm:$0xff] }
 0x7f6   : > { %v14440_v2 = vadd.f32 %v6697_v52, %v6649_v42 }
 0x7f7   : > { %v6552_v24 = vpop.f32.mrf.mxu3  ;;  %6928 = vmatpush.bf16.msra.mxu3 %v10825_v14 }
 0x7f8   : > { %v6553_v35 = vadd.f32 %v6552_v24, %v14367_v54 }
 0x7f9   : > { %v6699_v36 = vpop.f32.mrf.mxu2  ;;  %v6604_v3 = vpop.f32.mrf.mxu0 }
 0x7fa   : > { %v6602_v23 = vadd.f32 %v6601_v25, %v6553_v35 }
 0x7fb   : > { %v6653_v33 = vpop.f32.mrf.mxu1 }
 0x7fc   : > { %v6651_v7 = vadd.f32 %v6650_v58, %v6602_v23  ;;  %6750 = vmatmul.bf16.gmra.mxu3 %v15667_v61  ;;  %6799 = vmatmul.bf16.gmra.mxu0 %v15668_v21  ;;  %v10964_v23 = vld [vmem:[#allocation9 + $0x70] sm:$0xf] }
 0x7fd   : > { %v11028_v61 = vld [vmem:[#allocation9 + $0xf0] sm:$0xf] }
 0x7fe   : > { %6848 = vmatmul.bf16.gmra.mxu1 %v15669_v47  ;;  %6897 = vmatmul.bf16.gmra.mxu2 %v15670_v55  ;;  %v14447_v20 = vadd.f32 %v6699_v36, %v6651_v7  ;;  %v11792_v7 = vld [vmem:[#allocation9 + $0x74] sm:$0xf0]  ;;  %v15672_v47 = vld [vmem:[#allocation118_spill] sm:$0xff] }
 0x7ff   : > { %v6555_v38 = vpop.f32.mrf.mxu3  ;;  %v11808_v55 = vld [vmem:[#allocation9 + $0xf4] sm:$0xf0] }
 0x800   : > { %v6556_v54 = vadd.f32 %v6555_v38, %v14370_v51  ;;  %v15671_v51 = vld [vmem:[#allocation117_spill] sm:$0xff]  ;;  %v15674_v38 = vld [vmem:[#allocation120_spill] sm:$0xff] }
 0x801   : > { %v6702_v5 = vpop.f32.mrf.mxu2  ;;  %v6606_v0 = vpop.f32.mrf.mxu0 }
 0x802   : > { %v6605_v30 = vadd.f32 %v6604_v3, %v6556_v54  ;;  %v10965_v3 = vor.u32 %v11792_v7, %v10964_v23 }
 0x803   : > { %v6655_v16 = vpop.f32.mrf.mxu1 }
 0x804   : > { %v6654_v52 = vadd.f32 %v6653_v33, %v6605_v30  ;;  %v11092_v33 = vld [vmem:[#allocation9 + $0x170] sm:$0xf]  ;;  %7586 = vmatpush.bf16.msra.mxu0 %v10965_v3 }
 0x805   : > { %v11093_v14 = vor.u32 %v11824_v57, %v11092_v33  ;;  %v10948_v57 = vld [vmem:[#allocation9 + $0x50] sm:$0xf] }
 0x806   : > { %v14450_v25 = vadd.f32 %v6702_v5, %v6654_v52  ;;  %v11750_v5 = vld [vmem:[#allocation7 + $0xf2c] sm:$0xf]  ;;  %v10956_v52 = vld [vmem:[#allocation9 + $0x60] sm:$0xf] }
 0x807   : > { %v6557_v49 = vpop.f32.mrf.mxu3  ;;  %7684 = vmatpush.bf16.msra.mxu2 %v11093_v14 }
 0x808   : > { %v6558_v58 = vadd.f32 %v6557_v49, %v14377_v37  ;;  %v11029_v37 = vor.u32 %v11808_v55, %v11028_v61  ;;  %v11790_v49 = vld [vmem:[#allocation9 + $0x64] sm:$0xf0] }
 0x809   : > { %v6704_v42 = vpop.f32.mrf.mxu2  ;;  %v6609_v24 = vpop.f32.mrf.mxu0  ;;  %v10957_v7 = vor.u32 %v11790_v49, %v10956_v52  ;;  %v11822_v61 = vld [vmem:[#allocation9 + $0x164] sm:$0xf0] }
 0x80a   : > { %v6607_v35 = vadd.f32 %v6606_v0, %v6558_v58  ;;  %v10806_v0 = vld [vmem:[#allocation7 + $0xf38] sm:$0xf0]  ;;  %7635 = vmatpush.bf16.msra.mxu1 %v11029_v37  ;;  %v11020_v58 = vld [vmem:[#allocation9 + $0xe0] sm:$0xf] }
 0x80b   : > { %v6658_v36 = vpop.f32.mrf.mxu1  ;;  %7587 = vmatpush.bf16.msra.mxu0 %v10957_v7 }
 0x80c   : > { %v6656_v21 = vadd.f32 %v6655_v16, %v6607_v35  ;;  %6755 = vmatmul.bf16.gmra.mxu3 %v15671_v51  ;;  %6804 = vmatmul.bf16.gmra.mxu0 %v15672_v47  ;;  %v10809_v16 = vor.u32 %v11750_v5, %v10806_v0  ;;  %v11806_v51 = vld [vmem:[#allocation9 + $0xe4] sm:$0xf0]  ;;  %v11084_v47 = vld [vmem:[#allocation9 + $0x160] sm:$0xf]  ;;  %v11076_v5 = vld [vmem:[#allocation9 + $0x150] sm:$0xf] }
 0x80d   : > { %v11820_v0 = vld [vmem:[#allocation9 + $0x154] sm:$0xf0] }
 0x80e   : > { %6853 = vmatmul.bf16.gmra.mxu1 %v15673_v53  ;;  %6902 = vmatmul.bf16.gmra.mxu2 %v15674_v38  ;;  %v14457_v54 = vadd.f32 %v6704_v42, %v6656_v21  ;;  %v11021_v42 = vor.u32 %v11806_v51, %v11020_v58  ;;  %v11085_v21 = vor.u32 %v11822_v61, %v11084_v47  ;;  %v11788_v53 = vld [vmem:[#allocation9 + $0x54] sm:$0xf0]  ;;  %v11012_v38 = vld [vmem:[#allocation9 + $0xd0] sm:$0xf]  ;;  %v11786_v58 = vld [vmem:[#allocation9 + $0x44] sm:$0xf0] }
 0x80f   : > { %v6560_v30 = vpop.f32.mrf.mxu3  ;;  %6929 = vmatpush.bf16.msra.mxu3 %v10809_v16  ;;  %v10949_v14 = vor.u32 %v11788_v53, %v10948_v57  ;;  %v11077_v52 = vor.u32 %v11820_v0, %v11076_v5  ;;  %v11068_v61 = vld [vmem:[#allocation9 + $0x140] sm:$0xf] }
 0x810   : > { %v6561_v35 = vadd.f32 %v6560_v30, %v14380_v10  ;;  %7636 = vmatpush.bf16.msra.mxu1 %v11021_v42  ;;  %7685 = vmatpush.bf16.msra.mxu2 %v11085_v21  ;;  %v11804_v10 = vld [vmem:[#allocation9 + $0xd4] sm:$0xf0]  ;;  %v11818_v42 = vld [vmem:[#allocation9 + $0x144] sm:$0xf0]  ;;  %v15675_v5 = vld [vmem:[#allocation121_spill] sm:$0xff] }
 0x811   : > { %v6707_v23 = vpop.f32.mrf.mxu2  ;;  %v6611_v55 = vpop.f32.mrf.mxu0  ;;  %v11013_v30 = vor.u32 %v11804_v10, %v11012_v38  ;;  %7588 = vmatpush.bf16.msra.mxu0 %v10949_v14  ;;  %v11069_v57 = vor.u32 %v11818_v42, %v11068_v61  ;;  %v10932_v38 = vld [vmem:[#allocation9 + $0x30] sm:$0xf]  ;;  %v10924_v42 = vld [vmem:[#allocation9 + $0x20] sm:$0xf] }
 0x812   : > { %v6610_v33 = vadd.f32 %v6609_v24, %v6561_v35  ;;  %v10940_v24 = vld [vmem:[#allocation9 + $0x40] sm:$0xf]  ;;  %v10996_v14 = vld [vmem:[#allocation9 + $0xb0] sm:$0xf] }
 0x813   : > { %v6660_v3 = vpop.f32.mrf.mxu1  ;;  %v11004_v35 = vld [vmem:[#allocation9 + $0xc0] sm:$0xf]  ;;  %v10941_v47 = vor.u32 %v11786_v58, %v10940_v24  ;;  %v15677_v24 = vld [vmem:[#allocation123_spill] sm:$0xff]  ;;  %v15678_v58 = vld [vmem:[#allocation124_spill] sm:$0xff] }
 0x814   : > { %v6659_v37 = vadd.f32 %v6658_v36, %v6610_v33  ;;  %7637 = vmatpush.bf16.msra.mxu1 %v11013_v30  ;;  %7686 = vmatpush.bf16.msra.mxu2 %v11077_v52  ;;  %v11802_v36 = vld [vmem:[#allocation9 + $0xc4] sm:$0xf0]  ;;  %v11800_v30 = vld [vmem:[#allocation9 + $0xb4] sm:$0xf0]  ;;  %v11060_v52 = vld [vmem:[#allocation9 + $0x130] sm:$0xf] }
 0x815   : > { %v11005_v33 = vor.u32 %v11802_v36, %v11004_v35  ;;  %7589 = vmatpush.bf16.msra.mxu0 %v10941_v47  ;;  %v11746_v47 = vld [vmem:[#allocation7 + $0xf0c] sm:$0xf]  ;;  %v10790_v36 = vld [vmem:[#allocation7 + $0xf18] sm:$0xf0] }
 0x816   : > { %v14460_v49 = vadd.f32 %v6707_v23, %v6659_v37  ;;  %v11784_v37 = vld [vmem:[#allocation9 + $0x34] sm:$0xf0]  ;;  %v10793_v61 = vor.u32 %v11746_v47, %v10790_v36  ;;  %v11044_v47 = vld [vmem:[#allocation9 + $0x110] sm:$0xf] }
 0x817   : > { %v6562_v16 = vpop.f32.mrf.mxu3  ;;  %v10933_v0 = vor.u32 %v11784_v37, %v10932_v38  ;;  %v11812_v36 = vld [vmem:[#allocation9 + $0x114] sm:$0xf0] }
 0x818   : > { %v6563_v7 = vadd.f32 %v6562_v16, %v14387_v4  ;;  %7638 = vmatpush.bf16.msra.mxu1 %v11005_v33  ;;  %7687 = vmatpush.bf16.msra.mxu2 %v11069_v57  ;;  %v15676_v4 = vld [vmem:[#allocation122_spill] sm:$0xff]  ;;  %v11816_v16 = vld [vmem:[#allocation9 + $0x134] sm:$0xf0]  ;;  %v10988_v57 = vld [vmem:[#allocation9 + $0xa0] sm:$0xf] }
 0x819   : > { %v6709_v51 = vpop.f32.mrf.mxu2  ;;  %v6614_v21 = vpop.f32.mrf.mxu0  ;;  %v11061_v35 = vor.u32 %v11816_v16, %v11060_v52  ;;  %7590 = vmatpush.bf16.msra.mxu0 %v10933_v0  ;;  %v11782_v33 = vld [vmem:[#allocation9 + $0x24] sm:$0xf0]  ;;  %6930 = vmatpush.bf16.msra.mxu3 %v10793_v61  ;;  %v10916_v16 = vld [vmem:[#allocation9 + $0x10] sm:$0xf] }
 0x81a   : > { %v6612_v53 = vadd.f32 %v6611_v55, %v6563_v7  ;;  %v10997_v55 = vor.u32 %v11800_v30, %v10996_v14  ;;  %v10925_v37 = vor.u32 %v11782_v33, %v10924_v42  ;;  %v11814_v14 = vld [vmem:[#allocation9 + $0x124] sm:$0xf0]  ;;  %v11045_v42 = vor.u32 %v11812_v36, %v11044_v47 }
 0x81b   : > { %v6663_v23 = vpop.f32.mrf.mxu1 }
 0x81c   : > { %v6661_v10 = vadd.f32 %v6660_v3, %v6612_v53  ;;  %6760 = vmatmul.bf16.gmra.mxu3 %v15675_v5  ;;  %6809 = vmatmul.bf16.gmra.mxu0 %v15676_v4  ;;  %v11798_v5 = vld [vmem:[#allocation9 + $0xa4] sm:$0xf0]  ;;  %v11052_v4 = vld [vmem:[#allocation9 + $0x120] sm:$0xf] }
 0x81d   : > { %7639 = vmatpush.bf16.msra.mxu1 %v10997_v55  ;;  %7688 = vmatpush.bf16.msra.mxu2 %v11061_v35 }
 0x81e   : > { %6858 = vmatmul.bf16.gmra.mxu1 %v15677_v24  ;;  %6907 = vmatmul.bf16.gmra.mxu2 %v15678_v58  ;;  %v14467_v7 = vadd.f32 %v6709_v51, %v6661_v10  ;;  %v10989_v51 = vor.u32 %v11798_v5, %v10988_v57  ;;  %v11053_v10 = vor.u32 %v11814_v14, %v11052_v4  ;;  %v11780_v24 = vld [vmem:[#allocation9 + $0x14] sm:$0xf0]  ;;  %v10980_v58 = vld [vmem:[#allocation9 + $0x90] sm:$0xf]  ;;  %v11778_v57 = vld [vmem:[#allocation9 + $0x4] sm:$0xf0] }
 0x81f   : > { %v6565_v3 = vpop.f32.mrf.mxu3  ;;  %7591 = vmatpush.bf16.msra.mxu0 %v10925_v37  ;;  %v10917_v35 = vor.u32 %v11780_v24, %v10916_v16  ;;  %v11036_v14 = vld [vmem:[#allocation9 + $0x100] sm:$0xf] }
 0x820   : > { %v6566_v53 = vadd.f32 %v6565_v3, %v14390_v43  ;;  %v11796_v43 = vld [vmem:[#allocation9 + $0x94] sm:$0xf0] }
 0x821   : > { %v6712_v38 = vpop.f32.mrf.mxu2  ;;  %v6616_v30 = vpop.f32.mrf.mxu0  ;;  %7640 = vmatpush.bf16.msra.mxu1 %v10989_v51  ;;  %7689 = vmatpush.bf16.msra.mxu2 %v11053_v10  ;;  %v10981_v3 = vor.u32 %v11796_v43, %v10980_v58  ;;  %v11810_v51 = vld [vmem:[#allocation9 + $0x104] sm:$0xf0] }
 0x822   : > { %v6615_v52 = vadd.f32 %v6614_v21, %v6566_v53  ;;  %v10908_v21 = vld [vmem:[#allocation9] sm:$0xf]  ;;  %v11037_v16 = vor.u32 %v11810_v51, %v11036_v14  ;;  %v11156_v51 = vld [vmem:[#allocation9 + $0x1f0] sm:$0xf] }
 0x823   : > { %v6665_v0 = vpop.f32.mrf.mxu1  ;;  %7592 = vmatpush.bf16.msra.mxu0 %v10917_v35  ;;  %v10972_v53 = vld [vmem:[#allocation9 + $0x80] sm:$0xf]  ;;  %v10909_v4 = vor.u32 %v11778_v57, %v10908_v21 }
 0x824   : > { %v6664_v55 = vadd.f32 %v6663_v23, %v6615_v52  ;;  %v11794_v23 = vld [vmem:[#allocation9 + $0x84] sm:$0xf0] }
 0x825   : > { %7641 = vmatpush.bf16.msra.mxu1 %v10981_v3  ;;  %7690 = vmatpush.bf16.msra.mxu2 %v11045_v42  ;;  %v10973_v52 = vor.u32 %v11794_v23, %v10972_v53 }
 0x826   : > { %v14470_v33 = vadd.f32 %v6712_v38, %v6664_v55 }
 0x827   : > { %v6567_v61 = vpop.f32.mrf.mxu3  ;;  %7593 = vmatpush.bf16.msra.mxu0 %v10909_v4 }
 0x828   : > { %v6568_v37 = vadd.f32 %v6567_v61, %v14397_v34 }
 0x829   : > { %v6714_v5 = vpop.f32.mrf.mxu2  ;;  %v6619_v10 = vpop.f32.mrf.mxu0  ;;  %7642 = vmatpush.bf16.msra.mxu1 %v10973_v52  ;;  %7691 = vmatpush.bf16.msra.mxu2 %v11037_v16 }
 0x82a   : > { %v6617_v24 = vadd.f32 %v6616_v30, %v6568_v37 }
 0x82b   : > { %v6668_v38 = vpop.f32.mrf.mxu1 }
 0x82c   : > { %v6666_v58 = vadd.f32 %v6665_v0, %v6617_v24  ;;  %6765 = vmatmul.bf16.gmra.mxu3 %v13299_v60  ;;  %6814 = vmatmul.bf16.gmra.mxu0 %v13301_v39 }
 0x82e   : > { %6863 = vmatmul.bf16.gmra.mxu1 %v13303_v9  ;;  %6912 = vmatmul.bf16.gmra.mxu2 %v13305_v6  ;;  %v14477_v34 = vadd.f32 %v6714_v5, %v6666_v58  ;;  %v15680_v58 = vld [vmem:[#allocation137_spill] sm:$0xff] }
 0x82f   : > { %v6570_v55 = vpop.f32.mrf.mxu3 }
 0x830   : > { %v6571_v35 = vadd.f32 %v6570_v55, %v14400_v59 }
 0x831   : > { %v6717_v43 = vpop.f32.mrf.mxu2  ;;  %v6621_v30 = vpop.f32.mrf.mxu0 }
 0x832   : > { %v6620_v47 = vadd.f32 %v6619_v10, %v6571_v35 }
 0x833   : > { %v6670_v36 = vpop.f32.mrf.mxu1 }
 0x834   : > { %v6669_v3 = vadd.f32 %v6668_v38, %v6620_v47 }
 0x836   : > { %v14480_v42 = vadd.f32 %v6717_v43, %v6669_v3 }
 0x837   : > { %v6572_v0 = vpop.f32.mrf.mxu3 }
 0x838   : > { %v6573_v60 = vadd.f32 %v6572_v0, %v14407_v27 }
 0x839   : > { %v6719_v39 = vpop.f32.mrf.mxu2  ;;  %v6624_v61 = vpop.f32.mrf.mxu0 }
 0x83a   : > { %v6622_v9 = vadd.f32 %v6621_v30, %v6573_v60  ;;  %v11148_v60 = vld [vmem:[#allocation9 + $0x1e0] sm:$0xf] }
 0x83b   : > { %v6673_v21 = vpop.f32.mrf.mxu1 }
 0x83c   : > { %v6671_v6 = vadd.f32 %v6670_v36, %v6622_v9  ;;  %6770 = vmatmul.bf16.gmra.mxu3 %v13325_v26  ;;  %6819 = vmatmul.bf16.gmra.mxu0 %v13327_v45  ;;  %v11840_v26 = vld [vmem:[#allocation9 + $0x1f4] sm:$0xf0] }
 0x83d   : > { %v11157_v45 = vor.u32 %v11840_v26, %v11156_v51 }
 0x83e   : > { %6868 = vmatmul.bf16.gmra.mxu1 %v13329_v13  ;;  %6917 = vmatmul.bf16.gmra.mxu2 %v13331_v12  ;;  %v14487_v59 = vadd.f32 %v6719_v39, %v6671_v6 }
 0x83f   : > { %v6575_v57 = vpop.f32.mrf.mxu3  ;;  %7733 = vmatpush.bf16.msrb.mxu3 %v11157_v45 }
 0x840   : > { %v6576_v53 = vadd.f32 %v6575_v57, %v14410_v63  ;;  %v15679_v63 = vld [vmem:[#allocation130_spill] sm:$0xff] }
 0x841   : > { %v6722_v37 = vpop.f32.mrf.mxu2  ;;  %v6626_v27 = vpop.f32.mrf.mxu0 }
 0x842   : > { %v6625_v5 = vadd.f32 %v6624_v61, %v6576_v53 }
 0x843   : > { %v6675_v4 = vpop.f32.mrf.mxu1 }
 0x844   : > { %v6674_v23 = vadd.f32 %v6673_v21, %v6625_v5 }
 0x846   : > { %v14490_v14 = vadd.f32 %v6722_v37, %v6674_v23 }
 0x847   : > { %v6577_v10 = vpop.f32.mrf.mxu3 }
 0x848   : > { %v6578_v13 = vadd.f32 %v6577_v10, %v14417_v62 }
 0x849   : > { %v6724_v52 = vpop.f32.mrf.mxu2  ;;  %v6785_v12 = vpop.f32.mrf.mxu0 }
 0x84a   : > { %v6627_v16 = vadd.f32 %v6626_v27, %v6578_v13  ;;  %v15682_v27 = vld [vmem:[#allocation138_spill] sm:$0xff] }
 0x84b   : > { %v6834_v24 = vpop.f32.mrf.mxu1 }
 0x84c   : > { %v6676_v38 = vadd.f32 %v6675_v4, %v6627_v16  ;;  %6931 = vmatmul.bf16.vlgmr.msra.gmra.mxu3 %v13345_v8  ;;  %7594 = vmatmul.bf16.vlgmr.msra.gmra.mxu0 %v15679_v63  ;;  %v11838_v8 = vld [vmem:[#allocation9 + $0x1e4] sm:$0xf0] }
 0x84d   : > { %v11149_v61 = vor.u32 %v11838_v8, %v11148_v60 }
 0x84e   : > { %7643 = vmatmul.bf16.vlgmr.msra.gmra.mxu1 %v15680_v58  ;;  %7692 = vmatmul.bf16.vlgmr.msra.gmra.mxu2 %v14222_v15  ;;  %v14497_v55 = vadd.f32 %v6724_v52, %v6676_v38  ;;  %v11140_v52 = vld [vmem:[#allocation9 + $0x1d0] sm:$0xf] }
 0x84f   : > { %v6736_v35 = vpop.f32.mrf.mxu3  ;;  %7734 = vmatpush.bf16.msrb.mxu3 %v11149_v61 }
 0x850   : > { %v6737_v43 = vadd.f32 %v6736_v35, %v14420_v1  ;;  %v15681_v1 = vld [vmem:[#allocation131_spill] sm:$0xff] }
 0x851   : > { %v6883_v62 = vpop.f32.mrf.mxu2  ;;  %v6787_v30 = vpop.f32.mrf.mxu0 }
 0x852   : > { %v6786_v47 = vadd.f32 %v6785_v12, %v6737_v43 }
 0x853   : > { %v6836_v36 = vpop.f32.mrf.mxu1 }
 0x854   : > { %v6835_v3 = vadd.f32 %v6834_v24, %v6786_v47  ;;  %v15684_v47 = vld [vmem:[#allocation139_spill] sm:$0xff] }
 0x856   : > { %v14500_v0 = vadd.f32 %v6883_v62, %v6835_v3 }
 0x857   : > { %v6738_v39 = vpop.f32.mrf.mxu3 }
 0x858   : > { %v6739_v9 = vadd.f32 %v6738_v39, %v14427_v41 }
 0x859   : > { %v6885_v21 = vpop.f32.mrf.mxu2  ;;  %v6790_v6 = vpop.f32.mrf.mxu0 }
 0x85a   : > { %v6788_v57 = vadd.f32 %v6787_v30, %v6739_v9 }
 0x85b   : > { %v6839_v53 = vpop.f32.mrf.mxu1 }
 0x85c   : > { %v6837_v37 = vadd.f32 %v6836_v36, %v6788_v57  ;;  %6936 = vmatmul.bf16.gmra.mxu3 %v13359_v32  ;;  %7599 = vmatmul.bf16.gmra.mxu0 %v15681_v1  ;;  %v11836_v32 = vld [vmem:[#allocation9 + $0x1d4] sm:$0xf0] }
 0x85d   : > { %v11141_v16 = vor.u32 %v11836_v32, %v11140_v52 }
 0x85e   : > { %7648 = vmatmul.bf16.gmra.mxu1 %v15682_v27  ;;  %7697 = vmatmul.bf16.gmra.mxu2 %v14240_v19  ;;  %v14507_v5 = vadd.f32 %v6885_v21, %v6837_v37 }
 0x85f   : > { %v6741_v4 = vpop.f32.mrf.mxu3  ;;  %7735 = vmatpush.bf16.msrb.mxu3 %v11141_v16 }
 0x860   : > { %v6742_v23 = vadd.f32 %v6741_v4, %v14430_v18  ;;  %v15683_v18 = vld [vmem:[#allocation132_spill] sm:$0xff] }
 0x861   : > { %v6888_v41 = vpop.f32.mrf.mxu2  ;;  %v6792_v51 = vpop.f32.mrf.mxu0 }
 0x862   : > { %v6791_v26 = vadd.f32 %v6790_v6, %v6742_v23  ;;  %v11132_v6 = vld [vmem:[#allocation9 + $0x1c0] sm:$0xf] }
 0x863   : > { %v6841_v10 = vpop.f32.mrf.mxu1 }
 0x864   : > { %v6840_v45 = vadd.f32 %v6839_v53, %v6791_v26 }
 0x866   : > { %v14510_v13 = vadd.f32 %v6888_v41, %v6840_v45 }
 0x867   : > { %v6743_v12 = vpop.f32.mrf.mxu3 }
 0x868   : > { %v6744_v24 = vadd.f32 %v6743_v12, %v14437_v48 }
 0x869   : > { %v6890_v38 = vpop.f32.mrf.mxu2  ;;  %v6795_v35 = vpop.f32.mrf.mxu0 }
 0x86a   : > { %v6793_v43 = vadd.f32 %v6792_v51, %v6744_v24 }
 0x86b   : > { %v6844_v62 = vpop.f32.mrf.mxu1 }
 0x86c   : > { %v6842_v30 = vadd.f32 %v6841_v10, %v6793_v43  ;;  %6941 = vmatmul.bf16.gmra.mxu3 %v13373_v31  ;;  %7604 = vmatmul.bf16.gmra.mxu0 %v15683_v18  ;;  %v11834_v31 = vld [vmem:[#allocation9 + $0x1c4] sm:$0xf0]  ;;  %v15686_v10 = vld [vmem:[#allocation140_spill] sm:$0xff]  ;;  %v11124_v43 = vld [vmem:[#allocation9 + $0x1b0] sm:$0xf] }
 0x86d   : > { %v11133_v53 = vor.u32 %v11834_v31, %v11132_v6  ;;  %v15687_v31 = vld [vmem:[#allocation133_spill] sm:$0xff] }
 0x86e   : > { %7653 = vmatmul.bf16.gmra.mxu1 %v15684_v47  ;;  %7702 = vmatmul.bf16.gmra.mxu2 %v14256_v17  ;;  %v14517_v36 = vadd.f32 %v6890_v38, %v6842_v30 }
 0x86f   : > { %v6746_v3 = vpop.f32.mrf.mxu3  ;;  %7736 = vmatpush.bf16.msrb.mxu3 %v11133_v53  ;;  %v11030_v53 = vld [vmem:[#allocation9 + $0xf8] sm:$0xf0] }
 0x870   : > { %v6747_v60 = vadd.f32 %v6746_v3, %v14440_v2  ;;  %v15685_v2 = vld [vmem:[#allocation53_spill] sm:$0xff] }
 0x871   : > { %v6893_v48 = vpop.f32.mrf.mxu2  ;;  %v6797_v8 = vpop.f32.mrf.mxu0 }
 0x872   : > { %v6796_v39 = vadd.f32 %v6795_v35, %v6747_v60 }
 0x873   : > { %v6846_v61 = vpop.f32.mrf.mxu1 }
 0x874   : > { %v6845_v9 = vadd.f32 %v6844_v62, %v6796_v39 }
 0x876   : > { %v14520_v21 = vadd.f32 %v6893_v48, %v6845_v9  ;;  %v11807_v9 = vld [vmem:[#allocation9 + $0xf4] sm:$0xf] }
 0x877   : > { %v6748_v57 = vpop.f32.mrf.mxu3 }
 0x878   : > { %v6749_v37 = vadd.f32 %v6748_v57, %v14447_v20 }
 0x879   : > { %v6895_v4 = vpop.f32.mrf.mxu2  ;;  %v6800_v23 = vpop.f32.mrf.mxu0 }
 0x87a   : > { %v6798_v41 = vadd.f32 %v6797_v8, %v6749_v37  ;;  %v11823_v37 = vld [vmem:[#allocation9 + $0x174] sm:$0xf] }
 0x87b   : > { %v6849_v51 = vpop.f32.mrf.mxu1 }
 0x87c   : > { %v6847_v26 = vadd.f32 %v6846_v61, %v6798_v41  ;;  %6946 = vmatmul.bf16.gmra.mxu3 %v13387_v11  ;;  %7609 = vmatmul.bf16.gmra.mxu0 %v15685_v2  ;;  %v11832_v11 = vld [vmem:[#allocation9 + $0x1b4] sm:$0xf0]  ;;  %v11791_v61 = vld [vmem:[#allocation9 + $0x74] sm:$0xf] }
 0x87d   : > { %v11125_v30 = vor.u32 %v11832_v11, %v11124_v43  ;;  %v11086_v43 = vld [vmem:[#allocation9 + $0x168] sm:$0xf0] }
 0x87e   : > { %7658 = vmatmul.bf16.gmra.mxu1 %v15686_v10  ;;  %7707 = vmatmul.bf16.gmra.mxu2 %v14272_v56  ;;  %v14527_v45 = vadd.f32 %v6895_v4, %v6847_v26  ;;  %v11094_v4 = vld [vmem:[#allocation9 + $0x178] sm:$0xf0] }
 0x87f   : > { %v6751_v52 = vpop.f32.mrf.mxu3  ;;  %7737 = vmatpush.bf16.msrb.mxu3 %v11125_v30  ;;  %v11097_v41 = vor.u32 %v11823_v37, %v11094_v4 }
 0x880   : > { %v6752_v32 = vadd.f32 %v6751_v52, %v14450_v25  ;;  %v10966_v25 = vld [vmem:[#allocation9 + $0x78] sm:$0xf0]  ;;  %v11789_v52 = vld [vmem:[#allocation9 + $0x64] sm:$0xf] }
 0x881   : > { %v6898_v20 = vpop.f32.mrf.mxu2  ;;  %v6802_v12 = vpop.f32.mrf.mxu0  ;;  %v10969_v57 = vor.u32 %v11791_v61, %v10966_v25  ;;  %7880 = vmatpush.bf16.msrb.mxu2 %v11097_v41  ;;  %v10950_v61 = vld [vmem:[#allocation9 + $0x58] sm:$0xf0]  ;;  %v11803_v25 = vld [vmem:[#allocation9 + $0xd4] sm:$0xf]  ;;  %v11116_v41 = vld [vmem:[#allocation9 + $0x1a0] sm:$0xf] }
 0x882   : > { %v6801_v16 = vadd.f32 %v6800_v23, %v6752_v32  ;;  %v15688_v23 = vld [vmem:[#allocation141_spill] sm:$0xff] }
 0x883   : > { %v6851_v24 = vpop.f32.mrf.mxu1  ;;  %7782 = vmatpush.bf16.msrb.mxu0 %v10969_v57  ;;  %v11805_v32 = vld [vmem:[#allocation9 + $0xe4] sm:$0xf]  ;;  %v11014_v57 = vld [vmem:[#allocation9 + $0xd8] sm:$0xf0] }
 0x884   : > { %v6850_v38 = vadd.f32 %v6849_v51, %v6801_v16  ;;  %v11017_v37 = vor.u32 %v11803_v25, %v11014_v57  ;;  %v11783_v25 = vld [vmem:[#allocation9 + $0x34] sm:$0xf] }
 0x886   : > { %v14530_v35 = vadd.f32 %v6898_v20, %v6850_v38  ;;  %v11821_v38 = vld [vmem:[#allocation9 + $0x164] sm:$0xf] }
 0x887   : > { %v6753_v62 = vpop.f32.mrf.mxu3  ;;  %v11089_v30 = vor.u32 %v11821_v38, %v11086_v43  ;;  %v11006_v38 = vld [vmem:[#allocation9 + $0xc8] sm:$0xf0]  ;;  %v11817_v43 = vld [vmem:[#allocation9 + $0x144] sm:$0xf] }
 0x888   : > { %v6754_v3 = vadd.f32 %v6753_v62, %v14457_v54  ;;  %v11033_v54 = vor.u32 %v11807_v9, %v11030_v53  ;;  %v11078_v53 = vld [vmem:[#allocation9 + $0x158] sm:$0xf0] }
 0x889   : > { %v6900_v60 = vpop.f32.mrf.mxu2  ;;  %v6805_v48 = vpop.f32.mrf.mxu0  ;;  %7881 = vmatpush.bf16.msrb.mxu2 %v11089_v30 }
 0x88a   : > { %v6803_v8 = vadd.f32 %v6802_v12, %v6754_v3  ;;  %7831 = vmatpush.bf16.msrb.mxu1 %v11033_v54 }
 0x88b   : > { %v6854_v39 = vpop.f32.mrf.mxu1 }
 0x88c   : > { %v6852_v6 = vadd.f32 %v6851_v24, %v6803_v8  ;;  %6951 = vmatmul.bf16.gmra.mxu3 %v15575_v28  ;;  %7614 = vmatmul.bf16.gmra.mxu0 %v15687_v31  ;;  %v10958_v28 = vld [vmem:[#allocation9 + $0x68] sm:$0xf0]  ;;  %v11787_v8 = vld [vmem:[#allocation9 + $0x54] sm:$0xf] }
 0x88d   : > { %v10961_v16 = vor.u32 %v11789_v52, %v10958_v28  ;;  %v11022_v24 = vld [vmem:[#allocation9 + $0xe8] sm:$0xf0]  ;;  %v11785_v28 = vld [vmem:[#allocation9 + $0x44] sm:$0xf] }
 0x88e   : > { %7663 = vmatmul.bf16.gmra.mxu1 %v15688_v23  ;;  %7712 = vmatmul.bf16.gmra.mxu2 %v14290_v22  ;;  %v14537_v51 = vadd.f32 %v6900_v60, %v6852_v6  ;;  %v11025_v62 = vor.u32 %v11805_v32, %v11022_v24  ;;  %v10953_v6 = vor.u32 %v11787_v8, %v10950_v61  ;;  %v10942_v32 = vld [vmem:[#allocation9 + $0x48] sm:$0xf0] }
 0x88f   : > { %v6756_v26 = vpop.f32.mrf.mxu3  ;;  %7783 = vmatpush.bf16.msrb.mxu0 %v10961_v16  ;;  %v10945_v24 = vor.u32 %v11785_v28, %v10942_v32  ;;  %v11797_v28 = vld [vmem:[#allocation9 + $0xa4] sm:$0xf] }
 0x890   : > { %v6757_v20 = vadd.f32 %v6756_v26, %v14460_v49  ;;  %7832 = vmatpush.bf16.msrb.mxu1 %v11025_v62  ;;  %v11819_v49 = vld [vmem:[#allocation9 + $0x154] sm:$0xf]  ;;  %v11830_v26 = vld [vmem:[#allocation9 + $0x1a4] sm:$0xf0]  ;;  %v11070_v62 = vld [vmem:[#allocation9 + $0x148] sm:$0xf0] }
 0x891   : > { %v6903_v12 = vpop.f32.mrf.mxu2  ;;  %v6807_v11 = vpop.f32.mrf.mxu0  ;;  %v11081_v4 = vor.u32 %v11819_v49, %v11078_v53  ;;  %v11117_v52 = vor.u32 %v11830_v26, %v11116_v41  ;;  %v10998_v53 = vld [vmem:[#allocation9 + $0xb8] sm:$0xf0]  ;;  %v15690_v41 = vld [vmem:[#allocation142_spill] sm:$0xff] }
 0x892   : > { %v6806_v3 = vadd.f32 %v6805_v48, %v6757_v20  ;;  %v11801_v20 = vld [vmem:[#allocation9 + $0xc4] sm:$0xf] }
 0x893   : > { %v6856_v60 = vpop.f32.mrf.mxu1  ;;  %7784 = vmatpush.bf16.msrb.mxu0 %v10953_v6  ;;  %7882 = vmatpush.bf16.msrb.mxu2 %v11081_v4  ;;  %v11799_v6 = vld [vmem:[#allocation9 + $0xb4] sm:$0xf]  ;;  %v11062_v4 = vld [vmem:[#allocation9 + $0x138] sm:$0xf0] }
 0x894   : > { %v6855_v9 = vadd.f32 %v6854_v39, %v6806_v3  ;;  %7833 = vmatpush.bf16.msrb.mxu1 %v11017_v37  ;;  %7738 = vmatpush.bf16.msrb.mxu3 %v11117_v52  ;;  %v11073_v3 = vor.u32 %v11817_v43, %v11070_v62  ;;  %v11815_v37 = vld [vmem:[#allocation9 + $0x134] sm:$0xf]  ;;  %v11054_v43 = vld [vmem:[#allocation9 + $0x128] sm:$0xf0] }
 0x895   : > { %v11065_v26 = vor.u32 %v11815_v37, %v11062_v4  ;;  %v11046_v37 = vld [vmem:[#allocation9 + $0x118] sm:$0xf0] }
 0x896   : > { %v14540_v54 = vadd.f32 %v6903_v12, %v6855_v9  ;;  %v11009_v12 = vor.u32 %v11801_v20, %v11006_v38  ;;  %v10934_v9 = vld [vmem:[#allocation9 + $0x38] sm:$0xf0]  ;;  %v11813_v38 = vld [vmem:[#allocation9 + $0x124] sm:$0xf] }
 0x897   : > { %v6758_v48 = vpop.f32.mrf.mxu3  ;;  %7785 = vmatpush.bf16.msrb.mxu0 %v10945_v24  ;;  %7883 = vmatpush.bf16.msrb.mxu2 %v11073_v3  ;;  %v10937_v49 = vor.u32 %v11783_v25, %v10934_v9  ;;  %v10990_v24 = vld [vmem:[#allocation9 + $0xa8] sm:$0xf0]  ;;  %v11057_v3 = vor.u32 %v11813_v38, %v11054_v43  ;;  %v11779_v25 = vld [vmem:[#allocation9 + $0x14] sm:$0xf]  ;;  %v10918_v9 = vld [vmem:[#allocation9 + $0x18] sm:$0xf0] }
 0x898   : > { %v6759_v39 = vadd.f32 %v6758_v48, %v14467_v7  ;;  %7834 = vmatpush.bf16.msrb.mxu1 %v11009_v12  ;;  %v15689_v7 = vld [vmem:[#allocation134_spill] sm:$0xff]  ;;  %v10993_v12 = vor.u32 %v11797_v28, %v10990_v24  ;;  %v11777_v28 = vld [vmem:[#allocation9 + $0x4] sm:$0xf] }
 0x899   : > { %v6905_v16 = vpop.f32.mrf.mxu2  ;;  %v6810_v30 = vpop.f32.mrf.mxu0  ;;  %v10974_v43 = vld [vmem:[#allocation9 + $0x88] sm:$0xf0] }
 0x89a   : > { %v6808_v8 = vadd.f32 %v6807_v11, %v6759_v39  ;;  %v11001_v11 = vor.u32 %v11799_v6, %v10998_v53  ;;  %v11795_v6 = vld [vmem:[#allocation9 + $0x94] sm:$0xf]  ;;  %v10982_v53 = vld [vmem:[#allocation9 + $0x98] sm:$0xf0] }
 0x89b   : > { %v6859_v61 = vpop.f32.mrf.mxu1  ;;  %7786 = vmatpush.bf16.msrb.mxu0 %v10937_v49  ;;  %7884 = vmatpush.bf16.msrb.mxu2 %v11065_v26  ;;  %v10921_v49 = vor.u32 %v11779_v25, %v10918_v9  ;;  %v10985_v4 = vor.u32 %v11795_v6, %v10982_v53  ;;  %v15692_v53 = vld [vmem:[#allocation143_spill] sm:$0xff] }
 0x89c   : > { %v6857_v57 = vadd.f32 %v6856_v60, %v6808_v8  ;;  %6956 = vmatmul.bf16.gmra.mxu3 %v15579_v44  ;;  %7619 = vmatmul.bf16.gmra.mxu0 %v15689_v7  ;;  %v11781_v60 = vld [vmem:[#allocation9 + $0x24] sm:$0xf]  ;;  %v10926_v44 = vld [vmem:[#allocation9 + $0x28] sm:$0xf0] }
 0x89d   : > { %7835 = vmatpush.bf16.msrb.mxu1 %v11001_v11  ;;  %v10929_v39 = vor.u32 %v11781_v60, %v10926_v44  ;;  %v11828_v60 = vld [vmem:[#allocation9 + $0x194] sm:$0xf0] }
 0x89e   : > { %7668 = vmatmul.bf16.gmra.mxu1 %v15690_v41  ;;  %7717 = vmatmul.bf16.gmra.mxu2 %v14306_v46  ;;  %v14547_v48 = vadd.f32 %v6905_v16, %v6857_v57 }
 0x89f   : > { %v6761_v52 = vpop.f32.mrf.mxu3  ;;  %7787 = vmatpush.bf16.msrb.mxu0 %v10929_v39  ;;  %7885 = vmatpush.bf16.msrb.mxu2 %v11057_v3  ;;  %v11793_v39 = vld [vmem:[#allocation9 + $0x84] sm:$0xf] }
 0x8a0   : > { %v6762_v32 = vadd.f32 %v6761_v52, %v14470_v33  ;;  %v11811_v33 = vld [vmem:[#allocation9 + $0x114] sm:$0xf]  ;;  %v11108_v52 = vld [vmem:[#allocation9 + $0x190] sm:$0xf] }
 0x8a1   : > { %v6908_v20 = vpop.f32.mrf.mxu2  ;;  %v6812_v62 = vpop.f32.mrf.mxu0  ;;  %7836 = vmatpush.bf16.msrb.mxu1 %v10993_v12  ;;  %v11049_v11 = vor.u32 %v11811_v33, %v11046_v37  ;;  %v11109_v44 = vor.u32 %v11828_v60, %v11108_v52  ;;  %v11809_v12 = vld [vmem:[#allocation9 + $0x104] sm:$0xf] }
 0x8a2   : > { %v6811_v8 = vadd.f32 %v6810_v30, %v6762_v32  ;;  %v10910_v32 = vld [vmem:[#allocation9 + $0x8] sm:$0xf0] }
 0x8a3   : > { %v6861_v16 = vpop.f32.mrf.mxu1  ;;  %7788 = vmatpush.bf16.msrb.mxu0 %v10921_v49  ;;  %7886 = vmatpush.bf16.msrb.mxu2 %v11049_v11  ;;  %v10913_v38 = vor.u32 %v11777_v28, %v10910_v32  ;;  %v15691_v49 = vld [vmem:[#allocation135_spill] sm:$0xff] }
 0x8a4   : > { %v6860_v57 = vadd.f32 %v6859_v61, %v6811_v8  ;;  %7739 = vmatpush.bf16.msrb.mxu3 %v11109_v44  ;;  %v11038_v8 = vld [vmem:[#allocation9 + $0x108] sm:$0xf0] }
 0x8a5   : > { %7837 = vmatpush.bf16.msrb.mxu1 %v10985_v4  ;;  %v11041_v6 = vor.u32 %v11809_v12, %v11038_v8  ;;  %v15694_v12 = vld [vmem:[#allocation144_spill] sm:$0xff] }
 0x8a6   : > { %v14550_v26 = vadd.f32 %v6908_v20, %v6860_v57  ;;  %v10977_v20 = vor.u32 %v11793_v39, %v10974_v43 }
 0x8a7   : > { %v6763_v30 = vpop.f32.mrf.mxu3  ;;  %7789 = vmatpush.bf16.msrb.mxu0 %v10913_v38  ;;  %7887 = vmatpush.bf16.msrb.mxu2 %v11041_v6 }
 0x8a8   : > { %v6764_v61 = vadd.f32 %v6763_v30, %v14477_v34  ;;  %v11826_v30 = vld [vmem:[#allocation9 + $0x184] sm:$0xf0] }
 0x8a9   : > { %v6910_v24 = vpop.f32.mrf.mxu2  ;;  %v6815_v3 = vpop.f32.mrf.mxu0  ;;  %7838 = vmatpush.bf16.msrb.mxu1 %v10977_v20 }
 0x8aa   : > { %v6813_v25 = vadd.f32 %v6812_v62, %v6764_v61 }
 0x8ab   : > { %v6864_v9 = vpop.f32.mrf.mxu1 }
 0x8ac   : > { %v6862_v57 = vadd.f32 %v6861_v16, %v6813_v25  ;;  %6961 = vmatmul.bf16.gmra.mxu3 %v15583_v50  ;;  %7624 = vmatmul.bf16.gmra.mxu0 %v15691_v49  ;;  %v11100_v16 = vld [vmem:[#allocation9 + $0x180] sm:$0xf] }
 0x8ad   : > { %v11101_v50 = vor.u32 %v11826_v30, %v11100_v16 }
 0x8ae   : > { %7673 = vmatmul.bf16.gmra.mxu1 %v15692_v53  ;;  %7722 = vmatmul.bf16.gmra.mxu2 %v14322_v40  ;;  %v14557_v34 = vadd.f32 %v6910_v24, %v6862_v57 }
 0x8af   : > { %v6766_v33 = vpop.f32.mrf.mxu3  ;;  %7740 = vmatpush.bf16.msrb.mxu3 %v11101_v50 }
 0x8b0   : > { %v6767_v37 = vadd.f32 %v6766_v33, %v14480_v42  ;;  %v15693_v42 = vld [vmem:[#allocation136_spill] sm:$0xff]  ;;  %v11839_v33 = vld [vmem:[#allocation9 + $0x1f4] sm:$0xf] }
 0x8b1   : > { %v6913_v62 = vpop.f32.mrf.mxu2  ;;  %v6817_v4 = vpop.f32.mrf.mxu0 }
 0x8b2   : > { %v6816_v11 = vadd.f32 %v6815_v3, %v6767_v37  ;;  %v15695_v3 = vld [vmem:[#allocation22_spill] sm:$0xff]  ;;  %v11158_v37 = vld [vmem:[#allocation9 + $0x1f8] sm:$0xf0] }
 0x8b3   : > { %v6866_v52 = vpop.f32.mrf.mxu1 }
 0x8b4   : > { %v6865_v60 = vadd.f32 %v6864_v9, %v6816_v11 }
 0x8b6   : > { %v14560_v44 = vadd.f32 %v6913_v62, %v6865_v60  ;;  %v14570_v62 = vld [vmem:[#allocation13 + $0x4] sm:$0x3] }
 0x8b7   : > { %v6768_v28 = vpop.f32.mrf.mxu3 }
 0x8b8   : > { %v6769_v32 = vadd.f32 %v6768_v28, %v14487_v59 }
 0x8b9   : > { %v6915_v39 = vpop.f32.mrf.mxu2  ;;  %v6820_v61 = vpop.f32.mrf.mxu0 }
 0x8ba   : > { %v6818_v24 = vadd.f32 %v6817_v4, %v6769_v32 }
 0x8bb   : > { %v6869_v38 = vpop.f32.mrf.mxu1 }
 0x8bc   : > { %v6867_v43 = vadd.f32 %v6866_v52, %v6818_v24  ;;  %6966 = vmatmul.bf16.gmra.mxu3 %v15587_v29  ;;  %7629 = vmatmul.bf16.gmra.mxu0 %v15693_v42  ;;  %v11161_v29 = vor.u32 %v11839_v33, %v11158_v37  ;;  %v14575_v52 = vperm.slane %v14570_v62, 0  ;;  %v15696_v37 = vld [vmem:[#allocation129_spill] sm:$0xff] }
 0x8be   : > { %7678 = vmatmul.bf16.gmra.mxu1 %v15694_v12  ;;  %7727 = vmatmul.bf16.gmra.mxu2 %v15695_v3  ;;  %v14567_v20 = vadd.f32 %v6915_v39, %v6867_v43 }
 0x8bf   : > { %v6771_v8 = vpop.f32.mrf.mxu3  ;;  %7929 = vmatpush.bf16.msra.mxu3 %v11161_v29 }
 0x8c0   : > { %v6772_v25 = vadd.f32 %v6771_v8, %v14490_v14 }
 0x8c1   : > { %v6918_v9 = vpop.f32.mrf.mxu2  ;;  %v6822_v59 = vpop.f32.mrf.mxu0 }
 0x8c2   : > { %v6821_v6 = vadd.f32 %v6820_v61, %v6772_v25 }
 0x8c3   : > { %v6871_v57 = vpop.f32.mrf.mxu1 }
 0x8c4   : > { %v6870_v4 = vadd.f32 %v6869_v38, %v6821_v6  ;;  %v11150_v6 = vld [vmem:[#allocation9 + $0x1e8] sm:$0xf0] }
 0x8c6   : > { %v14572_v11 = vadd.f32 %v6918_v9, %v6870_v4 }
 0x8c7   : > { %v6773_v60 = vpop.f32.mrf.mxu3 }
 0x8c8   : > { %v6774_v16 = vadd.f32 %v6773_v60, %v14497_v55 }
 0x8c9   : > { %v6920_v14 = vpop.f32.mrf.mxu2  ;;  %v7595_v30 = vpop.f32.mrf.mxu0 }
 0x8ca   : > { %v6823_v50 = vadd.f32 %v6822_v59, %v6774_v16  ;;  %v7596_v28 = vadd.f32 %v7595_v30, %v14575_v52  ;;  %v11837_v59 = vld [vmem:[#allocation9 + $0x1e4] sm:$0xf] }
 0x8cb   : > { %v7644_v32 = vpop.f32.mrf.mxu1 }
 0x8cc   : > { %v6872_v39 = vadd.f32 %v6871_v57, %v6823_v50  ;;  %v7645_v61 = vadd.f32 %v7644_v32, %v7596_v28  ;;  %7790 = vmatmul.bf16.vlgmr.msrb.gmra.mxu0 %v15679_v63  ;;  %v11153_v57 = vor.u32 %v11837_v59, %v11150_v6  ;;  %v11142_v59 = vld [vmem:[#allocation9 + $0x1d8] sm:$0xf0] }
 0x8ce   : > { %7839 = vmatmul.bf16.vlgmr.msrb.gmra.mxu1 %v15680_v58  ;;  %7888 = vmatmul.bf16.vlgmr.msrb.gmra.mxu2 %v14222_v15  ;;  %v14582_v24 = vadd.f32 %v6920_v14, %v6872_v39 }
 0x8cf   : > { %v6932_v38 = vpop.f32.mrf.mxu3  ;;  %7930 = vmatpush.bf16.msra.mxu3 %v11153_v57 }
 0x8d0   : > { %v6933_v33 = vadd.f32 %v6932_v38, %v14500_v0 }
 0x8d1   : > { %v7693_v43 = vpop.f32.mrf.mxu2  ;;  %v7597_v55 = vpop.f32.mrf.mxu0 }
 0x8d2   : > { %v14584_v8 = vadd.f32 %v7693_v43, %v7645_v61  ;;  %v7598_v25 = vadd.f32 %v7597_v55, %v14575_v52  ;;  %v7040_v15 = vmul.f32 %v15696_v37, %v6933_v33  ;;  %vm6975_vm0 = vcmp.ge.f32.partialorder %v6933_v33, 0.0 }
 0x8d3   : > { %v7646_v9 = vpop.f32.mrf.mxu1 }
 0x8d4   : > { %v7647_v63 = vadd.f32 %v7646_v9, %v7598_v25  ;;  %v7104_v28 = vsel %vm6975_vm0, %v6933_v33, %v7040_v15  ;;  %v11835_v9 = vld [vmem:[#allocation9 + $0x1d4] sm:$0xf] }
 0x8d5   : > { %v11145_v6 = vor.u32 %v11835_v9, %v11142_v59 }
 0x8d7   : > { %v6934_v58 = vpop.f32.mrf.mxu3  ;;  %7931 = vmatpush.bf16.msra.mxu3 %v11145_v6 }
 0x8d8   : > { %v6935_v29 = vadd.f32 %v6934_v58, %v14507_v5 }
 0x8d9   : > { %v7695_v4 = vpop.f32.mrf.mxu2  ;;  %v7600_v16 = vpop.f32.mrf.mxu0 }
 0x8da   : > { %v14590_v60 = vadd.f32 %v7695_v4, %v7647_v63  ;;  %vm6979_vm1 = vcmp.ge.f32.partialorder %v6935_v29, 0.0  ;;  %v7044_v14 = vmul.f32 %v15696_v37, %v6935_v29  ;;  %v7601_v30 = vadd.f32 %v7600_v16, %v14575_v52 }
 0x8db   : > { %v7649_v50 = vpop.f32.mrf.mxu1 }
 0x8dc   : > { %v7108_v0 = vsel %vm6979_vm1, %v6935_v29, %v7044_v14  ;;  %v7650_v32 = vadd.f32 %v7649_v50, %v7601_v30  ;;  %7795 = vmatmul.bf16.gmra.mxu0 %v15681_v1 }
 0x8dd   : > { %v14595_v39 = vpack.c.bf16 %v7108_v0, %v7104_v28 }
 0x8de   : > { %7844 = vmatmul.bf16.gmra.mxu1 %v15682_v27  ;;  %7893 = vmatmul.bf16.gmra.mxu2 %v14240_v19 }
 0x8df   : > { %v6937_v5 = vpop.f32.mrf.mxu3  ;;  %7741 = vmatmul.bf16.vlgmr.msrb.gmra.mxu3 %v14595_v39 }
 0x8e0   : > { %v6938_v1 = vadd.f32 %v6937_v5, %v14510_v13 }
 0x8e1   : > { %v7698_v61 = vpop.f32.mrf.mxu2  ;;  %v7602_v43 = vpop.f32.mrf.mxu0 }
 0x8e2   : > { %v14600_v38 = vadd.f32 %v7698_v61, %v7650_v32  ;;  %v7603_v55 = vadd.f32 %v7602_v43, %v14575_v52  ;;  %v7048_v19 = vmul.f32 %v15696_v37, %v6938_v1  ;;  %vm6983_vm2 = vcmp.ge.f32.partialorder %v6938_v1, 0.0  ;;  %v11833_v43 = vld [vmem:[#allocation9 + $0x1c4] sm:$0xf] }
 0x8e3   : > { %v7651_v25 = vpop.f32.mrf.mxu1 }
 0x8e4   : > { %v7652_v57 = vadd.f32 %v7651_v25, %v7603_v55  ;;  %v7112_v13 = vsel %vm6983_vm2, %v6938_v1, %v7048_v19 }
 0x8e7   : > { %v6939_v27 = vpop.f32.mrf.mxu3 }
 0x8e8   : > { %v6940_v33 = vadd.f32 %v6939_v27, %v14517_v36 }
 0x8e9   : > { %v7700_v63 = vpop.f32.mrf.mxu2  ;;  %v7605_v15 = vpop.f32.mrf.mxu0 }
 0x8ea   : > { %v14606_v58 = vadd.f32 %v7700_v63, %v7652_v57  ;;  %vm6987_vm3 = vcmp.ge.f32.partialorder %v6940_v33, 0.0  ;;  %v7052_v29 = vmul.f32 %v15696_v37, %v6940_v33  ;;  %v7606_v4 = vadd.f32 %v7605_v15, %v14575_v52 }
 0x8eb   : > { %v7654_v16 = vpop.f32.mrf.mxu1 }
 0x8ec   : > { %v7655_v14 = vadd.f32 %v7654_v16, %v7606_v4  ;;  %7800 = vmatmul.bf16.gmra.mxu0 %v15683_v18  ;;  %v7116_v30 = vsel %vm6987_vm3, %v6940_v33, %v7052_v29  ;;  %v11134_v18 = vld [vmem:[#allocation9 + $0x1c8] sm:$0xf0] }
 0x8ed   : > { %v14613_v36 = vpack.c.bf16 %v7116_v30, %v7112_v13  ;;  %v11137_v55 = vor.u32 %v11833_v43, %v11134_v18  ;;  %v11831_v30 = vld [vmem:[#allocation9 + $0x1b4] sm:$0xf] }
 0x8ee   : > { %7849 = vmatmul.bf16.gmra.mxu1 %v15684_v47  ;;  %7898 = vmatmul.bf16.gmra.mxu2 %v14256_v17 }
 0x8ef   : > { %v6942_v50 = vpop.f32.mrf.mxu3  ;;  %7746 = vmatmul.bf16.gmra.mxu3 %v14613_v36 }
 0x8f0   : > { %v6943_v25 = vadd.f32 %v6942_v50, %v14520_v21  ;;  %7932 = vmatpush.bf16.msra.mxu3 %v11137_v55  ;;  %v11126_v50 = vld [vmem:[#allocation9 + $0x1b8] sm:$0xf0] }
 0x8f1   : > { %v7703_v28 = vpop.f32.mrf.mxu2  ;;  %v7607_v32 = vpop.f32.mrf.mxu0 }
 0x8f2   : > { %v14616_v0 = vadd.f32 %v7703_v28, %v7655_v14  ;;  %v7608_v5 = vadd.f32 %v7607_v32, %v14575_v52  ;;  %v7056_v9 = vmul.f32 %v15696_v37, %v6943_v25  ;;  %vm6991_vm4 = vcmp.ge.f32.partialorder %v6943_v25, 0.0 }
 0x8f3   : > { %v7656_v61 = vpop.f32.mrf.mxu1  ;;  %v11129_v28 = vor.u32 %v11831_v30, %v11126_v50  ;;  %v11825_v30 = vld [vmem:[#allocation9 + $0x184] sm:$0xf]  ;;  %v11102_v50 = vld [vmem:[#allocation9 + $0x188] sm:$0xf0] }
 0x8f4   : > { %v7657_v47 = vadd.f32 %v7656_v61, %v7608_v5  ;;  %v7120_v21 = vsel %vm6991_vm4, %v6943_v25, %v7056_v9  ;;  %v11118_v9 = vld [vmem:[#allocation9 + $0x1a8] sm:$0xf0] }
 0x8f5   : > { %7933 = vmatpush.bf16.msra.mxu3 %v11129_v28 }
 0x8f7   : > { %v6944_v17 = vpop.f32.mrf.mxu3 }
 0x8f8   : > { %v6945_v59 = vadd.f32 %v6944_v17, %v14527_v45 }
 0x8f9   : > { %v7705_v6 = vpop.f32.mrf.mxu2  ;;  %v7610_v57 = vpop.f32.mrf.mxu0 }
 0x8fa   : > { %v14622_v1 = vadd.f32 %v7705_v6, %v7657_v47  ;;  %vm6995_vm5 = vcmp.ge.f32.partialorder %v6945_v59, 0.0  ;;  %v7060_v27 = vmul.f32 %v15696_v37, %v6945_v59  ;;  %v7611_v19 = vadd.f32 %v7610_v57, %v14575_v52 }
 0x8fb   : > { %v7659_v33 = vpop.f32.mrf.mxu1 }
 0x8fc   : > { %v7660_v63 = vadd.f32 %v7659_v33, %v7611_v19  ;;  %7805 = vmatmul.bf16.gmra.mxu0 %v15685_v2  ;;  %v7124_v15 = vsel %vm6995_vm5, %v6945_v59, %v7060_v27 }
 0x8fd   : > { %v14629_v45 = vpack.c.bf16 %v7124_v15, %v7120_v21  ;;  %v11110_v21 = vld [vmem:[#allocation9 + $0x198] sm:$0xf0] }
 0x8fe   : > { %7854 = vmatmul.bf16.gmra.mxu1 %v15686_v10  ;;  %7903 = vmatmul.bf16.gmra.mxu2 %v14272_v56 }
 0x8ff   : > { %v6947_v29 = vpop.f32.mrf.mxu3  ;;  %7751 = vmatmul.bf16.gmra.mxu3 %v14629_v45 }
 0x900   : > { %v6948_v32 = vadd.f32 %v6947_v29, %v14530_v35 }
 0x901   : > { %v7708_v4 = vpop.f32.mrf.mxu2  ;;  %v7612_v14 = vpop.f32.mrf.mxu0 }
 0x902   : > { %v14632_v16 = vadd.f32 %v7708_v4, %v7660_v63  ;;  %v7613_v13 = vadd.f32 %v7612_v14, %v14575_v52  ;;  %v7064_v5 = vmul.f32 %v15696_v37, %v6948_v32  ;;  %vm6999_vm6 = vcmp.ge.f32.partialorder %v6948_v32, 0.0  ;;  %v11827_v63 = vld [vmem:[#allocation9 + $0x194] sm:$0xf] }
 0x903   : > { %v7661_v2 = vpop.f32.mrf.mxu1 }
 0x904   : > { %v7662_v10 = vadd.f32 %v7661_v2, %v7613_v13  ;;  %v7128_v25 = vsel %vm6999_vm6, %v6948_v32, %v7064_v5  ;;  %v11848_v2 = vld [vmem:[#allocation10 + $0x38] sm:$0xff] }
 0x905   : > { %8222 = vmatpush.bf16.msra.mxu0 %v11848_v2 }
 0x907   : > { %v6949_v56 = vpop.f32.mrf.mxu3 }
 0x908   : > { %v6950_v61 = vadd.f32 %v6949_v56, %v14537_v51  ;;  %v11829_v51 = vld [vmem:[#allocation9 + $0x1a4] sm:$0xf]  ;;  %v11846_v56 = vld [vmem:[#allocation10 + $0x28] sm:$0xff] }
 0x909   : > { %v7710_v43 = vpop.f32.mrf.mxu2  ;;  %v11121_v59 = vor.u32 %v11829_v51, %v11118_v9  ;;  %v11842_v51 = vld [vmem:[#allocation10 + $0x8] sm:$0xff]  ;;  %v14681_v9 = vpop.f32.mrf.mxu0 }
 0x90a   : > { %v14638_v18 = vadd.f32 %v7710_v43, %v7662_v10  ;;  %vm7003_vm7 = vcmp.ge.f32.partialorder %v6950_v61, 0.0  ;;  %v7068_v55 = vmul.f32 %v15696_v37, %v6950_v61  ;;  %v11845_v43 = vld [vmem:[#allocation10 + $0x20] sm:$0xff] }
 0x90b   : > { %7934 = vmatpush.bf16.msra.mxu3 %v11121_v59 }
 0x90c   : > { %7810 = vmatmul.bf16.gmra.mxu0 %v15687_v31  ;;  %v7132_v47 = vsel %vm7003_vm7, %v6950_v61, %v7068_v55 }
 0x90d   : > { %v14644_v35 = vpack.c.bf16 %v7132_v47, %v7128_v25  ;;  %v11843_v47 = vld [vmem:[#allocation10 + $0x10] sm:$0xff] }
 0x90e   : > { %7859 = vmatmul.bf16.gmra.mxu1 %v15688_v23  ;;  %7908 = vmatmul.bf16.gmra.mxu2 %v14290_v22 }
 0x90f   : > { %v6952_v17 = vpop.f32.mrf.mxu3  ;;  %7756 = vmatmul.bf16.gmra.mxu3 %v14644_v35 }
 0x910   : > { %v6953_v6 = vadd.f32 %v6952_v17, %v14540_v54 }
 0x912   : > { %v7072_v31 = vmul.f32 %v15696_v37, %v6953_v6  ;;  %vm7007_vm8 = vcmp.ge.f32.partialorder %v6953_v6, 0.0 }
 0x914   : > { %v7136_v23 = vsel %vm7007_vm8, %v6953_v6, %v7072_v31  ;;  %v11856_v31 = vld [vmem:[#allocation10 + $0x78] sm:$0xff] }
 0x915   : > { %8271 = vmatpush.bf16.msra.mxu1 %v11856_v31 }
 0x917   : > { %v6954_v57 = vpop.f32.mrf.mxu3 }
 0x918   : > { %v6955_v27 = vadd.f32 %v6954_v57, %v14547_v48  ;;  %v11113_v48 = vor.u32 %v11827_v63, %v11110_v21 }
 0x91a   : > { %vm7011_vm9 = vcmp.ge.f32.partialorder %v6955_v27, 0.0  ;;  %v7076_v22 = vmul.f32 %v15696_v37, %v6955_v27  ;;  %7935 = vmatpush.bf16.msra.mxu3 %v11113_v48 }
 0x91c   : > { %7815 = vmatmul.bf16.gmra.mxu0 %v15689_v7  ;;  %v7140_v19 = vsel %vm7011_vm9, %v6955_v27, %v7076_v22  ;;  %v14686_v27 = vpop.f32.mrf.mxu0  ;;  %v11855_v22 = vld [vmem:[#allocation10 + $0x70] sm:$0xff] }
 0x91d   : > { %v14654_v33 = vpack.c.bf16 %v7140_v19, %v7136_v23  ;;  %8272 = vmatpush.bf16.msra.mxu1 %v11855_v22  ;;  %v14692_v19 = vstv %s8857_s18  ;;  %v7616_v22 = vadd.f32 %v14681_v9, %v14575_v52 }
 0x91e   : > { %7864 = vmatmul.bf16.gmra.mxu1 %v15690_v41  ;;  %7913 = vmatmul.bf16.gmra.mxu2 %v14306_v46 }
 0x91f   : > { %v6957_v54 = vpop.f32.mrf.mxu3  ;;  %7761 = vmatmul.bf16.gmra.mxu3 %v14654_v33 }
 0x920   : > { %v6958_v15 = vadd.f32 %v6957_v54, %v14550_v26 }
 0x922   : > { %v7080_v7 = vmul.f32 %v15696_v37, %v6958_v15  ;;  %vm7015_vm10 = vcmp.ge.f32.partialorder %v6958_v15, 0.0 }
 0x924   : > { %v7144_v41 = vsel %vm7015_vm10, %v6958_v15, %v7080_v7  ;;  %v14699_v15 = vpop.f32.mrf.mxu1 }
 0x927   : > { %v6959_v29 = vpop.f32.mrf.mxu3 }
 0x928   : > { %v6960_v4 = vadd.f32 %v6959_v29, %v14557_v34  ;;  %v11105_v34 = vor.u32 %v11825_v30, %v11102_v50 }
 0x92a   : > { %vm7019_vm11 = vcmp.ge.f32.partialorder %v6960_v4, 0.0  ;;  %v7084_v46 = vmul.f32 %v15696_v37, %v6960_v4  ;;  %7936 = vmatpush.bf16.msra.mxu3 %v11105_v34 }
 0x92c   : > { %7820 = vmatmul.bf16.gmra.mxu0 %v15691_v49  ;;  %v7148_v14 = vsel %vm7019_vm11, %v6960_v4, %v7084_v46  ;;  %v11847_v49 = vld [vmem:[#allocation10 + $0x30] sm:$0xff] }
 0x92d   : > { %v14664_v13 = vpack.c.bf16 %v7148_v14, %v7144_v41  ;;  %8223 = vmatpush.bf16.msra.mxu0 %v11847_v49  ;;  %v11854_v14 = vld [vmem:[#allocation10 + $0x68] sm:$0xff] }
 0x92e   : > { %7869 = vmatmul.bf16.gmra.mxu1 %v15692_v53  ;;  %7918 = vmatmul.bf16.gmra.mxu2 %v14322_v40 }
 0x92f   : > { %v6962_v26 = vpop.f32.mrf.mxu3  ;;  %7766 = vmatmul.bf16.gmra.mxu3 %v14664_v13  ;;  %8273 = vmatpush.bf16.msra.mxu1 %v11854_v14 }
 0x930   : > { %v6963_v28 = vadd.f32 %v6962_v26, %v14560_v44  ;;  %v7666_v26 = vpop.f32.mrf.mxu1 }
 0x931   : > { %8224 = vmatpush.bf16.msra.mxu0 %v11846_v56  ;;  %v11853_v56 = vld [vmem:[#allocation10 + $0x60] sm:$0xff] }
 0x932   : > { %v7088_v10 = vmul.f32 %v15696_v37, %v6963_v28  ;;  %vm7023_vm12 = vcmp.ge.f32.partialorder %v6963_v28, 0.0 }
 0x933   : > { %8274 = vmatpush.bf16.msra.mxu1 %v11853_v56 }
 0x934   : > { %v7152_v5 = vsel %vm7023_vm12, %v6963_v28, %v7088_v10 }
 0x935   : > { %8225 = vmatpush.bf16.msra.mxu0 %v11845_v43 }
 0x937   : > { %v6964_v32 = vpop.f32.mrf.mxu3 }
 0x938   : > { %v6965_v53 = vadd.f32 %v6964_v32, %v14567_v20  ;;  %v11844_v20 = vld [vmem:[#allocation10 + $0x18] sm:$0xff] }
 0x939   : > { %8226 = vmatpush.bf16.msra.mxu0 %v11844_v20 }
 0x93a   : > { %vm7027_vm13 = vcmp.ge.f32.partialorder %v6965_v53, 0.0  ;;  %v7092_v40 = vmul.f32 %v15696_v37, %v6965_v53 }
 0x93c   : > { %7825 = vmatmul.bf16.gmra.mxu0 %v15693_v42  ;;  %v7156_v61 = vsel %vm7027_vm13, %v6965_v53, %v7092_v40  ;;  %v14715_v53 = vpop.f32.mrf.mxu1 }
 0x93d   : > { %v14674_v44 = vpack.c.bf16 %v7156_v61, %v7152_v5  ;;  %8227 = vmatpush.bf16.msra.mxu0 %v11843_v47 }
 0x93e   : > { %7874 = vmatmul.bf16.gmra.mxu1 %v15694_v12  ;;  %7923 = vmatmul.bf16.gmra.mxu2 %v15695_v3 }
 0x93f   : > { %v6967_v55 = vpop.f32.mrf.mxu3  ;;  %7771 = vmatmul.bf16.gmra.mxu3 %v14674_v44 }
 0x940   : > { %v6968_v25 = vadd.f32 %v6967_v55, %v14572_v11  ;;  %v11841_v11 = vld [vmem:[#allocation10] sm:$0xff] }
 0x941   : > { %8228 = vmatpush.bf16.msra.mxu0 %v11842_v51 }
 0x942   : > { %v7096_v17 = vmul.f32 %v15696_v37, %v6968_v25  ;;  %vm7031_vm14 = vcmp.ge.f32.partialorder %v6968_v25, 0.0 }
 0x944   : > { %v7160_v59 = vsel %vm7031_vm14, %v6968_v25, %v7096_v17  ;;  %v14724_v55 = vpop.f32.mrf.mxu1 }
 0x945   : > { %8229 = vmatpush.bf16.msra.mxu0 %v11841_v11 }
 0x947   : > { %v6969_v42 = vpop.f32.mrf.mxu3 }
 0x948   : > { %v6970_v12 = vadd.f32 %v6969_v42, %v14582_v24  ;;  %v14689_v24 = vpop.f32.mrf.mxu0 }
 0x94a   : > { %vm7035_vm15 = vcmp.ge.f32.partialorder %v6970_v12, 0.0  ;;  %v7100_v3 = vmul.f32 %v15696_v37, %v6970_v12 }
 0x94c   : > { %v7164_v6 = vsel %vm7035_vm15, %v6970_v12, %v7100_v3  ;;  %v11852_v3 = vld [vmem:[#allocation10 + $0x58] sm:$0xff]  ;;  %v14732_v51 = vpop.f32.mrf.mxu1 }
 0x94d   : > { %v14683_v57 = vpack.c.bf16 %v7164_v6, %v7160_v59  ;;  %8275 = vmatpush.bf16.msra.mxu1 %v11852_v3 }
 0x94f   : > { %7776 = vmatmul.bf16.gmra.mxu3 %v14683_v57 }
 0x950   : > { %v14694_v54 = vpop.f32.mrf.mxu0 }
 0x958   : > { %v14704_v41 = vpop.f32.mrf.mxu0 }
 0x95f   : > { %7937 = vmatmul.bf16.vlgmr.msra.gmra.mxu3 %v14595_v39 }
 0x960   : > { %v14712_v28 = vpop.f32.mrf.mxu0 }
 0x962   : > { %v7742_v37 = vpop.f32.mrf.mxu3 }
 0x963   : > { %v7743_v23 = vadd.f32 %v7742_v37, %v14584_v8  ;;  %v14702_v8 = vpop.f32.mrf.mxu2 }
 0x965   : > { %v8011_v21 = vmul.f32 %v14692_v19, %v7743_v23  ;;  %vm7978_vm0 = vcmp.ge.f32.partialorder %v7743_v23, 0.0 }
 0x967   : > { %v8043_v29 = vsel %vm7978_vm0, %v7743_v23, %v8011_v21  ;;  %v7676_v21 = vpop.f32.mrf.mxu1 }
 0x968   : > { %v14720_v5 = vpop.f32.mrf.mxu0 }
 0x96a   : > { %v7744_v63 = vpop.f32.mrf.mxu3 }
 0x96b   : > { %v7745_v48 = vadd.f32 %v7744_v63, %v14590_v60  ;;  %v14707_v30 = vpop.f32.mrf.mxu2 }
 0x96d   : > { %vm7980_vm1 = vcmp.ge.f32.partialorder %v7745_v48, 0.0  ;;  %v8013_v39 = vmul.f32 %v14692_v19, %v7745_v48 }
 0x96f   : > { %v8045_v7 = vsel %vm7980_vm1, %v7745_v48, %v8013_v39  ;;  %7942 = vmatmul.bf16.gmra.mxu3 %v14613_v36 }
 0x970   : > { %v8075_v4 = vpack.c.bf16 %v8045_v7, %v8043_v29  ;;  %v14730_v17 = vpop.f32.mrf.mxu0  ;;  %v7618_v29 = vadd.f32 %v14686_v27, %v14575_v52 }
 0x972   : > { %v7747_v46 = vpop.f32.mrf.mxu3  ;;  %8230 = vmatmul.bf16.vlgmr.msra.gmra.mxu0 %v8075_v4  ;;  %v11851_v4 = vld [vmem:[#allocation10 + $0x50] sm:$0xff]  ;;  %v7667_v9 = vadd.f32 %v7666_v26, %v7618_v29 }
 0x973   : > { %v7748_v60 = vadd.f32 %v7747_v46, %v14600_v38  ;;  %v14717_v40 = vpop.f32.mrf.mxu2  ;;  %8276 = vmatpush.bf16.msra.mxu1 %v11851_v4 }
 0x975   : > { %v8015_v34 = vmul.f32 %v14692_v19, %v7748_v60  ;;  %vm7982_vm2 = vcmp.ge.f32.partialorder %v7748_v60, 0.0 }
 0x977   : > { %v8047_v49 = vsel %vm7982_vm2, %v7748_v60, %v8015_v34 }
 0x978   : > { %v14739_v31 = vpop.f32.mrf.mxu0 }
 0x97a   : > { %v7749_v50 = vpop.f32.mrf.mxu3 }
 0x97b   : > { %v7750_v2 = vadd.f32 %v7749_v50, %v14606_v58  ;;  %v14727_v25 = vpop.f32.mrf.mxu2  ;;  %v14752_v50 = vpop.f32.mrf.mxu1 }
 0x97d   : > { %vm7984_vm3 = vcmp.ge.f32.partialorder %v7750_v2, 0.0  ;;  %v8017_v36 = vmul.f32 %v14692_v19, %v7750_v2 }
 0x97f   : > { %7947 = vmatmul.bf16.gmra.mxu3 %v14629_v45  ;;  %v8049_v32 = vsel %vm7984_vm3, %v7750_v2, %v8017_v36 }
 0x980   : > { %v8077_v38 = vpack.c.bf16 %v8049_v32, %v8047_v49  ;;  %v14749_v46 = vpop.f32.mrf.mxu0 }
 0x982   : > { %v7752_v10 = vpop.f32.mrf.mxu3  ;;  %8235 = vmatmul.bf16.gmra.mxu0 %v8077_v38 }
 0x983   : > { %v7753_v58 = vadd.f32 %v7752_v10, %v14616_v0  ;;  %v14735_v59 = vpop.f32.mrf.mxu2  ;;  %v7623_v10 = vadd.f32 %v14694_v54, %v14575_v52 }
 0x985   : > { %v8019_v43 = vmul.f32 %v14692_v19, %v7753_v58  ;;  %vm7986_vm4 = vcmp.ge.f32.partialorder %v7753_v58, 0.0 }
 0x987   : > { %v8051_v47 = vsel %vm7986_vm4, %v7753_v58, %v8019_v43  ;;  %v7681_v58 = vpop.f32.mrf.mxu1 }
 0x98a   : > { %v7754_v61 = vpop.f32.mrf.mxu3 }
 0x98b   : > { %v7755_v45 = vadd.f32 %v7754_v61, %v14622_v1  ;;  %v7725_v48 = vpop.f32.mrf.mxu2  ;;  %v11850_v61 = vld [vmem:[#allocation10 + $0x48] sm:$0xff] }
 0x98c   : > { %8277 = vmatpush.bf16.msra.mxu1 %v11850_v61 }
 0x98d   : > { %vm7988_vm5 = vcmp.ge.f32.partialorder %v7755_v45, 0.0  ;;  %v8021_v20 = vmul.f32 %v14692_v19, %v7755_v45 }
 0x98f   : > { %7952 = vmatmul.bf16.gmra.mxu3 %v14644_v35  ;;  %v8053_v0 = vsel %vm7988_vm5, %v7755_v45, %v8021_v20 }
 0x990   : > { %v8079_v42 = vpack.c.bf16 %v8053_v0, %v8051_v47 }
 0x992   : > { %v7757_v12 = vpop.f32.mrf.mxu3  ;;  %8240 = vmatmul.bf16.gmra.mxu0 %v8079_v42  ;;  %v7840_v42 = vpop.f32.mrf.mxu1 }
 0x993   : > { %v7758_v1 = vadd.f32 %v7757_v12, %v14632_v16 }
 0x995   : > { %v8023_v11 = vmul.f32 %v14692_v19, %v7758_v1  ;;  %vm7990_vm6 = vcmp.ge.f32.partialorder %v7758_v1, 0.0 }
 0x997   : > { %v8055_v16 = vsel %vm7990_vm6, %v7758_v1, %v8023_v11  ;;  %v7628_v11 = vadd.f32 %v14712_v28, %v14575_v52 }
 0x99a   : > { %v7759_v6 = vpop.f32.mrf.mxu3 }
 0x99b   : > { %v7760_v35 = vadd.f32 %v7759_v6, %v14638_v18  ;;  %v7665_v18 = vadd.f32 %v14699_v15, %v7616_v22  ;;  %v14755_v15 = vpop.f32.mrf.mxu2  ;;  %v7677_v22 = vadd.f32 %v7676_v21, %v7628_v11 }
 0x99d   : > { %vm7992_vm7 = vcmp.ge.f32.partialorder %v7760_v35, 0.0  ;;  %v8025_v37 = vmul.f32 %v14692_v19, %v7760_v35  ;;  %v7714_v7 = vadd.f32 %v14702_v8, %v7665_v18  ;;  %v7621_v8 = vadd.f32 %v14689_v24, %v14575_v52 }
 0x99e   : > { %v7672_v24 = vadd.f32 %v14724_v55, %v7623_v10 }
 0x99f   : > { %7957 = vmatmul.bf16.gmra.mxu3 %v14654_v33  ;;  %v8057_v23 = vsel %vm7992_vm7, %v7760_v35, %v8025_v37  ;;  %v7716_v33 = vadd.f32 %v14707_v30, %v7667_v9  ;;  %v14761_v30 = vpop.f32.mrf.mxu0  ;;  %v7670_v38 = vadd.f32 %v14715_v53, %v7621_v8 }
 0x9a0   : > { %v8081_v63 = vpack.c.bf16 %v8057_v23, %v8055_v16  ;;  %v7721_v45 = vadd.f32 %v14727_v25, %v7672_v24  ;;  %v11849_v16 = vld [vmem:[#allocation10 + $0x40] sm:$0xff]  ;;  %v7726_v23 = vadd.f32 %v7725_v48, %v7677_v22 }
 0x9a1   : > { %v7719_v56 = vadd.f32 %v14717_v40, %v7670_v38  ;;  %v7626_v40 = vadd.f32 %v14704_v41, %v14575_v52  ;;  %8278 = vmatpush.bf16.msra.mxu1 %v11849_v16 }
 0x9a2   : > { %v7762_v39 = vpop.f32.mrf.mxu3  ;;  %8245 = vmatmul.bf16.gmra.mxu0 %v8081_v63 }
 0x9a3   : > { %v7763_v14 = vadd.f32 %v7762_v39, %v7714_v7  ;;  %v7730_v43 = vpop.f32.mrf.mxu2  ;;  %v7675_v6 = vadd.f32 %v14732_v51, %v7626_v40 }
 0x9a5   : > { %v8027_v34 = vmul.f32 %v14692_v19, %v7763_v14  ;;  %vm7994_vm8 = vcmp.ge.f32.partialorder %v7763_v14, 0.0  ;;  %v7724_v37 = vadd.f32 %v14735_v59, %v7675_v6  ;;  %v7631_v59 = vadd.f32 %v14720_v5, %v14575_v52 }
 0x9a7   : > { %v8059_v26 = vsel %vm7994_vm8, %v7763_v14, %v8027_v34  ;;  %v14769_v20 = vpop.f32.mrf.mxu0  ;;  %v7680_v9 = vadd.f32 %v14752_v50, %v7631_v59  ;;  %v7633_v14 = vadd.f32 %v14730_v17, %v14575_v52 }
 0x9a9   : > { %v7729_v34 = vadd.f32 %v14755_v15, %v7680_v9 }
 0x9aa   : > { %v7764_v60 = vpop.f32.mrf.mxu3 }
 0x9ab   : > { %v7765_v2 = vadd.f32 %v7764_v60, %v7716_v33  ;;  %v7889_v3 = vpop.f32.mrf.mxu2 }
 0x9ad   : > { %vm7996_vm9 = vcmp.ge.f32.partialorder %v7765_v2, 0.0  ;;  %v8029_v27 = vmul.f32 %v14692_v19, %v7765_v2 }
 0x9af   : > { %7962 = vmatmul.bf16.gmra.mxu3 %v14664_v13  ;;  %v8061_v36 = vsel %vm7996_vm9, %v7765_v2, %v8029_v27  ;;  %v14779_v35 = vpop.f32.mrf.mxu0  ;;  %v7682_v2 = vadd.f32 %v7681_v58, %v7633_v14 }
 0x9b0   : > { %v8083_v49 = vpack.c.bf16 %v8061_v36, %v8059_v26  ;;  %v14796_v26 = vperm.slane %v14570_v62, 1 }
 0x9b1   : > { %v7731_v5 = vadd.f32 %v7730_v43, %v7682_v2 }
 0x9b2   : > { %v7767_v32 = vpop.f32.mrf.mxu3  ;;  %8250 = vmatmul.bf16.gmra.mxu0 %v8083_v49  ;;  %v7792_v15 = vadd.f32 %v14739_v31, %v14796_v26  ;;  %v7794_v61 = vadd.f32 %v14749_v46, %v14796_v26  ;;  %v7799_v11 = vadd.f32 %v14769_v20, %v14796_v26 }
 0x9b3   : > { %v7768_v13 = vadd.f32 %v7767_v32, %v7719_v56  ;;  %v7891_v63 = vpop.f32.mrf.mxu2 }
 0x9b4   : > { %v7841_v62 = vadd.f32 %v7840_v42, %v7792_v15  ;;  %v7797_v42 = vadd.f32 %v14761_v30, %v14796_v26 }
 0x9b5   : > { %v8031_v0 = vmul.f32 %v14692_v19, %v7768_v13  ;;  %vm7998_vm10 = vcmp.ge.f32.partialorder %v7768_v13, 0.0 }
 0x9b6   : > { %v7890_v43 = vadd.f32 %v7889_v3, %v7841_v62 }
 0x9b7   : > { %v8063_v55 = vsel %vm7998_vm10, %v7768_v13, %v8031_v0  ;;  %v14784_v28 = vpop.f32.mrf.mxu0 }
 0x9ba   : > { %v7769_v47 = vpop.f32.mrf.mxu3 }
 0x9bb   : > { %v7770_v53 = vadd.f32 %v7769_v47, %v7721_v45  ;;  %v7894_v60 = vpop.f32.mrf.mxu2 }
 0x9bd   : > { %vm8000_vm11 = vcmp.ge.f32.partialorder %v7770_v53, 0.0  ;;  %v8033_v54 = vmul.f32 %v14692_v19, %v7770_v53 }
 0x9bf   : > { %7967 = vmatmul.bf16.gmra.mxu3 %v14674_v44  ;;  %v8065_v12 = vsel %vm8000_vm11, %v7770_v53, %v8033_v54  ;;  %v7842_v44 = vpop.f32.mrf.mxu1  ;;  %v14793_v8 = vpop.f32.mrf.mxu0 }
 0x9c0   : > { %v8085_v25 = vpack.c.bf16 %v8065_v12, %v8063_v55  ;;  %v7843_v24 = vadd.f32 %v7842_v44, %v7794_v61 }
 0x9c2   : > { %v7772_v1 = vpop.f32.mrf.mxu3  ;;  %8255 = vmatmul.bf16.gmra.mxu0 %v8085_v25  ;;  %v7892_v0 = vadd.f32 %v7891_v63, %v7843_v24 }
 0x9c3   : > { %v7773_v41 = vadd.f32 %v7772_v1, %v7724_v37  ;;  %v7896_v17 = vpop.f32.mrf.mxu2 }
 0x9c5   : > { %v8035_v18 = vmul.f32 %v14692_v19, %v7773_v41  ;;  %vm8002_vm12 = vcmp.ge.f32.partialorder %v7773_v41, 0.0 }
 0x9c7   : > { %v8067_v21 = vsel %vm8002_vm12, %v7773_v41, %v8035_v18  ;;  %v7845_v33 = vpop.f32.mrf.mxu1  ;;  %v14802_v56 = vpop.f32.mrf.mxu0 }
 0x9c8   : > { %v7846_v6 = vadd.f32 %v7845_v33, %v7797_v42 }
 0x9ca   : > { %v7774_v39 = vpop.f32.mrf.mxu3  ;;  %v7895_v37 = vadd.f32 %v7894_v60, %v7846_v6 }
 0x9cb   : > { %v7775_v29 = vadd.f32 %v7774_v39, %v7726_v23  ;;  %v7899_v47 = vpop.f32.mrf.mxu2 }
 0x9cd   : > { %vm8004_vm13 = vcmp.ge.f32.partialorder %v7775_v29, 0.0  ;;  %v8037_v51 = vmul.f32 %v14692_v19, %v7775_v29 }
 0x9cf   : > { %7972 = vmatmul.bf16.gmra.mxu3 %v14683_v57  ;;  %v8069_v48 = vsel %vm8004_vm13, %v7775_v29, %v8037_v51  ;;  %v7847_v50 = vpop.f32.mrf.mxu1  ;;  %v7802_v29 = vadd.f32 %v14779_v35, %v14796_v26  ;;  %v7811_v51 = vpop.f32.mrf.mxu0 }
 0x9d0   : > { %v8087_v7 = vpack.c.bf16 %v8069_v48, %v8067_v21  ;;  %v7848_v22 = vadd.f32 %v7847_v50, %v7799_v11 }
 0x9d2   : > { %v7777_v4 = vpop.f32.mrf.mxu3  ;;  %8260 = vmatmul.bf16.gmra.mxu0 %v8087_v7  ;;  %v7897_v16 = vadd.f32 %v7896_v17, %v7848_v22 }
 0x9d3   : > { %v7778_v27 = vadd.f32 %v7777_v4, %v7729_v34  ;;  %v7901_v25 = vpop.f32.mrf.mxu2  ;;  %v7804_v4 = vadd.f32 %v14784_v28, %v14796_v26 }
 0x9d5   : > { %v8039_v36 = vmul.f32 %v14692_v19, %v7778_v27  ;;  %vm8006_vm14 = vcmp.ge.f32.partialorder %v7778_v27, 0.0 }
 0x9d7   : > { %v8071_v32 = vsel %vm8006_vm14, %v7778_v27, %v8039_v36  ;;  %v7850_v13 = vpop.f32.mrf.mxu1  ;;  %v7813_v27 = vpop.f32.mrf.mxu0 }
 0x9d8   : > { %v7851_v7 = vadd.f32 %v7850_v13, %v7802_v29 }
 0x9da   : > { %v7779_v57 = vpop.f32.mrf.mxu3  ;;  %v7900_v9 = vadd.f32 %v7899_v47, %v7851_v7 }
 0x9db   : > { %v7780_v49 = vadd.f32 %v7779_v57, %v7731_v5  ;;  %v7904_v39 = vpop.f32.mrf.mxu2 }
 0x9dd   : > { %vm8008_vm15 = vcmp.ge.f32.partialorder %v7780_v49, 0.0  ;;  %v8041_v52 = vmul.f32 %v14692_v19, %v7780_v49 }
 0x9df   : > { %v8073_v38 = vsel %vm8008_vm15, %v7780_v49, %v8041_v52  ;;  %v7852_v3 = vpop.f32.mrf.mxu1  ;;  %v7807_v49 = vadd.f32 %v14793_v8, %v14796_v26 }
 0x9e0   : > { %v8089_v10 = vpack.c.bf16 %v8073_v38, %v8071_v32  ;;  %v7853_v60 = vadd.f32 %v7852_v3, %v7804_v4 }
 0x9e2   : > { %v7938_v58 = vpop.f32.mrf.mxu3  ;;  %8265 = vmatmul.bf16.gmra.mxu0 %v8089_v10  ;;  %v7902_v2 = vadd.f32 %v7901_v25, %v7853_v60  ;;  %v7809_v10 = vadd.f32 %v14802_v56, %v14796_v26 }
 0x9e3   : > { %v7939_v45 = vadd.f32 %v7938_v58, %v7890_v43  ;;  %v7906_v33 = vpop.f32.mrf.mxu2  ;;  %v7816_v58 = vpop.f32.mrf.mxu0 }
 0x9e5   : > { %v8012_v31 = vmul.f32 %v14692_v19, %v7939_v45  ;;  %vm7979_vm0 = vcmp.ge.f32.partialorder %v7939_v45, 0.0 }
 0x9e7   : > { %v8044_v55 = vsel %vm7979_vm0, %v7939_v45, %v8012_v31  ;;  %v7855_v44 = vpop.f32.mrf.mxu1 }
 0x9e8   : > { %v7856_v38 = vadd.f32 %v7855_v44, %v7807_v49 }
 0x9ea   : > { %v7940_v53 = vpop.f32.mrf.mxu3  ;;  %v7905_v62 = vadd.f32 %v7904_v39, %v7856_v38  ;;  %v7817_v39 = vadd.f32 %v7816_v58, %v14796_v26 }
 0x9eb   : > { %v7941_v54 = vadd.f32 %v7940_v53, %v7892_v0  ;;  %v7909_v17 = vpop.f32.mrf.mxu2  ;;  %v7818_v53 = vpop.f32.mrf.mxu0 }
 0x9ed   : > { %vm7981_vm1 = vcmp.ge.f32.partialorder %v7941_v54, 0.0  ;;  %v8014_v40 = vmul.f32 %v14692_v19, %v7941_v54 }
 0x9ef   : > { %v8046_v12 = vsel %vm7981_vm1, %v7941_v54, %v8014_v40  ;;  %v7857_v14 = vpop.f32.mrf.mxu1  ;;  %v7812_v54 = vadd.f32 %v7811_v51, %v14796_v26 }
 0x9f0   : > { %v8076_v46 = vpack.c.bf16 %v8046_v12, %v8044_v55  ;;  %v7858_v61 = vadd.f32 %v7857_v14, %v7809_v10 }
 0x9f2   : > { %v7943_v1 = vpop.f32.mrf.mxu3  ;;  %8279 = vmatmul.bf16.vlgmr.msra.gmra.mxu1 %v8076_v46  ;;  %v7907_v24 = vadd.f32 %v7906_v33, %v7858_v61  ;;  %v7814_v46 = vadd.f32 %v7813_v27, %v14796_v26 }
 0x9f3   : > { %v7944_v41 = vadd.f32 %v7943_v1, %v7895_v37  ;;  %v7911_v45 = vpop.f32.mrf.mxu2  ;;  %v7821_v11 = vpop.f32.mrf.mxu0 }
 0x9f5   : > { %v8016_v63 = vmul.f32 %v14692_v19, %v7944_v41  ;;  %vm7983_vm2 = vcmp.ge.f32.partialorder %v7944_v41, 0.0 }
 0x9f7   : > { %v8048_v59 = vsel %vm7983_vm2, %v7944_v41, %v8016_v63  ;;  %v7860_v50 = vpop.f32.mrf.mxu1 }
 0x9f8   : > { %v7861_v12 = vadd.f32 %v7860_v50, %v7812_v54 }
 0x9fa   : > { %v7945_v23 = vpop.f32.mrf.mxu3  ;;  %v7910_v1 = vadd.f32 %v7909_v17, %v7861_v12 }
 0x9fb   : > { %v7946_v30 = vadd.f32 %v7945_v23, %v7897_v16  ;;  %v7914_v25 = vpop.f32.mrf.mxu2 }
 0x9fd   : > { %vm7985_vm3 = vcmp.ge.f32.partialorder %v7946_v30, 0.0  ;;  %v8018_v18 = vmul.f32 %v14692_v19, %v7946_v30 }
 0x9ff   : > { %v8050_v20 = vsel %vm7985_vm3, %v7946_v30, %v8018_v18  ;;  %v7862_v13 = vpop.f32.mrf.mxu1 }
 0xa00   : > { %v8078_v21 = vpack.c.bf16 %v8050_v20, %v8048_v59  ;;  %v7863_v6 = vadd.f32 %v7862_v13, %v7814_v46  ;;  %v7823_v59 = vpop.f32.mrf.mxu0 }
 0xa02   : > { %v7948_v48 = vpop.f32.mrf.mxu3  ;;  %8284 = vmatmul.bf16.gmra.mxu1 %v8078_v21  ;;  %v7912_v22 = vadd.f32 %v7911_v45, %v7863_v6 }
 0xa03   : > { %v7949_v34 = vadd.f32 %v7948_v48, %v7900_v9  ;;  %v7916_v30 = vpop.f32.mrf.mxu2  ;;  %v7819_v48 = vadd.f32 %v7818_v53, %v14796_v26 }
 0xa05   : > { %v8020_v35 = vmul.f32 %v14692_v19, %v7949_v34  ;;  %vm7987_vm4 = vcmp.ge.f32.partialorder %v7949_v34, 0.0 }
 0xa07   : > { %v8052_v28 = vsel %vm7987_vm4, %v7949_v34, %v8020_v35  ;;  %v7865_v3 = vpop.f32.mrf.mxu1 }
 0xa08   : > { %v7866_v21 = vadd.f32 %v7865_v3, %v7817_v39  ;;  %v14842_v39 = vld [vmem:[#allocation13 + $0x6] ss:$0 sm:$0xff] }
 0xa0a   : > { %v7950_v5 = vpop.f32.mrf.mxu3  ;;  %v7915_v7 = vadd.f32 %v7914_v25, %v7866_v21 }
 0xa0b   : > { %v7951_v57 = vadd.f32 %v7950_v5, %v7902_v2  ;;  %v7919_v33 = vpop.f32.mrf.mxu2  ;;  %v7826_v2 = vpop.f32.mrf.mxu0 }
 0xa0c   : > { %v7827_v53 = vadd.f32 %v7826_v2, %v14796_v26 }
 0xa0d   : > { %vm7989_vm5 = vcmp.ge.f32.partialorder %v7951_v57, 0.0  ;;  %v8022_v36 = vmul.f32 %v14692_v19, %v7951_v57 }
 0xa0f   : > { %v8054_v52 = vsel %vm7989_vm5, %v7951_v57, %v8022_v36  ;;  %v7867_v44 = vpop.f32.mrf.mxu1  ;;  %v7822_v57 = vadd.f32 %v7821_v11, %v14796_v26 }
 0xa10   : > { %v8080_v15 = vpack.c.bf16 %v8054_v52, %v8052_v28  ;;  %v7868_v4 = vadd.f32 %v7867_v44, %v7819_v48 }
 0xa12   : > { %v7953_v32 = vpop.f32.mrf.mxu3  ;;  %8289 = vmatmul.bf16.gmra.mxu1 %v8080_v15  ;;  %v7917_v60 = vadd.f32 %v7916_v30, %v7868_v4  ;;  %v11863_v4 = vld [vmem:[#allocation12 + $0x30] sm:$0xff] }
 0xa13   : > { %v7954_v43 = vadd.f32 %v7953_v32, %v7905_v62  ;;  %v7921_v52 = vpop.f32.mrf.mxu2  ;;  %v7824_v32 = vadd.f32 %v7823_v59, %v14796_v26  ;;  %v7828_v10 = vpop.f32.mrf.mxu0 }
 0xa15   : > { %v8024_v8 = vmul.f32 %v14692_v19, %v7954_v43  ;;  %vm7991_vm6 = vcmp.ge.f32.partialorder %v7954_v43, 0.0 }
 0xa17   : > { %v8056_v40 = vsel %vm7991_vm6, %v7954_v43, %v8024_v8  ;;  %v7870_v9 = vpop.f32.mrf.mxu1 }
 0xa18   : > { %v7871_v15 = vadd.f32 %v7870_v9, %v7822_v57  ;;  %v11862_v57 = vld [vmem:[#allocation12 + $0x28] sm:$0xff] }
 0xa1a   : > { %v7955_v47 = vpop.f32.mrf.mxu3  ;;  %v7920_v38 = vadd.f32 %v7919_v33, %v7871_v15 }
 0xa1b   : > { %v7956_v0 = vadd.f32 %v7955_v47, %v7907_v24  ;;  %v7924_v47 = vpop.f32.mrf.mxu2  ;;  %v8231_v8 = vpop.f32.mrf.mxu0 }
 0xa1d   : > { %vm7993_vm7 = vcmp.ge.f32.partialorder %v7956_v0, 0.0  ;;  %v8026_v31 = vmul.f32 %v14692_v19, %v7956_v0 }
 0xa1f   : > { %v8058_v56 = vsel %vm7993_vm7, %v7956_v0, %v8026_v31  ;;  %v7872_v28 = vpop.f32.mrf.mxu1 }
 0xa20   : > { %v8082_v42 = vpack.c.bf16 %v8058_v56, %v8056_v40  ;;  %v7873_v58 = vadd.f32 %v7872_v28, %v7824_v32 }
 0xa22   : > { %v7958_v55 = vpop.f32.mrf.mxu3  ;;  %8294 = vmatmul.bf16.gmra.mxu1 %v8082_v42  ;;  %v7922_v61 = vadd.f32 %v7921_v52, %v7873_v58  ;;  %v11861_v58 = vld [vmem:[#allocation12 + $0x20] sm:$0xff] }
 0xa23   : > { %v7959_v37 = vadd.f32 %v7958_v55, %v7910_v1  ;;  %v7829_v55 = vadd.f32 %v7828_v10, %v14796_v26  ;;  %v7926_v3 = vpop.f32.mrf.mxu2  ;;  %v8233_v1 = vpop.f32.mrf.mxu0  ;;  %v11864_v26 = vld [vmem:[#allocation12 + $0x38] sm:$0xff] }
 0xa24   : > { %8635 = vmatpush.bf16.msra.mxu2 %v11864_v26  ;;  %v8234_v21 = vadd.f32 %v14842_v39, %v8233_v1  ;;  %v11859_v1 = vld [vmem:[#allocation12 + $0x10] sm:$0xff] }
 0xa25   : > { %v8028_v16 = vmul.f32 %v14692_v19, %v7959_v37  ;;  %vm7995_vm8 = vcmp.ge.f32.partialorder %v7959_v37, 0.0 }
 0xa27   : > { %v8060_v18 = vsel %vm7995_vm8, %v7959_v37, %v8028_v16  ;;  %v7875_v45 = vpop.f32.mrf.mxu1 }
 0xa28   : > { %v7876_v42 = vadd.f32 %v7875_v45, %v7827_v53  ;;  %8636 = vmatpush.bf16.msra.mxu2 %v11863_v4 }
 0xa2a   : > { %v7960_v41 = vpop.f32.mrf.mxu3  ;;  %v7925_v12 = vadd.f32 %v7924_v47, %v7876_v42 }
 0xa2b   : > { %v7961_v23 = vadd.f32 %v7960_v41, %v7912_v22  ;;  %v8236_v30 = vpop.f32.mrf.mxu0 }
 0xa2c   : > { %8637 = vmatpush.bf16.msra.mxu2 %v11862_v57 }
 0xa2d   : > { %vm7997_vm9 = vcmp.ge.f32.partialorder %v7961_v23, 0.0  ;;  %v8030_v63 = vmul.f32 %v14692_v19, %v7961_v23 }
 0xa2f   : > { %v8062_v29 = vsel %vm7997_vm9, %v7961_v23, %v8030_v63  ;;  %v7877_v46 = vpop.f32.mrf.mxu1 }
 0xa30   : > { %v8084_v51 = vpack.c.bf16 %v8062_v29, %v8060_v18  ;;  %v7878_v25 = vadd.f32 %v7877_v46, %v7829_v55  ;;  %v8232_v29 = vadd.f32 %v14842_v39, %v8231_v8  ;;  %8638 = vmatpush.bf16.msra.mxu2 %v11861_v58 }
 0xa32   : > { %v7963_v20 = vpop.f32.mrf.mxu3  ;;  %8299 = vmatmul.bf16.gmra.mxu1 %v8084_v51  ;;  %v7927_v11 = vadd.f32 %v7926_v3, %v7878_v25 }
 0xa33   : > { %v7964_v14 = vadd.f32 %v7963_v20, %v7915_v7  ;;  %v8238_v18 = vpop.f32.mrf.mxu0 }
 0xa35   : > { %v8032_v27 = vmul.f32 %v14692_v19, %v7964_v14  ;;  %vm7999_vm10 = vcmp.ge.f32.partialorder %v7964_v14, 0.0 }
 0xa37   : > { %v8064_v36 = vsel %vm7999_vm10, %v7964_v14, %v8032_v27  ;;  %v8237_v14 = vadd.f32 %v14842_v39, %v8236_v30  ;;  %v8239_v27 = vadd.f32 %v14842_v39, %v8238_v18 }
 0xa3a   : > { %v7965_v34 = vpop.f32.mrf.mxu3 }
 0xa3b   : > { %v7966_v5 = vadd.f32 %v7965_v34, %v7917_v60 }
 0xa3d   : > { %vm8001_vm11 = vcmp.ge.f32.partialorder %v7966_v5, 0.0  ;;  %v8034_v35 = vmul.f32 %v14692_v19, %v7966_v5 }
 0xa3f   : > { %v8066_v49 = vsel %vm8001_vm11, %v7966_v5, %v8034_v35 }
 0xa40   : > { %v8086_v50 = vpack.c.bf16 %v8066_v49, %v8064_v36 }
 0xa42   : > { %v7968_v17 = vpop.f32.mrf.mxu3  ;;  %8304 = vmatmul.bf16.gmra.mxu1 %v8086_v50 }
 0xa43   : > { %v7969_v62 = vadd.f32 %v7968_v17, %v7920_v38 }
 0xa45   : > { %v8036_v24 = vmul.f32 %v14692_v19, %v7969_v62  ;;  %vm8003_vm12 = vcmp.ge.f32.partialorder %v7969_v62, 0.0 }
 0xa47   : > { %v8068_v31 = vsel %vm8003_vm12, %v7969_v62, %v8036_v24 }
 0xa4a   : > { %v7970_v43 = vpop.f32.mrf.mxu3 }
 0xa4b   : > { %v7971_v13 = vadd.f32 %v7970_v43, %v7922_v61 }
 0xa4d   : > { %vm8005_vm13 = vcmp.ge.f32.partialorder %v7971_v13, 0.0  ;;  %v8038_v0 = vmul.f32 %v14692_v19, %v7971_v13 }
 0xa4f   : > { %v8070_v54 = vsel %vm8005_vm13, %v7971_v13, %v8038_v0 }
 0xa50   : > { %v8088_v40 = vpack.c.bf16 %v8070_v54, %v8068_v31  ;;  %v11860_v31 = vld [vmem:[#allocation12 + $0x18] sm:$0xff] }
 0xa51   : > { %8639 = vmatpush.bf16.msra.mxu2 %v11860_v31 }
 0xa52   : > { %v7973_v56 = vpop.f32.mrf.mxu3  ;;  %8309 = vmatmul.bf16.gmra.mxu1 %v8088_v40 }
 0xa53   : > { %v7974_v6 = vadd.f32 %v7973_v56, %v7925_v12 }
 0xa55   : > { %v8040_v22 = vmul.f32 %v14692_v19, %v7974_v6  ;;  %vm8007_vm14 = vcmp.ge.f32.partialorder %v7974_v6, 0.0  ;;  %8640 = vmatpush.bf16.msra.mxu2 %v11859_v1 }
 0xa57   : > { %v8072_v23 = vsel %vm8007_vm14, %v7974_v6, %v8040_v22 }
 0xa5a   : > { %v7975_v37 = vpop.f32.mrf.mxu3 }
 0xa5b   : > { %v7976_v41 = vadd.f32 %v7975_v37, %v7927_v11 }
 0xa5d   : > { %vm8009_vm15 = vcmp.ge.f32.partialorder %v7976_v41, 0.0  ;;  %v8042_v16 = vmul.f32 %v14692_v19, %v7976_v41  ;;  %v8241_v19 = vpop.f32.mrf.mxu0 }
 0xa5e   : > { %v8242_v50 = vadd.f32 %v14842_v39, %v8241_v19 }
 0xa5f   : > { %v8074_v44 = vsel %vm8009_vm15, %v7976_v41, %v8042_v16 }
 0xa60   : > { %v8090_v63 = vpack.c.bf16 %v8074_v44, %v8072_v23 }
 0xa62   : > { %8314 = vmatmul.bf16.gmra.mxu1 %v8090_v63 }
 0xa65   : > { %v8243_v33 = vpop.f32.mrf.mxu0 }
 0xa66   : > { %v8244_v32 = vadd.f32 %v14842_v39, %v8243_v33  ;;  %v11858_v33 = vld [vmem:[#allocation12 + $0x8] sm:$0xff] }
 0xa67   : > { %8641 = vmatpush.bf16.msra.mxu2 %v11858_v33 }
 0xa6d   : > { %v8246_v36 = vpop.f32.mrf.mxu0 }
 0xa6e   : > { %v8247_v43 = vadd.f32 %v14842_v39, %v8246_v36  ;;  %v11857_v36 = vld [vmem:[#allocation12] sm:$0xff] }
 0xa6f   : > { %v8280_v51 = vpop.f32.mrf.mxu1  ;;  %8642 = vmatpush.bf16.msra.mxu2 %v11857_v36 }
 0xa70   : > { %v14845_v59 = vadd.f32 %v8280_v51, %v8232_v29 }
 0xa72   : > { %v8320_v20 = vmul.f32 %v14845_v59, %v14845_v59 }
 0xa74   : > { %8336 = vadd.xlane.f32.xlu0 %v8320_v20 }
 0xa75   : > { %v8248_v15 = vpop.f32.mrf.mxu0 }
 0xa76   : > { %v8249_v47 = vadd.f32 %v14842_v39, %v8248_v15 }
 0xa77   : > { %v8282_v48 = vpop.f32.mrf.mxu1 }
 0xa78   : > { %v14850_v7 = vadd.f32 %v8282_v48, %v8234_v21 }
 0xa7a   : > { %v8321_v9 = vmul.f32 %v14850_v7, %v14850_v7 }
 0xa7c   : > { %8338 = vadd.xlane.f32.xlu0 %v8321_v9 }
 0xa7d   : > { %v8251_v61 = vpop.f32.mrf.mxu0 }
 0xa7e   : > { %v8252_v40 = vadd.f32 %v14842_v39, %v8251_v61 }
 0xa7f   : > { %v8285_v60 = vpop.f32.mrf.mxu1 }
 0xa80   : > { %v14855_v34 = vadd.f32 %v8285_v60, %v8237_v14 }
 0xa82   : > { %v8322_v2 = vmul.f32 %v14855_v34, %v14855_v34 }
 0xa84   : > { %8340 = vadd.xlane.f32.xlu1 %v8322_v2 }
 0xa85   : > { %v8253_v8 = vpop.f32.mrf.mxu0 }
 0xa86   : > { %v8254_v46 = vadd.f32 %v14842_v39, %v8253_v8 }
 0xa87   : > { %v8287_v5 = vpop.f32.mrf.mxu1 }
 0xa88   : > { %v14860_v35 = vadd.f32 %v8287_v5, %v8239_v27 }
 0xa8a   : > { %v8323_v49 = vmul.f32 %v14860_v35, %v14860_v35 }
 0xa8c   : > { %8342 = vadd.xlane.f32.xlu1 %v8323_v49 }
 0xa8d   : > { %v8256_v55 = vpop.f32.mrf.mxu0 }
 0xa8e   : > { %v8257_v37 = vadd.f32 %v14842_v39, %v8256_v55 }
 0xa8f   : > { %v8290_v28 = vpop.f32.mrf.mxu1 }
 0xa90   : > { %v14865_v52 = vadd.f32 %v8290_v28, %v8242_v50 }
 0xa92   : > { %v8324_v17 = vmul.f32 %v14865_v52, %v14865_v52 }
 0xa94   : > { %8344 = vadd.xlane.f32.xlu2 %v8324_v17 }
 0xa95   : > { %v8258_v11 = vpop.f32.mrf.mxu0 }
 0xa96   : > { %v8259_v44 = vadd.f32 %v14842_v39, %v8258_v11 }
 0xa97   : > { %v8292_v38 = vpop.f32.mrf.mxu1 }
 0xa98   : > { %v14870_v10 = vadd.f32 %v8292_v38, %v8244_v32 }
 0xa9a   : > { %v8325_v62 = vmul.f32 %v14870_v10, %v14870_v10 }
 0xa9c   : > { %8346 = vadd.xlane.f32.xlu2 %v8325_v62 }
 0xa9d   : > { %v8261_v23 = vpop.f32.mrf.mxu0 }
 0xa9e   : > { %v8262_v18 = vadd.f32 %v14842_v39, %v8261_v23 }
 0xa9f   : > { %v8295_v24 = vpop.f32.mrf.mxu1 }
 0xaa0   : > { %v14875_v13 = vadd.f32 %v8295_v24, %v8247_v43 }
 0xaa2   : > { %v8326_v45 = vmul.f32 %v14875_v13, %v14875_v13 }
 0xaa4   : > { %8348 = vadd.xlane.f32.xlu0 %v8326_v45 }
 0xaa5   : > { %v8263_v29 = vpop.f32.mrf.mxu0 }
 0xaa6   : > { %v8264_v21 = vadd.f32 %v14842_v39, %v8263_v29 }
 0xaa7   : > { %v8297_v0 = vpop.f32.mrf.mxu1 }
 0xaa8   : > { %v14880_v53 = vadd.f32 %v8297_v0, %v8249_v47 }
 0xaaa   : > { %v8327_v54 = vmul.f32 %v14880_v53, %v14880_v53 }
 0xaac   : > { %8350 = vadd.xlane.f32.xlu1 %v8327_v54 }
 0xaad   : > { %v8266_v9 = vpop.f32.mrf.mxu0 }
 0xaae   : > { %v8267_v60 = vadd.f32 %v14842_v39, %v8266_v9 }
 0xaaf   : > { %v8300_v56 = vpop.f32.mrf.mxu1 }
 0xab0   : > { %v14885_v42 = vadd.f32 %v8300_v56, %v8252_v40 }
 0xab2   : > { %v8328_v12 = vmul.f32 %v14885_v42, %v14885_v42 }
 0xab4   : > { %8352 = vadd.xlane.f32.xlu2 %v8328_v12 }
 0xab5   : > { %v8268_v57 = vpop.f32.mrf.mxu0 }
 0xab6   : > { %v8269_v49 = vadd.f32 %v14842_v39, %v8268_v57 }
 0xab7   : > { %v8302_v3 = vpop.f32.mrf.mxu1 }
 0xab8   : > { %v14890_v25 = vadd.f32 %v8302_v3, %v8254_v46 }
 0xaba   : > { %v8329_v6 = vmul.f32 %v14890_v25, %v14890_v25 }
 0xabc   : > { %8354 = vadd.xlane.f32.xlu0 %v8329_v6 }
 0xabf   : > { %v8305_v22 = vpop.f32.mrf.mxu1 }
 0xac0   : > { %v14895_v41 = vadd.f32 %v8305_v22, %v8257_v37 }
 0xac2   : > { %v8330_v16 = vmul.f32 %v14895_v41, %v14895_v41 }
 0xac4   : > { %8356 = vadd.xlane.f32.xlu1 %v8330_v16 }
 0xac7   : > { %v8307_v63 = vpop.f32.mrf.mxu1 }
 0xac8   : > { %v14900_v30 = vadd.f32 %v8307_v63, %v8259_v44 }
 0xaca   : > { %v8331_v26 = vmul.f32 %v14900_v30, %v14900_v30 }
 0xacc   : > { %8358 = vadd.xlane.f32.xlu2 %v8331_v26 }
 0xacf   : > { %v8310_v51 = vpop.f32.mrf.mxu1 }
 0xad0   : > { %v14905_v20 = vadd.f32 %v8310_v51, %v8262_v18 }
 0xad2   : > { %v8332_v19 = vmul.f32 %v14905_v20, %v14905_v20 }
 0xad4   : > { %8360 = vadd.xlane.f32.xlu0 %v8332_v19 }
 0xad7   : > { %v8312_v48 = vpop.f32.mrf.mxu1 }
 0xad8   : > { %v14910_v4 = vadd.f32 %v8312_v48, %v8264_v21 }
 0xada   : > { %v8333_v14 = vmul.f32 %v14910_v4, %v14910_v4 }
 0xadc   : > { %8362 = vadd.xlane.f32.xlu1 %v8333_v14 }
 0xadf   : > { %v8315_v2 = vpop.f32.mrf.mxu1 }
 0xae0   : > { %v14915_v27 = vadd.f32 %v8315_v2, %v8267_v60 }
 0xae2   : > { %v8334_v5 = vmul.f32 %v14915_v27, %v14915_v27 }
 0xae4   : > { %8364 = vadd.xlane.f32.xlu2 %v8334_v5 }
 0xae7   : > { %v8317_v50 = vpop.f32.mrf.mxu1  ;;  %v8337_v28 = vpop.xlane.xlu0 %8336 }
 0xae8   : > { %v14920_v17 = vadd.f32 %v8317_v50, %v8269_v49  ;;  %v8368_v15 = vadd.f32 1e-32, %v8337_v28 }
 0xaea   : > { %11999 = vrsqrt.f32 %v8368_v15  ;;  %v8335_v32 = vmul.f32 %v14920_v17, %v14920_v17  ;;  %vm8390_vm1 = vweird.f32 %v8368_v15 }
 0xaec   : > { %8366 = vadd.xlane.f32.xlu0 %v8335_v32 }
 0xaef   : > { %v8339_v38 = vpop.xlane.xlu0 %8338 }
 0xaf0   : > { %v12000_v58 = vpop.eup %11999  ;;  %v8369_v62 = vadd.f32 1e-32, %v8339_v38 }
 0xaf1   : > { %v8385_v61 = vmul.f32 %v12000_v58, %v8368_v15  ;;  %vm8391_vm0 = vweird.f32 %v12000_v58 }
 0xaf2   : > { %12001 = vrsqrt.f32 %v8369_v62  ;;  %vm8392_vm3 = vmor %vm8390_vm1, %vm8391_vm0  ;;  %vm8400_vm4 = vweird.f32 %v8369_v62 }
 0xaf3   : > { %v8386_v43 = vmul.f32 %v12000_v58, %v8385_v61 }
 0xaf5   : > { %v8387_v24 = vmul.f32 0.5, %v8386_v43 }
 0xaf7   : > { %v8341_v45 = vpop.xlane.xlu1 %8340  ;;  %v8388_v8 = vsub.f32 1.5, %v8387_v24 }
 0xaf8   : > { %v12002_v39 = vpop.eup %12001  ;;  %v8370_v47 = vadd.f32 1e-32, %v8341_v45 }
 0xaf9   : > { %v8395_v0 = vmul.f32 %v12002_v39, %v8369_v62  ;;  %v8389_v54 = vmul.f32 %v12000_v58, %v8388_v8  ;;  %vm8401_vm2 = vweird.f32 %v12002_v39 }
 0xafa   : > { %12003 = vrsqrt.f32 %v8370_v47  ;;  %vm8402_vm5 = vmor %vm8400_vm4, %vm8401_vm2  ;;  %vm8410_vm7 = vweird.f32 %v8370_v47 }
 0xafb   : > { %v8396_v31 = vmul.f32 %v12002_v39, %v8395_v0  ;;  %v8393_v3 = vsel %vm8392_vm3, %v12000_v58, %v8389_v54 }
 0xafc   : > { %v8544_v22 = vmul.f32 %v8393_v3, %v14845_v59 }
 0xafd   : > { %v8397_v40 = vmul.f32 0.5, %v8396_v31 }
 0xaff   : > { %v8398_v56 = vsub.f32 1.5, %v8397_v40  ;;  %v8343_v55 = vpop.xlane.xlu1 %8342 }
 0xb00   : > { %v12004_v12 = vpop.eup %12003  ;;  %v8371_v46 = vadd.f32 1e-32, %v8343_v55 }
 0xb01   : > { %v8399_v1 = vmul.f32 %v12002_v39, %v8398_v56  ;;  %v8405_v6 = vmul.f32 %v12004_v12, %v8370_v47  ;;  %vm8411_vm6 = vweird.f32 %v12004_v12 }
 0xb02   : > { %12005 = vrsqrt.f32 %v8371_v46  ;;  %vm8412_vm9 = vmor %vm8410_vm7, %vm8411_vm6  ;;  %vm8420_vm10 = vweird.f32 %v8371_v46 }
 0xb03   : > { %v8403_v11 = vsel %vm8402_vm5, %v12002_v39, %v8399_v1  ;;  %v8406_v37 = vmul.f32 %v12004_v12, %v8405_v6 }
 0xb04   : > { %v8545_v16 = vmul.f32 %v8403_v11, %v14850_v7 }
 0xb05   : > { %v8407_v23 = vmul.f32 0.5, %v8406_v37 }
 0xb06   : > { %v8560_v44 = vpack.c.bf16 %v8545_v16, %v8544_v22 }
 0xb07   : > { %v8345_v63 = vpop.xlane.xlu2 %8344  ;;  %v8408_v29 = vsub.f32 1.5, %v8407_v23 }
 0xb08   : > { %v12006_v26 = vpop.eup %12005  ;;  %v8372_v18 = vadd.f32 1e-32, %v8345_v63  ;;  %8643 = vmatmul.bf16.vlgmr.msra.gmra.mxu2 %v8560_v44 }
 0xb09   : > { %v8415_v51 = vmul.f32 %v12006_v26, %v8371_v46  ;;  %v8409_v21 = vmul.f32 %v12004_v12, %v8408_v29  ;;  %vm8421_vm8 = vweird.f32 %v12006_v26 }
 0xb0a   : > { %12007 = vrsqrt.f32 %v8372_v18  ;;  %vm8422_vm11 = vmor %vm8420_vm10, %vm8421_vm8  ;;  %vm8430_vm13 = vweird.f32 %v8372_v18 }
 0xb0b   : > { %v8416_v19 = vmul.f32 %v12006_v26, %v8415_v51  ;;  %v8413_v2 = vsel %vm8412_vm9, %v12004_v12, %v8409_v21 }
 0xb0c   : > { %v8546_v36 = vmul.f32 %v8413_v2, %v14855_v34 }
 0xb0d   : > { %v8417_v48 = vmul.f32 0.5, %v8416_v19 }
 0xb0f   : > { %v8418_v9 = vsub.f32 1.5, %v8417_v48  ;;  %v8347_v14 = vpop.xlane.xlu2 %8346 }
 0xb10   : > { %v12008_v59 = vpop.eup %12007  ;;  %v8373_v7 = vadd.f32 1e-32, %v8347_v14 }
 0xb11   : > { %v8419_v33 = vmul.f32 %v12006_v26, %v8418_v9  ;;  %v8425_v60 = vmul.f32 %v12008_v59, %v8372_v18  ;;  %vm8431_vm12 = vweird.f32 %v12008_v59 }
 0xb12   : > { %12009 = vrsqrt.f32 %v8373_v7  ;;  %vm8432_vm15 = vmor %vm8430_vm13, %vm8431_vm12  ;;  %vm8440_vm0 = vweird.f32 %v8373_v7 }
 0xb13   : > { %v8426_v5 = vmul.f32 %v12008_v59, %v8425_v60  ;;  %v8423_v57 = vsel %vm8422_vm11, %v12006_v26, %v8419_v33 }
 0xb14   : > { %v8547_v49 = vmul.f32 %v8423_v57, %v14860_v35 }
 0xb15   : > { %v8427_v50 = vmul.f32 0.5, %v8426_v5 }
 0xb16   : > { %v8561_v28 = vpack.c.bf16 %v8547_v49, %v8546_v36 }
 0xb17   : > { %v8349_v15 = vpop.xlane.xlu0 %8348  ;;  %v8428_v58 = vsub.f32 1.5, %v8427_v50 }
 0xb18   : > { %v12010_v32 = vpop.eup %12009  ;;  %v8374_v38 = vadd.f32 1e-32, %v8349_v15  ;;  %8648 = vmatmul.bf16.gmra.mxu2 %v8561_v28 }
 0xb19   : > { %v8435_v62 = vmul.f32 %v12010_v32, %v8373_v7  ;;  %v8429_v43 = vmul.f32 %v12008_v59, %v8428_v58  ;;  %vm8441_vm14 = vweird.f32 %v12010_v32 }
 0xb1a   : > { %12011 = vrsqrt.f32 %v8374_v38  ;;  %vm8442_vm1 = vmor %vm8440_vm0, %vm8441_vm14  ;;  %vm8450_vm3 = vweird.f32 %v8374_v38 }
 0xb1b   : > { %v8436_v61 = vmul.f32 %v12010_v32, %v8435_v62  ;;  %v8433_v0 = vsel %vm8432_vm15, %v12008_v59, %v8429_v43 }
 0xb1c   : > { %v8548_v40 = vmul.f32 %v8433_v0, %v14865_v52 }
 0xb1d   : > { %v8437_v24 = vmul.f32 0.5, %v8436_v61 }
 0xb1f   : > { %v8438_v45 = vsub.f32 1.5, %v8437_v24  ;;  %v8351_v39 = vpop.xlane.xlu1 %8350 }
 0xb20   : > { %v12012_v34 = vpop.eup %12011  ;;  %v8375_v35 = vadd.f32 1e-32, %v8351_v39 }
 0xb21   : > { %v8439_v47 = vmul.f32 %v12010_v32, %v8438_v45  ;;  %v8445_v8 = vmul.f32 %v12012_v34, %v8374_v38  ;;  %vm8451_vm2 = vweird.f32 %v12012_v34 }
 0xb22   : > { %12013 = vrsqrt.f32 %v8375_v35  ;;  %vm8452_vm5 = vmor %vm8450_vm3, %vm8451_vm2  ;;  %vm8460_vm6 = vweird.f32 %v8375_v35 }
 0xb23   : > { %v8446_v31 = vmul.f32 %v12012_v34, %v8445_v8  ;;  %v8443_v54 = vsel %vm8442_vm1, %v12010_v32, %v8439_v47 }
 0xb24   : > { %v8549_v56 = vmul.f32 %v8443_v54, %v14870_v10 }
 0xb25   : > { %v8447_v55 = vmul.f32 0.5, %v8446_v31 }
 0xb26   : > { %v8562_v12 = vpack.c.bf16 %v8549_v56, %v8548_v40 }
 0xb27   : > { %v8353_v46 = vpop.xlane.xlu2 %8352  ;;  %v8448_v6 = vsub.f32 1.5, %v8447_v55 }
 0xb28   : > { %v12014_v3 = vpop.eup %12013  ;;  %v8376_v1 = vadd.f32 1e-32, %v8353_v46  ;;  %8653 = vmatmul.bf16.gmra.mxu2 %v8562_v12 }
 0xb29   : > { %v8455_v11 = vmul.f32 %v12014_v3, %v8375_v35  ;;  %v8449_v22 = vmul.f32 %v12012_v34, %v8448_v6  ;;  %vm8461_vm4 = vweird.f32 %v12014_v3 }
 0xb2a   : > { %12015 = vrsqrt.f32 %v8376_v1  ;;  %vm8462_vm7 = vmor %vm8460_vm6, %vm8461_vm4  ;;  %vm8470_vm9 = vweird.f32 %v8376_v1 }
 0xb2b   : > { %v8456_v37 = vmul.f32 %v12014_v3, %v8455_v11  ;;  %v8453_v18 = vsel %vm8452_vm5, %v12012_v34, %v8449_v22 }
 0xb2c   : > { %v8550_v19 = vmul.f32 %v8453_v18, %v14875_v13 }
 0xb2d   : > { %v8457_v16 = vmul.f32 0.5, %v8456_v37 }
 0xb2f   : > { %v8458_v23 = vsub.f32 1.5, %v8457_v16  ;;  %v8355_v44 = vpop.xlane.xlu0 %8354 }
 0xb30   : > { %v12016_v52 = vpop.eup %12015  ;;  %v8377_v10 = vadd.f32 1e-32, %v8355_v44 }
 0xb31   : > { %v8459_v63 = vmul.f32 %v12014_v3, %v8458_v23  ;;  %v8465_v26 = vmul.f32 %v12016_v52, %v8376_v1  ;;  %vm8471_vm8 = vweird.f32 %v12016_v52 }
 0xb32   : > { %12017 = vrsqrt.f32 %v8377_v10  ;;  %vm8472_vm11 = vmor %vm8470_vm9, %vm8471_vm8  ;;  %vm8480_vm12 = vweird.f32 %v8377_v10 }
 0xb33   : > { %v8466_v29 = vmul.f32 %v12016_v52, %v8465_v26  ;;  %v8463_v51 = vsel %vm8462_vm7, %v12014_v3, %v8459_v63 }
 0xb34   : > { %v8551_v21 = vmul.f32 %v8463_v51, %v14880_v53 }
 0xb35   : > { %v8467_v48 = vmul.f32 0.5, %v8466_v29 }
 0xb36   : > { %v8563_v9 = vpack.c.bf16 %v8551_v21, %v8550_v19 }
 0xb37   : > { %v8357_v14 = vpop.xlane.xlu1 %8356  ;;  %v8468_v33 = vsub.f32 1.5, %v8467_v48 }
 0xb38   : > { %v12018_v59 = vpop.eup %12017  ;;  %v8378_v7 = vadd.f32 1e-32, %v8357_v14  ;;  %8658 = vmatmul.bf16.gmra.mxu2 %v8563_v9 }
 0xb39   : > { %v8475_v60 = vmul.f32 %v12018_v59, %v8377_v10  ;;  %v8469_v5 = vmul.f32 %v12016_v52, %v8468_v33  ;;  %vm8481_vm10 = vweird.f32 %v12018_v59 }
 0xb3a   : > { %12019 = vrsqrt.f32 %v8378_v7  ;;  %vm8482_vm13 = vmor %vm8480_vm12, %vm8481_vm10  ;;  %vm8490_vm15 = vweird.f32 %v8378_v7 }
 0xb3b   : > { %v8476_v2 = vmul.f32 %v12018_v59, %v8475_v60  ;;  %v8473_v15 = vsel %vm8472_vm11, %v12016_v52, %v8469_v5 }
 0xb3c   : > { %v8552_v58 = vmul.f32 %v8473_v15, %v14885_v42  ;;  %v11998_v15 = vld [vmem:[#allocation13 + $0x7] ss:$0 sm:$0xff] }
 0xb3d   : > { %v8477_v57 = vmul.f32 0.5, %v8476_v2 }
 0xb3f   : > { %v8478_v36 = vsub.f32 1.5, %v8477_v57  ;;  %v8359_v49 = vpop.xlane.xlu2 %8358 }
 0xb40   : > { %v12020_v13 = vpop.eup %12019  ;;  %v8379_v53 = vadd.f32 1e-32, %v8359_v49 }
 0xb41   : > { %v8479_v50 = vmul.f32 %v12018_v59, %v8478_v36  ;;  %v8485_v28 = vmul.f32 %v12020_v13, %v8378_v7  ;;  %vm8491_vm14 = vweird.f32 %v12020_v13 }
 0xb42   : > { %12021 = vrsqrt.f32 %v8379_v53  ;;  %vm8492_vm1 = vmor %vm8490_vm15, %vm8491_vm14  ;;  %vm8500_vm2 = vweird.f32 %v8379_v53 }
 0xb43   : > { %v8486_v32 = vmul.f32 %v12020_v13, %v8485_v28  ;;  %v8483_v38 = vsel %vm8482_vm13, %v12018_v59, %v8479_v50 }
 0xb44   : > { %v8553_v62 = vmul.f32 %v8483_v38, %v14890_v25 }
 0xb45   : > { %v8487_v61 = vmul.f32 0.5, %v8486_v32 }
 0xb46   : > { %v8564_v43 = vpack.c.bf16 %v8553_v62, %v8552_v58 }
 0xb47   : > { %v8361_v24 = vpop.xlane.xlu0 %8360  ;;  %v8488_v34 = vsub.f32 1.5, %v8487_v61 }
 0xb48   : > { %v12022_v45 = vpop.eup %12021  ;;  %v8380_v39 = vadd.f32 1e-32, %v8361_v24  ;;  %8663 = vmatmul.bf16.gmra.mxu2 %v8564_v43 }
 0xb49   : > { %v8495_v35 = vmul.f32 %v12022_v45, %v8379_v53  ;;  %v8489_v8 = vmul.f32 %v12020_v13, %v8488_v34  ;;  %vm8501_vm0 = vweird.f32 %v12022_v45 }
 0xb4a   : > { %12023 = vrsqrt.f32 %v8380_v39  ;;  %vm8502_vm3 = vmor %vm8500_vm2, %vm8501_vm0  ;;  %vm8510_vm5 = vweird.f32 %v8380_v39 }
 0xb4b   : > { %v8496_v47 = vmul.f32 %v12022_v45, %v8495_v35  ;;  %v8493_v55 = vsel %vm8492_vm1, %v12020_v13, %v8489_v8 }
 0xb4c   : > { %v8554_v3 = vmul.f32 %v8493_v55, %v14895_v41 }
 0xb4d   : > { %v8497_v0 = vmul.f32 0.5, %v8496_v47 }
 0xb4f   : > { %v8498_v31 = vsub.f32 1.5, %v8497_v0  ;;  %v8363_v54 = vpop.xlane.xlu1 %8362 }
 0xb50   : > { %v12024_v42 = vpop.eup %12023  ;;  %v8381_v25 = vadd.f32 1e-32, %v8363_v54 }
 0xb51   : > { %v8499_v40 = vmul.f32 %v12022_v45, %v8498_v31  ;;  %v8505_v56 = vmul.f32 %v12024_v42, %v8380_v39  ;;  %vm8511_vm4 = vweird.f32 %v12024_v42 }
 0xb52   : > { %12025 = vrsqrt.f32 %v8381_v25  ;;  %vm8512_vm7 = vmor %vm8510_vm5, %vm8511_vm4  ;;  %vm8520_vm8 = vweird.f32 %v8381_v25 }
 0xb53   : > { %v8506_v12 = vmul.f32 %v12024_v42, %v8505_v56  ;;  %v8503_v46 = vsel %vm8502_vm3, %v12022_v45, %v8499_v40 }
 0xb54   : > { %v8555_v1 = vmul.f32 %v8503_v46, %v14900_v30 }
 0xb55   : > { %v8507_v6 = vmul.f32 0.5, %v8506_v12 }
 0xb56   : > { %v8565_v11 = vpack.c.bf16 %v8555_v1, %v8554_v3 }
 0xb57   : > { %v8365_v37 = vpop.xlane.xlu2 %8364  ;;  %v8508_v23 = vsub.f32 1.5, %v8507_v6 }
 0xb58   : > { %v12026_v22 = vpop.eup %12025  ;;  %v8382_v16 = vadd.f32 1e-32, %v8365_v37  ;;  %8668 = vmatmul.bf16.gmra.mxu2 %v8565_v11 }
 0xb59   : > { %v8515_v44 = vmul.f32 %v12026_v22, %v8381_v25  ;;  %v8509_v10 = vmul.f32 %v12024_v42, %v8508_v23  ;;  %vm8521_vm6 = vweird.f32 %v12026_v22 }
 0xb5a   : > { %12027 = vrsqrt.f32 %v8382_v16  ;;  %vm8522_vm9 = vmor %vm8520_vm8, %vm8521_vm6  ;;  %vm8530_vm11 = vweird.f32 %v8382_v16 }
 0xb5b   : > { %v8516_v52 = vmul.f32 %v12026_v22, %v8515_v44  ;;  %v8513_v19 = vsel %vm8512_vm7, %v12024_v42, %v8509_v10 }
 0xb5c   : > { %v8556_v9 = vmul.f32 %v8513_v19, %v14905_v20 }
 0xb5d   : > { %v8517_v63 = vmul.f32 0.5, %v8516_v52 }
 0xb5f   : > { %v8518_v26 = vsub.f32 1.5, %v8517_v63  ;;  %v8367_v18 = vpop.xlane.xlu0 %8366 }
 0xb60   : > { %v12028_v41 = vpop.eup %12027  ;;  %v8383_v30 = vadd.f32 1e-32, %v8367_v18 }
 0xb61   : > { %v8519_v29 = vmul.f32 %v12026_v22, %v8518_v26  ;;  %v8525_v51 = vmul.f32 %v12028_v41, %v8382_v16  ;;  %vm8531_vm10 = vweird.f32 %v12028_v41 }
 0xb62   : > { %12029 = vrsqrt.f32 %v8383_v30  ;;  %vm8532_vm13 = vmor %vm8530_vm11, %vm8531_vm10  ;;  %vm8540_vm14 = vweird.f32 %v8383_v30 }
 0xb63   : > { %v8526_v21 = vmul.f32 %v12028_v41, %v8525_v51  ;;  %v8523_v48 = vsel %vm8522_vm9, %v12026_v22, %v8519_v29 }
 0xb64   : > { %v8557_v14 = vmul.f32 %v8523_v48, %v14910_v4 }
 0xb65   : > { %v8527_v59 = vmul.f32 0.5, %v8526_v21 }
 0xb66   : > { %v8566_v7 = vpack.c.bf16 %v8557_v14, %v8556_v9 }
 0xb67   : > { %v8528_v60 = vsub.f32 1.5, %v8527_v59 }
 0xb68   : > { %v12030_v33 = vpop.eup %12029  ;;  %8673 = vmatmul.bf16.gmra.mxu2 %v8566_v7 }
 0xb69   : > { %v8535_v2 = vmul.f32 %v12030_v33, %v8383_v30  ;;  %v8529_v57 = vmul.f32 %v12028_v41, %v8528_v60  ;;  %vm8541_vm12 = vweird.f32 %v12030_v33 }
 0xb6a   : > { %vm8542_vm15 = vmor %vm8540_vm14, %vm8541_vm12 }
 0xb6b   : > { %v8536_v5 = vmul.f32 %v12030_v33, %v8535_v2  ;;  %v8533_v20 = vsel %vm8532_vm13, %v12028_v41, %v8529_v57 }
 0xb6c   : > { %v8558_v53 = vmul.f32 %v8533_v20, %v14915_v27 }
 0xb6d   : > { %v8537_v36 = vmul.f32 0.5, %v8536_v5 }
 0xb6f   : > { %v8538_v49 = vsub.f32 1.5, %v8537_v36 }
 0xb71   : > { %v8539_v13 = vmul.f32 %v12030_v33, %v8538_v49 }
 0xb73   : > { %v8543_v4 = vsel %vm8542_vm15, %v12030_v33, %v8539_v13 }
 0xb74   : > { %v8559_v50 = vmul.f32 %v8543_v4, %v14920_v17 }
 0xb76   : > { %v8567_v28 = vpack.c.bf16 %v8559_v50, %v8558_v53 }
 0xb78   : > { %8678 = vmatmul.bf16.gmra.mxu2 %v8567_v28 }
 0xb8b   : > { %v8644_v32 = vpop.f32.mrf.mxu2 }
 0xb8c   : > { %v8645_v38 = vadd.f32 %v11998_v15, %v8644_v32 }
 0xb8e   : > { %8684 = vst [vmem:[%s14941_s9] sm:$0xff] %v8645_v38 }
 0xb93   : > { %v8646_v58 = vpop.f32.mrf.mxu2 }
 0xb94   : > { %v8647_v62 = vadd.f32 %v11998_v15, %v8646_v58 }
 0xb96   : > { %8685 = vst [vmem:[%s14941_s9 + $0x8] sm:$0xff] %v8647_v62 }
 0xb9b   : > { %v8649_v27 = vpop.f32.mrf.mxu2 }
 0xb9c   : > { %v8650_v17 = vadd.f32 %v11998_v15, %v8649_v27 }
 0xb9e   : > { %8686 = vst [vmem:[%s14941_s9 + $0x10] sm:$0xff] %v8650_v17 }
 0xba3   : > { %v8651_v61 = vpop.f32.mrf.mxu2 }
 0xba4   : > { %v8652_v43 = vadd.f32 %v11998_v15, %v8651_v61 }
 0xba6   : > { %8687 = vst [vmem:[%s14941_s9 + $0x18] sm:$0xff] %v8652_v43 }
 0xbab   : > { %v8654_v24 = vpop.f32.mrf.mxu2 }
 0xbac   : > { %v8655_v45 = vadd.f32 %v11998_v15, %v8654_v24 }
 0xbae   : > { %8688 = vst [vmem:[%s14941_s9 + $0x20] sm:$0xff] %v8655_v45 }
 0xbb3   : > { %v8656_v39 = vpop.f32.mrf.mxu2 }
 0xbb4   : > { %v8657_v34 = vadd.f32 %v11998_v15, %v8656_v39 }
 0xbb6   : > { %8689 = vst [vmem:[%s14941_s9 + $0x28] sm:$0xff] %v8657_v34 }
 0xbbb   : > { %v8659_v35 = vpop.f32.mrf.mxu2 }
 0xbbc   : > { %v8660_v47 = vadd.f32 %v11998_v15, %v8659_v35 }
 0xbbe   : > { %8690 = vst [vmem:[%s14941_s9 + $0x30] sm:$0xff] %v8660_v47 }
 0xbc3   : > { %v8661_v8 = vpop.f32.mrf.mxu2 }
 0xbc4   : > { %v8662_v0 = vadd.f32 %v11998_v15, %v8661_v8 }
 0xbc6   : > { %8691 = vst [vmem:[%s14941_s9 + $0x38] sm:$0xff] %v8662_v0 }
 0xbcb   : > { %v8664_v31 = vpop.f32.mrf.mxu2 }
 0xbcc   : > { %v8665_v54 = vadd.f32 %v11998_v15, %v8664_v31 }
 0xbce   : > { %8692 = vst [vmem:[%s14941_s9 + $0x40] sm:$0xff] %v8665_v54 }
 0xbd3   : > { %v8666_v42 = vpop.f32.mrf.mxu2 }
 0xbd4   : > { %v8667_v25 = vadd.f32 %v11998_v15, %v8666_v42 }
 0xbd6   : > { %8693 = vst [vmem:[%s14941_s9 + $0x48] sm:$0xff] %v8667_v25 }
 0xbdb   : > { %v8669_v40 = vpop.f32.mrf.mxu2 }
 0xbdc   : > { %v8670_v56 = vadd.f32 %v11998_v15, %v8669_v40 }
 0xbde   : > { %8694 = vst [vmem:[%s14941_s9 + $0x50] sm:$0xff] %v8670_v56 }
 0xbe3   : > { %v8671_v55 = vpop.f32.mrf.mxu2 }
 0xbe4   : > { %v8672_v12 = vadd.f32 %v11998_v15, %v8671_v55 }
 0xbe6   : > { %8695 = vst [vmem:[%s14941_s9 + $0x58] sm:$0xff] %v8672_v12 }
 0xbeb   : > { %v8674_v46 = vpop.f32.mrf.mxu2 }
 0xbec   : > { %v8675_v3 = vadd.f32 %v11998_v15, %v8674_v46 }
 0xbee   : > { %8696 = vst [vmem:[%s14941_s9 + $0x60] sm:$0xff] %v8675_v3 }
 0xbf3   : > { %v8676_v1 = vpop.f32.mrf.mxu2 }
 0xbf4   : > { %v8677_v6 = vadd.f32 %v11998_v15, %v8676_v1 }
 0xbf6   : > { %8697 = vst [vmem:[%s14941_s9 + $0x68] sm:$0xff] %v8677_v6 }
 0xbfb   : > { %v8679_v11 = vpop.f32.mrf.mxu2 }
 0xbfc   : > { %v8680_v37 = vadd.f32 %v11998_v15, %v8679_v11 }
 0xbfe   : > { %8698 = vst [vmem:[%s14941_s9 + $0x70] sm:$0xff] %v8680_v37 }
 0xc03   : > { %v8681_v22 = vpop.f32.mrf.mxu2 }
 0xc04   : > { %v8682_v16 = vadd.f32 %v11998_v15, %v8681_v22 }
 0xc06   : > { %8699 = vst [vmem:[%s14941_s9 + $0x78] sm:$0xff] %v8682_v16 }
 0xc07   : > { %12253 = shalt.err (!%p12250_p9)
}
 0xc08   : > { %s12321_s26 = smov 128   ;;  %s12322_s25 = smov 8  }
 0xc09   : > { %11912 = dma.vmem_to_hbm [thread:$0]  (%p12458_p0), %s8714_s21, 2048, %s8716_s24, %s8701_s10, %s12321_s26, %s12321_s26, %s12322_s25  }
 0xc0a PF: > { %s8730_s9 = sand.u32 1, %s12294_s28   ;;  %p15697_p10 = scmp.ge.s32.totalorder %s12306_s0, 2 }
 0xc0b   : > { %s8731_s27 = scalar_lea.sflag [#allocation6], %s8730_s9 }
 0xc0c   : > { %p11935_p11 = pnand %p15697_p10, %p12464_p6 }
 0xc0e   : > { %p11936_p12 = pneg %p11935_p11 }
 0xc10   : > { %12289 = dma.done.wait (%p11936_p12), %s8731_s27, 2048  }
 0xc11   : > { %12291 = vsyncadd (%p11936_p12), %s8731_s27, 4294965248  ;;  %p31_p2 = scmp.ge.s32.totalorder %s12434_s8, 4   ;;  %s15698_s28 = smov %s12298_s29 }
 0xc12   : > { %s15699_s29 = smov %s12302_s30  ;;  %s15700_s30 = smov %s12446_s23 }
 0xc13   : > { %s15701_s0 = smov %s12434_s8  ;;  %33 = sbr.rel (!%p31_p2) target bundleno = 14 (0xe), region = 109 }
 0xc18   :  { %8737 = vsyncpa [#allocation5], 1 }
 0xc19   :  { %8739 = vsyncpa [#allocation5 + $0x1], 1 }
 0xc1a   :  { %8740 = vsyncpa [#allocation8], 1 }
 0xc1b   :  { %8741 = vsyncpa [#allocation11], 1 }
 0xc1c   :  { %8742 = vsyncpa [#allocation14], 1 }
 0xc1d   :  { %8743 = vsyncpa [#allocation6], 1 }
 0xc1e   :  { %8745 = vsyncpa [#allocation6 + $0x1], 1 }

</bundles_post_ra>
